<compile_context>
chip_gen: v5e
topology: v5e:2x2
jax: 0.10.0
libtpu: 0.0.40
codegen_flags: <defaults>
</compile_context>

<pallas_src>
import functools
import numpy as np
import jax
import jax.numpy as jnp
from jax.experimental import pallas as pl
from jax.experimental.pallas import tpu as pltpu


def _zero_halo(pad_ref, h, w, c):
    """Zero ONLY the 1-pixel border of an (h+2, w+2, c) padded staging buffer."""
    z_row = jnp.zeros((1, w + 2, c), pad_ref.dtype)
    pad_ref[0:1, :, :] = z_row
    pad_ref[h + 1:h + 2, :, :] = z_row
    z_col = jnp.zeros((h + 2, 1, c), pad_ref.dtype)
    pad_ref[:, 0:1, :] = z_col
    pad_ref[:, w + 1:w + 2, :] = z_col


def _conv3x3_mxu(pad_ref, w_ref, acc_ref, h, w, cin):
    """acc_ref <- sum_{dy,dx} window(dy,dx).reshape(h*w, cin) @ w[dy, dx]  (f32 acc)."""
    def tap(dy, dx):
        win = pad_ref[dy:dy + h, dx:dx + w, :].reshape(h * w, cin)
        return jnp.dot(win.astype(jnp.bfloat16), w_ref[dy, dx, :, :],
                       preferred_element_type=jnp.float32)

    acc_ref[...] = tap(0, 0)
    for dy in range(3):
        for dx in range(3):
            if dy == 0 and dx == 0:
                continue
            acc_ref[...] += tap(dy, dx)


def _double_conv_kernel(x_ref, w1_ref, s1_ref, t1_ref, w2_ref, s2_ref, t2_ref,
                        out_ref, pad1, pad2, acc, *, H, W, Cin, Cout):
    # ---- Conv #1 (3x3, pad=1) as 9 MXU matmuls + fused BN scale/shift + ReLU ----
    _zero_halo(pad1, H, W, Cin)
    pad1[1:H + 1, 1:W + 1, :] = x_ref[0].astype(pad1.dtype)
    _conv3x3_mxu(pad1, w1_ref, acc, H, W, Cin)
    h1 = jnp.maximum(acc[...] * s1_ref[...] + t1_ref[...], 0.0)      # (H*W, Cout) f32

    # ---- Conv #2 (3x3, pad=1) + fused BN + ReLU ----
    _zero_halo(pad2, H, W, Cout)
    pad2[1:H + 1, 1:W + 1, :] = h1.reshape(H, W, Cout).astype(pad2.dtype)
    _conv3x3_mxu(pad2, w2_ref, acc, H, W, Cout)
    h2 = jnp.maximum(acc[...] * s2_ref[...] + t2_ref[...], 0.0)      # (H*W, Cout) f32

    out_ref[...] = h2.reshape(1, H, W, Cout).astype(out_ref.dtype)


def double_conv_forward(x_nchw, params):
    """Inference-mode DoubleConv: x (N, Cin, H, W) f32 -> (N, Cout, H, W) f32."""
    (w1, b1, g1, be1, m1, v1, w2, b2, g2, be2, m2, v2) = params
    eps = 1e-5
    # Fold conv bias + BatchNorm running stats into per-channel scale/shift.
    s1 = g1 / jnp.sqrt(v1 + eps)
    t1 = be1 + s1 * (b1 - m1)
    s2 = g2 / jnp.sqrt(v2 + eps)
    t2 = be2 + s2 * (b2 - m2)

    x = jnp.transpose(x_nchw, (0, 2, 3, 1))                          # NCHW -> NHWC
    N, H, W, Cin = x.shape
    Cout = w1.shape[-1]
    assert w2.shape[-2] == Cout and w2.shape[-1] == Cout

    # bf16 MXU operands; accumulation / epilogue stay in f32.
    x_bf = x.astype(jnp.bfloat16)
    w1_bf = w1.astype(jnp.bfloat16)
    w2_bf = w2.astype(jnp.bfloat16)
    s1b = s1.reshape(1, Cout).astype(jnp.float32)
    t1b = t1.reshape(1, Cout).astype(jnp.float32)
    s2b = s2.reshape(1, Cout).astype(jnp.float32)
    t2b = t2.reshape(1, Cout).astype(jnp.float32)

    kernel = functools.partial(_double_conv_kernel, H=H, W=W, Cin=Cin, Cout=Cout)

    def full(shape):
        return pl.BlockSpec(shape, lambda b: (0,) * len(shape))

    out_nhwc = pl.pallas_call(
        kernel,
        out_shape=jax.ShapeDtypeStruct((N, H, W, Cout), jnp.float32),
        grid_spec=pltpu.PrefetchScalarGridSpec(
            num_scalar_prefetch=0,
            grid=(N,),                                   # one image per grid step
            in_specs=[pl.BlockSpec((1, H, W, Cin), lambda b: (b, 0, 0, 0)),
                      full((3, 3, Cin, Cout)),
                      full((1, Cout)), full((1, Cout)),
                      full((3, 3, Cout, Cout)),
                      full((1, Cout)), full((1, Cout))],
            out_specs=pl.BlockSpec((1, H, W, Cout), lambda b: (b, 0, 0, 0)),
            scratch_shapes=[pltpu.VMEM((H + 2, W + 2, Cin), jnp.float32),
                            pltpu.VMEM((H + 2, W + 2, Cout), jnp.float32),
                            pltpu.VMEM((H * W, Cout), jnp.float32)]),
        compiler_params=pltpu.CompilerParams(
            dimension_semantics=("parallel",),
            vmem_limit_bytes=32 * 1024 * 1024),
    )(x_bf, w1_bf, s1b, t1b, w2_bf, s2b, t2b)

    return jnp.transpose(out_nhwc, (0, 3, 1, 2))                     # NHWC -> NCHW


def _reference(x_nchw, params):
    """Pure-JAX reference of the same inference-mode forward pass (bf16 MXU operands,
    f32 accumulation — mirrors the kernel's numerics)."""
    (w1, b1, g1, be1, m1, v1, w2, b2, g2, be2, m2, v2) = params
    eps = 1e-5
    x = jnp.transpose(x_nchw, (0, 2, 3, 1))

    def conv_bn_relu(h, w, b, g, be, m, v):
        y = jax.lax.conv_general_dilated(
            h.astype(jnp.bfloat16), w.astype(jnp.bfloat16),
            window_strides=(1, 1), padding="SAME",
            dimension_numbers=("NHWC", "HWIO", "NHWC"),
            preferred_element_type=jnp.float32) + b
        y = g / jnp.sqrt(v + eps) * (y - m) + be
        return jnp.maximum(y, 0.0)

    h = conv_bn_relu(x, w1, b1, g1, be1, m1, v1)
    h = conv_bn_relu(h, w2, b2, g2, be2, m2, v2)
    return jnp.transpose(h, (0, 3, 1, 2))


if __name__ == "__main__":
    key = jax.random.PRNGKey(0)
    N, Cin, H, W = 2, 4, 16, 16
    Cout = 8  # DoubleConv(in_channels=4, out_channels=8)

    ks = jax.random.split(key, 13)
    x = jax.random.normal(ks[0], (N, Cin, H, W), jnp.float32)

    # Deterministic synthetic parameters (conv weights in HWIO layout).
    w1 = jax.random.normal(ks[1], (3, 3, Cin, Cout), jnp.float32) * 0.2
    b1 = jax.random.normal(ks[2], (Cout,), jnp.float32) * 0.1
    g1 = 1.0 + 0.1 * jax.random.normal(ks[3], (Cout,), jnp.float32)
    be1 = 0.1 * jax.random.normal(ks[4], (Cout,), jnp.float32)
    m1 = 0.1 * jax.random.normal(ks[5], (Cout,), jnp.float32)
    v1 = jnp.abs(1.0 + 0.1 * jax.random.normal(ks[6], (Cout,), jnp.float32))

    w2 = jax.random.normal(ks[7], (3, 3, Cout, Cout), jnp.float32) * 0.2
    b2 = jax.random.normal(ks[8], (Cout,), jnp.float32) * 0.1
    g2 = 1.0 + 0.1 * jax.random.normal(ks[9], (Cout,), jnp.float32)
    be2 = 0.1 * jax.random.normal(ks[10], (Cout,), jnp.float32)
    m2 = 0.1 * jax.random.normal(ks[11], (Cout,), jnp.float32)
    v2 = jnp.abs(1.0 + 0.1 * jax.random.normal(ks[12], (Cout,), jnp.float32))

    params = (w1, b1, g1, be1, m1, v1, w2, b2, g2, be2, m2, v2)

    out = double_conv_forward(x, params)
    out = jax.block_until_ready(out)
    assert out.shape == (N, Cout, H, W)

    ref = _reference(x, params)
    np.testing.assert_allclose(np.asarray(out), np.asarray(ref),
                               rtol=1e-3, atol=1e-3)

    print("KERNEL_OK")
</pallas_src>

<mosaic_0001>
module attributes {stable_mosaic.version = 11 : i64} {
  func.func @_double_conv_kernel(%arg0: i32, %arg1: memref<1x16x16x4xbf16, #tpu.memory_space<vmem>>, %arg2: memref<3x3x4x8xbf16, #tpu.memory_space<vmem>>, %arg3: memref<1x8xf32, #tpu.memory_space<vmem>>, %arg4: memref<1x8xf32, #tpu.memory_space<vmem>>, %arg5: memref<3x3x8x8xbf16, #tpu.memory_space<vmem>>, %arg6: memref<1x8xf32, #tpu.memory_space<vmem>>, %arg7: memref<1x8xf32, #tpu.memory_space<vmem>>, %arg8: memref<1x16x16x8xf32, #tpu.memory_space<vmem>>, %arg9: memref<18x18x4xf32, #tpu.memory_space<vmem>>, %arg10: memref<18x18x8xf32, #tpu.memory_space<vmem>>, %arg11: memref<256x8xf32, #tpu.memory_space<vmem>>) attributes {dimension_semantics = [#tpu.dimension_semantics<parallel>], iteration_bounds = array<i64: 2>, scalar_prefetch = 0 : i64, scratch_operands = 3 : i64, tpu.core_type = #tpu.core_type<tc>, window_params = [{transform_indices = @transform_0, window_bounds = array<i64: 1, 16, 16, 4>}, {pipeline_mode = #tpu.pipeline_mode<synchronous>, transform_indices = @transform_1, window_bounds = array<i64: 3, 3, 4, 8>}, {pipeline_mode = #tpu.pipeline_mode<synchronous>, transform_indices = @transform_2, window_bounds = array<i64: 1, 8>}, {pipeline_mode = #tpu.pipeline_mode<synchronous>, transform_indices = @transform_3, window_bounds = array<i64: 1, 8>}, {pipeline_mode = #tpu.pipeline_mode<synchronous>, transform_indices = @transform_4, window_bounds = array<i64: 3, 3, 8, 8>}, {pipeline_mode = #tpu.pipeline_mode<synchronous>, transform_indices = @transform_5, window_bounds = array<i64: 1, 8>}, {pipeline_mode = #tpu.pipeline_mode<synchronous>, transform_indices = @transform_6, window_bounds = array<i64: 1, 8>}, {transform_indices = @transform_7, window_bounds = array<i64: 1, 16, 16, 8>}]} {
    %cst = arith.constant 0.000000e+00 : f32
    %0 = vector.broadcast %cst : f32 to vector<1x18x4xf32>
    %c0 = arith.constant 0 : index
    %c0_0 = arith.constant 0 : index
    %c0_1 = arith.constant 0 : index
    %1 = vector.load %arg9[%c0, %c0_0, %c0_1] : memref<18x18x4xf32, #tpu.memory_space<vmem>>, vector<1x18x4xf32>
    tpu.vector_store %arg9[%c0, %c0_0, %c0_1], %0 {strides = array<i32>} : memref<18x18x4xf32, #tpu.memory_space<vmem>>, vector<1x18x4xf32>,
    %c17 = arith.constant 17 : index
    %c0_2 = arith.constant 0 : index
    %c0_3 = arith.constant 0 : index
    %2 = vector.load %arg9[%c17, %c0_2, %c0_3] : memref<18x18x4xf32, #tpu.memory_space<vmem>>, vector<1x18x4xf32>
    tpu.vector_store %arg9[%c17, %c0_2, %c0_3], %0 {strides = array<i32>} : memref<18x18x4xf32, #tpu.memory_space<vmem>>, vector<1x18x4xf32>,
    %cst_4 = arith.constant 0.000000e+00 : f32
    %3 = vector.broadcast %cst_4 : f32 to vector<18x1x4xf32>
    %c0_5 = arith.constant 0 : index
    %c0_6 = arith.constant 0 : index
    %c0_7 = arith.constant 0 : index
    %4 = vector.load %arg9[%c0_5, %c0_6, %c0_7] : memref<18x18x4xf32, #tpu.memory_space<vmem>>, vector<18x1x4xf32>
    tpu.vector_store %arg9[%c0_5, %c0_6, %c0_7], %3 {strides = array<i32>} : memref<18x18x4xf32, #tpu.memory_space<vmem>>, vector<18x1x4xf32>,
    %c0_8 = arith.constant 0 : index
    %c17_9 = arith.constant 17 : index
    %c0_10 = arith.constant 0 : index
    %5 = vector.load %arg9[%c0_8, %c17_9, %c0_10] : memref<18x18x4xf32, #tpu.memory_space<vmem>>, vector<18x1x4xf32>
    tpu.vector_store %arg9[%c0_8, %c17_9, %c0_10], %3 {strides = array<i32>} : memref<18x18x4xf32, #tpu.memory_space<vmem>>, vector<18x1x4xf32>,
    %c0_11 = arith.constant 0 : index
    %c0_12 = arith.constant 0 : index
    %c0_13 = arith.constant 0 : index
    %c0_14 = arith.constant 0 : index
    %6 = vector.load %arg1[%c0_11, %c0_12, %c0_13, %c0_14] : memref<1x16x16x4xbf16, #tpu.memory_space<vmem>>, vector<1x16x16x4xbf16>
    %7 = vector.shape_cast %6 : vector<1x16x16x4xbf16> to vector<16x16x4xbf16>
    %8 = arith.extf %7 : vector<16x16x4xbf16> to vector<16x16x4xf32>
    %c1 = arith.constant 1 : index
    %c1_15 = arith.constant 1 : index
    %c0_16 = arith.constant 0 : index
    %9 = vector.load %arg9[%c1, %c1_15, %c0_16] : memref<18x18x4xf32, #tpu.memory_space<vmem>>, vector<16x16x4xf32>
    tpu.vector_store %arg9[%c1, %c1_15, %c0_16], %8 {strides = array<i32>} : memref<18x18x4xf32, #tpu.memory_space<vmem>>, vector<16x16x4xf32>,
    %c0_17 = arith.constant 0 : index
    %c0_18 = arith.constant 0 : index
    %c0_19 = arith.constant 0 : index
    %10 = vector.load %arg9[%c0_17, %c0_18, %c0_19] : memref<18x18x4xf32, #tpu.memory_space<vmem>>, vector<16x16x4xf32>
    %11 = vector.shape_cast %10 : vector<16x16x4xf32> to vector<256x4xf32>
    %12 = arith.truncf %11 : vector<256x4xf32> to vector<256x4xbf16>
    %c0_20 = arith.constant 0 : index
    %c0_21 = arith.constant 0 : index
    %c0_22 = arith.constant 0 : index
    %c0_23 = arith.constant 0 : index
    %13 = vector.load %arg2[%c0_20, %c0_21, %c0_22, %c0_23] : memref<3x3x4x8xbf16, #tpu.memory_space<vmem>>, vector<1x1x4x8xbf16>
    %14 = vector.shape_cast %13 : vector<1x1x4x8xbf16> to vector<4x8xbf16>
    %cst_24 = arith.constant dense<0.000000e+00> : vector<256x8xf32>
    %15 = tpu.matmul %12, %14, %cst_24 {dimension_numbers = #tpu.dot_dimension_numbers<[1], [0], [0], [1], [0, 0, 1, 1], [], []>} : vector<256x4xbf16>, vector<4x8xbf16>, vector<256x8xf32> -> vector<256x8xf32>
    %c0_25 = arith.constant 0 : index
    %c0_26 = arith.constant 0 : index
    %16 = vector.load %arg11[%c0_25, %c0_26] : memref<256x8xf32, #tpu.memory_space<vmem>>, vector<256x8xf32>
    tpu.vector_store %arg11[%c0_25, %c0_26], %15 {strides = array<i32>} : memref<256x8xf32, #tpu.memory_space<vmem>>, vector<256x8xf32>,
    %c0_27 = arith.constant 0 : index
    %c0_28 = arith.constant 0 : index
    %17 = vector.load %arg11[%c0_27, %c0_28] : memref<256x8xf32, #tpu.memory_space<vmem>>, vector<256x8xf32>
    %c0_29 = arith.constant 0 : index
    %c1_30 = arith.constant 1 : index
    %c0_31 = arith.constant 0 : index
    %18 = vector.load %arg9[%c0_29, %c1_30, %c0_31] : memref<18x18x4xf32, #tpu.memory_space<vmem>>, vector<16x16x4xf32>
    %19 = vector.shape_cast %18 : vector<16x16x4xf32> to vector<256x4xf32>
    %20 = arith.truncf %19 : vector<256x4xf32> to vector<256x4xbf16>
    %c0_32 = arith.constant 0 : index
    %c1_33 = arith.constant 1 : index
    %c0_34 = arith.constant 0 : index
    %c0_35 = arith.constant 0 : index
    %21 = vector.load %arg2[%c0_32, %c1_33, %c0_34, %c0_35] : memref<3x3x4x8xbf16, #tpu.memory_space<vmem>>, vector<1x1x4x8xbf16>
    %22 = vector.shape_cast %21 : vector<1x1x4x8xbf16> to vector<4x8xbf16>
    %cst_36 = arith.constant dense<0.000000e+00> : vector<256x8xf32>
    %23 = tpu.matmul %20, %22, %cst_36 {dimension_numbers = #tpu.dot_dimension_numbers<[1], [0], [0], [1], [0, 0, 1, 1], [], []>} : vector<256x4xbf16>, vector<4x8xbf16>, vector<256x8xf32> -> vector<256x8xf32>
    %24 = arith.addf %17, %23 : vector<256x8xf32>
    %c0_37 = arith.constant 0 : index
    %c0_38 = arith.constant 0 : index
    %25 = vector.load %arg11[%c0_37, %c0_38] : memref<256x8xf32, #tpu.memory_space<vmem>>, vector<256x8xf32>
    tpu.vector_store %arg11[%c0_37, %c0_38], %24 {strides = array<i32>} : memref<256x8xf32, #tpu.memory_space<vmem>>, vector<256x8xf32>,
    %c0_39 = arith.constant 0 : index
    %c0_40 = arith.constant 0 : index
    %26 = vector.load %arg11[%c0_39, %c0_40] : memref<256x8xf32, #tpu.memory_space<vmem>>, vector<256x8xf32>
    %c0_41 = arith.constant 0 : index
    %c2 = arith.constant 2 : index
    %c0_42 = arith.constant 0 : index
    %27 = vector.load %arg9[%c0_41, %c2, %c0_42] : memref<18x18x4xf32, #tpu.memory_space<vmem>>, vector<16x16x4xf32>
    %28 = vector.shape_cast %27 : vector<16x16x4xf32> to vector<256x4xf32>
    %29 = arith.truncf %28 : vector<256x4xf32> to vector<256x4xbf16>
    %c0_43 = arith.constant 0 : index
    %c2_44 = arith.constant 2 : index
    %c0_45 = arith.constant 0 : index
    %c0_46 = arith.constant 0 : index
    %30 = vector.load %arg2[%c0_43, %c2_44, %c0_45, %c0_46] : memref<3x3x4x8xbf16, #tpu.memory_space<vmem>>, vector<1x1x4x8xbf16>
    %31 = vector.shape_cast %30 : vector<1x1x4x8xbf16> to vector<4x8xbf16>
    %cst_47 = arith.constant dense<0.000000e+00> : vector<256x8xf32>
    %32 = tpu.matmul %29, %31, %cst_47 {dimension_numbers = #tpu.dot_dimension_numbers<[1], [0], [0], [1], [0, 0, 1, 1], [], []>} : vector<256x4xbf16>, vector<4x8xbf16>, vector<256x8xf32> -> vector<256x8xf32>
    %33 = arith.addf %26, %32 : vector<256x8xf32>
    %c0_48 = arith.constant 0 : index
    %c0_49 = arith.constant 0 : index
    %34 = vector.load %arg11[%c0_48, %c0_49] : memref<256x8xf32, #tpu.memory_space<vmem>>, vector<256x8xf32>
    tpu.vector_store %arg11[%c0_48, %c0_49], %33 {strides = array<i32>} : memref<256x8xf32, #tpu.memory_space<vmem>>, vector<256x8xf32>,
    %c0_50 = arith.constant 0 : index
    %c0_51 = arith.constant 0 : index
    %35 = vector.load %arg11[%c0_50, %c0_51] : memref<256x8xf32, #tpu.memory_space<vmem>>, vector<256x8xf32>
    %c1_52 = arith.constant 1 : index
    %c0_53 = arith.constant 0 : index
    %c0_54 = arith.constant 0 : index
    %36 = vector.load %arg9[%c1_52, %c0_53, %c0_54] : memref<18x18x4xf32, #tpu.memory_space<vmem>>, vector<16x16x4xf32>
    %37 = vector.shape_cast %36 : vector<16x16x4xf32> to vector<256x4xf32>
    %38 = arith.truncf %37 : vector<256x4xf32> to vector<256x4xbf16>
    %c1_55 = arith.constant 1 : index
    %c0_56 = arith.constant 0 : index
    %c0_57 = arith.constant 0 : index
    %c0_58 = arith.constant 0 : index
    %39 = vector.load %arg2[%c1_55, %c0_56, %c0_57, %c0_58] : memref<3x3x4x8xbf16, #tpu.memory_space<vmem>>, vector<1x1x4x8xbf16>
    %40 = vector.shape_cast %39 : vector<1x1x4x8xbf16> to vector<4x8xbf16>
    %cst_59 = arith.constant dense<0.000000e+00> : vector<256x8xf32>
    %41 = tpu.matmul %38, %40, %cst_59 {dimension_numbers = #tpu.dot_dimension_numbers<[1], [0], [0], [1], [0, 0, 1, 1], [], []>} : vector<256x4xbf16>, vector<4x8xbf16>, vector<256x8xf32> -> vector<256x8xf32>
    %42 = arith.addf %35, %41 : vector<256x8xf32>
    %c0_60 = arith.constant 0 : index
    %c0_61 = arith.constant 0 : index
    %43 = vector.load %arg11[%c0_60, %c0_61] : memref<256x8xf32, #tpu.memory_space<vmem>>, vector<256x8xf32>
    tpu.vector_store %arg11[%c0_60, %c0_61], %42 {strides = array<i32>} : memref<256x8xf32, #tpu.memory_space<vmem>>, vector<256x8xf32>,
    %c0_62 = arith.constant 0 : index
    %c0_63 = arith.constant 0 : index
    %44 = vector.load %arg11[%c0_62, %c0_63] : memref<256x8xf32, #tpu.memory_space<vmem>>, vector<256x8xf32>
    %c1_64 = arith.constant 1 : index
    %c1_65 = arith.constant 1 : index
    %c0_66 = arith.constant 0 : index
    %45 = vector.load %arg9[%c1_64, %c1_65, %c0_66] : memref<18x18x4xf32, #tpu.memory_space<vmem>>, vector<16x16x4xf32>
    %46 = vector.shape_cast %45 : vector<16x16x4xf32> to vector<256x4xf32>
    %47 = arith.truncf %46 : vector<256x4xf32> to vector<256x4xbf16>
    %c1_67 = arith.constant 1 : index
    %c1_68 = arith.constant 1 : index
    %c0_69 = arith.constant 0 : index
    %c0_70 = arith.constant 0 : index
    %48 = vector.load %arg2[%c1_67, %c1_68, %c0_69, %c0_70] : memref<3x3x4x8xbf16, #tpu.memory_space<vmem>>, vector<1x1x4x8xbf16>
    %49 = vector.shape_cast %48 : vector<1x1x4x8xbf16> to vector<4x8xbf16>
    %cst_71 = arith.constant dense<0.000000e+00> : vector<256x8xf32>
    %50 = tpu.matmul %47, %49, %cst_71 {dimension_numbers = #tpu.dot_dimension_numbers<[1], [0], [0], [1], [0, 0, 1, 1], [], []>} : vector<256x4xbf16>, vector<4x8xbf16>, vector<256x8xf32> -> vector<256x8xf32>
    %51 = arith.addf %44, %50 : vector<256x8xf32>
    %c0_72 = arith.constant 0 : index
    %c0_73 = arith.constant 0 : index
    %52 = vector.load %arg11[%c0_72, %c0_73] : memref<256x8xf32, #tpu.memory_space<vmem>>, vector<256x8xf32>
    tpu.vector_store %arg11[%c0_72, %c0_73], %51 {strides = array<i32>} : memref<256x8xf32, #tpu.memory_space<vmem>>, vector<256x8xf32>,
    %c0_74 = arith.constant 0 : index
    %c0_75 = arith.constant 0 : index
    %53 = vector.load %arg11[%c0_74, %c0_75] : memref<256x8xf32, #tpu.memory_space<vmem>>, vector<256x8xf32>
    %c1_76 = arith.constant 1 : index
    %c2_77 = arith.constant 2 : index
    %c0_78 = arith.constant 0 : index
    %54 = vector.load %arg9[%c1_76, %c2_77, %c0_78] : memref<18x18x4xf32, #tpu.memory_space<vmem>>, vector<16x16x4xf32>
    %55 = vector.shape_cast %54 : vector<16x16x4xf32> to vector<256x4xf32>
    %56 = arith.truncf %55 : vector<256x4xf32> to vector<256x4xbf16>
    %c1_79 = arith.constant 1 : index
    %c2_80 = arith.constant 2 : index
    %c0_81 = arith.constant 0 : index
    %c0_82 = arith.constant 0 : index
    %57 = vector.load %arg2[%c1_79, %c2_80, %c0_81, %c0_82] : memref<3x3x4x8xbf16, #tpu.memory_space<vmem>>, vector<1x1x4x8xbf16>
    %58 = vector.shape_cast %57 : vector<1x1x4x8xbf16> to vector<4x8xbf16>
    %cst_83 = arith.constant dense<0.000000e+00> : vector<256x8xf32>
    %59 = tpu.matmul %56, %58, %cst_83 {dimension_numbers = #tpu.dot_dimension_numbers<[1], [0], [0], [1], [0, 0, 1, 1], [], []>} : vector<256x4xbf16>, vector<4x8xbf16>, vector<256x8xf32> -> vector<256x8xf32>
    %60 = arith.addf %53, %59 : vector<256x8xf32>
    %c0_84 = arith.constant 0 : index
    %c0_85 = arith.constant 0 : index
    %61 = vector.load %arg11[%c0_84, %c0_85] : memref<256x8xf32, #tpu.memory_space<vmem>>, vector<256x8xf32>
    tpu.vector_store %arg11[%c0_84, %c0_85], %60 {strides = array<i32>} : memref<256x8xf32, #tpu.memory_space<vmem>>, vector<256x8xf32>,
    %c0_86 = arith.constant 0 : index
    %c0_87 = arith.constant 0 : index
    %62 = vector.load %arg11[%c0_86, %c0_87] : memref<256x8xf32, #tpu.memory_space<vmem>>, vector<256x8xf32>
    %c2_88 = arith.constant 2 : index
    %c0_89 = arith.constant 0 : index
    %c0_90 = arith.constant 0 : index
    %63 = vector.load %arg9[%c2_88, %c0_89, %c0_90] : memref<18x18x4xf32, #tpu.memory_space<vmem>>, vector<16x16x4xf32>
    %64 = vector.shape_cast %63 : vector<16x16x4xf32> to vector<256x4xf32>
    %65 = arith.truncf %64 : vector<256x4xf32> to vector<256x4xbf16>
    %c2_91 = arith.constant 2 : index
    %c0_92 = arith.constant 0 : index
    %c0_93 = arith.constant 0 : index
    %c0_94 = arith.constant 0 : index
    %66 = vector.load %arg2[%c2_91, %c0_92, %c0_93, %c0_94] : memref<3x3x4x8xbf16, #tpu.memory_space<vmem>>, vector<1x1x4x8xbf16>
    %67 = vector.shape_cast %66 : vector<1x1x4x8xbf16> to vector<4x8xbf16>
    %cst_95 = arith.constant dense<0.000000e+00> : vector<256x8xf32>
    %68 = tpu.matmul %65, %67, %cst_95 {dimension_numbers = #tpu.dot_dimension_numbers<[1], [0], [0], [1], [0, 0, 1, 1], [], []>} : vector<256x4xbf16>, vector<4x8xbf16>, vector<256x8xf32> -> vector<256x8xf32>
    %69 = arith.addf %62, %68 : vector<256x8xf32>
    %c0_96 = arith.constant 0 : index
    %c0_97 = arith.constant 0 : index
    %70 = vector.load %arg11[%c0_96, %c0_97] : memref<256x8xf32, #tpu.memory_space<vmem>>, vector<256x8xf32>
    tpu.vector_store %arg11[%c0_96, %c0_97], %69 {strides = array<i32>} : memref<256x8xf32, #tpu.memory_space<vmem>>, vector<256x8xf32>,
    %c0_98 = arith.constant 0 : index
    %c0_99 = arith.constant 0 : index
    %71 = vector.load %arg11[%c0_98, %c0_99] : memref<256x8xf32, #tpu.memory_space<vmem>>, vector<256x8xf32>
    %c2_100 = arith.constant 2 : index
    %c1_101 = arith.constant 1 : index
    %c0_102 = arith.constant 0 : index
    %72 = vector.load %arg9[%c2_100, %c1_101, %c0_102] : memref<18x18x4xf32, #tpu.memory_space<vmem>>, vector<16x16x4xf32>
    %73 = vector.shape_cast %72 : vector<16x16x4xf32> to vector<256x4xf32>
    %74 = arith.truncf %73 : vector<256x4xf32> to vector<256x4xbf16>
    %c2_103 = arith.constant 2 : index
    %c1_104 = arith.constant 1 : index
    %c0_105 = arith.constant 0 : index
    %c0_106 = arith.constant 0 : index
    %75 = vector.load %arg2[%c2_103, %c1_104, %c0_105, %c0_106] : memref<3x3x4x8xbf16, #tpu.memory_space<vmem>>, vector<1x1x4x8xbf16>
    %76 = vector.shape_cast %75 : vector<1x1x4x8xbf16> to vector<4x8xbf16>
    %cst_107 = arith.constant dense<0.000000e+00> : vector<256x8xf32>
    %77 = tpu.matmul %74, %76, %cst_107 {dimension_numbers = #tpu.dot_dimension_numbers<[1], [0], [0], [1], [0, 0, 1, 1], [], []>} : vector<256x4xbf16>, vector<4x8xbf16>, vector<256x8xf32> -> vector<256x8xf32>
    %78 = arith.addf %71, %77 : vector<256x8xf32>
    %c0_108 = arith.constant 0 : index
    %c0_109 = arith.constant 0 : index
    %79 = vector.load %arg11[%c0_108, %c0_109] : memref<256x8xf32, #tpu.memory_space<vmem>>, vector<256x8xf32>
    tpu.vector_store %arg11[%c0_108, %c0_109], %78 {strides = array<i32>} : memref<256x8xf32, #tpu.memory_space<vmem>>, vector<256x8xf32>,
    %c0_110 = arith.constant 0 : index
    %c0_111 = arith.constant 0 : index
    %80 = vector.load %arg11[%c0_110, %c0_111] : memref<256x8xf32, #tpu.memory_space<vmem>>, vector<256x8xf32>
    %c2_112 = arith.constant 2 : index
    %c2_113 = arith.constant 2 : index
    %c0_114 = arith.constant 0 : index
    %81 = vector.load %arg9[%c2_112, %c2_113, %c0_114] : memref<18x18x4xf32, #tpu.memory_space<vmem>>, vector<16x16x4xf32>
    %82 = vector.shape_cast %81 : vector<16x16x4xf32> to vector<256x4xf32>
    %83 = arith.truncf %82 : vector<256x4xf32> to vector<256x4xbf16>
    %c2_115 = arith.constant 2 : index
    %c2_116 = arith.constant 2 : index
    %c0_117 = arith.constant 0 : index
    %c0_118 = arith.constant 0 : index
    %84 = vector.load %arg2[%c2_115, %c2_116, %c0_117, %c0_118] : memref<3x3x4x8xbf16, #tpu.memory_space<vmem>>, vector<1x1x4x8xbf16>
    %85 = vector.shape_cast %84 : vector<1x1x4x8xbf16> to vector<4x8xbf16>
    %cst_119 = arith.constant dense<0.000000e+00> : vector<256x8xf32>
    %86 = tpu.matmul %83, %85, %cst_119 {dimension_numbers = #tpu.dot_dimension_numbers<[1], [0], [0], [1], [0, 0, 1, 1], [], []>} : vector<256x4xbf16>, vector<4x8xbf16>, vector<256x8xf32> -> vector<256x8xf32>
    %87 = arith.addf %80, %86 : vector<256x8xf32>
    %c0_120 = arith.constant 0 : index
    %c0_121 = arith.constant 0 : index
    %88 = vector.load %arg11[%c0_120, %c0_121] : memref<256x8xf32, #tpu.memory_space<vmem>>, vector<256x8xf32>
    tpu.vector_store %arg11[%c0_120, %c0_121], %87 {strides = array<i32>} : memref<256x8xf32, #tpu.memory_space<vmem>>, vector<256x8xf32>,
    %c0_122 = arith.constant 0 : index
    %c0_123 = arith.constant 0 : index
    %89 = vector.load %arg11[%c0_122, %c0_123] : memref<256x8xf32, #tpu.memory_space<vmem>>, vector<256x8xf32>
    %c0_124 = arith.constant 0 : index
    %c0_125 = arith.constant 0 : index
    %90 = vector.load %arg3[%c0_124, %c0_125] : memref<1x8xf32, #tpu.memory_space<vmem>>, vector<1x8xf32>
    %91 = vector.broadcast %90 : vector<1x8xf32> to vector<256x8xf32>
    %92 = arith.mulf %89, %91 : vector<256x8xf32>
    %c0_126 = arith.constant 0 : index
    %c0_127 = arith.constant 0 : index
    %93 = vector.load %arg4[%c0_126, %c0_127] : memref<1x8xf32, #tpu.memory_space<vmem>>, vector<1x8xf32>
    %94 = vector.broadcast %93 : vector<1x8xf32> to vector<256x8xf32>
    %95 = arith.addf %92, %94 : vector<256x8xf32>
    %cst_128 = arith.constant 0.000000e+00 : f32
    %96 = vector.broadcast %cst_128 : f32 to vector<256x8xf32>
    %97 = arith.maximumf %95, %96 : vector<256x8xf32>
    %cst_129 = arith.constant 0.000000e+00 : f32
    %98 = vector.broadcast %cst_129 : f32 to vector<1x18x8xf32>
    %c0_130 = arith.constant 0 : index
    %c0_131 = arith.constant 0 : index
    %c0_132 = arith.constant 0 : index
    %99 = vector.load %arg10[%c0_130, %c0_131, %c0_132] : memref<18x18x8xf32, #tpu.memory_space<vmem>>, vector<1x18x8xf32>
    tpu.vector_store %arg10[%c0_130, %c0_131, %c0_132], %98 {strides = array<i32>} : memref<18x18x8xf32, #tpu.memory_space<vmem>>, vector<1x18x8xf32>,
    %c17_133 = arith.constant 17 : index
    %c0_134 = arith.constant 0 : index
    %c0_135 = arith.constant 0 : index
    %100 = vector.load %arg10[%c17_133, %c0_134, %c0_135] : memref<18x18x8xf32, #tpu.memory_space<vmem>>, vector<1x18x8xf32>
    tpu.vector_store %arg10[%c17_133, %c0_134, %c0_135], %98 {strides = array<i32>} : memref<18x18x8xf32, #tpu.memory_space<vmem>>, vector<1x18x8xf32>,
    %cst_136 = arith.constant 0.000000e+00 : f32
    %101 = vector.broadcast %cst_136 : f32 to vector<18x1x8xf32>
    %c0_137 = arith.constant 0 : index
    %c0_138 = arith.constant 0 : index
    %c0_139 = arith.constant 0 : index
    %102 = vector.load %arg10[%c0_137, %c0_138, %c0_139] : memref<18x18x8xf32, #tpu.memory_space<vmem>>, vector<18x1x8xf32>
    tpu.vector_store %arg10[%c0_137, %c0_138, %c0_139], %101 {strides = array<i32>} : memref<18x18x8xf32, #tpu.memory_space<vmem>>, vector<18x1x8xf32>,
    %c0_140 = arith.constant 0 : index
    %c17_141 = arith.constant 17 : index
    %c0_142 = arith.constant 0 : index
    %103 = vector.load %arg10[%c0_140, %c17_141, %c0_142] : memref<18x18x8xf32, #tpu.memory_space<vmem>>, vector<18x1x8xf32>
    tpu.vector_store %arg10[%c0_140, %c17_141, %c0_142], %101 {strides = array<i32>} : memref<18x18x8xf32, #tpu.memory_space<vmem>>, vector<18x1x8xf32>,
    %104 = vector.shape_cast %97 : vector<256x8xf32> to vector<16x16x8xf32>
    %c1_143 = arith.constant 1 : index
    %c1_144 = arith.constant 1 : index
    %c0_145 = arith.constant 0 : index
    %105 = vector.load %arg10[%c1_143, %c1_144, %c0_145] : memref<18x18x8xf32, #tpu.memory_space<vmem>>, vector<16x16x8xf32>
    tpu.vector_store %arg10[%c1_143, %c1_144, %c0_145], %104 {strides = array<i32>} : memref<18x18x8xf32, #tpu.memory_space<vmem>>, vector<16x16x8xf32>,
    %c0_146 = arith.constant 0 : index
    %c0_147 = arith.constant 0 : index
    %c0_148 = arith.constant 0 : index
    %106 = vector.load %arg10[%c0_146, %c0_147, %c0_148] : memref<18x18x8xf32, #tpu.memory_space<vmem>>, vector<16x16x8xf32>
    %107 = vector.shape_cast %106 : vector<16x16x8xf32> to vector<256x8xf32>
    %108 = arith.truncf %107 : vector<256x8xf32> to vector<256x8xbf16>
    %c0_149 = arith.constant 0 : index
    %c0_150 = arith.constant 0 : index
    %c0_151 = arith.constant 0 : index
    %c0_152 = arith.constant 0 : index
    %109 = vector.load %arg5[%c0_149, %c0_150, %c0_151, %c0_152] : memref<3x3x8x8xbf16, #tpu.memory_space<vmem>>, vector<1x1x8x8xbf16>
    %110 = vector.shape_cast %109 : vector<1x1x8x8xbf16> to vector<8x8xbf16>
    %cst_153 = arith.constant dense<0.000000e+00> : vector<256x8xf32>
    %111 = tpu.matmul %108, %110, %cst_153 {dimension_numbers = #tpu.dot_dimension_numbers<[1], [0], [0], [1], [0, 0, 1, 1], [], []>} : vector<256x8xbf16>, vector<8x8xbf16>, vector<256x8xf32> -> vector<256x8xf32>
    %c0_154 = arith.constant 0 : index
    %c0_155 = arith.constant 0 : index
    %112 = vector.load %arg11[%c0_154, %c0_155] : memref<256x8xf32, #tpu.memory_space<vmem>>, vector<256x8xf32>
    tpu.vector_store %arg11[%c0_154, %c0_155], %111 {strides = array<i32>} : memref<256x8xf32, #tpu.memory_space<vmem>>, vector<256x8xf32>,
    %c0_156 = arith.constant 0 : index
    %c0_157 = arith.constant 0 : index
    %113 = vector.load %arg11[%c0_156, %c0_157] : memref<256x8xf32, #tpu.memory_space<vmem>>, vector<256x8xf32>
    %c0_158 = arith.constant 0 : index
    %c1_159 = arith.constant 1 : index
    %c0_160 = arith.constant 0 : index
    %114 = vector.load %arg10[%c0_158, %c1_159, %c0_160] : memref<18x18x8xf32, #tpu.memory_space<vmem>>, vector<16x16x8xf32>
    %115 = vector.shape_cast %114 : vector<16x16x8xf32> to vector<256x8xf32>
    %116 = arith.truncf %115 : vector<256x8xf32> to vector<256x8xbf16>
    %c0_161 = arith.constant 0 : index
    %c1_162 = arith.constant 1 : index
    %c0_163 = arith.constant 0 : index
    %c0_164 = arith.constant 0 : index
    %117 = vector.load %arg5[%c0_161, %c1_162, %c0_163, %c0_164] : memref<3x3x8x8xbf16, #tpu.memory_space<vmem>>, vector<1x1x8x8xbf16>
    %118 = vector.shape_cast %117 : vector<1x1x8x8xbf16> to vector<8x8xbf16>
    %cst_165 = arith.constant dense<0.000000e+00> : vector<256x8xf32>
    %119 = tpu.matmul %116, %118, %cst_165 {dimension_numbers = #tpu.dot_dimension_numbers<[1], [0], [0], [1], [0, 0, 1, 1], [], []>} : vector<256x8xbf16>, vector<8x8xbf16>, vector<256x8xf32> -> vector<256x8xf32>
    %120 = arith.addf %113, %119 : vector<256x8xf32>
    %c0_166 = arith.constant 0 : index
    %c0_167 = arith.constant 0 : index
    %121 = vector.load %arg11[%c0_166, %c0_167] : memref<256x8xf32, #tpu.memory_space<vmem>>, vector<256x8xf32>
    tpu.vector_store %arg11[%c0_166, %c0_167], %120 {strides = array<i32>} : memref<256x8xf32, #tpu.memory_space<vmem>>, vector<256x8xf32>,
    %c0_168 = arith.constant 0 : index
    %c0_169 = arith.constant 0 : index
    %122 = vector.load %arg11[%c0_168, %c0_169] : memref<256x8xf32, #tpu.memory_space<vmem>>, vector<256x8xf32>
    %c0_170 = arith.constant 0 : index
    %c2_171 = arith.constant 2 : index
    %c0_172 = arith.constant 0 : index
    %123 = vector.load %arg10[%c0_170, %c2_171, %c0_172] : memref<18x18x8xf32, #tpu.memory_space<vmem>>, vector<16x16x8xf32>
    %124 = vector.shape_cast %123 : vector<16x16x8xf32> to vector<256x8xf32>
    %125 = arith.truncf %124 : vector<256x8xf32> to vector<256x8xbf16>
    %c0_173 = arith.constant 0 : index
    %c2_174 = arith.constant 2 : index
    %c0_175 = arith.constant 0 : index
    %c0_176 = arith.constant 0 : index
    %126 = vector.load %arg5[%c0_173, %c2_174, %c0_175, %c0_176] : memref<3x3x8x8xbf16, #tpu.memory_space<vmem>>, vector<1x1x8x8xbf16>
    %127 = vector.shape_cast %126 : vector<1x1x8x8xbf16> to vector<8x8xbf16>
    %cst_177 = arith.constant dense<0.000000e+00> : vector<256x8xf32>
    %128 = tpu.matmul %125, %127, %cst_177 {dimension_numbers = #tpu.dot_dimension_numbers<[1], [0], [0], [1], [0, 0, 1, 1], [], []>} : vector<256x8xbf16>, vector<8x8xbf16>, vector<256x8xf32> -> vector<256x8xf32>
    %129 = arith.addf %122, %128 : vector<256x8xf32>
    %c0_178 = arith.constant 0 : index
    %c0_179 = arith.constant 0 : index
    %130 = vector.load %arg11[%c0_178, %c0_179] : memref<256x8xf32, #tpu.memory_space<vmem>>, vector<256x8xf32>
    tpu.vector_store %arg11[%c0_178, %c0_179], %129 {strides = array<i32>} : memref<256x8xf32, #tpu.memory_space<vmem>>, vector<256x8xf32>,
    %c0_180 = arith.constant 0 : index
    %c0_181 = arith.constant 0 : index
    %131 = vector.load %arg11[%c0_180, %c0_181] : memref<256x8xf32, #tpu.memory_space<vmem>>, vector<256x8xf32>
    %c1_182 = arith.constant 1 : index
    %c0_183 = arith.constant 0 : index
    %c0_184 = arith.constant 0 : index
    %132 = vector.load %arg10[%c1_182, %c0_183, %c0_184] : memref<18x18x8xf32, #tpu.memory_space<vmem>>, vector<16x16x8xf32>
    %133 = vector.shape_cast %132 : vector<16x16x8xf32> to vector<256x8xf32>
    %134 = arith.truncf %133 : vector<256x8xf32> to vector<256x8xbf16>
    %c1_185 = arith.constant 1 : index
    %c0_186 = arith.constant 0 : index
    %c0_187 = arith.constant 0 : index
    %c0_188 = arith.constant 0 : index
    %135 = vector.load %arg5[%c1_185, %c0_186, %c0_187, %c0_188] : memref<3x3x8x8xbf16, #tpu.memory_space<vmem>>, vector<1x1x8x8xbf16>
    %136 = vector.shape_cast %135 : vector<1x1x8x8xbf16> to vector<8x8xbf16>
    %cst_189 = arith.constant dense<0.000000e+00> : vector<256x8xf32>
    %137 = tpu.matmul %134, %136, %cst_189 {dimension_numbers = #tpu.dot_dimension_numbers<[1], [0], [0], [1], [0, 0, 1, 1], [], []>} : vector<256x8xbf16>, vector<8x8xbf16>, vector<256x8xf32> -> vector<256x8xf32>
    %138 = arith.addf %131, %137 : vector<256x8xf32>
    %c0_190 = arith.constant 0 : index
    %c0_191 = arith.constant 0 : index
    %139 = vector.load %arg11[%c0_190, %c0_191] : memref<256x8xf32, #tpu.memory_space<vmem>>, vector<256x8xf32>
    tpu.vector_store %arg11[%c0_190, %c0_191], %138 {strides = array<i32>} : memref<256x8xf32, #tpu.memory_space<vmem>>, vector<256x8xf32>,
    %c0_192 = arith.constant 0 : index
    %c0_193 = arith.constant 0 : index
    %140 = vector.load %arg11[%c0_192, %c0_193] : memref<256x8xf32, #tpu.memory_space<vmem>>, vector<256x8xf32>
    %c1_194 = arith.constant 1 : index
    %c1_195 = arith.constant 1 : index
    %c0_196 = arith.constant 0 : index
    %141 = vector.load %arg10[%c1_194, %c1_195, %c0_196] : memref<18x18x8xf32, #tpu.memory_space<vmem>>, vector<16x16x8xf32>
    %142 = vector.shape_cast %141 : vector<16x16x8xf32> to vector<256x8xf32>
    %143 = arith.truncf %142 : vector<256x8xf32> to vector<256x8xbf16>
    %c1_197 = arith.constant 1 : index
    %c1_198 = arith.constant 1 : index
    %c0_199 = arith.constant 0 : index
    %c0_200 = arith.constant 0 : index
    %144 = vector.load %arg5[%c1_197, %c1_198, %c0_199, %c0_200] : memref<3x3x8x8xbf16, #tpu.memory_space<vmem>>, vector<1x1x8x8xbf16>
    %145 = vector.shape_cast %144 : vector<1x1x8x8xbf16> to vector<8x8xbf16>
    %cst_201 = arith.constant dense<0.000000e+00> : vector<256x8xf32>
    %146 = tpu.matmul %143, %145, %cst_201 {dimension_numbers = #tpu.dot_dimension_numbers<[1], [0], [0], [1], [0, 0, 1, 1], [], []>} : vector<256x8xbf16>, vector<8x8xbf16>, vector<256x8xf32> -> vector<256x8xf32>
    %147 = arith.addf %140, %146 : vector<256x8xf32>
    %c0_202 = arith.constant 0 : index
    %c0_203 = arith.constant 0 : index
    %148 = vector.load %arg11[%c0_202, %c0_203] : memref<256x8xf32, #tpu.memory_space<vmem>>, vector<256x8xf32>
    tpu.vector_store %arg11[%c0_202, %c0_203], %147 {strides = array<i32>} : memref<256x8xf32, #tpu.memory_space<vmem>>, vector<256x8xf32>,
    %c0_204 = arith.constant 0 : index
    %c0_205 = arith.constant 0 : index
    %149 = vector.load %arg11[%c0_204, %c0_205] : memref<256x8xf32, #tpu.memory_space<vmem>>, vector<256x8xf32>
    %c1_206 = arith.constant 1 : index
    %c2_207 = arith.constant 2 : index
    %c0_208 = arith.constant 0 : index
    %150 = vector.load %arg10[%c1_206, %c2_207, %c0_208] : memref<18x18x8xf32, #tpu.memory_space<vmem>>, vector<16x16x8xf32>
    %151 = vector.shape_cast %150 : vector<16x16x8xf32> to vector<256x8xf32>
    %152 = arith.truncf %151 : vector<256x8xf32> to vector<256x8xbf16>
    %c1_209 = arith.constant 1 : index
    %c2_210 = arith.constant 2 : index
    %c0_211 = arith.constant 0 : index
    %c0_212 = arith.constant 0 : index
    %153 = vector.load %arg5[%c1_209, %c2_210, %c0_211, %c0_212] : memref<3x3x8x8xbf16, #tpu.memory_space<vmem>>, vector<1x1x8x8xbf16>
    %154 = vector.shape_cast %153 : vector<1x1x8x8xbf16> to vector<8x8xbf16>
    %cst_213 = arith.constant dense<0.000000e+00> : vector<256x8xf32>
    %155 = tpu.matmul %152, %154, %cst_213 {dimension_numbers = #tpu.dot_dimension_numbers<[1], [0], [0], [1], [0, 0, 1, 1], [], []>} : vector<256x8xbf16>, vector<8x8xbf16>, vector<256x8xf32> -> vector<256x8xf32>
    %156 = arith.addf %149, %155 : vector<256x8xf32>
    %c0_214 = arith.constant 0 : index
    %c0_215 = arith.constant 0 : index
    %157 = vector.load %arg11[%c0_214, %c0_215] : memref<256x8xf32, #tpu.memory_space<vmem>>, vector<256x8xf32>
    tpu.vector_store %arg11[%c0_214, %c0_215], %156 {strides = array<i32>} : memref<256x8xf32, #tpu.memory_space<vmem>>, vector<256x8xf32>,
    %c0_216 = arith.constant 0 : index
    %c0_217 = arith.constant 0 : index
    %158 = vector.load %arg11[%c0_216, %c0_217] : memref<256x8xf32, #tpu.memory_space<vmem>>, vector<256x8xf32>
    %c2_218 = arith.constant 2 : index
    %c0_219 = arith.constant 0 : index
    %c0_220 = arith.constant 0 : index
    %159 = vector.load %arg10[%c2_218, %c0_219, %c0_220] : memref<18x18x8xf32, #tpu.memory_space<vmem>>, vector<16x16x8xf32>
    %160 = vector.shape_cast %159 : vector<16x16x8xf32> to vector<256x8xf32>
    %161 = arith.truncf %160 : vector<256x8xf32> to vector<256x8xbf16>
    %c2_221 = arith.constant 2 : index
    %c0_222 = arith.constant 0 : index
    %c0_223 = arith.constant 0 : index
    %c0_224 = arith.constant 0 : index
    %162 = vector.load %arg5[%c2_221, %c0_222, %c0_223, %c0_224] : memref<3x3x8x8xbf16, #tpu.memory_space<vmem>>, vector<1x1x8x8xbf16>
    %163 = vector.shape_cast %162 : vector<1x1x8x8xbf16> to vector<8x8xbf16>
    %cst_225 = arith.constant dense<0.000000e+00> : vector<256x8xf32>
    %164 = tpu.matmul %161, %163, %cst_225 {dimension_numbers = #tpu.dot_dimension_numbers<[1], [0], [0], [1], [0, 0, 1, 1], [], []>} : vector<256x8xbf16>, vector<8x8xbf16>, vector<256x8xf32> -> vector<256x8xf32>
    %165 = arith.addf %158, %164 : vector<256x8xf32>
    %c0_226 = arith.constant 0 : index
    %c0_227 = arith.constant 0 : index
    %166 = vector.load %arg11[%c0_226, %c0_227] : memref<256x8xf32, #tpu.memory_space<vmem>>, vector<256x8xf32>
    tpu.vector_store %arg11[%c0_226, %c0_227], %165 {strides = array<i32>} : memref<256x8xf32, #tpu.memory_space<vmem>>, vector<256x8xf32>,
    %c0_228 = arith.constant 0 : index
    %c0_229 = arith.constant 0 : index
    %167 = vector.load %arg11[%c0_228, %c0_229] : memref<256x8xf32, #tpu.memory_space<vmem>>, vector<256x8xf32>
    %c2_230 = arith.constant 2 : index
    %c1_231 = arith.constant 1 : index
    %c0_232 = arith.constant 0 : index
    %168 = vector.load %arg10[%c2_230, %c1_231, %c0_232] : memref<18x18x8xf32, #tpu.memory_space<vmem>>, vector<16x16x8xf32>
    %169 = vector.shape_cast %168 : vector<16x16x8xf32> to vector<256x8xf32>
    %170 = arith.truncf %169 : vector<256x8xf32> to vector<256x8xbf16>
    %c2_233 = arith.constant 2 : index
    %c1_234 = arith.constant 1 : index
    %c0_235 = arith.constant 0 : index
    %c0_236 = arith.constant 0 : index
    %171 = vector.load %arg5[%c2_233, %c1_234, %c0_235, %c0_236] : memref<3x3x8x8xbf16, #tpu.memory_space<vmem>>, vector<1x1x8x8xbf16>
    %172 = vector.shape_cast %171 : vector<1x1x8x8xbf16> to vector<8x8xbf16>
    %cst_237 = arith.constant dense<0.000000e+00> : vector<256x8xf32>
    %173 = tpu.matmul %170, %172, %cst_237 {dimension_numbers = #tpu.dot_dimension_numbers<[1], [0], [0], [1], [0, 0, 1, 1], [], []>} : vector<256x8xbf16>, vector<8x8xbf16>, vector<256x8xf32> -> vector<256x8xf32>
    %174 = arith.addf %167, %173 : vector<256x8xf32>
    %c0_238 = arith.constant 0 : index
    %c0_239 = arith.constant 0 : index
    %175 = vector.load %arg11[%c0_238, %c0_239] : memref<256x8xf32, #tpu.memory_space<vmem>>, vector<256x8xf32>
    tpu.vector_store %arg11[%c0_238, %c0_239], %174 {strides = array<i32>} : memref<256x8xf32, #tpu.memory_space<vmem>>, vector<256x8xf32>,
    %c0_240 = arith.constant 0 : index
    %c0_241 = arith.constant 0 : index
    %176 = vector.load %arg11[%c0_240, %c0_241] : memref<256x8xf32, #tpu.memory_space<vmem>>, vector<256x8xf32>
    %c2_242 = arith.constant 2 : index
    %c2_243 = arith.constant 2 : index
    %c0_244 = arith.constant 0 : index
    %177 = vector.load %arg10[%c2_242, %c2_243, %c0_244] : memref<18x18x8xf32, #tpu.memory_space<vmem>>, vector<16x16x8xf32>
    %178 = vector.shape_cast %177 : vector<16x16x8xf32> to vector<256x8xf32>
    %179 = arith.truncf %178 : vector<256x8xf32> to vector<256x8xbf16>
    %c2_245 = arith.constant 2 : index
    %c2_246 = arith.constant 2 : index
    %c0_247 = arith.constant 0 : index
    %c0_248 = arith.constant 0 : index
    %180 = vector.load %arg5[%c2_245, %c2_246, %c0_247, %c0_248] : memref<3x3x8x8xbf16, #tpu.memory_space<vmem>>, vector<1x1x8x8xbf16>
    %181 = vector.shape_cast %180 : vector<1x1x8x8xbf16> to vector<8x8xbf16>
    %cst_249 = arith.constant dense<0.000000e+00> : vector<256x8xf32>
    %182 = tpu.matmul %179, %181, %cst_249 {dimension_numbers = #tpu.dot_dimension_numbers<[1], [0], [0], [1], [0, 0, 1, 1], [], []>} : vector<256x8xbf16>, vector<8x8xbf16>, vector<256x8xf32> -> vector<256x8xf32>
    %183 = arith.addf %176, %182 : vector<256x8xf32>
    %c0_250 = arith.constant 0 : index
    %c0_251 = arith.constant 0 : index
    %184 = vector.load %arg11[%c0_250, %c0_251] : memref<256x8xf32, #tpu.memory_space<vmem>>, vector<256x8xf32>
    tpu.vector_store %arg11[%c0_250, %c0_251], %183 {strides = array<i32>} : memref<256x8xf32, #tpu.memory_space<vmem>>, vector<256x8xf32>,
    %c0_252 = arith.constant 0 : index
    %c0_253 = arith.constant 0 : index
    %185 = vector.load %arg11[%c0_252, %c0_253] : memref<256x8xf32, #tpu.memory_space<vmem>>, vector<256x8xf32>
    %c0_254 = arith.constant 0 : index
    %c0_255 = arith.constant 0 : index
    %186 = vector.load %arg6[%c0_254, %c0_255] : memref<1x8xf32, #tpu.memory_space<vmem>>, vector<1x8xf32>
    %187 = vector.broadcast %186 : vector<1x8xf32> to vector<256x8xf32>
    %188 = arith.mulf %185, %187 : vector<256x8xf32>
    %c0_256 = arith.constant 0 : index
    %c0_257 = arith.constant 0 : index
    %189 = vector.load %arg7[%c0_256, %c0_257] : memref<1x8xf32, #tpu.memory_space<vmem>>, vector<1x8xf32>
    %190 = vector.broadcast %189 : vector<1x8xf32> to vector<256x8xf32>
    %191 = arith.addf %188, %190 : vector<256x8xf32>
    %cst_258 = arith.constant 0.000000e+00 : f32
    %192 = vector.broadcast %cst_258 : f32 to vector<256x8xf32>
    %193 = arith.maximumf %191, %192 : vector<256x8xf32>
    %194 = vector.shape_cast %193 : vector<256x8xf32> to vector<1x16x16x8xf32>
    %c0_259 = arith.constant 0 : index
    %c0_260 = arith.constant 0 : index
    %c0_261 = arith.constant 0 : index
    %c0_262 = arith.constant 0 : index
    %195 = vector.load %arg8[%c0_259, %c0_260, %c0_261, %c0_262] : memref<1x16x16x8xf32, #tpu.memory_space<vmem>>, vector<1x16x16x8xf32>
    tpu.vector_store %arg8[%c0_259, %c0_260, %c0_261, %c0_262], %194 {strides = array<i32>} : memref<1x16x16x8xf32, #tpu.memory_space<vmem>>, vector<1x16x16x8xf32>,
    return
  }
  func.func @transform_0(%arg0: i32) -> (i32, i32, i32, i32) {
    %c0_i32 = arith.constant 0 : i32
    %c0_i32_0 = arith.constant 0 : i32
    %c0_i32_1 = arith.constant 0 : i32
    %c0_i32_2 = arith.constant 0 : i32
    return %arg0, %c0_i32, %c0_i32_0, %c0_i32_1 : i32, i32, i32, i32
  }
  func.func @transform_1(%arg0: i32) -> (i32, i32, i32, i32) {
    %c0_i32 = arith.constant 0 : i32
    %c0_i32_0 = arith.constant 0 : i32
    %c0_i32_1 = arith.constant 0 : i32
    %c0_i32_2 = arith.constant 0 : i32
    %c0_i32_3 = arith.constant 0 : i32
    return %c0_i32, %c0_i32_0, %c0_i32_1, %c0_i32_2 : i32, i32, i32, i32
  }
  func.func @transform_2(%arg0: i32) -> (i32, i32) {
    %c0_i32 = arith.constant 0 : i32
    %c0_i32_0 = arith.constant 0 : i32
    %c0_i32_1 = arith.constant 0 : i32
    return %c0_i32, %c0_i32_0 : i32, i32
  }
  func.func @transform_3(%arg0: i32) -> (i32, i32) {
    %c0_i32 = arith.constant 0 : i32
    %c0_i32_0 = arith.constant 0 : i32
    %c0_i32_1 = arith.constant 0 : i32
    return %c0_i32, %c0_i32_0 : i32, i32
  }
  func.func @transform_4(%arg0: i32) -> (i32, i32, i32, i32) {
    %c0_i32 = arith.constant 0 : i32
    %c0_i32_0 = arith.constant 0 : i32
    %c0_i32_1 = arith.constant 0 : i32
    %c0_i32_2 = arith.constant 0 : i32
    %c0_i32_3 = arith.constant 0 : i32
    return %c0_i32, %c0_i32_0, %c0_i32_1, %c0_i32_2 : i32, i32, i32, i32
  }
  func.func @transform_5(%arg0: i32) -> (i32, i32) {
    %c0_i32 = arith.constant 0 : i32
    %c0_i32_0 = arith.constant 0 : i32
    %c0_i32_1 = arith.constant 0 : i32
    return %c0_i32, %c0_i32_0 : i32, i32
  }
  func.func @transform_6(%arg0: i32) -> (i32, i32) {
    %c0_i32 = arith.constant 0 : i32
    %c0_i32_0 = arith.constant 0 : i32
    %c0_i32_1 = arith.constant 0 : i32
    return %c0_i32, %c0_i32_0 : i32, i32
  }
  func.func @transform_7(%arg0: i32) -> (i32, i32, i32, i32) {
    %c0_i32 = arith.constant 0 : i32
    %c0_i32_0 = arith.constant 0 : i32
    %c0_i32_1 = arith.constant 0 : i32
    %c0_i32_2 = arith.constant 0 : i32
    return %arg0, %c0_i32, %c0_i32_0, %c0_i32_1 : i32, i32, i32, i32
  }
}

</mosaic_0001>

<bundles_post_ra>
// kernel: tpu_custom_call.1
= control target key start
LH: loop header
LB: loop body
LE: loop exit
PB: predicated region body
PF: predicated region fallthrough
CT: control target
= control target key end

     0   :  { %s6345_s24 = smov 0   ;;  %s8448_s0 = inlined_call_operand.vmem [shape: bf16[2,16,16,4], index: 0, kind: input, shape index: {}]   ;;  %s8449_s1 = inlined_call_operand.vmem [shape: bf16[3,3,4,8], index: 1, kind: input, shape index: {}]   ;;  %s8450_s2 = inlined_call_operand.vmem [shape: f32[1,8], index: 2, kind: input, shape index: {}]   ;;  %s8451_s3 = inlined_call_operand.vmem [shape: f32[1,8], index: 3, kind: input, shape index: {}]   ;;  %s8452_s4 = inlined_call_operand.vmem [shape: bf16[3,3,8,8], index: 4, kind: input, shape index: {}]   ;;  %s8453_s5 = inlined_call_operand.vmem [shape: f32[1,8], index: 5, kind: input, shape index: {}]   ;;  %s8454_s6 = inlined_call_operand.vmem [shape: f32[1,8], index: 6, kind: input, shape index: {}]   ;;  %s8455_s7 = inlined_call_operand.vmem [shape: f32[2,16,16,8], index: 7, kind: output, shape index: {}]  }
   0x1 LB: > { %s5883_s25 = sadd.s32 4294967295, %s6302_s24   ;;  %p5887_p0 = scmp.ge.s32.totalorder %s6302_s24, 1  ;;  %s6302_s24 = sphi %s6345_s24, %s17_s24  }
   0x2   : > { %p237_p1 = scmp.lt.s32.totalorder %s6302_s24, 3 }
   0x4   : > { %p238_p2 = pnand %p5887_p0, %p237_p1 }
   0x5   : > { %p269_p3 = scmp.lt.s32.totalorder (!%p238_p2), %s5883_s25, 1 }
   0x6   : > { %241 = sbr.rel (%p238_p2) target bundleno = 1520 (0x5f0), region = 48 }
   0xb   : > { %v471_v0 = vld [vmem:[%s8449_s1] sm:$0x3]  ;;  %vm520_vm0 = vcmask 1041408   ;;  %vm280_vm1 = vcmask 31744   ;;  %vm289_vm2 = vcmask 24576   ;;  %v6304_v2 = vmov 0.0  }
   0xc   : > { %v522_v1 = vsel %vm520_vm0, %v471_v0, 0  ;;  %281 = vst.msk [vmem:[#allocation2] sm:$0xff] %vm280_vm1, %v6304_v2  ;;  %v5908_v3 = vld [vmem:[%s8449_s1 + $0x2] sm:$0x3]  ;;  %v5925_v8 = vld [vmem:[%s8449_s1 + $0x4] sm:$0x3] }
   0xd   : > { %531 = vmatpush.bf16.msra.mxu0 %v522_v1  ;;  %282 = vst.msk [vmem:[#allocation2 + $0x8] sm:$0xff] %vm280_vm1, %v6304_v2  ;;  %6279 = vmatpush.bf16.msra.mxu2 %v522_v1  ;;  %v777_v4 = vsel %vm520_vm0, %v5908_v3, 0  ;;  %v1063_v9 = vsel %vm520_vm0, %v5925_v8, 0  ;;  %v5942_v10 = vld [vmem:[%s8449_s1 + $0x6] sm:$0x3]  ;;  %s8457_s25 = smov (!%p269_p3, %s5883_s25), 1 }
   0xe   : > { %290 = vst.msk [vmem:[#allocation2] sm:$0x1] %vm289_vm2, %v6304_v2  ;;  %6280 = vmatpush.bf16.msra.mxu3 %v777_v4  ;;  %786 = vmatpush.bf16.msra.mxu1 %v777_v4  ;;  %v1349_v11 = vsel %vm520_vm0, %v5942_v10, 0  ;;  %s6198_s11 = sshll.u32 %s8457_s25, 7  ;;  %v5959_v17 = vld [vmem:[%s8449_s1 + $0x8] sm:$0x3] }
   0xf   : > { %286 = vst.msk [vmem:[#allocation2 + $0x198] sm:$0xff] %vm280_vm1, %v6304_v2  ;;  %s6438_s14 = scalar_lea.vmem %s8448_s0, %s6198_s11  ;;  %v1635_v19 = vsel %vm520_vm0, %v5959_v17, 0  ;;  %vm283_vm3 = vcmask 25600   ;;  %vm613_vm4 = vcmask 64512   ;;  %vm3246_vm5 = vcmask 1043456   ;;  %s6199_s13 = sshll.u32 %s8457_s25, 8 }
  0x10   : > { %287 = vst.msk [vmem:[#allocation2 + $0x1a0] sm:$0xff] %vm280_vm1, %v6304_v2  ;;  %v6270_v12 = vld [vmem:[%s6438_s14 + $0x38] sm:$0xff]   ;;  %v6201_v13 = vld [vmem:[%s6438_s14] sm:$0xff]   ;;  %v6264_v21 = vld [vmem:[%s6438_s14 + $0x8] sm:$0xff]   ;;  %vm3079_vm6 = vcmask 57344   ;;  %vm3073_vm7 = vcmask 58368   ;;  %s8244_s16 = scalar_lea.vmem %s8455_s7, %s6199_s13 }
  0x11   : > { %291 = vst.msk [vmem:[#allocation2 + $0x18] sm:$0x1] %vm289_vm2, %v6304_v2  ;;  %1072 = vmatpush.bf16.msrb.mxu2 %v1063_v9  ;;  %v6230_v14 = vunpack.c.l.bf16 %v6270_v12  ;;  %v6231_v15 = vunpack.c.h.bf16 %v6270_v12  ;;  %v6271_v16 = vld [vmem:[%s6438_s14 + $0x40] sm:$0xff]   ;;  %v6202_v18 = vunpack.c.l.bf16 %v6201_v13  ;;  %v6203_v20 = vunpack.c.h.bf16 %v6201_v13  ;;  %1644 = vmatpush.bf16.msrb.mxu0 %v1635_v19  ;;  %v6272_v26 = vld [vmem:[%s6438_s14 + $0x48] sm:$0xff]   ;;  %v6265_v29 = vld [vmem:[%s6438_s14 + $0x10] sm:$0xff]  }
  0x12   : > { %292 = vst.msk [vmem:[#allocation2 + $0x30] sm:$0x1] %vm289_vm2, %v6304_v2  ;;  %1358 = vmatpush.bf16.msrb.mxu3 %v1349_v11  ;;  %v6234_v22 = vunpack.c.l.bf16 %v6271_v16  ;;  %v6235_v23 = vunpack.c.h.bf16 %v6271_v16  ;;  %v6206_v24 = vunpack.c.l.bf16 %v6264_v21  ;;  %v6207_v25 = vunpack.c.h.bf16 %v6264_v21  ;;  %v6273_v42 = vld [vmem:[%s6438_s14 + $0x50] sm:$0xff]   ;;  %v6266_v55 = vld [vmem:[%s6438_s14 + $0x18] sm:$0xff]   ;;  %v6267_v10 = vld [vmem:[%s6438_s14 + $0x20] sm:$0xff]  }
  0x13   : > { %293 = vst.msk [vmem:[#allocation2 + $0x48] sm:$0x1] %vm289_vm2, %v6304_v2  ;;  %v6238_v32 = vunpack.c.l.bf16 %v6272_v26  ;;  %v6239_v36 = vunpack.c.h.bf16 %v6272_v26  ;;  %v6210_v38 = vunpack.c.l.bf16 %v6265_v29  ;;  %v6211_v40 = vunpack.c.h.bf16 %v6265_v29  ;;  %v6274_v61 = vld [vmem:[%s6438_s14 + $0x58] sm:$0xff]   ;;  %v6275_v16 = vld [vmem:[%s6438_s14 + $0x60] sm:$0xff]  }
  0x14   : > { %v424_v5 = vld [vmem:[#allocation2 + $0x8] sm:$0xff]  ;;  %294 = vst.msk [vmem:[#allocation2 + $0x60] sm:$0x1] %vm289_vm2, %v6304_v2  ;;  %v6242_v44 = vunpack.c.l.bf16 %v6273_v42  ;;  %v6243_v45 = vunpack.c.h.bf16 %v6273_v42  ;;  %v6214_v56 = vunpack.c.l.bf16 %v6266_v55  ;;  %v6215_v57 = vunpack.c.h.bf16 %v6266_v55 }
  0x15   : > { %v423_v6 = vld [vmem:[#allocation2] sm:$0xff]  ;;  %295 = vst.msk [vmem:[#allocation2 + $0x78] sm:$0x1] %vm289_vm2, %v6304_v2  ;;  %v6246_v63 = vunpack.c.l.bf16 %v6274_v61  ;;  %v6247_v0 = vunpack.c.h.bf16 %v6274_v61  ;;  %v6218_v11 = vunpack.c.l.bf16 %v6267_v10  ;;  %v6219_v12 = vunpack.c.h.bf16 %v6267_v10 }
  0x16   : > { %v455_v7 = vpack.c.bf16 %v424_v5, %v423_v6  ;;  %296 = vst.msk [vmem:[#allocation2 + $0x90] sm:$0x1] %vm289_vm2, %v6304_v2  ;;  %v678_v41 = vld [vmem:[#allocation2 + $0x1] sm:$0xff]  ;;  %v6251_v19 = vunpack.c.h.bf16 %v6275_v16 }
  0x17   : > { %297 = vst.msk [vmem:[#allocation2 + $0xa8] sm:$0x1] %vm289_vm2, %v6304_v2 }
  0x18   : > { %5892 = vmatmul.msk.bf16.vlgmr.msra.gmra.mxu0 %vm280_vm1, %v455_v7  ;;  %298 = vst.msk [vmem:[#allocation2 + $0xc0] sm:$0x1] %vm289_vm2, %v6304_v2 }
  0x19   : > { %299 = vst.msk [vmem:[#allocation2 + $0xd8] sm:$0x1] %vm289_vm2, %v6304_v2 }
  0x1a   : > { %300 = vst.msk [vmem:[#allocation2 + $0xf0] sm:$0x1] %vm289_vm2, %v6304_v2 }
  0x1b   : > { %301 = vst.msk [vmem:[#allocation2 + $0x108] sm:$0x1] %vm289_vm2, %v6304_v2 }
  0x1c   : > { %302 = vst.msk [vmem:[#allocation2 + $0x120] sm:$0x1] %vm289_vm2, %v6304_v2 }
  0x1d   : > { %303 = vst.msk [vmem:[#allocation2 + $0x138] sm:$0x1] %vm289_vm2, %v6304_v2 }
  0x1e   : > { %304 = vst.msk [vmem:[#allocation2 + $0x150] sm:$0x1] %vm289_vm2, %v6304_v2 }
  0x1f   : > { %305 = vst.msk [vmem:[#allocation2 + $0x168] sm:$0x1] %vm289_vm2, %v6304_v2 }
  0x20   : > { %306 = vst.msk [vmem:[#allocation2 + $0x180] sm:$0x1] %vm289_vm2, %v6304_v2 }
  0x21   : > { %309 = vst.msk [vmem:[#allocation2 + $0x29] sm:$0x1] %vm289_vm2, %v6304_v2 }
  0x22   : > { %310 = vst.msk [vmem:[#allocation2 + $0x41] sm:$0x1] %vm289_vm2, %v6304_v2 }
  0x23   : > { %311 = vst.msk [vmem:[#allocation2 + $0x59] sm:$0x1] %vm289_vm2, %v6304_v2 }
  0x24   : > { %312 = vst.msk [vmem:[#allocation2 + $0x71] sm:$0x1] %vm289_vm2, %v6304_v2 }
  0x25   : > { %313 = vst.msk [vmem:[#allocation2 + $0x89] sm:$0x1] %vm289_vm2, %v6304_v2 }
  0x26   : > { %314 = vst.msk [vmem:[#allocation2 + $0xa1] sm:$0x1] %vm289_vm2, %v6304_v2 }
  0x27   : > { %315 = vst.msk [vmem:[#allocation2 + $0xb9] sm:$0x1] %vm289_vm2, %v6304_v2 }
  0x28   : > { %316 = vst.msk [vmem:[#allocation2 + $0xd1] sm:$0x1] %vm289_vm2, %v6304_v2 }
  0x29   : > { %317 = vst.msk [vmem:[#allocation2 + $0xe9] sm:$0x1] %vm289_vm2, %v6304_v2 }
  0x2a   : > { %318 = vst.msk [vmem:[#allocation2 + $0x101] sm:$0x1] %vm289_vm2, %v6304_v2 }
  0x2b   : > { %319 = vst.msk [vmem:[#allocation2 + $0x119] sm:$0x1] %vm289_vm2, %v6304_v2 }
  0x2c   : > { %320 = vst.msk [vmem:[#allocation2 + $0x131] sm:$0x1] %vm289_vm2, %v6304_v2 }
  0x2d   : > { %321 = vst.msk [vmem:[#allocation2 + $0x149] sm:$0x1] %vm289_vm2, %v6304_v2 }
  0x2e   : > { %322 = vst.msk [vmem:[#allocation2 + $0x161] sm:$0x1] %vm289_vm2, %v6304_v2 }
  0x2f   : > { %323 = vst.msk [vmem:[#allocation2 + $0x179] sm:$0x1] %vm289_vm2, %v6304_v2 }
  0x30   : > { %324 = vst.msk [vmem:[#allocation2 + $0x191] sm:$0x1] %vm289_vm2, %v6304_v2 }
  0x31   : > { %307 = vst.msk [vmem:[#allocation2 + $0x198] sm:$0x1] %vm289_vm2, %v6304_v2 }
  0x32   : > { %405 = vst.msk [vmem:[#allocation2 + $0xc1] sm:$0xff] %vm280_vm1, %v6230_v14 }
  0x33   : > { %406 = vst.msk [vmem:[#allocation2 + $0xc9] sm:$0xff] %vm280_vm1, %v6231_v15 }
  0x34   : > { %391 = vst.msk [vmem:[#allocation2 + $0x19] sm:$0xff] %vm280_vm1, %v6202_v18  ;;  %v6250_v18 = vunpack.c.l.bf16 %v6275_v16 }
  0x35   : > { %392 = vst.msk [vmem:[#allocation2 + $0x21] sm:$0xff] %vm280_vm1, %v6203_v20 }
  0x36   : > { %407 = vst.msk [vmem:[#allocation2 + $0xd9] sm:$0xff] %vm280_vm1, %v6234_v22 }
  0x37   : > { %408 = vst.msk [vmem:[#allocation2 + $0xe1] sm:$0xff] %vm280_vm1, %v6235_v23 }
  0x38   : > { %393 = vst.msk [vmem:[#allocation2 + $0x31] sm:$0xff] %vm280_vm1, %v6206_v24 }
  0x39   : > { %v439_v27 = vld [vmem:[#allocation2 + $0xc0] sm:$0xff]  ;;  %394 = vst.msk [vmem:[#allocation2 + $0x39] sm:$0xff] %vm280_vm1, %v6207_v25 }
  0x3a   : > { %v694_v28 = vld [vmem:[#allocation2 + $0xc1] sm:$0xff]  ;;  %v695_v31 = vld [vmem:[#allocation2 + $0xc9] sm:$0xff]  ;;  %284 = vst.msk [vmem:[#allocation2 + $0x10] sm:$0x3] %vm283_vm3, %v6304_v2 }
  0x3b   : > { %v440_v30 = vld [vmem:[#allocation2 + $0xc8] sm:$0xff]  ;;  %v6479_v34 = vpack.c.bf16 %v695_v31, %v694_v28  ;;  %v425_v35 = vld [vmem:[#allocation2 + $0x18] sm:$0xff]  ;;  %288 = vst.msk [vmem:[#allocation2 + $0x1a8] sm:$0x3] %vm283_vm3, %v6304_v2 }
  0x3c   : > { %v6477_v33 = vpack.c.bf16 %v440_v30, %v439_v27  ;;  %v426_v37 = vld [vmem:[#allocation2 + $0x20] sm:$0xff]  ;;  %308 = vst.msk [vmem:[#allocation2 + $0x11] sm:$0x1] %vm289_vm2, %v6304_v2  ;;  %v6268_v28 = vld [vmem:[%s6438_s14 + $0x28] sm:$0xff]  }
  0x3d   : > { %5917 = vmatmul.msk.bf16.vlgmr.msra.gmra.mxu3 %vm280_vm1, %v6479_v34  ;;  %v6488_v39 = vpack.c.bf16 %v426_v37, %v425_v35  ;;  %325 = vst.msk [vmem:[#allocation2 + $0x1a9] sm:$0x1] %vm289_vm2, %v6304_v2  ;;  %v441_v47 = vld [vmem:[#allocation2 + $0xd8] sm:$0xff]  ;;  %v681_v60 = vld [vmem:[#allocation2 + $0x21] sm:$0xff]  ;;  %v6222_v29 = vunpack.c.l.bf16 %v6268_v28  ;;  %v6223_v30 = vunpack.c.h.bf16 %v6268_v28 }
  0x3e   : > { %5900 = vmatmul.msk.bf16.vlgmr.msra.gmra.mxu2 %vm280_vm1, %v6477_v33  ;;  %409 = vst.msk [vmem:[#allocation2 + $0xf1] sm:$0xff] %vm280_vm1, %v6238_v32  ;;  %v442_v48 = vld [vmem:[#allocation2 + $0xe0] sm:$0xff] }
  0x3f   : > { %5893 = vmatmul.msk.bf16.gmra.mxu0 %vm280_vm1, %v6488_v39  ;;  %410 = vst.msk [vmem:[#allocation2 + $0xf9] sm:$0xff] %vm280_vm1, %v6239_v36  ;;  %v696_v49 = vld [vmem:[#allocation2 + $0xd9] sm:$0xff]  ;;  %v697_v50 = vld [vmem:[#allocation2 + $0xe1] sm:$0xff]  ;;  %v427_v51 = vld [vmem:[#allocation2 + $0x30] sm:$0xff]  ;;  %v6502_v53 = vpack.c.bf16 %v442_v48, %v441_v47 }
  0x40   : > { %395 = vst.msk [vmem:[#allocation2 + $0x49] sm:$0xff] %vm280_vm1, %v6210_v38  ;;  %v428_v52 = vld [vmem:[#allocation2 + $0x38] sm:$0xff]  ;;  %v6504_v54 = vpack.c.bf16 %v697_v50, %v696_v49  ;;  %v6276_v36 = vld [vmem:[%s6438_s14 + $0x68] sm:$0xff]   ;;  %v6269_v49 = vld [vmem:[%s6438_s14 + $0x30] sm:$0xff]  }
  0x41   : > { %v679_v43 = vld [vmem:[#allocation2 + $0x9] sm:$0xff]  ;;  %396 = vst.msk [vmem:[#allocation2 + $0x51] sm:$0xff] %vm280_vm1, %v6211_v40  ;;  %v6507_v58 = vpack.c.bf16 %v428_v52, %v427_v51  ;;  %v680_v59 = vld [vmem:[#allocation2 + $0x19] sm:$0xff]  ;;  %v682_v14 = vld [vmem:[#allocation2 + $0x31] sm:$0xff]  ;;  %v6254_v38 = vunpack.c.l.bf16 %v6276_v36  ;;  %v6255_v40 = vunpack.c.h.bf16 %v6276_v36  ;;  %v6226_v50 = vunpack.c.l.bf16 %v6269_v49 }
  0x42   : > { %v710_v46 = vpack.c.bf16 %v679_v43, %v678_v41  ;;  %411 = vst.msk [vmem:[#allocation2 + $0x109] sm:$0xff] %vm280_vm1, %v6242_v44  ;;  %v6518_v62 = vpack.c.bf16 %v681_v60, %v680_v59  ;;  %v683_v15 = vld [vmem:[#allocation2 + $0x39] sm:$0xff]  ;;  %v6227_v51 = vunpack.c.h.bf16 %v6269_v49 }
  0x43   : > { %412 = vst.msk [vmem:[#allocation2 + $0x111] sm:$0xff] %vm280_vm1, %v6243_v45  ;;  %v6537_v17 = vpack.c.bf16 %v683_v15, %v682_v14  ;;  %v965_v49 = vld [vmem:[#allocation2 + $0xa] sm:$0xff] }
  0x44   : > { %5909 = vmatmul.msk.bf16.vlgmr.msra.gmra.mxu1 %vm280_vm1, %v710_v46  ;;  %397 = vst.msk [vmem:[#allocation2 + $0x61] sm:$0xff] %vm280_vm1, %v6214_v56 }
  0x45   : > { %398 = vst.msk [vmem:[#allocation2 + $0x69] sm:$0xff] %vm280_vm1, %v6215_v57  ;;  %v443_v1 = vld [vmem:[#allocation2 + $0xf0] sm:$0xff] }
  0x46   : > { %413 = vst.msk [vmem:[#allocation2 + $0x121] sm:$0xff] %vm280_vm1, %v6246_v63  ;;  %v444_v3 = vld [vmem:[#allocation2 + $0xf8] sm:$0xff]  ;;  %v6277_v57 = vld [vmem:[%s6438_s14 + $0x70] sm:$0xff]  }
  0x47   : > { %414 = vst.msk [vmem:[#allocation2 + $0x129] sm:$0xff] %vm280_vm1, %v6247_v0  ;;  %v698_v4 = vld [vmem:[#allocation2 + $0xf1] sm:$0xff]  ;;  %v699_v5 = vld [vmem:[#allocation2 + $0xf9] sm:$0xff]  ;;  %v429_v6 = vld [vmem:[#allocation2 + $0x48] sm:$0xff]  ;;  %v465_v8 = vpack.c.bf16 %v444_v3, %v443_v1  ;;  %v6258_v60 = vunpack.c.l.bf16 %v6277_v57  ;;  %v6259_v61 = vunpack.c.h.bf16 %v6277_v57 }
  0x48   : > { %v430_v7 = vld [vmem:[#allocation2 + $0x50] sm:$0xff]  ;;  %v6524_v9 = vpack.c.bf16 %v699_v5, %v698_v4  ;;  %399 = vst.msk [vmem:[#allocation2 + $0x79] sm:$0xff] %vm280_vm1, %v6218_v11  ;;  %v5976_v57 = vld [vmem:[%s8449_s1 + $0xa] sm:$0x3] }
  0x49   : > { %v6527_v13 = vpack.c.bf16 %v430_v7, %v429_v6  ;;  %400 = vst.msk [vmem:[#allocation2 + $0x81] sm:$0xff] %vm280_vm1, %v6219_v12  ;;  %v445_v20 = vld [vmem:[#allocation2 + $0x108] sm:$0xff]  ;;  %v685_v35 = vld [vmem:[#allocation2 + $0x51] sm:$0xff] }
  0x4a   : > { %415 = vst.msk [vmem:[#allocation2 + $0x139] sm:$0xff] %vm280_vm1, %v6250_v18  ;;  %v446_v21 = vld [vmem:[#allocation2 + $0x110] sm:$0xff] }
  0x4b   : > { %416 = vst.msk [vmem:[#allocation2 + $0x141] sm:$0xff] %vm280_vm1, %v6251_v19  ;;  %v700_v22 = vld [vmem:[#allocation2 + $0x109] sm:$0xff]  ;;  %v701_v23 = vld [vmem:[#allocation2 + $0x111] sm:$0xff]  ;;  %v431_v24 = vld [vmem:[#allocation2 + $0x60] sm:$0xff]  ;;  %v466_v26 = vpack.c.bf16 %v446_v21, %v445_v20 }
  0x4c   : > { %v432_v25 = vld [vmem:[#allocation2 + $0x68] sm:$0xff]  ;;  %v6543_v27 = vpack.c.bf16 %v701_v23, %v700_v22  ;;  %401 = vst.msk [vmem:[#allocation2 + $0x91] sm:$0xff] %vm280_vm1, %v6222_v29 }
  0x4d   : > { %5918 = vmatmul.msk.bf16.gmra.mxu3 %vm280_vm1, %v6504_v54  ;;  %v6546_v31 = vpack.c.bf16 %v432_v25, %v431_v24  ;;  %v684_v32 = vld [vmem:[#allocation2 + $0x49] sm:$0xff]  ;;  %402 = vst.msk [vmem:[#allocation2 + $0x99] sm:$0xff] %vm280_vm1, %v6223_v30  ;;  %v447_v41 = vld [vmem:[#allocation2 + $0x120] sm:$0xff] }
  0x4e   : > { %5901 = vmatmul.msk.bf16.gmra.mxu2 %vm280_vm1, %v6502_v53  ;;  %v6556_v37 = vpack.c.bf16 %v685_v35, %v684_v32  ;;  %417 = vst.msk [vmem:[#allocation2 + $0x151] sm:$0xff] %vm280_vm1, %v6254_v38  ;;  %v448_v42 = vld [vmem:[#allocation2 + $0x128] sm:$0xff] }
  0x4f   : > { %5894 = vmatmul.msk.bf16.gmra.mxu0 %vm280_vm1, %v6507_v58  ;;  %418 = vst.msk [vmem:[#allocation2 + $0x159] sm:$0xff] %vm280_vm1, %v6255_v40  ;;  %v702_v43 = vld [vmem:[#allocation2 + $0x121] sm:$0xff]  ;;  %v703_v44 = vld [vmem:[#allocation2 + $0x129] sm:$0xff]  ;;  %v433_v45 = vld [vmem:[#allocation2 + $0x78] sm:$0xff]  ;;  %v467_v47 = vpack.c.bf16 %v448_v42, %v447_v41 }
  0x50   : > { %v434_v46 = vld [vmem:[#allocation2 + $0x80] sm:$0xff]  ;;  %v722_v48 = vpack.c.bf16 %v703_v44, %v702_v43  ;;  %403 = vst.msk [vmem:[#allocation2 + $0xa9] sm:$0xff] %vm280_vm1, %v6226_v50  ;;  %v687_v56 = vld [vmem:[#allocation2 + $0x69] sm:$0xff] }
  0x51   : > { %v6563_v52 = vpack.c.bf16 %v434_v46, %v433_v45  ;;  %v686_v55 = vld [vmem:[#allocation2 + $0x61] sm:$0xff]  ;;  %404 = vst.msk [vmem:[#allocation2 + $0xb1] sm:$0xff] %vm280_vm1, %v6227_v51  ;;  %v449_v63 = vld [vmem:[#allocation2 + $0x138] sm:$0xff]  ;;  %v5993_v29 = vld [vmem:[%s8449_s1 + $0xc] sm:$0x3] }
  0x52   : > { %v6572_v59 = vpack.c.bf16 %v687_v56, %v686_v55  ;;  %419 = vst.msk [vmem:[#allocation2 + $0x169] sm:$0xff] %vm280_vm1, %v6258_v60  ;;  %v450_v0 = vld [vmem:[#allocation2 + $0x140] sm:$0xff]  ;;  %v2208_v30 = vsel %vm520_vm0, %v5993_v29, 0  ;;  %v6010_v43 = vld [vmem:[%s8449_s1 + $0xe] sm:$0x3] }
  0x53   : > { %420 = vst.msk [vmem:[#allocation2 + $0x171] sm:$0xff] %vm280_vm1, %v6259_v61  ;;  %v704_v1 = vld [vmem:[#allocation2 + $0x139] sm:$0xff]  ;;  %v705_v3 = vld [vmem:[#allocation2 + $0x141] sm:$0xff]  ;;  %v435_v4 = vld [vmem:[#allocation2 + $0x90] sm:$0xff]  ;;  %v468_v6 = vpack.c.bf16 %v450_v0, %v449_v63  ;;  %2217 = vmatpush.bf16.msra.mxu2 %v2208_v30  ;;  %v2494_v44 = vsel %vm520_vm0, %v6010_v43, 0 }
  0x54   : > { %5910 = vmatmul.msk.bf16.gmra.mxu1 %vm280_vm1, %v6518_v62  ;;  %v436_v5 = vld [vmem:[#allocation2 + $0x98] sm:$0xff]  ;;  %v723_v7 = vpack.c.bf16 %v705_v3, %v704_v1  ;;  %v689_v11 = vld [vmem:[#allocation2 + $0x81] sm:$0xff]  ;;  %3071 = vst.msk [vmem:[#allocation3] sm:$0xff] %vm613_vm4, %v6304_v2  ;;  %2503 = vmatpush.bf16.msra.mxu3 %v2494_v44  ;;  %v6027_v51 = vld [vmem:[%s8449_s1 + $0x10] sm:$0x3] }
  0x55   : > { %v688_v10 = vld [vmem:[#allocation2 + $0x79] sm:$0xff]  ;;  %3072 = vst.msk [vmem:[#allocation3 + $0x8] sm:$0xff] %vm613_vm4, %v6304_v2  ;;  %v451_v14 = vld [vmem:[#allocation2 + $0x150] sm:$0xff]  ;;  %v2780_v56 = vsel %vm520_vm0, %v6027_v51, 0  ;;  %v967_v61 = vld [vmem:[#allocation2 + $0x22] sm:$0xff] }
  0x56   : > { %v6588_v12 = vpack.c.bf16 %v689_v11, %v688_v10  ;;  %3076 = vst.msk [vmem:[#allocation3 + $0x198] sm:$0xff] %vm613_vm4, %v6304_v2  ;;  %v452_v16 = vld [vmem:[#allocation2 + $0x158] sm:$0xff]  ;;  %2789 = vmatpush.bf16.msra.mxu0 %v2780_v56  ;;  %v970_v43 = vld [vmem:[#allocation2 + $0x4a] sm:$0xff] }
  0x57   : > { %3077 = vst.msk [vmem:[#allocation3 + $0x1a0] sm:$0xff] %vm613_vm4, %v6304_v2  ;;  %v706_v18 = vld [vmem:[#allocation2 + $0x151] sm:$0xff]  ;;  %v707_v19 = vld [vmem:[#allocation2 + $0x159] sm:$0xff]  ;;  %v437_v20 = vld [vmem:[#allocation2 + $0xa8] sm:$0xff]  ;;  %v469_v22 = vpack.c.bf16 %v452_v16, %v451_v14 }
  0x58   : > { %v438_v21 = vld [vmem:[#allocation2 + $0xb0] sm:$0xff]  ;;  %v724_v23 = vpack.c.bf16 %v707_v19, %v706_v18  ;;  %v966_v60 = vld [vmem:[#allocation2 + $0x1a] sm:$0xff]  ;;  %3080 = vst.msk [vmem:[#allocation3] sm:$0x1] %vm3079_vm6, %v6304_v2 }
  0x59   : > { %v6597_v24 = vpack.c.bf16 %v438_v21, %v437_v20  ;;  %v690_v25 = vld [vmem:[#allocation2 + $0x91] sm:$0xff]  ;;  %v453_v35 = vld [vmem:[#allocation2 + $0x168] sm:$0xff]  ;;  %v969_v19 = vld [vmem:[#allocation2 + $0x3a] sm:$0xff]  ;;  %3081 = vst.msk [vmem:[#allocation3 + $0x18] sm:$0x1] %vm3079_vm6, %v6304_v2 }
  0x5a   : > { %v454_v36 = vld [vmem:[#allocation2 + $0x170] sm:$0xff]  ;;  %3082 = vst.msk [vmem:[#allocation3 + $0x30] sm:$0x1] %vm3079_vm6, %v6304_v2 }
  0x5b   : > { %v708_v38 = vld [vmem:[#allocation2 + $0x169] sm:$0xff]  ;;  %v709_v40 = vld [vmem:[#allocation2 + $0x171] sm:$0xff]  ;;  %v470_v41 = vpack.c.bf16 %v454_v36, %v453_v35  ;;  %3083 = vst.msk [vmem:[#allocation3 + $0x48] sm:$0x1] %vm3079_vm6, %v6304_v2 }
  0x5c   : > { %v725_v42 = vpack.c.bf16 %v709_v40, %v708_v38  ;;  %v692_v45 = vld [vmem:[#allocation2 + $0xa9] sm:$0xff]  ;;  %v693_v46 = vld [vmem:[#allocation2 + $0xb1] sm:$0xff]  ;;  %3084 = vst.msk [vmem:[#allocation3 + $0x60] sm:$0x1] %vm3079_vm6, %v6304_v2 }
  0x5d   : > { %5919 = vmatmul.msk.bf16.gmra.mxu3 %vm280_vm1, %v6524_v9  ;;  %v968_v18 = vld [vmem:[#allocation2 + $0x32] sm:$0xff]  ;;  %3085 = vst.msk [vmem:[#allocation3 + $0x78] sm:$0x1] %vm3079_vm6, %v6304_v2 }
  0x5e   : > { %5902 = vmatmul.msk.bf16.gmra.mxu2 %vm280_vm1, %v465_v8  ;;  %v6578_v8 = vpack.c.bf16 %v436_v5, %v435_v4  ;;  %v997_v4 = vpack.c.bf16 %v967_v61, %v966_v60  ;;  %v971_v44 = vld [vmem:[#allocation2 + $0x52] sm:$0xff]  ;;  %3086 = vst.msk [vmem:[#allocation3 + $0x90] sm:$0x1] %vm3079_vm6, %v6304_v2 }
  0x5f   : > { %5895 = vmatmul.msk.bf16.gmra.mxu0 %vm280_vm1, %v6527_v13  ;;  %3087 = vst.msk [vmem:[#allocation3 + $0xa8] sm:$0x1] %vm3079_vm6, %v6304_v2 }
  0x60   : > { %3088 = vst.msk [vmem:[#allocation3 + $0xc0] sm:$0x1] %vm3079_vm6, %v6304_v2 }
  0x61   : > { %3089 = vst.msk [vmem:[#allocation3 + $0xd8] sm:$0x1] %vm3079_vm6, %v6304_v2 }
  0x62   : > { %3090 = vst.msk [vmem:[#allocation3 + $0xf0] sm:$0x1] %vm3079_vm6, %v6304_v2 }
  0x63   : > { %3091 = vst.msk [vmem:[#allocation3 + $0x108] sm:$0x1] %vm3079_vm6, %v6304_v2 }
  0x64   : > { %5911 = vmatmul.msk.bf16.gmra.mxu1 %vm280_vm1, %v6537_v17  ;;  %3092 = vst.msk [vmem:[#allocation3 + $0x120] sm:$0x1] %vm3079_vm6, %v6304_v2 }
  0x65   : > { %3093 = vst.msk [vmem:[#allocation3 + $0x138] sm:$0x1] %vm3079_vm6, %v6304_v2 }
  0x66   : > { %3094 = vst.msk [vmem:[#allocation3 + $0x150] sm:$0x1] %vm3079_vm6, %v6304_v2 }
  0x67   : > { %3095 = vst.msk [vmem:[#allocation3 + $0x168] sm:$0x1] %vm3079_vm6, %v6304_v2 }
  0x68   : > { %3096 = vst.msk [vmem:[#allocation3 + $0x180] sm:$0x1] %vm3079_vm6, %v6304_v2 }
  0x69   : > { %3097 = vst.msk [vmem:[#allocation3 + $0x198] sm:$0x1] %vm3079_vm6, %v6304_v2 }
  0x6a   : > { %3099 = vst.msk [vmem:[#allocation3 + $0x29] sm:$0x1] %vm3079_vm6, %v6304_v2 }
  0x6b   : > { %3100 = vst.msk [vmem:[#allocation3 + $0x41] sm:$0x1] %vm3079_vm6, %v6304_v2 }
  0x6c   : > { %3101 = vst.msk [vmem:[#allocation3 + $0x59] sm:$0x1] %vm3079_vm6, %v6304_v2 }
  0x6d   : > { %5920 = vmatmul.msk.bf16.gmra.mxu3 %vm280_vm1, %v6543_v27  ;;  %3102 = vst.msk [vmem:[#allocation3 + $0x71] sm:$0x1] %vm3079_vm6, %v6304_v2 }
  0x6e   : > { %5903 = vmatmul.msk.bf16.gmra.mxu2 %vm280_vm1, %v466_v26  ;;  %v691_v26 = vld [vmem:[#allocation2 + $0x99] sm:$0xff]  ;;  %3103 = vst.msk [vmem:[#allocation3 + $0x89] sm:$0x1] %vm3079_vm6, %v6304_v2 }
  0x6f   : > { %5896 = vmatmul.msk.bf16.gmra.mxu0 %vm280_vm1, %v6546_v31  ;;  %v6608_v32 = vpack.c.bf16 %v691_v26, %v690_v25  ;;  %3104 = vst.msk [vmem:[#allocation3 + $0xa1] sm:$0x1] %vm3079_vm6, %v6304_v2 }
  0x70   : > { %3105 = vst.msk [vmem:[#allocation3 + $0xb9] sm:$0x1] %vm3079_vm6, %v6304_v2 }
  0x71   : > { %3106 = vst.msk [vmem:[#allocation3 + $0xd1] sm:$0x1] %vm3079_vm6, %v6304_v2 }
  0x72   : > { %3107 = vst.msk [vmem:[#allocation3 + $0xe9] sm:$0x1] %vm3079_vm6, %v6304_v2 }
  0x73   : > { %3108 = vst.msk [vmem:[#allocation3 + $0x101] sm:$0x1] %vm3079_vm6, %v6304_v2 }
  0x74   : > { %5912 = vmatmul.msk.bf16.gmra.mxu1 %vm280_vm1, %v6556_v37  ;;  %3109 = vst.msk [vmem:[#allocation3 + $0x119] sm:$0x1] %vm3079_vm6, %v6304_v2 }
  0x75   : > { %3110 = vst.msk [vmem:[#allocation3 + $0x131] sm:$0x1] %vm3079_vm6, %v6304_v2 }
  0x76   : > { %3111 = vst.msk [vmem:[#allocation3 + $0x149] sm:$0x1] %vm3079_vm6, %v6304_v2 }
  0x77   : > { %3112 = vst.msk [vmem:[#allocation3 + $0x161] sm:$0x1] %vm3079_vm6, %v6304_v2 }
  0x78   : > { %3113 = vst.msk [vmem:[#allocation3 + $0x179] sm:$0x1] %vm3079_vm6, %v6304_v2 }
  0x79   : > { %3114 = vst.msk [vmem:[#allocation3 + $0x191] sm:$0x1] %vm3079_vm6, %v6304_v2 }
  0x7a   : > { %3074 = vst.msk [vmem:[#allocation3 + $0x10] sm:$0x3] %vm3073_vm7, %v6304_v2 }
  0x7b   : > { %3078 = vst.msk [vmem:[#allocation3 + $0x1a8] sm:$0x3] %vm3073_vm7, %v6304_v2 }
  0x7c   : > { %3098 = vst.msk [vmem:[#allocation3 + $0x11] sm:$0x1] %vm3079_vm6, %v6304_v2 }
  0x7d   : > { %5921 = vmatmul.msk.bf16.gmra.mxu3 %vm280_vm1, %v722_v48  ;;  %v964_v48 = vld [vmem:[#allocation2 + $0x2] sm:$0xff]  ;;  %3115 = vst.msk [vmem:[#allocation3 + $0x1a9] sm:$0x1] %vm3079_vm6, %v6304_v2 }
  0x7e   : > { %5904 = vmatmul.msk.bf16.gmra.mxu2 %vm280_vm1, %v467_v47  ;;  %v6620_v47 = vpack.c.bf16 %v693_v46, %v692_v45  ;;  %v996_v50 = vpack.c.bf16 %v965_v49, %v964_v48 }
  0x7f   : > { %5897 = vmatmul.msk.bf16.gmra.mxu0 %vm280_vm1, %v6563_v52 }
  0x84   : > { %5913 = vmatmul.msk.bf16.gmra.mxu1 %vm280_vm1, %v6572_v59 }
  0x8d   : > { %5922 = vmatmul.msk.bf16.gmra.mxu3 %vm280_vm1, %v723_v7 }
  0x8e   : > { %5905 = vmatmul.msk.bf16.gmra.mxu2 %vm280_vm1, %v468_v6 }
  0x8f   : > { %5898 = vmatmul.msk.bf16.gmra.mxu0 %vm280_vm1, %v6578_v8 }
  0x94   : > { %5914 = vmatmul.msk.bf16.gmra.mxu1 %vm280_vm1, %v6588_v12 }
  0x95   : > { %v533_v15 = vpop.f32.mrf.mxu0 }
  0x96   : > { %614 = vst.msk [vmem:[#allocation4] sm:$0xff] %vm613_vm4, %v533_v15 }
  0x9d   : > { %5923 = vmatmul.msk.bf16.gmra.mxu3 %vm280_vm1, %v724_v23  ;;  %v535_v28 = vpop.f32.mrf.mxu0  ;;  %v646_v63 = vld [vmem:[#allocation4] sm:$0xff] }
  0x9e   : > { %5906 = vmatmul.msk.bf16.gmra.mxu2 %vm280_vm1, %v469_v22  ;;  %615 = vst.msk [vmem:[#allocation4 + $0x8] sm:$0xff] %vm613_vm4, %v535_v28  ;;  %v998_v28 = vpack.c.bf16 %v969_v19, %v968_v18 }
  0x9f   : > { %5899 = vmatmul.msk.bf16.gmra.mxu0 %vm280_vm1, %v6597_v24 }
  0xa4   : > { %5915 = vmatmul.msk.bf16.gmra.mxu1 %vm280_vm1, %v6608_v32 }
  0xa5   : > { %v647_v6 = vld [vmem:[#allocation4 + $0x8] sm:$0xff] }
  0xad   : > { %5924 = vmatmul.msk.bf16.gmra.mxu3 %vm280_vm1, %v725_v42 }
  0xae   : > { %5907 = vmatmul.msk.bf16.gmra.mxu2 %vm280_vm1, %v470_v41 }
  0xaf   : > { %5960 = vmatmul.msk.bf16.vlgmr.msrb.gmra.mxu0 %vm280_vm1, %v6518_v62  ;;  %v1921_v62 = vsel %vm520_vm0, %v5976_v57, 0 }
  0xb0   : > { %1930 = vmatpush.bf16.msrb.mxu1 %v1921_v62 }
  0xb4   : > { %5916 = vmatmul.msk.bf16.gmra.mxu1 %vm280_vm1, %v6620_v47 }
  0xbc   : > { %v538_v55 = vpop.f32.mrf.mxu0 }
  0xbd   : > { %5943 = vmatmul.msk.bf16.vlgmr.msrb.gmra.mxu3 %vm280_vm1, %v6488_v39  ;;  %616 = vst.msk [vmem:[#allocation4 + $0x10] sm:$0xff] %vm613_vm4, %v538_v55  ;;  %v999_v55 = vpack.c.bf16 %v971_v44, %v970_v43 }
  0xbe   : > { %5926 = vmatmul.msk.bf16.vlgmr.msrb.gmra.mxu2 %vm280_vm1, %v996_v50 }
  0xbf   : > { %5961 = vmatmul.msk.bf16.gmra.mxu0 %vm280_vm1, %v6537_v17 }
  0xc0   : > { %v828_v1 = vpop.f32.mrf.mxu3 }
  0xc1   : > { %v573_v0 = vpop.f32.mrf.mxu2  ;;  %v788_v3 = vpop.f32.mrf.mxu1 }
  0xc2   : > { %630 = vst.msk [vmem:[#allocation4 + $0x80] sm:$0xff] %vm613_vm4, %v573_v0  ;;  %v868_v5 = vadd.f32 %v788_v3, %v646_v63  ;;  %v972_v3 = vld [vmem:[#allocation2 + $0x62] sm:$0xff] }
  0xc4   : > { %v540_v39 = vpop.f32.mrf.mxu0  ;;  %900 = vst.msk [vmem:[#allocation4] sm:$0xff] %vm613_vm4, %v868_v5  ;;  %5977 = vmatmul.msk.bf16.vlgmr.msrb.gmra.mxu1 %vm280_vm1, %v997_v4  ;;  %v648_v20 = vld [vmem:[#allocation4 + $0x10] sm:$0xff] }
  0xc5   : > { %617 = vst.msk [vmem:[#allocation4 + $0x18] sm:$0xff] %vm613_vm4, %v540_v39 }
  0xc8   : > { %v830_v10 = vpop.f32.mrf.mxu3 }
  0xc9   : > { %v662_v7 = vld [vmem:[#allocation4 + $0x80] sm:$0xff]  ;;  %v575_v17 = vpop.f32.mrf.mxu2  ;;  %v790_v14 = vpop.f32.mrf.mxu1 }
  0xca   : > { %v884_v11 = vadd.f32 %v828_v1, %v662_v7  ;;  %631 = vst.msk [vmem:[#allocation4 + $0x88] sm:$0xff] %vm613_vm4, %v575_v17  ;;  %v869_v15 = vadd.f32 %v790_v14, %v647_v6 }
  0xcc   : > { %916 = vst.msk [vmem:[#allocation4 + $0x80] sm:$0xff] %vm613_vm4, %v884_v11  ;;  %v543_v16 = vpop.f32.mrf.mxu0 }
  0xcd   : > { %901 = vst.msk [vmem:[#allocation4 + $0x8] sm:$0xff] %vm613_vm4, %v869_v15  ;;  %5944 = vmatmul.msk.bf16.gmra.mxu3 %vm280_vm1, %v6507_v58 }
  0xce   : > { %5927 = vmatmul.msk.bf16.gmra.mxu2 %vm280_vm1, %v997_v4  ;;  %618 = vst.msk [vmem:[#allocation4 + $0x20] sm:$0xff] %vm613_vm4, %v543_v16  ;;  %v973_v4 = vld [vmem:[#allocation2 + $0x6a] sm:$0xff] }
  0xcf   : > { %5962 = vmatmul.msk.bf16.gmra.mxu0 %vm280_vm1, %v6556_v37  ;;  %v649_v37 = vld [vmem:[#allocation4 + $0x18] sm:$0xff]  ;;  %v1000_v11 = vpack.c.bf16 %v973_v4, %v972_v3  ;;  %v978_v4 = vld [vmem:[#allocation2 + $0xaa] sm:$0xff] }
  0xd0   : > { %v833_v23 = vpop.f32.mrf.mxu3 }
  0xd1   : > { %v663_v21 = vld [vmem:[#allocation4 + $0x88] sm:$0xff]  ;;  %v578_v22 = vpop.f32.mrf.mxu2  ;;  %v793_v26 = vpop.f32.mrf.mxu1 }
  0xd2   : > { %v885_v25 = vadd.f32 %v830_v10, %v663_v21  ;;  %632 = vst.msk [vmem:[#allocation4 + $0x90] sm:$0xff] %vm613_vm4, %v578_v22  ;;  %v870_v29 = vadd.f32 %v793_v26, %v648_v20 }
  0xd4   : > { %917 = vst.msk [vmem:[#allocation4 + $0x88] sm:$0xff] %vm613_vm4, %v885_v25  ;;  %v545_v58 = vpop.f32.mrf.mxu0  ;;  %5978 = vmatmul.msk.bf16.gmra.mxu1 %vm280_vm1, %v998_v28  ;;  %v975_v25 = vld [vmem:[#allocation2 + $0x82] sm:$0xff] }
  0xd5   : > { %902 = vst.msk [vmem:[#allocation4 + $0x10] sm:$0xff] %vm613_vm4, %v870_v29  ;;  %v650_v45 = vld [vmem:[#allocation4 + $0x20] sm:$0xff] }
  0xd6   : > { %619 = vst.msk [vmem:[#allocation4 + $0x28] sm:$0xff] %vm613_vm4, %v545_v58 }
  0xd8   : > { %v835_v36 = vpop.f32.mrf.mxu3 }
  0xd9   : > { %v664_v30 = vld [vmem:[#allocation4 + $0x90] sm:$0xff]  ;;  %v580_v35 = vpop.f32.mrf.mxu2  ;;  %v795_v40 = vpop.f32.mrf.mxu1 }
  0xda   : > { %v886_v38 = vadd.f32 %v833_v23, %v664_v30  ;;  %633 = vst.msk [vmem:[#allocation4 + $0x98] sm:$0xff] %vm613_vm4, %v580_v35  ;;  %v871_v41 = vadd.f32 %v795_v40, %v649_v37  ;;  %v974_v23 = vld [vmem:[#allocation2 + $0x7a] sm:$0xff] }
  0xdb   : > { %v1001_v35 = vpack.c.bf16 %v975_v25, %v974_v23  ;;  %v981_v23 = vld [vmem:[#allocation2 + $0xca] sm:$0xff] }
  0xdc   : > { %918 = vst.msk [vmem:[#allocation4 + $0x90] sm:$0xff] %vm613_vm4, %v886_v38  ;;  %v548_v42 = vpop.f32.mrf.mxu0 }
  0xdd   : > { %903 = vst.msk [vmem:[#allocation4 + $0x18] sm:$0xff] %vm613_vm4, %v871_v41  ;;  %5945 = vmatmul.msk.bf16.gmra.mxu3 %vm280_vm1, %v6527_v13 }
  0xde   : > { %5928 = vmatmul.msk.bf16.gmra.mxu2 %vm280_vm1, %v998_v28  ;;  %620 = vst.msk [vmem:[#allocation4 + $0x30] sm:$0xff] %vm613_vm4, %v548_v42 }
  0xdf   : > { %5963 = vmatmul.msk.bf16.gmra.mxu0 %vm280_vm1, %v6572_v59  ;;  %v651_v59 = vld [vmem:[#allocation4 + $0x28] sm:$0xff] }
  0xe0   : > { %v838_v49 = vpop.f32.mrf.mxu3 }
  0xe1   : > { %v665_v46 = vld [vmem:[#allocation4 + $0x98] sm:$0xff]  ;;  %v583_v48 = vpop.f32.mrf.mxu2  ;;  %v798_v51 = vpop.f32.mrf.mxu1 }
  0xe2   : > { %v887_v50 = vadd.f32 %v835_v36, %v665_v46  ;;  %634 = vst.msk [vmem:[#allocation4 + $0xa0] sm:$0xff] %vm613_vm4, %v583_v48  ;;  %v872_v56 = vadd.f32 %v798_v51, %v650_v45  ;;  %v976_v46 = vld [vmem:[#allocation2 + $0x92] sm:$0xff]  ;;  %v977_v48 = vld [vmem:[#allocation2 + $0x9a] sm:$0xff] }
  0xe4   : > { %919 = vst.msk [vmem:[#allocation4 + $0x98] sm:$0xff] %vm613_vm4, %v887_v50  ;;  %v550_v13 = vpop.f32.mrf.mxu0  ;;  %5979 = vmatmul.msk.bf16.gmra.mxu1 %vm280_vm1, %v999_v55 }
  0xe5   : > { %904 = vst.msk [vmem:[#allocation4 + $0x20] sm:$0xff] %vm613_vm4, %v872_v56  ;;  %v652_v5 = vld [vmem:[#allocation4 + $0x30] sm:$0xff] }
  0xe6   : > { %621 = vst.msk [vmem:[#allocation4 + $0x38] sm:$0xff] %vm613_vm4, %v550_v13 }
  0xe8   : > { %v840_v60 = vpop.f32.mrf.mxu3 }
  0xe9   : > { %v666_v57 = vld [vmem:[#allocation4 + $0xa0] sm:$0xff]  ;;  %v585_v62 = vpop.f32.mrf.mxu2  ;;  %v800_v63 = vpop.f32.mrf.mxu1 }
  0xea   : > { %v888_v61 = vadd.f32 %v838_v49, %v666_v57  ;;  %635 = vst.msk [vmem:[#allocation4 + $0xa8] sm:$0xff] %vm613_vm4, %v585_v62  ;;  %v873_v0 = vadd.f32 %v800_v63, %v651_v59  ;;  %v1002_v59 = vpack.c.bf16 %v977_v48, %v976_v46  ;;  %v932_v46 = vld [vmem:[#allocation4] sm:$0xff] }
  0xec   : > { %920 = vst.msk [vmem:[#allocation4 + $0xa0] sm:$0xff] %vm613_vm4, %v888_v61  ;;  %v553_v1 = vpop.f32.mrf.mxu0 }
  0xed   : > { %905 = vst.msk [vmem:[#allocation4 + $0x28] sm:$0xff] %vm613_vm4, %v873_v0  ;;  %5946 = vmatmul.msk.bf16.gmra.mxu3 %vm280_vm1, %v6546_v31 }
  0xee   : > { %5929 = vmatmul.msk.bf16.gmra.mxu2 %vm280_vm1, %v999_v55  ;;  %622 = vst.msk [vmem:[#allocation4 + $0x40] sm:$0xff] %vm613_vm4, %v553_v1 }
  0xef   : > { %5964 = vmatmul.msk.bf16.gmra.mxu0 %vm280_vm1, %v6588_v12  ;;  %v653_v12 = vld [vmem:[#allocation4 + $0x38] sm:$0xff] }
  0xf0   : > { %v843_v7 = vpop.f32.mrf.mxu3 }
  0xf1   : > { %v667_v39 = vld [vmem:[#allocation4 + $0xa8] sm:$0xff]  ;;  %v588_v6 = vpop.f32.mrf.mxu2  ;;  %v803_v10 = vpop.f32.mrf.mxu1 }
  0xf2   : > { %v889_v17 = vadd.f32 %v840_v60, %v667_v39  ;;  %636 = vst.msk [vmem:[#allocation4 + $0xb0] sm:$0xff] %vm613_vm4, %v588_v6  ;;  %v874_v14 = vadd.f32 %v803_v10, %v652_v5  ;;  %v979_v5 = vld [vmem:[#allocation2 + $0xb2] sm:$0xff] }
  0xf4   : > { %921 = vst.msk [vmem:[#allocation4 + $0xa8] sm:$0xff] %vm613_vm4, %v889_v17  ;;  %v555_v31 = vpop.f32.mrf.mxu0  ;;  %5980 = vmatmul.msk.bf16.gmra.mxu1 %vm280_vm1, %v1000_v11 }
  0xf5   : > { %906 = vst.msk [vmem:[#allocation4 + $0x30] sm:$0xff] %vm613_vm4, %v874_v14  ;;  %v654_v26 = vld [vmem:[#allocation4 + $0x40] sm:$0xff]  ;;  %v1003_v14 = vpack.c.bf16 %v979_v5, %v978_v4  ;;  %v984_v4 = vld [vmem:[#allocation2 + $0xf2] sm:$0xff] }
  0xf6   : > { %623 = vst.msk [vmem:[#allocation4 + $0x48] sm:$0xff] %vm613_vm4, %v555_v31  ;;  %v985_v5 = vld [vmem:[#allocation2 + $0xfa] sm:$0xff] }
  0xf8   : > { %v845_v18 = vpop.f32.mrf.mxu3 }
  0xf9   : > { %v668_v15 = vld [vmem:[#allocation4 + $0xb0] sm:$0xff]  ;;  %v590_v16 = vpop.f32.mrf.mxu2  ;;  %v805_v20 = vpop.f32.mrf.mxu1 }
  0xfa   : > { %v890_v19 = vadd.f32 %v843_v7, %v668_v15  ;;  %637 = vst.msk [vmem:[#allocation4 + $0xb8] sm:$0xff] %vm613_vm4, %v590_v16  ;;  %v875_v21 = vadd.f32 %v805_v20, %v653_v12 }
  0xfc   : > { %922 = vst.msk [vmem:[#allocation4 + $0xb0] sm:$0xff] %vm613_vm4, %v890_v19  ;;  %v558_v22 = vpop.f32.mrf.mxu0 }
  0xfd   : > { %907 = vst.msk [vmem:[#allocation4 + $0x38] sm:$0xff] %vm613_vm4, %v875_v21  ;;  %5947 = vmatmul.msk.bf16.gmra.mxu3 %vm280_vm1, %v6563_v52 }
  0xfe   : > { %5930 = vmatmul.msk.bf16.gmra.mxu2 %vm280_vm1, %v1000_v11  ;;  %624 = vst.msk [vmem:[#allocation4 + $0x50] sm:$0xff] %vm613_vm4, %v558_v22  ;;  %v980_v22 = vld [vmem:[#allocation2 + $0xc2] sm:$0xff] }
  0xff   : > { %5965 = vmatmul.msk.bf16.gmra.mxu0 %vm280_vm1, %v6608_v32  ;;  %v655_v32 = vld [vmem:[#allocation4 + $0x48] sm:$0xff] }
 0x100   : > { %v848_v58 = vpop.f32.mrf.mxu3 }
 0x101   : > { %v669_v28 = vld [vmem:[#allocation4 + $0xb8] sm:$0xff]  ;;  %v593_v29 = vpop.f32.mrf.mxu2  ;;  %v808_v30 = vpop.f32.mrf.mxu1 }
 0x102   : > { %v891_v37 = vadd.f32 %v845_v18, %v669_v28  ;;  %638 = vst.msk [vmem:[#allocation4 + $0xc0] sm:$0xff] %vm613_vm4, %v593_v29  ;;  %v876_v36 = vadd.f32 %v808_v30, %v654_v26  ;;  %v1004_v30 = vpack.c.bf16 %v981_v23, %v980_v22  ;;  %v1559_v22 = vld [vmem:[#allocation2 + $0x129] sm:$0xff] }
 0x104   : > { %923 = vst.msk [vmem:[#allocation4 + $0xb8] sm:$0xff] %vm613_vm4, %v891_v37  ;;  %v560_v52 = vpop.f32.mrf.mxu0  ;;  %5981 = vmatmul.msk.bf16.gmra.mxu1 %vm280_vm1, %v1001_v35 }
 0x105   : > { %908 = vst.msk [vmem:[#allocation4 + $0x40] sm:$0xff] %vm613_vm4, %v876_v36  ;;  %v656_v49 = vld [vmem:[#allocation4 + $0x50] sm:$0xff] }
 0x106   : > { %625 = vst.msk [vmem:[#allocation4 + $0x58] sm:$0xff] %vm613_vm4, %v560_v52 }
 0x108   : > { %v850_v41 = vpop.f32.mrf.mxu3 }
 0x109   : > { %v670_v38 = vld [vmem:[#allocation4 + $0xc0] sm:$0xff]  ;;  %v595_v40 = vpop.f32.mrf.mxu2  ;;  %v810_v43 = vpop.f32.mrf.mxu1 }
 0x10a   : > { %v892_v42 = vadd.f32 %v848_v58, %v670_v38  ;;  %639 = vst.msk [vmem:[#allocation4 + $0xc8] sm:$0xff] %vm613_vm4, %v595_v40  ;;  %v877_v44 = vadd.f32 %v810_v43, %v655_v32  ;;  %v982_v43 = vld [vmem:[#allocation2 + $0xda] sm:$0xff] }
 0x10c   : > { %924 = vst.msk [vmem:[#allocation4 + $0xc0] sm:$0xff] %vm613_vm4, %v892_v42  ;;  %v563_v45 = vpop.f32.mrf.mxu0 }
 0x10d   : > { %909 = vst.msk [vmem:[#allocation4 + $0x48] sm:$0xff] %vm613_vm4, %v877_v44  ;;  %5948 = vmatmul.msk.bf16.gmra.mxu3 %vm280_vm1, %v6578_v8  ;;  %v983_v44 = vld [vmem:[#allocation2 + $0xe2] sm:$0xff] }
 0x10e   : > { %5931 = vmatmul.msk.bf16.gmra.mxu2 %vm280_vm1, %v1001_v35  ;;  %626 = vst.msk [vmem:[#allocation4 + $0x60] sm:$0xff] %vm613_vm4, %v563_v45 }
 0x10f   : > { %5966 = vmatmul.msk.bf16.gmra.mxu0 %vm280_vm1, %v6620_v47  ;;  %v657_v47 = vld [vmem:[#allocation4 + $0x58] sm:$0xff] }
 0x110   : > { %v853_v55 = vpop.f32.mrf.mxu3 }
 0x111   : > { %v671_v50 = vld [vmem:[#allocation4 + $0xc8] sm:$0xff]  ;;  %v598_v51 = vpop.f32.mrf.mxu2  ;;  %v813_v13 = vpop.f32.mrf.mxu1 }
 0x112   : > { %v893_v56 = vadd.f32 %v850_v41, %v671_v50  ;;  %640 = vst.msk [vmem:[#allocation4 + $0xd0] sm:$0xff] %vm613_vm4, %v598_v51  ;;  %v878_v57 = vadd.f32 %v813_v13, %v656_v49 }
 0x114   : > { %925 = vst.msk [vmem:[#allocation4 + $0xc8] sm:$0xff] %vm613_vm4, %v893_v56  ;;  %v565_v8 = vpop.f32.mrf.mxu0  ;;  %5982 = vmatmul.msk.bf16.gmra.mxu1 %vm280_vm1, %v1002_v59  ;;  %v1005_v56 = vpack.c.bf16 %v983_v44, %v982_v43 }
 0x115   : > { %910 = vst.msk [vmem:[#allocation4 + $0x50] sm:$0xff] %vm613_vm4, %v878_v57  ;;  %v658_v39 = vld [vmem:[#allocation4 + $0x60] sm:$0xff] }
 0x116   : > { %627 = vst.msk [vmem:[#allocation4 + $0x68] sm:$0xff] %vm613_vm4, %v565_v8 }
 0x118   : > { %v855_v61 = vpop.f32.mrf.mxu3 }
 0x119   : > { %v672_v62 = vld [vmem:[#allocation4 + $0xd0] sm:$0xff]  ;;  %v600_v60 = vpop.f32.mrf.mxu2  ;;  %v815_v0 = vpop.f32.mrf.mxu1 }
 0x11a   : > { %v894_v63 = vadd.f32 %v853_v55, %v672_v62  ;;  %641 = vst.msk [vmem:[#allocation4 + $0xd8] sm:$0xff] %vm613_vm4, %v600_v60  ;;  %v879_v1 = vadd.f32 %v815_v0, %v657_v47 }
 0x11c   : > { %926 = vst.msk [vmem:[#allocation4 + $0xd0] sm:$0xff] %vm613_vm4, %v894_v63  ;;  %v568_v3 = vpop.f32.mrf.mxu0 }
 0x11d   : > { %911 = vst.msk [vmem:[#allocation4 + $0x58] sm:$0xff] %vm613_vm4, %v879_v1  ;;  %5949 = vmatmul.msk.bf16.gmra.mxu3 %vm280_vm1, %v6597_v24  ;;  %v3197_v1 = vld [vmem:[%s8452_s4] sm:$0xf] }
 0x11e   : > { %5932 = vmatmul.msk.bf16.gmra.mxu2 %vm280_vm1, %v1002_v59  ;;  %628 = vst.msk [vmem:[#allocation4 + $0x70] sm:$0xff] %vm613_vm4, %v568_v3  ;;  %v933_v59 = vld [vmem:[#allocation4 + $0x8] sm:$0xff]  ;;  %v3248_v3 = vsel %vm3246_vm5, %v3197_v1, 0 }
 0x11f   : > { %5967 = vmatmul.msk.bf16.gmra.mxu0 %vm280_vm1, %v6479_v34  ;;  %v659_v34 = vld [vmem:[#allocation4 + $0x68] sm:$0xff]  ;;  %3257 = vmatpush.bf16.msra.mxu1 %v3248_v3 }
 0x120   : > { %v858_v17 = vpop.f32.mrf.mxu3 }
 0x121   : > { %v673_v6 = vld [vmem:[#allocation4 + $0xd8] sm:$0xff]  ;;  %v603_v7 = vpop.f32.mrf.mxu2  ;;  %v818_v11 = vpop.f32.mrf.mxu1 }
 0x122   : > { %v895_v10 = vadd.f32 %v855_v61, %v673_v6  ;;  %642 = vst.msk [vmem:[#allocation4 + $0xe0] sm:$0xff] %vm613_vm4, %v603_v7  ;;  %v880_v31 = vadd.f32 %v818_v11, %v658_v39  ;;  %v934_v39 = vld [vmem:[#allocation4 + $0x10] sm:$0xff] }
 0x124   : > { %927 = vst.msk [vmem:[#allocation4 + $0xd8] sm:$0xff] %vm613_vm4, %v895_v10  ;;  %v570_v24 = vpop.f32.mrf.mxu0  ;;  %5983 = vmatmul.msk.bf16.gmra.mxu1 %vm280_vm1, %v1003_v14 }
 0x125   : > { %912 = vst.msk [vmem:[#allocation4 + $0x60] sm:$0xff] %vm613_vm4, %v880_v31  ;;  %v660_v25 = vld [vmem:[#allocation4 + $0x70] sm:$0xff] }
 0x126   : > { %629 = vst.msk [vmem:[#allocation4 + $0x78] sm:$0xff] %vm613_vm4, %v570_v24 }
 0x128   : > { %v860_v16 = vpop.f32.mrf.mxu3 }
 0x129   : > { %v674_v12 = vld [vmem:[#allocation4 + $0xe0] sm:$0xff]  ;;  %v605_v15 = vpop.f32.mrf.mxu2  ;;  %v820_v19 = vpop.f32.mrf.mxu1 }
 0x12a   : > { %v896_v18 = vadd.f32 %v858_v17, %v674_v12  ;;  %643 = vst.msk [vmem:[#allocation4 + $0xe8] sm:$0xff] %vm613_vm4, %v605_v15  ;;  %v881_v20 = vadd.f32 %v820_v19, %v659_v34  ;;  %v1270_v34 = vld [vmem:[#allocation2 + $0x108] sm:$0xff]  ;;  %v1271_v12 = vld [vmem:[#allocation2 + $0x110] sm:$0xff] }
 0x12c   : > { %928 = vst.msk [vmem:[#allocation4 + $0xe0] sm:$0xff] %vm613_vm4, %v896_v18  ;;  %v6728_v21 = vpop.f32.mrf.mxu0 }
 0x12d   : > { %913 = vst.msk [vmem:[#allocation4 + $0x68] sm:$0xff] %vm613_vm4, %v881_v20  ;;  %5950 = vmatmul.msk.bf16.gmra.mxu3 %vm280_vm1, %v6477_v33  ;;  %v661_v33 = vld [vmem:[#allocation4 + $0x78] sm:$0xff]  ;;  %v1558_v20 = vld [vmem:[#allocation2 + $0x121] sm:$0xff] }
 0x12e   : > { %5933 = vmatmul.msk.bf16.gmra.mxu2 %vm280_vm1, %v1003_v14  ;;  %v1006_v14 = vpack.c.bf16 %v985_v5, %v984_v4 }
 0x12f   : > { %5968 = vmatmul.msk.bf16.gmra.mxu0 %vm280_vm1, %v6504_v54 }
 0x130   : > { %v863_v29 = vpop.f32.mrf.mxu3 }
 0x131   : > { %v675_v26 = vld [vmem:[#allocation4 + $0xe8] sm:$0xff]  ;;  %v608_v28 = vpop.f32.mrf.mxu2  ;;  %v823_v37 = vpop.f32.mrf.mxu1 }
 0x132   : > { %v897_v58 = vadd.f32 %v860_v16, %v675_v26  ;;  %644 = vst.msk [vmem:[#allocation4 + $0xf0] sm:$0xff] %vm613_vm4, %v608_v28  ;;  %v882_v35 = vadd.f32 %v823_v37, %v660_v25  ;;  %v935_v16 = vld [vmem:[#allocation4 + $0x18] sm:$0xff]  ;;  %v1292_v25 = vpack.c.bf16 %v1271_v12, %v1270_v34 }
 0x134   : > { %929 = vst.msk [vmem:[#allocation4 + $0xe8] sm:$0xff] %vm613_vm4, %v897_v58  ;;  %v6738_v36 = vpop.f32.mrf.mxu0  ;;  %5984 = vmatmul.msk.bf16.gmra.mxu1 %vm280_vm1, %v1004_v30  ;;  %v1579_v58 = vpack.c.bf16 %v1559_v22, %v1558_v20  ;;  %v1275_v20 = vld [vmem:[#allocation2 + $0x140] sm:$0xff] }
 0x135   : > { %914 = vst.msk [vmem:[#allocation4 + $0x70] sm:$0xff] %vm613_vm4, %v882_v35 }
 0x138   : > { %v865_v32 = vpop.f32.mrf.mxu3 }
 0x139   : > { %v676_v54 = vld [vmem:[#allocation4 + $0xf0] sm:$0xff]  ;;  %v610_v52 = vpop.f32.mrf.mxu2  ;;  %v825_v40 = vpop.f32.mrf.mxu1 }
 0x13a   : > { %v898_v38 = vadd.f32 %v863_v29, %v676_v54  ;;  %645 = vst.msk [vmem:[#allocation4 + $0xf8] sm:$0xff] %vm613_vm4, %v610_v52  ;;  %v883_v41 = vadd.f32 %v825_v40, %v661_v33  ;;  %v986_v33 = vld [vmem:[#allocation2 + $0x10a] sm:$0xff]  ;;  %v987_v54 = vld [vmem:[#allocation2 + $0x112] sm:$0xff] }
 0x13c   : > { %930 = vst.msk [vmem:[#allocation4 + $0xf0] sm:$0xff] %vm613_vm4, %v898_v38  ;;  %v6744_v42 = vpop.f32.mrf.mxu0 }
 0x13d   : > { %915 = vst.msk [vmem:[#allocation4 + $0x78] sm:$0xff] %vm613_vm4, %v883_v41  ;;  %5951 = vmatmul.msk.bf16.gmra.mxu3 %vm280_vm1, %v6502_v53  ;;  %v1268_v53 = vld [vmem:[#allocation2 + $0xf0] sm:$0xff] }
 0x13e   : > { %5934 = vmatmul.msk.bf16.gmra.mxu2 %vm280_vm1, %v1004_v30 }
 0x13f   : > { %5969 = vmatmul.msk.bf16.gmra.mxu0 %vm280_vm1, %v6524_v9  ;;  %v1269_v9 = vld [vmem:[#allocation2 + $0xf8] sm:$0xff] }
 0x140   : > { %v1360_v49 = vpop.f32.mrf.mxu3  ;;  %v1291_v62 = vpack.c.bf16 %v1269_v9, %v1268_v53  ;;  %v937_v53 = vld [vmem:[#allocation4 + $0x28] sm:$0xff] }
 0x141   : > { %v677_v45 = vld [vmem:[#allocation4 + $0xf8] sm:$0xff]  ;;  %v1074_v48 = vpop.f32.mrf.mxu2  ;;  %v6752_v55 = vpop.f32.mrf.mxu1 }
 0x142   : > { %v899_v50 = vadd.f32 %v865_v32, %v677_v45  ;;  %v1154_v51 = vadd.f32 %v1074_v48, %v932_v46  ;;  %v936_v32 = vld [vmem:[#allocation4 + $0x20] sm:$0xff]  ;;  %v1007_v45 = vpack.c.bf16 %v987_v54, %v986_v33  ;;  %v6278_v33 = vld [vmem:[%s6438_s14 + $0x78] sm:$0xff]  }
 0x144   : > { %931 = vst.msk [vmem:[#allocation4 + $0xf8] sm:$0xff] %vm613_vm4, %v899_v50  ;;  %v6756_v13 = vpop.f32.mrf.mxu0  ;;  %5985 = vmatmul.msk.bf16.gmra.mxu1 %vm280_vm1, %v1005_v56 }
 0x145   : > { %1186 = vst.msk [vmem:[#allocation4] sm:$0xff] %vm613_vm4, %v1154_v51  ;;  %v1272_v51 = vld [vmem:[#allocation2 + $0x120] sm:$0xff] }
 0x148   : > { %v1362_v8 = vpop.f32.mrf.mxu3 }
 0x149   : > { %v1076_v57 = vpop.f32.mrf.mxu2  ;;  %v6759_v60 = vpop.f32.mrf.mxu1 }
 0x14a   : > { %v1155_v47 = vadd.f32 %v1076_v57, %v933_v59  ;;  %v1560_v57 = vld [vmem:[#allocation2 + $0x139] sm:$0xff] }
 0x14c   : > { %v1218_v61 = vld [vmem:[#allocation4] sm:$0xff]  ;;  %1187 = vst.msk [vmem:[#allocation4 + $0x8] sm:$0xff] %vm613_vm4, %v1155_v47  ;;  %v6762_v0 = vpop.f32.mrf.mxu0 }
 0x14d   : > { %v1440_v63 = vadd.f32 %v1360_v49, %v1218_v61  ;;  %5952 = vmatmul.msk.bf16.gmra.mxu3 %vm280_vm1, %v1291_v62 }
 0x14e   : > { %5935 = vmatmul.msk.bf16.gmra.mxu2 %vm280_vm1, %v1005_v56 }
 0x14f   : > { %1472 = vst.msk [vmem:[#allocation4] sm:$0xff] %vm613_vm4, %v1440_v63  ;;  %5970 = vmatmul.msk.bf16.gmra.mxu0 %vm280_vm1, %v6543_v27 }
 0x150   : > { %v1365_v7 = vpop.f32.mrf.mxu3 }
 0x151   : > { %v1079_v6 = vpop.f32.mrf.mxu2  ;;  %v6773_v10 = vpop.f32.mrf.mxu1 }
 0x152   : > { %v1156_v17 = vadd.f32 %v1079_v6, %v934_v39  ;;  %v988_v6 = vld [vmem:[#allocation2 + $0x122] sm:$0xff] }
 0x153   : > { %v1219_v11 = vld [vmem:[#allocation4 + $0x8] sm:$0xff] }
 0x154   : > { %v1441_v31 = vadd.f32 %v1362_v8, %v1219_v11  ;;  %1188 = vst.msk [vmem:[#allocation4 + $0x10] sm:$0xff] %vm613_vm4, %v1156_v17  ;;  %v6776_v24 = vpop.f32.mrf.mxu0  ;;  %5986 = vmatmul.msk.bf16.gmra.mxu1 %vm280_vm1, %v1006_v14  ;;  %v1561_v8 = vld [vmem:[#allocation2 + $0x141] sm:$0xff]  ;;  %v938_v17 = vld [vmem:[#allocation4 + $0x30] sm:$0xff] }
 0x155   : > { %v1580_v1 = vpack.c.bf16 %v1561_v8, %v1560_v57 }
 0x156   : > { %1473 = vst.msk [vmem:[#allocation4 + $0x8] sm:$0xff] %vm613_vm4, %v1441_v31  ;;  %v1504_v27 = vld [vmem:[#allocation4] sm:$0xff] }
 0x157   : > { %v1726_v15 = vadd.f32 %v6728_v21, %v1504_v27 }
 0x158   : > { %v1367_v19 = vpop.f32.mrf.mxu3 }
 0x159   : > { %v1081_v18 = vpop.f32.mrf.mxu2  ;;  %1758 = vst.msk [vmem:[#allocation4] sm:$0xff] %vm613_vm4, %v1726_v15  ;;  %v6782_v26 = vpop.f32.mrf.mxu1 }
 0x15a   : > { %v1157_v23 = vadd.f32 %v1081_v18, %v935_v16 }
 0x15b   : > { %v1220_v28 = vld [vmem:[#allocation4 + $0x10] sm:$0xff] }
 0x15c   : > { %v1442_v29 = vadd.f32 %v1365_v7, %v1220_v28  ;;  %1189 = vst.msk [vmem:[#allocation4 + $0x18] sm:$0xff] %vm613_vm4, %v1157_v23  ;;  %v6785_v37 = vpop.f32.mrf.mxu0  ;;  %v989_v7 = vld [vmem:[#allocation2 + $0x12a] sm:$0xff]  ;;  %v939_v23 = vld [vmem:[#allocation4 + $0x38] sm:$0xff] }
 0x15d   : > { %v1505_v30 = vld [vmem:[#allocation4 + $0x8] sm:$0xff]  ;;  %5953 = vmatmul.msk.bf16.gmra.mxu3 %vm280_vm1, %v1292_v25  ;;  %v1008_v12 = vpack.c.bf16 %v989_v7, %v988_v6 }
 0x15e   : > { %1474 = vst.msk [vmem:[#allocation4 + $0x10] sm:$0xff] %vm613_vm4, %v1442_v29  ;;  %5936 = vmatmul.msk.bf16.gmra.mxu2 %vm280_vm1, %v1006_v14  ;;  %v1727_v21 = vadd.f32 %v6738_v36, %v1505_v30  ;;  %v1562_v29 = vld [vmem:[#allocation2 + $0x151] sm:$0xff] }
 0x15f   : > { %5971 = vmatmul.msk.bf16.gmra.mxu0 %vm280_vm1, %v1579_v58  ;;  %v1563_v58 = vld [vmem:[#allocation2 + $0x159] sm:$0xff] }
 0x160   : > { %v1790_v35 = vld [vmem:[#allocation4] sm:$0xff]  ;;  %1759 = vst.msk [vmem:[#allocation4 + $0x8] sm:$0xff] %vm613_vm4, %v1727_v21  ;;  %v1370_v40 = vpop.f32.mrf.mxu3 }
 0x161   : > { %v2012_v52 = vadd.f32 %v6752_v55, %v1790_v35  ;;  %v1084_v38 = vpop.f32.mrf.mxu2  ;;  %v6794_v43 = vpop.f32.mrf.mxu1  ;;  %v1273_v55 = vld [vmem:[#allocation2 + $0x128] sm:$0xff] }
 0x162   : > { %v1158_v41 = vadd.f32 %v1084_v38, %v936_v32  ;;  %v1293_v62 = vpack.c.bf16 %v1273_v55, %v1272_v51 }
 0x163   : > { %v1221_v44 = vld [vmem:[#allocation4 + $0x18] sm:$0xff]  ;;  %2044 = vst.msk [vmem:[#allocation4] sm:$0xff] %vm613_vm4, %v2012_v52  ;;  %v1581_v52 = vpack.c.bf16 %v1563_v58, %v1562_v29 }
 0x164   : > { %v1443_v36 = vadd.f32 %v1367_v19, %v1221_v44  ;;  %1190 = vst.msk [vmem:[#allocation4 + $0x20] sm:$0xff] %vm613_vm4, %v1158_v41  ;;  %v6798_v46 = vpop.f32.mrf.mxu0  ;;  %5987 = vmatmul.msk.bf16.gmra.mxu1 %vm280_vm1, %v1007_v45  ;;  %v1274_v19 = vld [vmem:[#allocation2 + $0x138] sm:$0xff] }
 0x165   : > { %v1506_v48 = vld [vmem:[#allocation4 + $0x10] sm:$0xff]  ;;  %v1294_v21 = vpack.c.bf16 %v1275_v20, %v1274_v19 }
 0x166   : > { %1475 = vst.msk [vmem:[#allocation4 + $0x18] sm:$0xff] %vm613_vm4, %v1443_v36  ;;  %v1728_v49 = vadd.f32 %v6744_v42, %v1506_v48  ;;  %v990_v36 = vld [vmem:[#allocation2 + $0x13a] sm:$0xff]  ;;  %v991_v48 = vld [vmem:[#allocation2 + $0x142] sm:$0xff] }
 0x167   : > { %v1791_v50 = vld [vmem:[#allocation4 + $0x8] sm:$0xff] }
 0x168   : > { %v2013_v56 = vadd.f32 %v6759_v60, %v1791_v50  ;;  %1760 = vst.msk [vmem:[#allocation4 + $0x10] sm:$0xff] %vm613_vm4, %v1728_v49  ;;  %v1372_v59 = vpop.f32.mrf.mxu3  ;;  %v940_v49 = vld [vmem:[#allocation4 + $0x40] sm:$0xff] }
 0x169   : > { %v1086_v9 = vpop.f32.mrf.mxu2  ;;  %v6806_v61 = vpop.f32.mrf.mxu1 }
 0x16a   : > { %2045 = vst.msk [vmem:[#allocation4 + $0x8] sm:$0xff] %vm613_vm4, %v2013_v56  ;;  %v1159_v47 = vadd.f32 %v1086_v9, %v937_v53  ;;  %v1009_v53 = vpack.c.bf16 %v991_v48, %v990_v36 }
 0x16b   : > { %v1222_v63 = vld [vmem:[#allocation4 + $0x20] sm:$0xff] }
 0x16c   : > { %v1444_v42 = vadd.f32 %v1370_v40, %v1222_v63  ;;  %1191 = vst.msk [vmem:[#allocation4 + $0x28] sm:$0xff] %vm613_vm4, %v1159_v47  ;;  %v6809_v3 = vpop.f32.mrf.mxu0  ;;  %v6263_v40 = vunpack.c.h.bf16 %v6278_v33  ;;  %v1276_v47 = vld [vmem:[#allocation2 + $0x150] sm:$0xff] }
 0x16d   : > { %v1507_v60 = vld [vmem:[#allocation4 + $0x18] sm:$0xff]  ;;  %5954 = vmatmul.msk.bf16.gmra.mxu3 %vm280_vm1, %v1293_v62 }
 0x16e   : > { %1476 = vst.msk [vmem:[#allocation4 + $0x20] sm:$0xff] %vm613_vm4, %v1444_v42  ;;  %5937 = vmatmul.msk.bf16.gmra.mxu2 %vm280_vm1, %v1007_v45  ;;  %v1729_v4 = vadd.f32 %v6756_v13, %v1507_v60  ;;  %v1277_v62 = vld [vmem:[#allocation2 + $0x158] sm:$0xff]  ;;  %v941_v42 = vld [vmem:[#allocation4 + $0x48] sm:$0xff] }
 0x16f   : > { %v1792_v5 = vld [vmem:[#allocation4 + $0x10] sm:$0xff]  ;;  %5972 = vmatmul.msk.bf16.gmra.mxu0 %vm280_vm1, %v1580_v1  ;;  %422 = vst.msk [vmem:[#allocation2 + $0x189] sm:$0xff] %vm280_vm1, %v6263_v40  ;;  %v1295_v6 = vpack.c.bf16 %v1277_v62, %v1276_v47 }
 0x170   : > { %v2014_v39 = vadd.f32 %v6773_v10, %v1792_v5  ;;  %1761 = vst.msk [vmem:[#allocation4 + $0x18] sm:$0xff] %vm613_vm4, %v1729_v4  ;;  %v1375_v14 = vpop.f32.mrf.mxu3  ;;  %v1564_v4 = vld [vmem:[#allocation2 + $0x169] sm:$0xff]  ;;  %v1565_v5 = vld [vmem:[#allocation2 + $0x171] sm:$0xff] }
 0x171   : > { %v1089_v11 = vpop.f32.mrf.mxu2  ;;  %v6819_v27 = vpop.f32.mrf.mxu1 }
 0x172   : > { %2046 = vst.msk [vmem:[#allocation4 + $0x10] sm:$0xff] %vm613_vm4, %v2014_v39  ;;  %v1160_v31 = vadd.f32 %v1089_v11, %v938_v17  ;;  %v1582_v11 = vpack.c.bf16 %v1565_v5, %v1564_v4 }
 0x173   : > { %v1223_v34 = vld [vmem:[#allocation4 + $0x28] sm:$0xff] }
 0x174   : > { %v1445_v13 = vadd.f32 %v1372_v59, %v1223_v34  ;;  %1192 = vst.msk [vmem:[#allocation4 + $0x30] sm:$0xff] %vm613_vm4, %v1160_v31  ;;  %v6822_v10 = vpop.f32.mrf.mxu0  ;;  %5988 = vmatmul.msk.bf16.gmra.mxu1 %vm280_vm1, %v1008_v12 }
 0x175   : > { %v1508_v15 = vld [vmem:[#allocation4 + $0x20] sm:$0xff] }
 0x176   : > { %1477 = vst.msk [vmem:[#allocation4 + $0x28] sm:$0xff] %vm613_vm4, %v1445_v13  ;;  %v1730_v16 = vadd.f32 %v6762_v0, %v1508_v15  ;;  %v992_v13 = vld [vmem:[#allocation2 + $0x152] sm:$0xff]  ;;  %v993_v15 = vld [vmem:[#allocation2 + $0x15a] sm:$0xff] }
 0x177   : > { %v1793_v18 = vld [vmem:[#allocation4 + $0x18] sm:$0xff] }
 0x178   : > { %v2015_v22 = vadd.f32 %v6782_v26, %v1793_v18  ;;  %1762 = vst.msk [vmem:[#allocation4 + $0x20] sm:$0xff] %vm613_vm4, %v1730_v16  ;;  %v1377_v28 = vpop.f32.mrf.mxu3  ;;  %v6262_v26 = vunpack.c.l.bf16 %v6278_v33  ;;  %v942_v16 = vld [vmem:[#allocation4 + $0x50] sm:$0xff]  ;;  %v943_v33 = vld [vmem:[#allocation4 + $0x58] sm:$0xff] }
 0x179   : > { %v1091_v25 = vpop.f32.mrf.mxu2  ;;  %v6830_v35 = vpop.f32.mrf.mxu1 }
 0x17a   : > { %2047 = vst.msk [vmem:[#allocation4 + $0x18] sm:$0xff] %vm613_vm4, %v2015_v22  ;;  %v1161_v30 = vadd.f32 %v1091_v25, %v939_v23  ;;  %v1010_v25 = vpack.c.bf16 %v993_v15, %v992_v13 }
 0x17b   : > { %v1224_v0 = vld [vmem:[#allocation4 + $0x30] sm:$0xff]  ;;  %421 = vst.msk [vmem:[#allocation2 + $0x181] sm:$0xff] %vm280_vm1, %v6262_v26 }
 0x17c   : > { %v1446_v54 = vadd.f32 %v1375_v14, %v1224_v0  ;;  %1193 = vst.msk [vmem:[#allocation4 + $0x38] sm:$0xff] %vm613_vm4, %v1161_v30  ;;  %v6834_v32 = vpop.f32.mrf.mxu0  ;;  %v1278_v30 = vld [vmem:[#allocation2 + $0x168] sm:$0xff] }
 0x17d   : > { %v1509_v38 = vld [vmem:[#allocation4 + $0x28] sm:$0xff]  ;;  %5955 = vmatmul.msk.bf16.gmra.mxu3 %vm280_vm1, %v1294_v21  ;;  %v1279_v21 = vld [vmem:[#allocation2 + $0x170] sm:$0xff] }
 0x17e   : > { %1478 = vst.msk [vmem:[#allocation4 + $0x30] sm:$0xff] %vm613_vm4, %v1446_v54  ;;  %5938 = vmatmul.msk.bf16.gmra.mxu2 %vm280_vm1, %v1008_v12  ;;  %v1731_v41 = vadd.f32 %v6776_v24, %v1509_v38  ;;  %v1567_v38 = vld [vmem:[#allocation2 + $0x189] sm:$0xff] }
 0x17f   : > { %v1794_v44 = vld [vmem:[#allocation4 + $0x20] sm:$0xff]  ;;  %5973 = vmatmul.msk.bf16.gmra.mxu0 %vm280_vm1, %v1581_v52 }
 0x180   : > { %v2016_v45 = vadd.f32 %v6794_v43, %v1794_v44  ;;  %1763 = vst.msk [vmem:[#allocation4 + $0x28] sm:$0xff] %vm613_vm4, %v1731_v41  ;;  %v1380_v51 = vpop.f32.mrf.mxu3  ;;  %v1296_v41 = vpack.c.bf16 %v1279_v21, %v1278_v30 }
 0x181   : > { %v1094_v50 = vpop.f32.mrf.mxu2  ;;  %v6846_v24 = vpop.f32.mrf.mxu1 }
 0x182   : > { %2048 = vst.msk [vmem:[#allocation4 + $0x20] sm:$0xff] %vm613_vm4, %v2016_v45  ;;  %v1162_v55 = vadd.f32 %v1094_v50, %v940_v49  ;;  %v1566_v26 = vld [vmem:[#allocation2 + $0x181] sm:$0xff] }
 0x183   : > { %v1225_v56 = vld [vmem:[#allocation4 + $0x38] sm:$0xff]  ;;  %v1583_v36 = vpack.c.bf16 %v1567_v38, %v1566_v26  ;;  %v1281_v4 = vld [vmem:[#allocation2 + $0x188] sm:$0xff] }
 0x184   : > { %v1447_v9 = vadd.f32 %v1377_v28, %v1225_v56  ;;  %1194 = vst.msk [vmem:[#allocation4 + $0x40] sm:$0xff] %vm613_vm4, %v1162_v55  ;;  %v6849_v43 = vpop.f32.mrf.mxu0  ;;  %5989 = vmatmul.msk.bf16.gmra.mxu1 %vm280_vm1, %v1009_v53  ;;  %v994_v55 = vld [vmem:[#allocation2 + $0x16a] sm:$0xff]  ;;  %v995_v56 = vld [vmem:[#allocation2 + $0x172] sm:$0xff] }
 0x185   : > { %v1510_v59 = vld [vmem:[#allocation4 + $0x30] sm:$0xff]  ;;  %v1011_v62 = vpack.c.bf16 %v995_v56, %v994_v55 }
 0x186   : > { %1479 = vst.msk [vmem:[#allocation4 + $0x38] sm:$0xff] %vm613_vm4, %v1447_v9  ;;  %v1732_v57 = vadd.f32 %v6785_v37, %v1510_v59  ;;  %v2395_v38 = vld [vmem:[#allocation2 + $0x31] sm:$0xff] }
 0x187   : > { %v1795_v8 = vld [vmem:[#allocation4 + $0x28] sm:$0xff] }
 0x188   : > { %v2017_v63 = vadd.f32 %v6806_v61, %v1795_v8  ;;  %1764 = vst.msk [vmem:[#allocation4 + $0x30] sm:$0xff] %vm613_vm4, %v1732_v57  ;;  %v1382_v60 = vpop.f32.mrf.mxu3 }
 0x189   : > { %v1096_v1 = vpop.f32.mrf.mxu2  ;;  %v6857_v7 = vpop.f32.mrf.mxu1 }
 0x18a   : > { %2049 = vst.msk [vmem:[#allocation4 + $0x28] sm:$0xff] %vm613_vm4, %v2017_v63  ;;  %v1163_v39 = vadd.f32 %v1096_v1, %v941_v42 }
 0x18b   : > { %v1226_v17 = vld [vmem:[#allocation4 + $0x40] sm:$0xff] }
 0x18c   : > { %v1448_v37 = vadd.f32 %v1380_v51, %v1226_v17  ;;  %1195 = vst.msk [vmem:[#allocation4 + $0x48] sm:$0xff] %vm613_vm4, %v1163_v39  ;;  %v6860_v14 = vpop.f32.mrf.mxu0  ;;  %v945_v39 = vld [vmem:[#allocation4 + $0x68] sm:$0xff] }
 0x18d   : > { %v1511_v61 = vld [vmem:[#allocation4 + $0x38] sm:$0xff]  ;;  %5956 = vmatmul.msk.bf16.gmra.mxu3 %vm280_vm1, %v1295_v6 }
 0x18e   : > { %1480 = vst.msk [vmem:[#allocation4 + $0x40] sm:$0xff] %vm613_vm4, %v1448_v37  ;;  %5939 = vmatmul.msk.bf16.gmra.mxu2 %vm280_vm1, %v1009_v53  ;;  %v1733_v31 = vadd.f32 %v6798_v46, %v1511_v61  ;;  %v944_v53 = vld [vmem:[#allocation4 + $0x60] sm:$0xff]  ;;  %v2681_v37 = vld [vmem:[#allocation2 + $0x32] sm:$0xff] }
 0x18f   : > { %v1796_v34 = vld [vmem:[#allocation4 + $0x30] sm:$0xff]  ;;  %5974 = vmatmul.msk.bf16.gmra.mxu0 %vm280_vm1, %v1582_v11  ;;  %v2682_v11 = vld [vmem:[#allocation2 + $0x3a] sm:$0xff] }
 0x190   : > { %v2018_v12 = vadd.f32 %v6819_v27, %v1796_v34  ;;  %1765 = vst.msk [vmem:[#allocation4 + $0x38] sm:$0xff] %vm613_vm4, %v1733_v31  ;;  %v1385_v19 = vpop.f32.mrf.mxu3  ;;  %v2713_v13 = vpack.c.bf16 %v2682_v11, %v2681_v37  ;;  %v2397_v11 = vld [vmem:[#allocation2 + $0x49] sm:$0xff] }
 0x191   : > { %v1099_v18 = vpop.f32.mrf.mxu2  ;;  %v6870_v22 = vpop.f32.mrf.mxu1 }
 0x192   : > { %2050 = vst.msk [vmem:[#allocation4 + $0x30] sm:$0xff] %vm613_vm4, %v2018_v12  ;;  %v1164_v20 = vadd.f32 %v1099_v18, %v942_v16 }
 0x193   : > { %v1227_v23 = vld [vmem:[#allocation4 + $0x48] sm:$0xff] }
 0x194   : > { %v1449_v46 = vadd.f32 %v1382_v60, %v1227_v23  ;;  %1196 = vst.msk [vmem:[#allocation4 + $0x50] sm:$0xff] %vm613_vm4, %v1164_v20  ;;  %v6873_v27 = vpop.f32.mrf.mxu0  ;;  %5990 = vmatmul.msk.bf16.gmra.mxu1 %vm280_vm1, %v1010_v25  ;;  %v1280_v60 = vld [vmem:[#allocation2 + $0x180] sm:$0xff]  ;;  %v1853_v23 = vld [vmem:[#allocation2 + $0x18a] sm:$0xff] }
 0x195   : > { %v1512_v28 = vld [vmem:[#allocation4 + $0x40] sm:$0xff]  ;;  %v1297_v31 = vpack.c.bf16 %v1281_v4, %v1280_v60 }
 0x196   : > { %1481 = vst.msk [vmem:[#allocation4 + $0x48] sm:$0xff] %vm613_vm4, %v1449_v46  ;;  %v1734_v29 = vadd.f32 %v6809_v3, %v1512_v28  ;;  %v1852_v20 = vld [vmem:[#allocation2 + $0x182] sm:$0xff] }
 0x197   : > { %v1797_v58 = vld [vmem:[#allocation4 + $0x38] sm:$0xff] }
 0x198   : > { %v2019_v0 = vadd.f32 %v6830_v35, %v1797_v58  ;;  %1766 = vst.msk [vmem:[#allocation4 + $0x40] sm:$0xff] %vm613_vm4, %v1734_v29  ;;  %v1387_v52 = vpop.f32.mrf.mxu3  ;;  %v1869_v29 = vpack.c.bf16 %v1853_v23, %v1852_v20 }
 0x199   : > { %v1101_v54 = vpop.f32.mrf.mxu2  ;;  %v6881_v44 = vpop.f32.mrf.mxu1 }
 0x19a   : > { %2051 = vst.msk [vmem:[#allocation4 + $0x38] sm:$0xff] %vm613_vm4, %v2019_v0  ;;  %v1165_v40 = vadd.f32 %v1101_v54, %v943_v33  ;;  %v2109_v33 = vld [vmem:[#allocation2 + $0x30] sm:$0xff]  ;;  %v2110_v54 = vld [vmem:[#allocation2 + $0x38] sm:$0xff] }
 0x19b   : > { %v1228_v45 = vld [vmem:[#allocation4 + $0x50] sm:$0xff] }
 0x19c   : > { %v1450_v3 = vadd.f32 %v1385_v19, %v1228_v45  ;;  %1197 = vst.msk [vmem:[#allocation4 + $0x58] sm:$0xff] %vm613_vm4, %v1165_v40  ;;  %v6884_v48 = vpop.f32.mrf.mxu0  ;;  %v2396_v40 = vld [vmem:[#allocation2 + $0x39] sm:$0xff] }
 0x19d   : > { %v1513_v35 = vld [vmem:[#allocation4 + $0x48] sm:$0xff]  ;;  %5957 = vmatmul.msk.bf16.gmra.mxu3 %vm280_vm1, %v1296_v41  ;;  %v947_v45 = vld [vmem:[#allocation4 + $0x78] sm:$0xff]  ;;  %v2427_v55 = vpack.c.bf16 %v2396_v40, %v2395_v38 }
 0x19e   : > { %1482 = vst.msk [vmem:[#allocation4 + $0x50] sm:$0xff] %vm613_vm4, %v1450_v3  ;;  %5940 = vmatmul.msk.bf16.gmra.mxu2 %vm280_vm1, %v1010_v25  ;;  %v1735_v49 = vadd.f32 %v6822_v10, %v1513_v35  ;;  %v946_v25 = vld [vmem:[#allocation4 + $0x70] sm:$0xff] }
 0x19f   : > { %v1798_v50 = vld [vmem:[#allocation4 + $0x40] sm:$0xff]  ;;  %5975 = vmatmul.msk.bf16.gmra.mxu0 %vm280_vm1, %v1583_v36  ;;  %v2683_v35 = vld [vmem:[#allocation2 + $0x4a] sm:$0xff] }
 0x1a0   : > { %v2020_v51 = vadd.f32 %v6846_v24, %v1798_v50  ;;  %1767 = vst.msk [vmem:[#allocation4 + $0x48] sm:$0xff] %vm613_vm4, %v1735_v49  ;;  %v1390_v59 = vpop.f32.mrf.mxu3  ;;  %v2684_v49 = vld [vmem:[#allocation2 + $0x52] sm:$0xff] }
 0x1a1   : > { %v1104_v9 = vpop.f32.mrf.mxu2  ;;  %v6894_v8 = vpop.f32.mrf.mxu1 }
 0x1a2   : > { %2052 = vst.msk [vmem:[#allocation4 + $0x40] sm:$0xff] %vm613_vm4, %v2020_v51  ;;  %v1166_v57 = vadd.f32 %v1104_v9, %v944_v53  ;;  %v2141_v51 = vpack.c.bf16 %v2110_v54, %v2109_v33  ;;  %v2714_v9 = vpack.c.bf16 %v2684_v49, %v2683_v35  ;;  %v2400_v35 = vld [vmem:[#allocation2 + $0x69] sm:$0xff] }
 0x1a3   : > { %v1229_v47 = vld [vmem:[#allocation4 + $0x58] sm:$0xff] }
 0x1a4   : > { %v1451_v10 = vadd.f32 %v1387_v52, %v1229_v47  ;;  %1198 = vst.msk [vmem:[#allocation4 + $0x60] sm:$0xff] %vm613_vm4, %v1166_v57  ;;  %v6897_v24 = vpop.f32.mrf.mxu0  ;;  %5991 = vmatmul.msk.bf16.gmra.mxu1 %vm280_vm1, %v1011_v62 }
 0x1a5   : > { %v1514_v63 = vld [vmem:[#allocation4 + $0x50] sm:$0xff] }
 0x1a6   : > { %1483 = vst.msk [vmem:[#allocation4 + $0x58] sm:$0xff] %vm613_vm4, %v1451_v10  ;;  %v1736_v42 = vadd.f32 %v6834_v32, %v1514_v63  ;;  %v948_v10 = vld [vmem:[#allocation4 + $0x80] sm:$0xff] }
 0x1a7   : > { %v1799_v1 = vld [vmem:[#allocation4 + $0x48] sm:$0xff] }
 0x1a8   : > { %v2021_v5 = vadd.f32 %v6857_v7, %v1799_v1  ;;  %1768 = vst.msk [vmem:[#allocation4 + $0x50] sm:$0xff] %vm613_vm4, %v1736_v42  ;;  %v1392_v17 = vpop.f32.mrf.mxu3 }
 0x1a9   : > { %v1106_v6 = vpop.f32.mrf.mxu2  ;;  %v6905_v34 = vpop.f32.mrf.mxu1 }
 0x1aa   : > { %2053 = vst.msk [vmem:[#allocation4 + $0x48] sm:$0xff] %vm613_vm4, %v2021_v5  ;;  %v1167_v61 = vadd.f32 %v1106_v6, %v945_v39  ;;  %v2112_v6 = vld [vmem:[#allocation2 + $0x50] sm:$0xff] }
 0x1ab   : > { %v1230_v12 = vld [vmem:[#allocation4 + $0x60] sm:$0xff] }
 0x1ac   : > { %v1452_v32 = vadd.f32 %v1390_v59, %v1230_v12  ;;  %1199 = vst.msk [vmem:[#allocation4 + $0x68] sm:$0xff] %vm613_vm4, %v1167_v61  ;;  %v6908_v15 = vpop.f32.mrf.mxu0  ;;  %v2398_v61 = vld [vmem:[#allocation2 + $0x51] sm:$0xff]  ;;  %v949_v12 = vld [vmem:[#allocation4 + $0x88] sm:$0xff] }
 0x1ad   : > { %v1515_v7 = vld [vmem:[#allocation4 + $0x58] sm:$0xff]  ;;  %5958 = vmatmul.msk.bf16.gmra.mxu3 %vm280_vm1, %v1297_v31  ;;  %v2428_v20 = vpack.c.bf16 %v2398_v61, %v2397_v11  ;;  %v2116_v61 = vld [vmem:[#allocation2 + $0x80] sm:$0xff] }
 0x1ae   : > { %1484 = vst.msk [vmem:[#allocation4 + $0x60] sm:$0xff] %vm613_vm4, %v1452_v32  ;;  %5941 = vmatmul.msk.bf16.gmra.mxu2 %vm280_vm1, %v1011_v62  ;;  %v1737_v16 = vadd.f32 %v6849_v43, %v1515_v7  ;;  %v2685_v7 = vld [vmem:[#allocation2 + $0x62] sm:$0xff] }
 0x1af   : > { %v1800_v18 = vld [vmem:[#allocation4 + $0x50] sm:$0xff]  ;;  %6028 = vmatmul.msk.bf16.vlgmr.msra.gmra.mxu0 %vm280_vm1, %v2713_v13 }
 0x1b0   : > { %v2022_v19 = vadd.f32 %v6870_v22, %v1800_v18  ;;  %1769 = vst.msk [vmem:[#allocation4 + $0x58] sm:$0xff] %vm613_vm4, %v1737_v16  ;;  %v1395_v28 = vpop.f32.mrf.mxu3  ;;  %v2686_v16 = vld [vmem:[#allocation2 + $0x6a] sm:$0xff] }
 0x1b1   : > { %v1109_v46 = vpop.f32.mrf.mxu2  ;;  %v6918_v30 = vpop.f32.mrf.mxu1 }
 0x1b2   : > { %2054 = vst.msk [vmem:[#allocation4 + $0x50] sm:$0xff] %vm613_vm4, %v2022_v19  ;;  %v1168_v58 = vadd.f32 %v1109_v46, %v946_v25  ;;  %v2715_v46 = vpack.c.bf16 %v2686_v16, %v2685_v7  ;;  %v2402_v7 = vld [vmem:[#allocation2 + $0x81] sm:$0xff] }
 0x1b3   : > { %v1231_v21 = vld [vmem:[#allocation4 + $0x68] sm:$0xff] }
 0x1b4   : > { %v1453_v43 = vadd.f32 %v1392_v17, %v1231_v21  ;;  %1200 = vst.msk [vmem:[#allocation4 + $0x70] sm:$0xff] %vm613_vm4, %v1168_v58  ;;  %v6921_v22 = vpop.f32.mrf.mxu0  ;;  %5992 = vmatmul.msk.bf16.gmra.mxu1 %vm280_vm1, %v1869_v29 }
 0x1b5   : > { %v1516_v0 = vld [vmem:[#allocation4 + $0x60] sm:$0xff] }
 0x1b6   : > { %1485 = vst.msk [vmem:[#allocation4 + $0x68] sm:$0xff] %vm613_vm4, %v1453_v43  ;;  %v1738_v52 = vadd.f32 %v6860_v14, %v1516_v0  ;;  %v950_v43 = vld [vmem:[#allocation4 + $0x90] sm:$0xff] }
 0x1b7   : > { %v1801_v26 = vld [vmem:[#allocation4 + $0x58] sm:$0xff] }
 0x1b8   : > { %v2023_v41 = vadd.f32 %v6881_v44, %v1801_v26  ;;  %1770 = vst.msk [vmem:[#allocation4 + $0x60] sm:$0xff] %vm613_vm4, %v1738_v52  ;;  %v1397_v36 = vpop.f32.mrf.mxu3 }
 0x1b9   : > { %v1111_v3 = vpop.f32.mrf.mxu2  ;;  %v6929_v56 = vpop.f32.mrf.mxu1 }
 0x1ba   : > { %2055 = vst.msk [vmem:[#allocation4 + $0x58] sm:$0xff] %vm613_vm4, %v2023_v41  ;;  %v1169_v50 = vadd.f32 %v1111_v3, %v947_v45  ;;  %v2114_v41 = vld [vmem:[#allocation2 + $0x68] sm:$0xff] }
 0x1bb   : > { %v1232_v14 = vld [vmem:[#allocation4 + $0x70] sm:$0xff] }
 0x1bc   : > { %v1454_v53 = vadd.f32 %v1395_v28, %v1232_v14  ;;  %1201 = vst.msk [vmem:[#allocation4 + $0x78] sm:$0xff] %vm613_vm4, %v1169_v50  ;;  %v6932_v44 = vpop.f32.mrf.mxu0  ;;  %v951_v50 = vld [vmem:[#allocation4 + $0x98] sm:$0xff] }
 0x1bd   : > { %v1517_v59 = vld [vmem:[#allocation4 + $0x68] sm:$0xff]  ;;  %6011 = vmatmul.msk.bf16.vlgmr.msra.gmra.mxu3 %vm280_vm1, %v2427_v55  ;;  %v2687_v14 = vld [vmem:[#allocation2 + $0x7a] sm:$0xff] }
 0x1be   : > { %1486 = vst.msk [vmem:[#allocation4 + $0x70] sm:$0xff] %vm613_vm4, %v1454_v53  ;;  %5994 = vmatmul.msk.bf16.vlgmr.msra.gmra.mxu2 %vm280_vm1, %v2141_v51  ;;  %v1739_v57 = vadd.f32 %v6873_v27, %v1517_v59  ;;  %v2688_v53 = vld [vmem:[#allocation2 + $0x82] sm:$0xff] }
 0x1bf   : > { %v1802_v47 = vld [vmem:[#allocation4 + $0x60] sm:$0xff]  ;;  %6029 = vmatmul.msk.bf16.gmra.mxu0 %vm280_vm1, %v2714_v9 }
 0x1c0   : > { %v2024_v62 = vadd.f32 %v6894_v8, %v1802_v47  ;;  %1771 = vst.msk [vmem:[#allocation4 + $0x68] sm:$0xff] %vm613_vm4, %v1739_v57  ;;  %v1400_v42 = vpop.f32.mrf.mxu3  ;;  %v2111_v8 = vld [vmem:[#allocation2 + $0x48] sm:$0xff] }
 0x1c1   : > { %v1114_v63 = vpop.f32.mrf.mxu2  ;;  %v6942_v60 = vpop.f32.mrf.mxu1  ;;  %v2142_v19 = vpack.c.bf16 %v2112_v6, %v2111_v8 }
 0x1c2   : > { %2056 = vst.msk [vmem:[#allocation4 + $0x60] sm:$0xff] %vm613_vm4, %v2024_v62  ;;  %v1170_v1 = vadd.f32 %v1114_v63, %v948_v10 }
 0x1c3   : > { %v1233_v4 = vld [vmem:[#allocation4 + $0x78] sm:$0xff] }
 0x1c4   : > { %v1455_v5 = vadd.f32 %v1397_v36, %v1233_v4  ;;  %1202 = vst.msk [vmem:[#allocation4 + $0x80] sm:$0xff] %vm613_vm4, %v1170_v1  ;;  %v6945_v27 = vpop.f32.mrf.mxu0  ;;  %v2399_v36 = vld [vmem:[#allocation2 + $0x61] sm:$0xff] }
 0x1c5   : > { %v1518_v39 = vld [vmem:[#allocation4 + $0x70] sm:$0xff]  ;;  %v2429_v57 = vpack.c.bf16 %v2400_v35, %v2399_v36  ;;  %v2118_v35 = vld [vmem:[#allocation2 + $0x98] sm:$0xff] }
 0x1c6   : > { %1487 = vst.msk [vmem:[#allocation4 + $0x78] sm:$0xff] %vm613_vm4, %v1455_v5  ;;  %v1740_v17 = vadd.f32 %v6884_v48, %v1518_v39  ;;  %v952_v5 = vld [vmem:[#allocation4 + $0xa0] sm:$0xff] }
 0x1c7   : > { %v1803_v37 = vld [vmem:[#allocation4 + $0x68] sm:$0xff] }
 0x1c8   : > { %v2025_v31 = vadd.f32 %v6905_v34, %v1803_v37  ;;  %1772 = vst.msk [vmem:[#allocation4 + $0x70] sm:$0xff] %vm613_vm4, %v1740_v17  ;;  %v1402_v13 = vpop.f32.mrf.mxu3 }
 0x1c9   : > { %v1116_v32 = vpop.f32.mrf.mxu2  ;;  %v6952_v23 = vpop.f32.mrf.mxu1 }
 0x1ca   : > { %2057 = vst.msk [vmem:[#allocation4 + $0x68] sm:$0xff] %vm613_vm4, %v2025_v31  ;;  %v1171_v18 = vadd.f32 %v1116_v32, %v949_v12 }
 0x1cb   : > { %v1234_v48 = vld [vmem:[#allocation4 + $0x80] sm:$0xff] }
 0x1cc   : > { %v1456_v25 = vadd.f32 %v1400_v42, %v1234_v48  ;;  %1203 = vst.msk [vmem:[#allocation4 + $0x88] sm:$0xff] %vm613_vm4, %v1171_v18  ;;  %v6955_v34 = vpop.f32.mrf.mxu0  ;;  %v953_v18 = vld [vmem:[#allocation4 + $0xa8] sm:$0xff]  ;;  %v2689_v48 = vld [vmem:[#allocation2 + $0x92] sm:$0xff] }
 0x1cd   : > { %v1519_v28 = vld [vmem:[#allocation4 + $0x78] sm:$0xff]  ;;  %6012 = vmatmul.msk.bf16.gmra.mxu3 %vm280_vm1, %v2428_v20 }
 0x1ce   : > { %1488 = vst.msk [vmem:[#allocation4 + $0x80] sm:$0xff] %vm613_vm4, %v1456_v25  ;;  %5995 = vmatmul.msk.bf16.gmra.mxu2 %vm280_vm1, %v2142_v19  ;;  %v1741_v29 = vadd.f32 %v6897_v24, %v1519_v28  ;;  %v2690_v25 = vld [vmem:[#allocation2 + $0x9a] sm:$0xff] }
 0x1cf   : > { %v1804_v58 = vld [vmem:[#allocation4 + $0x70] sm:$0xff]  ;;  %6030 = vmatmul.msk.bf16.gmra.mxu0 %vm280_vm1, %v2715_v46 }
 0x1d0   : > { %v2026_v21 = vadd.f32 %v6918_v30, %v1804_v58  ;;  %1773 = vst.msk [vmem:[#allocation4 + $0x78] sm:$0xff] %vm613_vm4, %v1741_v29  ;;  %v1405_v33 = vpop.f32.mrf.mxu3  ;;  %v2113_v30 = vld [vmem:[#allocation2 + $0x60] sm:$0xff] }
 0x1d1   : > { %v1119_v0 = vpop.f32.mrf.mxu2  ;;  %v6965_v52 = vpop.f32.mrf.mxu1  ;;  %v2143_v59 = vpack.c.bf16 %v2114_v41, %v2113_v30 }
 0x1d2   : > { %2058 = vst.msk [vmem:[#allocation4 + $0x70] sm:$0xff] %vm613_vm4, %v2026_v21  ;;  %v1172_v54 = vadd.f32 %v1119_v0, %v950_v43  ;;  %v2717_v21 = vpack.c.bf16 %v2690_v25, %v2689_v48  ;;  %v957_v25 = vld [vmem:[#allocation4 + $0xc8] sm:$0xff] }
 0x1d3   : > { %v1235_v26 = vld [vmem:[#allocation4 + $0x88] sm:$0xff] }
 0x1d4   : > { %v1457_v38 = vadd.f32 %v1402_v13, %v1235_v26  ;;  %1204 = vst.msk [vmem:[#allocation4 + $0x90] sm:$0xff] %vm613_vm4, %v1172_v54  ;;  %v6968_v24 = vpop.f32.mrf.mxu0  ;;  %v2401_v13 = vld [vmem:[#allocation2 + $0x79] sm:$0xff] }
 0x1d5   : > { %v1520_v40 = vld [vmem:[#allocation4 + $0x80] sm:$0xff]  ;;  %v2430_v29 = vpack.c.bf16 %v2402_v7, %v2401_v13  ;;  %v2120_v7 = vld [vmem:[#allocation2 + $0xb0] sm:$0xff] }
 0x1d6   : > { %1489 = vst.msk [vmem:[#allocation4 + $0x88] sm:$0xff] %vm613_vm4, %v1457_v38  ;;  %v1742_v45 = vadd.f32 %v6908_v15, %v1520_v40  ;;  %v2716_v15 = vpack.c.bf16 %v2688_v53, %v2687_v14  ;;  %v954_v38 = vld [vmem:[#allocation4 + $0xb0] sm:$0xff]  ;;  %v955_v53 = vld [vmem:[#allocation4 + $0xb8] sm:$0xff] }
 0x1d7   : > { %v1805_v3 = vld [vmem:[#allocation4 + $0x78] sm:$0xff] }
 0x1d8   : > { %v2027_v49 = vadd.f32 %v6929_v56, %v1805_v3  ;;  %1774 = vst.msk [vmem:[#allocation4 + $0x80] sm:$0xff] %vm613_vm4, %v1742_v45  ;;  %v1407_v55 = vpop.f32.mrf.mxu3 }
 0x1d9   : > { %v1121_v51 = vpop.f32.mrf.mxu2  ;;  %v6976_v10 = vpop.f32.mrf.mxu1 }
 0x1da   : > { %2059 = vst.msk [vmem:[#allocation4 + $0x78] sm:$0xff] %vm613_vm4, %v2027_v49  ;;  %v1173_v9 = vadd.f32 %v1121_v51, %v951_v50  ;;  %v2403_v51 = vld [vmem:[#allocation2 + $0x91] sm:$0xff] }
 0x1db   : > { %v1236_v47 = vld [vmem:[#allocation4 + $0x90] sm:$0xff] }
 0x1dc   : > { %v1458_v62 = vadd.f32 %v1405_v33, %v1236_v47  ;;  %1205 = vst.msk [vmem:[#allocation4 + $0x98] sm:$0xff] %vm613_vm4, %v1173_v9  ;;  %v6978_v56 = vpop.f32.mrf.mxu0  ;;  %v2692_v47 = vld [vmem:[#allocation2 + $0xb2] sm:$0xff] }
 0x1dd   : > { %v1521_v63 = vld [vmem:[#allocation4 + $0x88] sm:$0xff]  ;;  %6013 = vmatmul.msk.bf16.gmra.mxu3 %vm280_vm1, %v2429_v57 }
 0x1de   : > { %1490 = vst.msk [vmem:[#allocation4 + $0x90] sm:$0xff] %vm613_vm4, %v1458_v62  ;;  %5996 = vmatmul.msk.bf16.gmra.mxu2 %vm280_vm1, %v2143_v59  ;;  %v1743_v42 = vadd.f32 %v6921_v22, %v1521_v63  ;;  %v2691_v57 = vld [vmem:[#allocation2 + $0xaa] sm:$0xff] }
 0x1df   : > { %v1806_v1 = vld [vmem:[#allocation4 + $0x80] sm:$0xff]  ;;  %6031 = vmatmul.msk.bf16.gmra.mxu0 %vm280_vm1, %v2716_v15 }
 0x1e0   : > { %v2028_v4 = vadd.f32 %v6942_v60, %v1806_v1  ;;  %1775 = vst.msk [vmem:[#allocation4 + $0x88] sm:$0xff] %vm613_vm4, %v1743_v42  ;;  %v1410_v8 = vpop.f32.mrf.mxu3  ;;  %v2115_v60 = vld [vmem:[#allocation2 + $0x78] sm:$0xff] }
 0x1e1   : > { %v1124_v39 = vpop.f32.mrf.mxu2  ;;  %v6993_v12 = vpop.f32.mrf.mxu1  ;;  %v2144_v28 = vpack.c.bf16 %v2116_v61, %v2115_v60 }
 0x1e2   : > { %2060 = vst.msk [vmem:[#allocation4 + $0x80] sm:$0xff] %vm613_vm4, %v2028_v4  ;;  %v1174_v6 = vadd.f32 %v1124_v39, %v952_v5  ;;  %v2718_v4 = vpack.c.bf16 %v2692_v47, %v2691_v57 }
 0x1e3   : > { %v1237_v17 = vld [vmem:[#allocation4 + $0x98] sm:$0xff] }
 0x1e4   : > { %v1459_v37 = vadd.f32 %v1407_v55, %v1237_v17  ;;  %1206 = vst.msk [vmem:[#allocation4 + $0xa0] sm:$0xff] %vm613_vm4, %v1174_v6  ;;  %v6989_v11 = vpop.f32.mrf.mxu0  ;;  %v2404_v55 = vld [vmem:[#allocation2 + $0x99] sm:$0xff] }
 0x1e5   : > { %v1522_v22 = vld [vmem:[#allocation4 + $0x90] sm:$0xff]  ;;  %v2431_v63 = vpack.c.bf16 %v2404_v55, %v2403_v51  ;;  %v956_v17 = vld [vmem:[#allocation4 + $0xc0] sm:$0xff]  ;;  %v2122_v55 = vld [vmem:[#allocation2 + $0xc8] sm:$0xff] }
 0x1e6   : > { %1491 = vst.msk [vmem:[#allocation4 + $0x98] sm:$0xff] %vm613_vm4, %v1459_v37  ;;  %v1744_v31 = vadd.f32 %v6932_v44, %v1522_v22  ;;  %v2121_v51 = vld [vmem:[#allocation2 + $0xc0] sm:$0xff] }
 0x1e7   : > { %v1807_v32 = vld [vmem:[#allocation4 + $0x88] sm:$0xff] }
 0x1e8   : > { %v2029_v16 = vadd.f32 %v6952_v23, %v1807_v32  ;;  %1776 = vst.msk [vmem:[#allocation4 + $0x90] sm:$0xff] %vm613_vm4, %v1744_v31  ;;  %v1412_v20 = vpop.f32.mrf.mxu3 }
 0x1e9   : > { %v1126_v19 = vpop.f32.mrf.mxu2  ;;  %v1984_v26 = vpop.f32.mrf.mxu1 }
 0x1ea   : > { %2061 = vst.msk [vmem:[#allocation4 + $0x88] sm:$0xff] %vm613_vm4, %v2029_v16  ;;  %v1175_v46 = vadd.f32 %v1126_v19, %v953_v18  ;;  %v2405_v19 = vld [vmem:[#allocation2 + $0xa9] sm:$0xff] }
 0x1eb   : > { %v1238_v44 = vld [vmem:[#allocation4 + $0xa0] sm:$0xff] }
 0x1ec   : > { %v1460_v58 = vadd.f32 %v1410_v8, %v1238_v44  ;;  %1207 = vst.msk [vmem:[#allocation4 + $0xa8] sm:$0xff] %vm613_vm4, %v1175_v46  ;;  %v6999_v43 = vpop.f32.mrf.mxu0  ;;  %v2694_v44 = vld [vmem:[#allocation2 + $0xca] sm:$0xff] }
 0x1ed   : > { %v1523_v23 = vld [vmem:[#allocation4 + $0x98] sm:$0xff]  ;;  %6014 = vmatmul.msk.bf16.gmra.mxu3 %vm280_vm1, %v2430_v29  ;;  %v2693_v29 = vld [vmem:[#allocation2 + $0xc2] sm:$0xff] }
 0x1ee   : > { %1492 = vst.msk [vmem:[#allocation4 + $0xa0] sm:$0xff] %vm613_vm4, %v1460_v58  ;;  %5997 = vmatmul.msk.bf16.gmra.mxu2 %vm280_vm1, %v2144_v28  ;;  %v1745_v0 = vadd.f32 %v6945_v27, %v1523_v23 }
 0x1ef   : > { %v1808_v33 = vld [vmem:[#allocation4 + $0x90] sm:$0xff]  ;;  %6032 = vmatmul.msk.bf16.gmra.mxu0 %vm280_vm1, %v2717_v21 }
 0x1f0   : > { %v2030_v54 = vadd.f32 %v6965_v52, %v1808_v33  ;;  %1777 = vst.msk [vmem:[#allocation4 + $0x98] sm:$0xff] %vm613_vm4, %v1745_v0  ;;  %v1415_v30 = vpop.f32.mrf.mxu3  ;;  %v2117_v52 = vld [vmem:[#allocation2 + $0x90] sm:$0xff] }
 0x1f1   : > { %v1129_v40 = vpop.f32.mrf.mxu2  ;;  %v2145_v15 = vpack.c.bf16 %v2118_v35, %v2117_v52  ;;  %v1987_v42 = vpop.f32.mrf.mxu1 }
 0x1f2   : > { %2062 = vst.msk [vmem:[#allocation4 + $0x90] sm:$0xff] %vm613_vm4, %v2030_v54  ;;  %v1176_v41 = vadd.f32 %v1129_v40, %v954_v38 }
 0x1f3   : > { %v1239_v45 = vld [vmem:[#allocation4 + $0xa8] sm:$0xff] }
 0x1f4   : > { %v1461_v3 = vadd.f32 %v1412_v20, %v1239_v45  ;;  %1208 = vst.msk [vmem:[#allocation4 + $0xb0] sm:$0xff] %vm613_vm4, %v1176_v41  ;;  %v7010_v36 = vpop.f32.mrf.mxu0  ;;  %v2406_v20 = vld [vmem:[#allocation2 + $0xb1] sm:$0xff] }
 0x1f5   : > { %v1524_v27 = vld [vmem:[#allocation4 + $0xa0] sm:$0xff]  ;;  %v2432_v23 = vpack.c.bf16 %v2406_v20, %v2405_v19  ;;  %v958_v45 = vld [vmem:[#allocation4 + $0xd0] sm:$0xff]  ;;  %v2123_v19 = vld [vmem:[#allocation2 + $0xd8] sm:$0xff] }
 0x1f6   : > { %1493 = vst.msk [vmem:[#allocation4 + $0xa8] sm:$0xff] %vm613_vm4, %v1461_v3  ;;  %v1746_v49 = vadd.f32 %v6955_v34, %v1524_v27  ;;  %v2124_v20 = vld [vmem:[#allocation2 + $0xe0] sm:$0xff] }
 0x1f7   : > { %v1809_v50 = vld [vmem:[#allocation4 + $0x98] sm:$0xff] }
 0x1f8   : > { %v2031_v14 = vadd.f32 %v6976_v10, %v1809_v50  ;;  %1778 = vst.msk [vmem:[#allocation4 + $0xa0] sm:$0xff] %vm613_vm4, %v1746_v49  ;;  %v1417_v59 = vpop.f32.mrf.mxu3 }
 0x1f9   : > { %v1131_v9 = vpop.f32.mrf.mxu2  ;;  %v1989_v32 = vpop.f32.mrf.mxu1 }
 0x1fa   : > { %2063 = vst.msk [vmem:[#allocation4 + $0x98] sm:$0xff] %vm613_vm4, %v2031_v14  ;;  %v1177_v62 = vadd.f32 %v1131_v9, %v955_v53  ;;  %v2407_v9 = vld [vmem:[#allocation2 + $0xc1] sm:$0xff] }
 0x1fb   : > { %v1240_v1 = vld [vmem:[#allocation4 + $0xb0] sm:$0xff] }
 0x1fc   : > { %v1462_v34 = vadd.f32 %v1415_v30, %v1240_v1  ;;  %1209 = vst.msk [vmem:[#allocation4 + $0xb8] sm:$0xff] %vm613_vm4, %v1177_v62  ;;  %v7018_v5 = vpop.f32.mrf.mxu0  ;;  %v959_v62 = vld [vmem:[#allocation4 + $0xd8] sm:$0xff]  ;;  %v2696_v1 = vld [vmem:[#allocation2 + $0xe2] sm:$0xff] }
 0x1fd   : > { %v1525_v10 = vld [vmem:[#allocation4 + $0xa8] sm:$0xff]  ;;  %6015 = vmatmul.msk.bf16.gmra.mxu3 %vm280_vm1, %v2431_v63 }
 0x1fe   : > { %1494 = vst.msk [vmem:[#allocation4 + $0xb0] sm:$0xff] %vm613_vm4, %v1462_v34  ;;  %5998 = vmatmul.msk.bf16.gmra.mxu2 %vm280_vm1, %v2145_v15  ;;  %v1747_v39 = vadd.f32 %v6968_v24, %v1525_v10 }
 0x1ff   : > { %v1810_v8 = vld [vmem:[#allocation4 + $0xa0] sm:$0xff]  ;;  %6033 = vmatmul.msk.bf16.gmra.mxu0 %vm280_vm1, %v2718_v4  ;;  %v2147_v4 = vpack.c.bf16 %v2122_v55, %v2121_v51 }
 0x200   : > { %v2032_v6 = vadd.f32 %v6993_v12, %v1810_v8  ;;  %1779 = vst.msk [vmem:[#allocation4 + $0xa8] sm:$0xff] %vm613_vm4, %v1747_v39  ;;  %v1420_v22 = vpop.f32.mrf.mxu3  ;;  %v2119_v12 = vld [vmem:[#allocation2 + $0xa8] sm:$0xff] }
 0x201   : > { %v1134_v37 = vpop.f32.mrf.mxu2  ;;  %v2146_v21 = vpack.c.bf16 %v2120_v7, %v2119_v12  ;;  %v1992_v40 = vpop.f32.mrf.mxu1 }
 0x202   : > { %2064 = vst.msk [vmem:[#allocation4 + $0xa0] sm:$0xff] %vm613_vm4, %v2032_v6  ;;  %v1178_v60 = vadd.f32 %v1134_v37, %v956_v17 }
 0x203   : > { %v1241_v61 = vld [vmem:[#allocation4 + $0xb8] sm:$0xff] }
 0x204   : > { %v1463_v31 = vadd.f32 %v1417_v59, %v1241_v61  ;;  %1210 = vst.msk [vmem:[#allocation4 + $0xc0] sm:$0xff] %vm613_vm4, %v1178_v60  ;;  %v7029_v13 = vpop.f32.mrf.mxu0  ;;  %v2408_v59 = vld [vmem:[#allocation2 + $0xc9] sm:$0xff]  ;;  %v960_v61 = vld [vmem:[#allocation4 + $0xe0] sm:$0xff] }
 0x205   : > { %v1526_v24 = vld [vmem:[#allocation4 + $0xb0] sm:$0xff]  ;;  %v2433_v10 = vpack.c.bf16 %v2408_v59, %v2407_v9  ;;  %v2126_v59 = vld [vmem:[#allocation2 + $0xf8] sm:$0xff] }
 0x206   : > { %1495 = vst.msk [vmem:[#allocation4 + $0xb8] sm:$0xff] %vm613_vm4, %v1463_v31  ;;  %v1748_v16 = vadd.f32 %v6978_v56, %v1526_v24  ;;  %v2719_v56 = vpack.c.bf16 %v2694_v44, %v2693_v29  ;;  %v961_v44 = vld [vmem:[#allocation4 + $0xe8] sm:$0xff] }
 0x207   : > { %v1811_v18 = vld [vmem:[#allocation4 + $0xa8] sm:$0xff] }
 0x208   : > { %v2033_v48 = vadd.f32 %v1984_v26, %v1811_v18  ;;  %1780 = vst.msk [vmem:[#allocation4 + $0xb0] sm:$0xff] %vm613_vm4, %v1748_v16  ;;  %v1422_v28 = vpop.f32.mrf.mxu3 }
 0x209   : > { %v1136_v46 = vpop.f32.mrf.mxu2  ;;  %v1994_v47 = vpop.f32.mrf.mxu1 }
 0x20a   : > { %2065 = vst.msk [vmem:[#allocation4 + $0xa8] sm:$0xff] %vm613_vm4, %v2033_v48  ;;  %v1179_v58 = vadd.f32 %v1136_v46, %v957_v25  ;;  %v2409_v46 = vld [vmem:[#allocation2 + $0xd9] sm:$0xff] }
 0x20b   : > { %v1242_v0 = vld [vmem:[#allocation4 + $0xc0] sm:$0xff] }
 0x20c   : > { %v1464_v33 = vadd.f32 %v1420_v22, %v1242_v0  ;;  %1211 = vst.msk [vmem:[#allocation4 + $0xc8] sm:$0xff] %vm613_vm4, %v1179_v58  ;;  %v7036_v54 = vpop.f32.mrf.mxu0  ;;  %v2698_v0 = vld [vmem:[#allocation2 + $0xfa] sm:$0xff] }
 0x20d   : > { %v1527_v26 = vld [vmem:[#allocation4 + $0xb8] sm:$0xff]  ;;  %6016 = vmatmul.msk.bf16.gmra.mxu3 %vm280_vm1, %v2432_v23 }
 0x20e   : > { %1496 = vst.msk [vmem:[#allocation4 + $0xc0] sm:$0xff] %vm613_vm4, %v1464_v33  ;;  %5999 = vmatmul.msk.bf16.gmra.mxu2 %vm280_vm1, %v2146_v21  ;;  %v1749_v38 = vadd.f32 %v6989_v11, %v1527_v26  ;;  %v2697_v23 = vld [vmem:[#allocation2 + $0xf2] sm:$0xff] }
 0x20f   : > { %v1812_v30 = vld [vmem:[#allocation4 + $0xb0] sm:$0xff]  ;;  %6034 = vmatmul.msk.bf16.gmra.mxu0 %vm280_vm1, %v2719_v56  ;;  %v2148_v56 = vpack.c.bf16 %v2124_v20, %v2123_v19  ;;  %v2076_v20 = vld [vmem:[#allocation4] sm:$0xff] }
 0x210   : > { %v2034_v41 = vadd.f32 %v1987_v42, %v1812_v30  ;;  %1781 = vst.msk [vmem:[#allocation4 + $0xb8] sm:$0xff] %vm613_vm4, %v1749_v38  ;;  %v1425_v27 = vpop.f32.mrf.mxu3  ;;  %v2695_v42 = vld [vmem:[#allocation2 + $0xda] sm:$0xff]  ;;  %v2721_v30 = vpack.c.bf16 %v2698_v0, %v2697_v23  ;;  %v2128_v23 = vld [vmem:[#allocation2 + $0x110] sm:$0xff] }
 0x211   : > { %v1139_v3 = vpop.f32.mrf.mxu2  ;;  %v1997_v12 = vpop.f32.mrf.mxu1 }
 0x212   : > { %2066 = vst.msk [vmem:[#allocation4 + $0xb0] sm:$0xff] %vm613_vm4, %v2034_v41  ;;  %v1180_v52 = vadd.f32 %v1139_v3, %v958_v45 }
 0x213   : > { %v1243_v35 = vld [vmem:[#allocation4 + $0xc8] sm:$0xff] }
 0x214   : > { %v1465_v49 = vadd.f32 %v1422_v28, %v1243_v35  ;;  %1212 = vst.msk [vmem:[#allocation4 + $0xd0] sm:$0xff] %vm613_vm4, %v1180_v52  ;;  %v7046_v50 = vpop.f32.mrf.mxu0  ;;  %v2410_v28 = vld [vmem:[#allocation2 + $0xe1] sm:$0xff]  ;;  %v962_v35 = vld [vmem:[#allocation4 + $0xf0] sm:$0xff] }
 0x215   : > { %v1528_v11 = vld [vmem:[#allocation4 + $0xc0] sm:$0xff]  ;;  %v2434_v26 = vpack.c.bf16 %v2410_v28, %v2409_v46 }
 0x216   : > { %1497 = vst.msk [vmem:[#allocation4 + $0xc8] sm:$0xff] %vm613_vm4, %v1465_v49  ;;  %v1750_v14 = vadd.f32 %v6999_v43, %v1528_v11  ;;  %v2720_v43 = vpack.c.bf16 %v2696_v1, %v2695_v42  ;;  %v963_v1 = vld [vmem:[#allocation4 + $0xf8] sm:$0xff] }
 0x217   : > { %v1813_v53 = vld [vmem:[#allocation4 + $0xb8] sm:$0xff] }
 0x218   : > { %v2035_v57 = vadd.f32 %v1989_v32, %v1813_v53  ;;  %1782 = vst.msk [vmem:[#allocation4 + $0xc0] sm:$0xff] %vm613_vm4, %v1750_v14  ;;  %v1427_v63 = vpop.f32.mrf.mxu3 }
 0x219   : > { %v1141_v15 = vpop.f32.mrf.mxu2 }
 0x21a   : > { %2067 = vst.msk [vmem:[#allocation4 + $0xb8] sm:$0xff] %vm613_vm4, %v2035_v57  ;;  %v1181_v34 = vadd.f32 %v1141_v15, %v959_v62  ;;  %v2411_v15 = vld [vmem:[#allocation2 + $0xf1] sm:$0xff] }
 0x21b   : > { %v1244_v39 = vld [vmem:[#allocation4 + $0xd0] sm:$0xff] }
 0x21c   : > { %v1466_v8 = vadd.f32 %v1425_v27, %v1244_v39  ;;  %1213 = vst.msk [vmem:[#allocation4 + $0xd8] sm:$0xff] %vm613_vm4, %v1181_v34  ;;  %v7053_v6 = vpop.f32.mrf.mxu0  ;;  %v2700_v39 = vld [vmem:[#allocation2 + $0x112] sm:$0xff] }
 0x21d   : > { %v1529_v17 = vld [vmem:[#allocation4 + $0xc8] sm:$0xff]  ;;  %6017 = vmatmul.msk.bf16.gmra.mxu3 %vm280_vm1, %v2433_v10 }
 0x21e   : > { %1498 = vst.msk [vmem:[#allocation4 + $0xd0] sm:$0xff] %vm613_vm4, %v1466_v8  ;;  %6000 = vmatmul.msk.bf16.gmra.mxu2 %vm280_vm1, %v2147_v4  ;;  %v1751_v37 = vadd.f32 %v7010_v36, %v1529_v17  ;;  %v2699_v10 = vld [vmem:[#allocation2 + $0x10a] sm:$0xff] }
 0x21f   : > { %v1814_v22 = vld [vmem:[#allocation4 + $0xc0] sm:$0xff]  ;;  %6035 = vmatmul.msk.bf16.gmra.mxu0 %vm280_vm1, %v2720_v43 }
 0x220   : > { %v2036_v60 = vadd.f32 %v1992_v40, %v1814_v22  ;;  %1783 = vst.msk [vmem:[#allocation4 + $0xc8] sm:$0xff] %vm613_vm4, %v1751_v37  ;;  %v1430_v32 = vpop.f32.mrf.mxu3  ;;  %v2722_v22 = vpack.c.bf16 %v2700_v39, %v2699_v10 }
 0x221   : > { %v1144_v31 = vpop.f32.mrf.mxu2 }
 0x222   : > { %2068 = vst.msk [vmem:[#allocation4 + $0xc0] sm:$0xff] %vm613_vm4, %v2036_v60  ;;  %v1182_v24 = vadd.f32 %v1144_v31, %v960_v61 }
 0x223   : > { %v1245_v7 = vld [vmem:[#allocation4 + $0xd8] sm:$0xff] }
 0x224   : > { %v1467_v16 = vadd.f32 %v1427_v63, %v1245_v7  ;;  %1214 = vst.msk [vmem:[#allocation4 + $0xe0] sm:$0xff] %vm613_vm4, %v1182_v24  ;;  %v7063_v18 = vpop.f32.mrf.mxu0  ;;  %v2412_v63 = vld [vmem:[#allocation2 + $0xf9] sm:$0xff] }
 0x225   : > { %v1530_v36 = vld [vmem:[#allocation4 + $0xd0] sm:$0xff]  ;;  %v2435_v43 = vpack.c.bf16 %v2412_v63, %v2411_v15  ;;  %v3150_v24 = vld [vmem:[#allocation3 + $0x8] sm:$0xff] }
 0x226   : > { %1499 = vst.msk [vmem:[#allocation4 + $0xd8] sm:$0xff] %vm613_vm4, %v1467_v16  ;;  %v1752_v48 = vadd.f32 %v7018_v5, %v1530_v36  ;;  %v1999_v5 = vpop.f32.mrf.mxu1  ;;  %v6060_v36 = vld [vmem:[%s8452_s4 + $0x4] sm:$0xf] }
 0x227   : > { %v1815_v25 = vld [vmem:[#allocation4 + $0xc8] sm:$0xff] }
 0x228   : > { %v2037_v29 = vadd.f32 %v1994_v47, %v1815_v25  ;;  %1784 = vst.msk [vmem:[#allocation4 + $0xd0] sm:$0xff] %vm613_vm4, %v1752_v48  ;;  %v1432_v21 = vpop.f32.mrf.mxu3  ;;  %v3502_v25 = vsel %vm3246_vm5, %v6060_v36, 0 }
 0x229   : > { %v1146_v58 = vpop.f32.mrf.mxu2  ;;  %3511 = vmatpush.bf16.msrb.mxu2 %v3502_v25 }
 0x22a   : > { %2069 = vst.msk [vmem:[#allocation4 + $0xc8] sm:$0xff] %vm613_vm4, %v2037_v29  ;;  %v1183_v33 = vadd.f32 %v1146_v58, %v961_v44 }
 0x22b   : > { %v1246_v38 = vld [vmem:[#allocation4 + $0xe0] sm:$0xff] }
 0x22c   : > { %v1468_v40 = vadd.f32 %v1430_v32, %v1246_v38  ;;  %1215 = vst.msk [vmem:[#allocation4 + $0xe8] sm:$0xff] %vm613_vm4, %v1183_v33  ;;  %v7070_v41 = vpop.f32.mrf.mxu0  ;;  %v3149_v32 = vld [vmem:[#allocation3] sm:$0xff] }
 0x22d   : > { %v1531_v45 = vld [vmem:[#allocation4 + $0xd8] sm:$0xff]  ;;  %6018 = vmatmul.msk.bf16.gmra.mxu3 %vm280_vm1, %v2434_v26  ;;  %v3181_v7 = vpack.c.bf16 %v3150_v24, %v3149_v32 }
 0x22e   : > { %1500 = vst.msk [vmem:[#allocation4 + $0xe0] sm:$0xff] %vm613_vm4, %v1468_v40  ;;  %6001 = vmatmul.msk.bf16.gmra.mxu2 %vm280_vm1, %v2148_v56  ;;  %v1753_v3 = vadd.f32 %v7029_v13, %v1531_v45  ;;  %v2125_v13 = vld [vmem:[#allocation2 + $0xf0] sm:$0xff]  ;;  %v2002_v47 = vpop.f32.mrf.mxu1  ;;  %v6077_v40 = vld [vmem:[%s8452_s4 + $0x8] sm:$0xf] }
 0x22f   : > { %v1816_v27 = vld [vmem:[#allocation4 + $0xd0] sm:$0xff]  ;;  %6036 = vmatmul.msk.bf16.gmra.mxu0 %vm280_vm1, %v2721_v30  ;;  %v2149_v8 = vpack.c.bf16 %v2126_v59, %v2125_v13  ;;  %6044 = vmatmul.msk.bf16.vlgmr.msra.gmra.mxu1 %vm613_vm4, %v3181_v7  ;;  %v2704_v7 = vld [vmem:[#allocation2 + $0x142] sm:$0xff] }
 0x230   : > { %v2038_v52 = vadd.f32 %v1997_v12, %v1816_v27  ;;  %1785 = vst.msk [vmem:[#allocation4 + $0xd8] sm:$0xff] %vm613_vm4, %v1753_v3  ;;  %v1435_v11 = vpop.f32.mrf.mxu3  ;;  %v2413_v56 = vld [vmem:[#allocation2 + $0x109] sm:$0xff]  ;;  %v2414_v26 = vld [vmem:[#allocation2 + $0x111] sm:$0xff]  ;;  %v3788_v3 = vsel %vm3246_vm5, %v6077_v40, 0  ;;  %v2132_v40 = vld [vmem:[#allocation2 + $0x140] sm:$0xff] }
 0x231   : > { %v1149_v49 = vpop.f32.mrf.mxu2  ;;  %v2701_v27 = vld [vmem:[#allocation2 + $0x122] sm:$0xff]  ;;  %3797 = vmatpush.bf16.msrb.mxu3 %v3788_v3  ;;  %v2417_v3 = vld [vmem:[#allocation2 + $0x139] sm:$0xff] }
 0x232   : > { %2070 = vst.msk [vmem:[#allocation4 + $0xd0] sm:$0xff] %vm613_vm4, %v2038_v52  ;;  %v1184_v51 = vadd.f32 %v1149_v49, %v962_v35  ;;  %v2436_v49 = vpack.c.bf16 %v2414_v26, %v2413_v56 }
 0x233   : > { %v1247_v55 = vld [vmem:[#allocation4 + $0xe8] sm:$0xff] }
 0x234   : > { %v1469_v14 = vadd.f32 %v1432_v21, %v1247_v55  ;;  %1216 = vst.msk [vmem:[#allocation4 + $0xf0] sm:$0xff] %vm613_vm4, %v1184_v51  ;;  %v7080_v53 = vpop.f32.mrf.mxu0  ;;  %v2127_v21 = vld [vmem:[#allocation2 + $0x108] sm:$0xff] }
 0x235   : > { %v1532_v9 = vld [vmem:[#allocation4 + $0xe0] sm:$0xff]  ;;  %v2150_v35 = vpack.c.bf16 %v2128_v23, %v2127_v21 }
 0x236   : > { %1501 = vst.msk [vmem:[#allocation4 + $0xe8] sm:$0xff] %vm613_vm4, %v1469_v14  ;;  %v1754_v57 = vadd.f32 %v7036_v54, %v1532_v9  ;;  %v2004_v19 = vpop.f32.mrf.mxu1 }
 0x237   : > { %v1817_v62 = vld [vmem:[#allocation4 + $0xd8] sm:$0xff] }
 0x238   : > { %v2039_v42 = vadd.f32 %v1999_v5, %v1817_v62  ;;  %1786 = vst.msk [vmem:[#allocation4 + $0xe0] sm:$0xff] %vm613_vm4, %v1754_v57  ;;  %v1437_v4 = vpop.f32.mrf.mxu3  ;;  %v2077_v5 = vld [vmem:[#allocation4 + $0x8] sm:$0xff]  ;;  %v2078_v62 = vld [vmem:[#allocation4 + $0x10] sm:$0xff] }
 0x239   : > { %v1151_v34 = vpop.f32.mrf.mxu2 }
 0x23a   : > { %2071 = vst.msk [vmem:[#allocation4 + $0xd8] sm:$0xff] %vm613_vm4, %v2039_v42  ;;  %v1185_v54 = vadd.f32 %v1151_v34, %v963_v1 }
 0x23b   : > { %v1248_v17 = vld [vmem:[#allocation4 + $0xf0] sm:$0xff] }
 0x23c   : > { %v1470_v37 = vadd.f32 %v1435_v11, %v1248_v17  ;;  %1217 = vst.msk [vmem:[#allocation4 + $0xf8] sm:$0xff] %vm613_vm4, %v1185_v54  ;;  %v7093_v60 = vpop.f32.mrf.mxu0  ;;  %v2129_v54 = vld [vmem:[#allocation2 + $0x120] sm:$0xff] }
 0x23d   : > { %v1533_v61 = vld [vmem:[#allocation4 + $0xe8] sm:$0xff]  ;;  %6019 = vmatmul.msk.bf16.gmra.mxu3 %vm280_vm1, %v2435_v43 }
 0x23e   : > { %1502 = vst.msk [vmem:[#allocation4 + $0xf0] sm:$0xff] %vm613_vm4, %v1470_v37  ;;  %6002 = vmatmul.msk.bf16.gmra.mxu2 %vm280_vm1, %v2149_v8  ;;  %v1755_v31 = vadd.f32 %v7046_v50, %v1533_v61  ;;  %v2007_v51 = vpop.f32.mrf.mxu1  ;;  %v2130_v8 = vld [vmem:[#allocation2 + $0x128] sm:$0xff] }
 0x23f   : > { %v1818_v12 = vld [vmem:[#allocation4 + $0xe0] sm:$0xff]  ;;  %6037 = vmatmul.msk.bf16.gmra.mxu0 %vm280_vm1, %v2722_v22  ;;  %v2416_v37 = vld [vmem:[#allocation2 + $0x129] sm:$0xff]  ;;  %v2151_v36 = vpack.c.bf16 %v2130_v8, %v2129_v54 }
 0x240   : > { %v2040_v16 = vadd.f32 %v2002_v47, %v1818_v12  ;;  %1787 = vst.msk [vmem:[#allocation4 + $0xe8] sm:$0xff] %vm613_vm4, %v1755_v31  ;;  %v2505_v50 = vpop.f32.mrf.mxu3  ;;  %v2415_v17 = vld [vmem:[#allocation2 + $0x121] sm:$0xff]  ;;  %v6094_v61 = vld [vmem:[%s8452_s4 + $0xc] sm:$0xf]  ;;  %v2079_v31 = vld [vmem:[#allocation4 + $0x18] sm:$0xff] }
 0x241   : > { %v2219_v48 = vpop.f32.mrf.mxu2  ;;  %v4074_v24 = vsel %vm3246_vm5, %v6094_v61, 0  ;;  %v2703_v12 = vld [vmem:[#allocation2 + $0x13a] sm:$0xff] }
 0x242   : > { %2072 = vst.msk [vmem:[#allocation4 + $0xe0] sm:$0xff] %vm613_vm4, %v2040_v16  ;;  %v2299_v46 = vadd.f32 %v2219_v48, %v2076_v20  ;;  %4083 = vmatpush.bf16.msrb.mxu0 %v4074_v24  ;;  %v2419_v24 = vld [vmem:[#allocation2 + $0x151] sm:$0xff] }
 0x243   : > { %v1249_v28 = vld [vmem:[#allocation4 + $0xf8] sm:$0xff] }
 0x244   : > { %v1471_v29 = vadd.f32 %v1437_v4, %v1249_v28  ;;  %2331 = vst.msk [vmem:[#allocation4] sm:$0xff] %vm613_vm4, %v2299_v46  ;;  %v7116_v44 = vpop.f32.mrf.mxu0 }
 0x245   : > { %v1534_v58 = vld [vmem:[#allocation4 + $0xf0] sm:$0xff] }
 0x246   : > { %1503 = vst.msk [vmem:[#allocation4 + $0xf8] sm:$0xff] %vm613_vm4, %v1471_v29  ;;  %v1756_v0 = vadd.f32 %v7053_v6, %v1534_v58  ;;  %v2702_v6 = vld [vmem:[#allocation2 + $0x12a] sm:$0xff]  ;;  %v2009_v4 = vpop.f32.mrf.mxu1 }
 0x247   : > { %v1819_v33 = vld [vmem:[#allocation4 + $0xe8] sm:$0xff]  ;;  %v2723_v14 = vpack.c.bf16 %v2702_v6, %v2701_v27 }
 0x248   : > { %v2041_v38 = vadd.f32 %v2004_v19, %v1819_v33  ;;  %1788 = vst.msk [vmem:[#allocation4 + $0xf0] sm:$0xff] %vm613_vm4, %v1756_v0  ;;  %v2507_v45 = vpop.f32.mrf.mxu3  ;;  %v2437_v19 = vpack.c.bf16 %v2416_v37, %v2415_v17  ;;  %v2418_v27 = vld [vmem:[#allocation2 + $0x141] sm:$0xff] }
 0x249   : > { %v2221_v30 = vpop.f32.mrf.mxu2 }
 0x24a   : > { %2073 = vst.msk [vmem:[#allocation4 + $0xe8] sm:$0xff] %vm613_vm4, %v2041_v38  ;;  %v2300_v52 = vadd.f32 %v2221_v30, %v2077_v5  ;;  %v2131_v38 = vld [vmem:[#allocation2 + $0x138] sm:$0xff]  ;;  %v7208_v5 = vld [vmem:[%s8451_s3] ss:$0 sm:$0xff] }
 0x24b   : > { %v2363_v11 = vld [vmem:[#allocation4] sm:$0xff] }
 0x24c   : > { %v2585_v55 = vadd.f32 %v2505_v50, %v2363_v11  ;;  %2332 = vst.msk [vmem:[#allocation4 + $0x8] sm:$0xff] %vm613_vm4, %v2300_v52  ;;  %v7135_v9 = vpop.f32.mrf.mxu0  ;;  %v2724_v50 = vpack.c.bf16 %v2704_v7, %v2703_v12  ;;  %v2152_v11 = vpack.c.bf16 %v2132_v40, %v2131_v38  ;;  %v2420_v12 = vld [vmem:[#allocation2 + $0x159] sm:$0xff] }
 0x24d   : > { %v1535_v13 = vld [vmem:[#allocation4 + $0xf8] sm:$0xff]  ;;  %6020 = vmatmul.msk.bf16.gmra.mxu3 %vm280_vm1, %v2436_v49 }
 0x24e   : > { %2617 = vst.msk [vmem:[#allocation4] sm:$0xff] %vm613_vm4, %v2585_v55  ;;  %6003 = vmatmul.msk.bf16.gmra.mxu2 %vm280_vm1, %v2150_v35  ;;  %v1757_v59 = vadd.f32 %v7063_v18, %v1535_v13  ;;  %v2705_v35 = vld [vmem:[#allocation2 + $0x152] sm:$0xff]  ;;  %v2706_v49 = vld [vmem:[#allocation2 + $0x15a] sm:$0xff] }
 0x24f   : > { %v1820_v57 = vld [vmem:[#allocation4 + $0xf0] sm:$0xff]  ;;  %6038 = vmatmul.msk.bf16.gmra.mxu0 %vm280_vm1, %v2723_v14  ;;  %v2080_v14 = vld [vmem:[#allocation4 + $0x20] sm:$0xff]  ;;  %v2725_v13 = vpack.c.bf16 %v2706_v49, %v2705_v35 }
 0x250   : > { %v2042_v47 = vadd.f32 %v2007_v51, %v1820_v57  ;;  %1789 = vst.msk [vmem:[#allocation4 + $0xf8] sm:$0xff] %vm613_vm4, %v1757_v59  ;;  %v2510_v63 = vpop.f32.mrf.mxu3  ;;  %v2438_v51 = vpack.c.bf16 %v2418_v27, %v2417_v3 }
 0x251   : > { %v2224_v15 = vpop.f32.mrf.mxu2 }
 0x252   : > { %2074 = vst.msk [vmem:[#allocation4 + $0xf0] sm:$0xff] %vm613_vm4, %v2042_v47  ;;  %v2301_v42 = vadd.f32 %v2224_v15, %v2078_v62  ;;  %v6111_v47 = vld [vmem:[%s8452_s4 + $0x10] sm:$0xf]  ;;  %v2081_v62 = vld [vmem:[#allocation4 + $0x28] sm:$0xff] }
 0x253   : > { %v2364_v1 = vld [vmem:[#allocation4 + $0x8] sm:$0xff] }
 0x254   : > { %v2586_v18 = vadd.f32 %v2507_v45, %v2364_v1  ;;  %2333 = vst.msk [vmem:[#allocation4 + $0x10] sm:$0xff] %vm613_vm4, %v2301_v42  ;;  %v7153_v10 = vpop.f32.mrf.mxu0  ;;  %v4360_v1 = vsel %vm3246_vm5, %v6111_v47, 0 }
 0x255   : > { %v2649_v34 = vld [vmem:[#allocation4] sm:$0xff]  ;;  %4369 = vmatpush.bf16.msrb.mxu1 %v4360_v1  ;;  %v2085_v1 = vld [vmem:[#allocation4 + $0x48] sm:$0xff] }
 0x256   : > { %v2871_v39 = vadd.f32 %v7070_v41, %v2649_v34  ;;  %2618 = vst.msk [vmem:[#allocation4 + $0x8] sm:$0xff] %vm613_vm4, %v2586_v18 }
 0x257   : > { %v1821_v43 = vld [vmem:[#allocation4 + $0xf8] sm:$0xff] }
 0x258   : > { %2903 = vst.msk [vmem:[#allocation4] sm:$0xff] %vm613_vm4, %v2871_v39  ;;  %v2043_v22 = vadd.f32 %v2009_v4, %v1821_v43  ;;  %v2512_v41 = vpop.f32.mrf.mxu3 }
 0x259   : > { %v2226_v32 = vpop.f32.mrf.mxu2 }
 0x25a   : > { %2075 = vst.msk [vmem:[#allocation4 + $0xf8] sm:$0xff] %vm613_vm4, %v2043_v22  ;;  %v2302_v16 = vadd.f32 %v2226_v32, %v2079_v31  ;;  %v2133_v31 = vld [vmem:[#allocation2 + $0x150] sm:$0xff]  ;;  %v2134_v32 = vld [vmem:[#allocation2 + $0x158] sm:$0xff] }
 0x25b   : > { %v2365_v20 = vld [vmem:[#allocation4 + $0x10] sm:$0xff] }
 0x25c   : > { %v2587_v48 = vadd.f32 %v2510_v63, %v2365_v20  ;;  %2334 = vst.msk [vmem:[#allocation4 + $0x18] sm:$0xff] %vm613_vm4, %v2302_v16  ;;  %v7174_v46 = vpop.f32.mrf.mxu0 }
 0x25d   : > { %v2650_v25 = vld [vmem:[#allocation4 + $0x8] sm:$0xff]  ;;  %6021 = vmatmul.msk.bf16.gmra.mxu3 %vm280_vm1, %v2437_v19 }
 0x25e   : > { %v2872_v28 = vadd.f32 %v7080_v53, %v2650_v25  ;;  %2619 = vst.msk [vmem:[#allocation4 + $0x10] sm:$0xff] %vm613_vm4, %v2587_v48  ;;  %6004 = vmatmul.msk.bf16.gmra.mxu2 %vm280_vm1, %v2151_v36  ;;  %v7193_v53 = vld [vmem:[%s8450_s2] ss:$0 sm:$0xff]  ;;  %v2083_v36 = vld [vmem:[#allocation4 + $0x38] sm:$0xff]  ;;  %v2153_v25 = vpack.c.bf16 %v2134_v32, %v2133_v31 }
 0x25f   : > { %6039 = vmatmul.msk.bf16.gmra.mxu0 %vm280_vm1, %v2724_v50  ;;  %v2935_v23 = vld [vmem:[#allocation4] sm:$0xff] }
 0x260   : > { %2904 = vst.msk [vmem:[#allocation4 + $0x8] sm:$0xff] %vm613_vm4, %v2872_v28  ;;  %v7186_v58 = vpop.f32.mrf.mxu3  ;;  %v2971_v30 = vmul.f32 %v7193_v53, %v2935_v23  ;;  %v2707_v28 = vld [vmem:[#allocation2 + $0x16a] sm:$0xff] }
 0x261   : > { %v2229_v29 = vpop.f32.mrf.mxu2 }
 0x262   : > { %v3007_v55 = vadd.f32 %v7208_v5, %v2971_v30  ;;  %v2303_v57 = vadd.f32 %v2229_v29, %v2080_v14  ;;  %v2708_v29 = vld [vmem:[#allocation2 + $0x172] sm:$0xff] }
 0x263   : > { %v2366_v21 = vld [vmem:[#allocation4 + $0x18] sm:$0xff] }
 0x264   : > { %v2588_v0 = vadd.f32 %v2512_v41, %v2366_v21  ;;  %v7201_v56 = vpop.f32.mrf.mxu0  ;;  %v3039_v4 = vmax.f32 %v3007_v55, 0.0  ;;  %2335 = vst.msk [vmem:[#allocation4 + $0x20] sm:$0xff] %vm613_vm4, %v2303_v57 }
 0x265   : > { %v2651_v33 = vld [vmem:[#allocation4 + $0x10] sm:$0xff] }
 0x266   : > { %v2873_v26 = vadd.f32 %v7093_v60, %v2651_v33  ;;  %2620 = vst.msk [vmem:[#allocation4 + $0x18] sm:$0xff] %vm613_vm4, %v2588_v0  ;;  %v2439_v0 = vpack.c.bf16 %v2420_v12, %v2419_v24 }
 0x267   : > { %v2936_v45 = vld [vmem:[#allocation4 + $0x8] sm:$0xff]  ;;  %3117 = vst.msk [vmem:[#allocation3 + $0x19] sm:$0xff] %vm613_vm4, %v3039_v4 }
 0x268   : > { %2905 = vst.msk [vmem:[#allocation4 + $0x10] sm:$0xff] %vm613_vm4, %v2873_v26  ;;  %v2972_v60 = vmul.f32 %v7193_v53, %v2936_v45  ;;  %v2517_v52 = vpop.f32.mrf.mxu3  ;;  %v2709_v4 = vld [vmem:[#allocation2 + $0x182] sm:$0xff] }
 0x269   : > { %v2231_v6 = vpop.f32.mrf.mxu2 }
 0x26a   : > { %v3008_v63 = vadd.f32 %v7208_v5, %v2972_v60  ;;  %v2304_v18 = vadd.f32 %v2231_v6, %v2081_v62  ;;  %v2084_v60 = vld [vmem:[#allocation4 + $0x40] sm:$0xff]  ;;  %v2135_v62 = vld [vmem:[#allocation2 + $0x168] sm:$0xff] }
 0x26b   : > { %v2367_v16 = vld [vmem:[#allocation4 + $0x20] sm:$0xff] }
 0x26c   : > { %v7229_v15 = vpop.f32.mrf.mxu0  ;;  %v3040_v43 = vmax.f32 %v3008_v63, 0.0  ;;  %2336 = vst.msk [vmem:[#allocation4 + $0x28] sm:$0xff] %vm613_vm4, %v2304_v18  ;;  %v2589_v19 = vadd.f32 %v7186_v58, %v2367_v16  ;;  %v2726_v58 = vpack.c.bf16 %v2708_v29, %v2707_v28  ;;  %v2421_v63 = vld [vmem:[#allocation2 + $0x169] sm:$0xff] }
 0x26d   : > { %v2652_v59 = vld [vmem:[#allocation4 + $0x18] sm:$0xff]  ;;  %6022 = vmatmul.msk.bf16.gmra.mxu3 %vm280_vm1, %v2438_v51 }
 0x26e   : > { %v2874_v42 = vadd.f32 %v7116_v44, %v2652_v59  ;;  %6005 = vmatmul.msk.bf16.gmra.mxu2 %vm280_vm1, %v2152_v11  ;;  %v2082_v44 = vld [vmem:[#allocation4 + $0x30] sm:$0xff]  ;;  %3118 = vst.msk [vmem:[#allocation3 + $0x21] sm:$0xff] %vm613_vm4, %v3040_v43  ;;  %v3151_v40 = vld [vmem:[#allocation3 + $0x18] sm:$0xff] }
 0x26f   : > { %v2937_v34 = vld [vmem:[#allocation4 + $0x10] sm:$0xff]  ;;  %6040 = vmatmul.msk.bf16.gmra.mxu0 %vm280_vm1, %v2725_v13  ;;  %2621 = vst.msk [vmem:[#allocation4 + $0x20] sm:$0xff] %vm613_vm4, %v2589_v19 }
 0x270   : > { %v2973_v39 = vmul.f32 %v7193_v53, %v2937_v34  ;;  %2906 = vst.msk [vmem:[#allocation4 + $0x18] sm:$0xff] %vm613_vm4, %v2874_v42  ;;  %v2520_v8 = vpop.f32.mrf.mxu3  ;;  %v2422_v42 = vld [vmem:[#allocation2 + $0x171] sm:$0xff] }
 0x271   : > { %v2234_v54 = vpop.f32.mrf.mxu2  ;;  %v2440_v43 = vpack.c.bf16 %v2422_v42, %v2421_v63 }
 0x272   : > { %v2305_v17 = vadd.f32 %v2234_v54, %v2082_v44  ;;  %v3009_v37 = vadd.f32 %v7208_v5, %v2973_v39  ;;  %v2710_v39 = vld [vmem:[#allocation2 + $0x18a] sm:$0xff] }
 0x273   : > { %v2368_v20 = vld [vmem:[#allocation4 + $0x28] sm:$0xff]  ;;  %v2727_v31 = vpack.c.bf16 %v2710_v39, %v2709_v4 }
 0x274   : > { %2337 = vst.msk [vmem:[#allocation4 + $0x30] sm:$0xff] %vm613_vm4, %v2305_v17  ;;  %v3041_v22 = vmax.f32 %v3009_v37, 0.0  ;;  %v7249_v61 = vpop.f32.mrf.mxu0  ;;  %v2590_v21 = vadd.f32 %v2517_v52, %v2368_v20 }
 0x275   : > { %v3152_v30 = vld [vmem:[#allocation3 + $0x20] sm:$0xff] }
 0x276   : > { %3119 = vst.msk [vmem:[#allocation3 + $0x31] sm:$0xff] %vm613_vm4, %v3041_v22  ;;  %v7257_v3 = vpack.c.bf16 %v3152_v30, %v3151_v40  ;;  %v2653_v35 = vld [vmem:[#allocation4 + $0x20] sm:$0xff] }
 0x277   : > { %v2938_v41 = vld [vmem:[#allocation4 + $0x18] sm:$0xff]  ;;  %2622 = vst.msk [vmem:[#allocation4 + $0x28] sm:$0xff] %vm613_vm4, %v2590_v21  ;;  %v2875_v11 = vadd.f32 %v7135_v9, %v2653_v35  ;;  %v2136_v9 = vld [vmem:[#allocation2 + $0x170] sm:$0xff] }
 0x278   : > { %v2974_v7 = vmul.f32 %v7193_v53, %v2938_v41  ;;  %v2522_v50 = vpop.f32.mrf.mxu3  ;;  %6045 = vmatmul.msk.bf16.gmra.mxu1 %vm613_vm4, %v7257_v3 }
 0x279   : > { %v2236_v48 = vpop.f32.mrf.mxu2  ;;  %2907 = vst.msk [vmem:[#allocation4 + $0x20] sm:$0xff] %vm613_vm4, %v2875_v11 }
 0x27a   : > { %v2306_v23 = vadd.f32 %v2236_v48, %v2083_v36  ;;  %v3010_v33 = vadd.f32 %v7208_v5, %v2974_v7 }
 0x27b   : > { %v2369_v26 = vld [vmem:[#allocation4 + $0x30] sm:$0xff] }
 0x27c   : > { %v2591_v38 = vadd.f32 %v2520_v8, %v2369_v26  ;;  %v3042_v45 = vmax.f32 %v3010_v33, 0.0  ;;  %2338 = vst.msk [vmem:[#allocation4 + $0x38] sm:$0xff] %vm613_vm4, %v2306_v23  ;;  %v7260_v27 = vpop.f32.mrf.mxu0  ;;  %v2154_v8 = vpack.c.bf16 %v2136_v9, %v2135_v62 }
 0x27d   : > { %6023 = vmatmul.msk.bf16.gmra.mxu3 %vm280_vm1, %v2439_v0  ;;  %v3153_v44 = vld [vmem:[#allocation3 + $0x30] sm:$0xff] }
 0x27e   : > { %2623 = vst.msk [vmem:[#allocation4 + $0x30] sm:$0xff] %vm613_vm4, %v2591_v38  ;;  %6006 = vmatmul.msk.bf16.gmra.mxu2 %vm280_vm1, %v2153_v25  ;;  %v2654_v51 = vld [vmem:[#allocation4 + $0x28] sm:$0xff] }
 0x27f   : > { %3120 = vst.msk [vmem:[#allocation3 + $0x39] sm:$0xff] %vm613_vm4, %v3042_v45  ;;  %6041 = vmatmul.msk.bf16.gmra.mxu0 %vm280_vm1, %v2726_v58  ;;  %v2876_v55 = vadd.f32 %v7153_v10, %v2654_v51  ;;  %v2137_v58 = vld [vmem:[#allocation2 + $0x180] sm:$0xff]  ;;  %v2138_v45 = vld [vmem:[#allocation2 + $0x188] sm:$0xff] }
 0x280   : > { %v2525_v52 = vpop.f32.mrf.mxu3  ;;  %v2939_v37 = vld [vmem:[#allocation4 + $0x20] sm:$0xff] }
 0x281   : > { %v2239_v6 = vpop.f32.mrf.mxu2  ;;  %2908 = vst.msk [vmem:[#allocation4 + $0x28] sm:$0xff] %vm613_vm4, %v2876_v55  ;;  %v2975_v32 = vmul.f32 %v7193_v53, %v2939_v37  ;;  %v2711_v55 = vld [vmem:[#allocation2 + $0x19a] sm:$0xff] }
 0x282   : > { %v2307_v49 = vadd.f32 %v2239_v6, %v2084_v60  ;;  %v2423_v60 = vld [vmem:[#allocation2 + $0x181] sm:$0xff]  ;;  %v2424_v6 = vld [vmem:[#allocation2 + $0x189] sm:$0xff] }
 0x283   : > { %v2370_v14 = vld [vmem:[#allocation4 + $0x38] sm:$0xff]  ;;  %v3011_v19 = vadd.f32 %v7208_v5, %v2975_v32 }
 0x284   : > { %2339 = vst.msk [vmem:[#allocation4 + $0x40] sm:$0xff] %vm613_vm4, %v2307_v49  ;;  %v2592_v59 = vadd.f32 %v2522_v50, %v2370_v14  ;;  %v7273_v57 = vpop.f32.mrf.mxu0  ;;  %v2086_v50 = vld [vmem:[#allocation4 + $0x50] sm:$0xff]  ;;  %v2087_v49 = vld [vmem:[#allocation4 + $0x58] sm:$0xff]  ;;  %v2712_v14 = vld [vmem:[#allocation2 + $0x1a2] sm:$0xff] }
 0x285   : > { %v2655_v13 = vld [vmem:[#allocation4 + $0x30] sm:$0xff]  ;;  %v3043_v29 = vmax.f32 %v3011_v19, 0.0 }
 0x286   : > { %v2877_v47 = vadd.f32 %v7174_v46, %v2655_v13  ;;  %2624 = vst.msk [vmem:[#allocation4 + $0x38] sm:$0xff] %vm613_vm4, %v2592_v59  ;;  %v3154_v10 = vld [vmem:[#allocation3 + $0x38] sm:$0xff]  ;;  %v2441_v59 = vpack.c.bf16 %v2424_v6, %v2423_v60 }
 0x287   : > { %v7279_v46 = vpack.c.bf16 %v3154_v10, %v3153_v44  ;;  %3121 = vst.msk [vmem:[#allocation3 + $0x49] sm:$0xff] %vm613_vm4, %v3043_v29  ;;  %v2728_v10 = vpack.c.bf16 %v2712_v14, %v2711_v55 }
 0x288   : > { %2909 = vst.msk [vmem:[#allocation4 + $0x30] sm:$0xff] %vm613_vm4, %v2877_v47  ;;  %v2527_v34 = vpop.f32.mrf.mxu3  ;;  %v2940_v41 = vld [vmem:[#allocation4 + $0x28] sm:$0xff] }
 0x289   : > { %v2241_v18 = vpop.f32.mrf.mxu2  ;;  %v2976_v12 = vmul.f32 %v7193_v53, %v2940_v41  ;;  %6046 = vmatmul.msk.bf16.gmra.mxu1 %vm613_vm4, %v7279_v46 }
 0x28a   : > { %v2308_v54 = vadd.f32 %v2241_v18, %v2085_v1 }
 0x28b   : > { %v2371_v17 = vld [vmem:[#allocation4 + $0x40] sm:$0xff]  ;;  %v3012_v48 = vadd.f32 %v7208_v5, %v2976_v12 }
 0x28c   : > { %v2593_v22 = vadd.f32 %v2525_v52, %v2371_v17  ;;  %2340 = vst.msk [vmem:[#allocation4 + $0x48] sm:$0xff] %vm613_vm4, %v2308_v54  ;;  %v7283_v24 = vpop.f32.mrf.mxu0 }
 0x28d   : > { %v2656_v7 = vld [vmem:[#allocation4 + $0x38] sm:$0xff]  ;;  %6024 = vmatmul.msk.bf16.gmra.mxu3 %vm280_vm1, %v2440_v43  ;;  %v3044_v23 = vmax.f32 %v3012_v48, 0.0  ;;  %v2426_v48 = vld [vmem:[#allocation2 + $0x1a1] sm:$0xff] }
 0x28e   : > { %2625 = vst.msk [vmem:[#allocation4 + $0x40] sm:$0xff] %vm613_vm4, %v2593_v22  ;;  %6007 = vmatmul.msk.bf16.gmra.mxu2 %vm280_vm1, %v2154_v8  ;;  %v2878_v36 = vadd.f32 %v7201_v56, %v2656_v7  ;;  %v3155_v63 = vld [vmem:[#allocation3 + $0x48] sm:$0xff] }
 0x28f   : > { %v2941_v16 = vld [vmem:[#allocation4 + $0x30] sm:$0xff]  ;;  %6042 = vmatmul.msk.bf16.gmra.mxu0 %vm280_vm1, %v2727_v31  ;;  %3122 = vst.msk [vmem:[#allocation3 + $0x51] sm:$0xff] %vm613_vm4, %v3044_v23 }
 0x290   : > { %v2977_v20 = vmul.f32 %v7193_v53, %v2941_v16  ;;  %2910 = vst.msk [vmem:[#allocation4 + $0x38] sm:$0xff] %vm613_vm4, %v2878_v36  ;;  %v2530_v28 = vpop.f32.mrf.mxu3  ;;  %v2139_v16 = vld [vmem:[#allocation2 + $0x198] sm:$0xff]  ;;  %v2140_v36 = vld [vmem:[#allocation2 + $0x1a0] sm:$0xff] }
 0x291   : > { %v2244_v25 = vpop.f32.mrf.mxu2 }
 0x292   : > { %v2309_v21 = vadd.f32 %v2244_v25, %v2086_v50  ;;  %v3013_v56 = vadd.f32 %v7208_v5, %v2977_v20  ;;  %v2425_v20 = vld [vmem:[#allocation2 + $0x199] sm:$0xff] }
 0x293   : > { %v2372_v0 = vld [vmem:[#allocation4 + $0x48] sm:$0xff] }
 0x294   : > { %v2594_v33 = vadd.f32 %v2527_v34, %v2372_v0  ;;  %2341 = vst.msk [vmem:[#allocation4 + $0x50] sm:$0xff] %vm613_vm4, %v2309_v21  ;;  %v3045_v26 = vmax.f32 %v3013_v56, 0.0  ;;  %v7301_v40 = vpop.f32.mrf.mxu0  ;;  %v2442_v56 = vpack.c.bf16 %v2426_v48, %v2425_v20 }
 0x295   : > { %v2657_v38 = vld [vmem:[#allocation4 + $0x40] sm:$0xff] }
 0x296   : > { %v2879_v30 = vadd.f32 %v7229_v15, %v2657_v38  ;;  %2626 = vst.msk [vmem:[#allocation4 + $0x48] sm:$0xff] %vm613_vm4, %v2594_v33  ;;  %v2155_v15 = vpack.c.bf16 %v2138_v45, %v2137_v58  ;;  %v3156_v42 = vld [vmem:[#allocation3 + $0x50] sm:$0xff] }
 0x297   : > { %3123 = vst.msk [vmem:[#allocation3 + $0x61] sm:$0xff] %vm613_vm4, %v3045_v26  ;;  %v2942_v52 = vld [vmem:[#allocation4 + $0x38] sm:$0xff]  ;;  %v7310_v18 = vpack.c.bf16 %v3156_v42, %v3155_v63 }
 0x298   : > { %2911 = vst.msk [vmem:[#allocation4 + $0x40] sm:$0xff] %vm613_vm4, %v2879_v30  ;;  %v2978_v35 = vmul.f32 %v7193_v53, %v2942_v52  ;;  %v2532_v51 = vpop.f32.mrf.mxu3  ;;  %v3689_v63 = vld [vmem:[#allocation3 + $0x2] sm:$0xff]  ;;  %v3690_v42 = vld [vmem:[#allocation3 + $0xa] sm:$0xff] }
 0x299   : > { %v2246_v11 = vpop.f32.mrf.mxu2  ;;  %6047 = vmatmul.msk.bf16.gmra.mxu1 %vm613_vm4, %v7310_v18 }
 0x29a   : > { %v2310_v13 = vadd.f32 %v2246_v11, %v2087_v49  ;;  %v3014_v62 = vadd.f32 %v7208_v5, %v2978_v35 }
 0x29b   : > { %v2373_v47 = vld [vmem:[#allocation4 + $0x50] sm:$0xff] }
 0x29c   : > { %v2595_v9 = vadd.f32 %v2530_v28, %v2373_v47  ;;  %2342 = vst.msk [vmem:[#allocation4 + $0x58] sm:$0xff] %vm613_vm4, %v2310_v13  ;;  %v7312_v34 = vpop.f32.mrf.mxu0  ;;  %v3046_v4 = vmax.f32 %v3014_v62, 0.0  ;;  %v2089_v28 = vld [vmem:[#allocation4 + $0x68] sm:$0xff]  ;;  %v3403_v62 = vld [vmem:[#allocation3 + $0x1] sm:$0xff] }
 0x29d   : > { %v2658_v1 = vld [vmem:[#allocation4 + $0x48] sm:$0xff]  ;;  %6025 = vmatmul.msk.bf16.gmra.mxu3 %vm280_vm1, %v2441_v59 }
 0x29e   : > { %v2880_v39 = vadd.f32 %v7249_v61, %v2658_v1  ;;  %2627 = vst.msk [vmem:[#allocation4 + $0x50] sm:$0xff] %vm613_vm4, %v2595_v9  ;;  %6008 = vmatmul.msk.bf16.gmra.mxu2 %vm280_vm1, %v2155_v15  ;;  %v2088_v61 = vld [vmem:[#allocation4 + $0x60] sm:$0xff]  ;;  %v3157_v2 = vld [vmem:[#allocation3 + $0x60] sm:$0xff] }
 0x29f   : > { %v2943_v44 = vld [vmem:[#allocation4 + $0x40] sm:$0xff]  ;;  %3124 = vst.msk [vmem:[#allocation3 + $0x69] sm:$0xff] %vm613_vm4, %v3046_v4  ;;  %6043 = vmatmul.msk.bf16.gmra.mxu0 %vm280_vm1, %v2728_v10  ;;  %v2091_v4 = vld [vmem:[#allocation4 + $0x78] sm:$0xff] }
 0x2a0   : > { %v2979_v54 = vmul.f32 %v7193_v53, %v2943_v44  ;;  %2912 = vst.msk [vmem:[#allocation4 + $0x48] sm:$0xff] %vm613_vm4, %v2880_v39  ;;  %v2535_v43 = vpop.f32.mrf.mxu3 }
 0x2a1   : > { %v2249_v8 = vpop.f32.mrf.mxu2 }
 0x2a2   : > { %v2311_v17 = vadd.f32 %v2249_v8, %v2088_v61  ;;  %v3015_v37 = vadd.f32 %v7208_v5, %v2979_v54  ;;  %v3721_v8 = vpack.c.bf16 %v3690_v42, %v3689_v63 }
 0x2a3   : > { %v2374_v22 = vld [vmem:[#allocation4 + $0x58] sm:$0xff] }
 0x2a4   : > { %v2596_v31 = vadd.f32 %v2532_v51, %v2374_v22  ;;  %2343 = vst.msk [vmem:[#allocation4 + $0x60] sm:$0xff] %vm613_vm4, %v2311_v17  ;;  %v3047_v32 = vmax.f32 %v3015_v37, 0.0  ;;  %v7330_v12 = vpop.f32.mrf.mxu0 }
 0x2a5   : > { %v2659_v41 = vld [vmem:[#allocation4 + $0x50] sm:$0xff] }
 0x2a6   : > { %v2881_v7 = vadd.f32 %v7260_v27, %v2659_v41  ;;  %2628 = vst.msk [vmem:[#allocation4 + $0x58] sm:$0xff] %vm613_vm4, %v2596_v31  ;;  %v3158_v25 = vld [vmem:[#allocation3 + $0x68] sm:$0xff]  ;;  %v2156_v27 = vpack.c.bf16 %v2140_v36, %v2139_v16 }
 0x2a7   : > { %v2944_v19 = vld [vmem:[#allocation4 + $0x48] sm:$0xff]  ;;  %3125 = vst.msk [vmem:[#allocation3 + $0x79] sm:$0xff] %vm613_vm4, %v3047_v32  ;;  %v7340_v26 = vpack.c.bf16 %v3158_v25, %v3157_v2 }
 0x2a8   : > { %v2980_v50 = vmul.f32 %v7193_v53, %v2944_v19  ;;  %2913 = vst.msk [vmem:[#allocation4 + $0x50] sm:$0xff] %vm613_vm4, %v2881_v7  ;;  %v2537_v21 = vpop.f32.mrf.mxu3 }
 0x2a9   : > { %v2251_v29 = vpop.f32.mrf.mxu2  ;;  %6048 = vmatmul.msk.bf16.gmra.mxu1 %vm613_vm4, %v7340_v26 }
 0x2aa   : > { %v2312_v23 = vadd.f32 %v2251_v29, %v2089_v28  ;;  %v3016_v0 = vadd.f32 %v7208_v5, %v2980_v50 }
 0x2ab   : > { %v2375_v33 = vld [vmem:[#allocation4 + $0x60] sm:$0xff] }
 0x2ac   : > { %v2597_v38 = vadd.f32 %v2535_v43, %v2375_v33  ;;  %2344 = vst.msk [vmem:[#allocation4 + $0x68] sm:$0xff] %vm613_vm4, %v2312_v23  ;;  %v3048_v30 = vmax.f32 %v3016_v0, 0.0  ;;  %v7343_v45 = vpop.f32.mrf.mxu0  ;;  %v2093_v0 = vld [vmem:[#allocation4 + $0x88] sm:$0xff] }
 0x2ad   : > { %v2660_v58 = vld [vmem:[#allocation4 + $0x58] sm:$0xff]  ;;  %6026 = vmatmul.msk.bf16.gmra.mxu3 %vm280_vm1, %v2442_v56 }
 0x2ae   : > { %v2882_v60 = vadd.f32 %v7273_v57, %v2660_v58  ;;  %2629 = vst.msk [vmem:[#allocation4 + $0x60] sm:$0xff] %vm613_vm4, %v2597_v38  ;;  %6009 = vmatmul.msk.bf16.gmra.mxu2 %vm280_vm1, %v2156_v27  ;;  %v2090_v57 = vld [vmem:[#allocation4 + $0x70] sm:$0xff]  ;;  %v3159_v54 = vld [vmem:[#allocation3 + $0x78] sm:$0xff] }
 0x2af   : > { %v2945_v6 = vld [vmem:[#allocation4 + $0x50] sm:$0xff]  ;;  %3126 = vst.msk [vmem:[#allocation3 + $0x81] sm:$0xff] %vm613_vm4, %v3048_v30  ;;  %6095 = vmatmul.msk.bf16.vlgmr.msrb.gmra.mxu0 %vm613_vm4, %v7257_v3  ;;  %v3404_v3 = vld [vmem:[#allocation3 + $0x9] sm:$0xff] }
 0x2b0   : > { %v2981_v52 = vmul.f32 %v7193_v53, %v2945_v6  ;;  %2914 = vst.msk [vmem:[#allocation4 + $0x58] sm:$0xff] %vm613_vm4, %v2882_v60  ;;  %v2540_v49 = vpop.f32.mrf.mxu3  ;;  %v3406_v30 = vld [vmem:[#allocation3 + $0x21] sm:$0xff] }
 0x2b1   : > { %v2254_v35 = vpop.f32.mrf.mxu2  ;;  %v3691_v58 = vld [vmem:[#allocation3 + $0x1a] sm:$0xff]  ;;  %v3692_v60 = vld [vmem:[#allocation3 + $0x22] sm:$0xff] }
 0x2b2   : > { %v2313_v11 = vadd.f32 %v2254_v35, %v2090_v57  ;;  %v3017_v51 = vadd.f32 %v7208_v5, %v2981_v52  ;;  %v3259_v57 = vpop.f32.mrf.mxu1 }
 0x2b3   : > { %v2376_v55 = vld [vmem:[#allocation4 + $0x68] sm:$0xff]  ;;  %3339 = vst.msk [vmem:[#allocation4] sm:$0xff] %vm613_vm4, %v3259_v57 }
 0x2b4   : > { %v2598_v14 = vadd.f32 %v2537_v21, %v2376_v55  ;;  %2345 = vst.msk [vmem:[#allocation4 + $0x70] sm:$0xff] %vm613_vm4, %v2313_v11  ;;  %v3049_v13 = vmax.f32 %v3017_v51, 0.0  ;;  %v7358_v59 = vpop.f32.mrf.mxu0  ;;  %v3405_v11 = vld [vmem:[#allocation3 + $0x19] sm:$0xff] }
 0x2b5   : > { %v2661_v15 = vld [vmem:[#allocation4 + $0x60] sm:$0xff]  ;;  %v7396_v55 = vpack.c.bf16 %v3406_v30, %v3405_v11 }
 0x2b6   : > { %v2883_v47 = vadd.f32 %v7283_v24, %v2661_v15  ;;  %2630 = vst.msk [vmem:[#allocation4 + $0x68] sm:$0xff] %vm613_vm4, %v2598_v14  ;;  %v3160_v1 = vld [vmem:[#allocation3 + $0x80] sm:$0xff]  ;;  %v3435_v24 = vpack.c.bf16 %v3404_v3, %v3403_v62  ;;  %v3722_v14 = vpack.c.bf16 %v3692_v60, %v3691_v58 }
 0x2b7   : > { %v2946_v9 = vld [vmem:[#allocation4 + $0x58] sm:$0xff]  ;;  %3127 = vst.msk [vmem:[#allocation3 + $0x91] sm:$0xff] %vm613_vm4, %v3049_v13  ;;  %v7366_v37 = vpack.c.bf16 %v3160_v1, %v3159_v54 }
 0x2b8   : > { %v2982_v10 = vmul.f32 %v7193_v53, %v2946_v9  ;;  %2915 = vst.msk [vmem:[#allocation4 + $0x60] sm:$0xff] %vm613_vm4, %v2883_v47  ;;  %v2542_v44 = vpop.f32.mrf.mxu3 }
 0x2b9   : > { %v2256_v39 = vpop.f32.mrf.mxu2  ;;  %6049 = vmatmul.msk.bf16.gmra.mxu1 %vm613_vm4, %v7366_v37 }
 0x2ba   : > { %v2314_v61 = vadd.f32 %v2256_v39, %v2091_v4  ;;  %v3018_v43 = vadd.f32 %v7208_v5, %v2982_v10  ;;  %v3261_v1 = vpop.f32.mrf.mxu1 }
 0x2bb   : > { %v2377_v17 = vld [vmem:[#allocation4 + $0x70] sm:$0xff]  ;;  %3340 = vst.msk [vmem:[#allocation4 + $0x8] sm:$0xff] %vm613_vm4, %v3261_v1  ;;  %v3409_v1 = vld [vmem:[#allocation3 + $0x49] sm:$0xff] }
 0x2bc   : > { %v2599_v22 = vadd.f32 %v2540_v49, %v2377_v17  ;;  %2346 = vst.msk [vmem:[#allocation4 + $0x78] sm:$0xff] %vm613_vm4, %v2314_v61  ;;  %v3050_v31 = vmax.f32 %v3018_v43, 0.0  ;;  %v7369_v41 = vpop.f32.mrf.mxu0 }
 0x2bd   : > { %v2662_v32 = vld [vmem:[#allocation4 + $0x68] sm:$0xff]  ;;  %6078 = vmatmul.msk.bf16.vlgmr.msrb.gmra.mxu3 %vm613_vm4, %v3721_v8 }
 0x2be   : > { %v2884_v7 = vadd.f32 %v7301_v40, %v2662_v32  ;;  %2631 = vst.msk [vmem:[#allocation4 + $0x70] sm:$0xff] %vm613_vm4, %v2599_v22  ;;  %6061 = vmatmul.msk.bf16.vlgmr.msrb.gmra.mxu2 %vm613_vm4, %v3435_v24  ;;  %v2092_v40 = vld [vmem:[#allocation4 + $0x80] sm:$0xff]  ;;  %v2095_v22 = vld [vmem:[#allocation4 + $0x98] sm:$0xff] }
 0x2bf   : > { %v2947_v16 = vld [vmem:[#allocation4 + $0x60] sm:$0xff]  ;;  %3128 = vst.msk [vmem:[#allocation3 + $0x99] sm:$0xff] %vm613_vm4, %v3050_v31  ;;  %6096 = vmatmul.msk.bf16.gmra.mxu0 %vm613_vm4, %v7279_v46 }
 0x2c0   : > { %v2983_v36 = vmul.f32 %v7193_v53, %v2947_v16  ;;  %2916 = vst.msk [vmem:[#allocation4 + $0x68] sm:$0xff] %vm613_vm4, %v2884_v7  ;;  %v2545_v20 = vpop.f32.mrf.mxu3  ;;  %v3161_v6 = vld [vmem:[#allocation3 + $0x90] sm:$0xff]  ;;  %v3408_v7 = vld [vmem:[#allocation3 + $0x39] sm:$0xff] }
 0x2c1   : > { %v2259_v19 = vpop.f32.mrf.mxu2  ;;  %v3693_v16 = vld [vmem:[#allocation3 + $0x32] sm:$0xff] }
 0x2c2   : > { %v2315_v48 = vadd.f32 %v2259_v19, %v2092_v40  ;;  %v3019_v50 = vadd.f32 %v7208_v5, %v2983_v36  ;;  %v3694_v36 = vld [vmem:[#allocation3 + $0x3a] sm:$0xff] }
 0x2c3   : > { %v2378_v25 = vld [vmem:[#allocation4 + $0x78] sm:$0xff] }
 0x2c4   : > { %v2600_v28 = vadd.f32 %v2542_v44, %v2378_v25  ;;  %2347 = vst.msk [vmem:[#allocation4 + $0x80] sm:$0xff] %vm613_vm4, %v2315_v48  ;;  %v3051_v29 = vmax.f32 %v3019_v50, 0.0  ;;  %v7384_v2 = vpop.f32.mrf.mxu0  ;;  %v3407_v50 = vld [vmem:[#allocation3 + $0x31] sm:$0xff] }
 0x2c5   : > { %v2663_v21 = vld [vmem:[#allocation4 + $0x70] sm:$0xff] }
 0x2c6   : > { %v2885_v23 = vadd.f32 %v7312_v34, %v2663_v21  ;;  %2632 = vst.msk [vmem:[#allocation4 + $0x78] sm:$0xff] %vm613_vm4, %v2600_v28  ;;  %v3162_v56 = vld [vmem:[#allocation3 + $0x98] sm:$0xff]  ;;  %v7426_v28 = vpack.c.bf16 %v3408_v7, %v3407_v50 }
 0x2c7   : > { %v2948_v27 = vld [vmem:[#allocation4 + $0x68] sm:$0xff]  ;;  %3129 = vst.msk [vmem:[#allocation3 + $0xa9] sm:$0xff] %vm613_vm4, %v3051_v29  ;;  %v7392_v49 = vpack.c.bf16 %v3162_v56, %v3161_v6  ;;  %v3723_v29 = vpack.c.bf16 %v3694_v36, %v3693_v16 }
 0x2c8   : > { %v2984_v46 = vmul.f32 %v7193_v53, %v2948_v27  ;;  %2917 = vst.msk [vmem:[#allocation4 + $0x70] sm:$0xff] %vm613_vm4, %v2885_v23  ;;  %v2547_v38 = vpop.f32.mrf.mxu3 }
 0x2c9   : > { %v2261_v33 = vpop.f32.mrf.mxu2  ;;  %6050 = vmatmul.msk.bf16.gmra.mxu1 %vm613_vm4, %v7392_v49 }
 0x2ca   : > { %v2316_v52 = vadd.f32 %v2261_v33, %v2093_v0  ;;  %v3020_v34 = vadd.f32 %v7208_v5, %v2984_v46 }
 0x2cb   : > { %v2379_v35 = vld [vmem:[#allocation4 + $0x80] sm:$0xff] }
 0x2cc   : > { %v2601_v51 = vadd.f32 %v2545_v20, %v2379_v35  ;;  %2348 = vst.msk [vmem:[#allocation4 + $0x88] sm:$0xff] %vm613_vm4, %v2316_v52  ;;  %v3052_v13 = vmax.f32 %v3020_v34, 0.0  ;;  %v7398_v47 = vpop.f32.mrf.mxu0 }
 0x2cd   : > { %v2664_v15 = vld [vmem:[#allocation4 + $0x78] sm:$0xff]  ;;  %6079 = vmatmul.msk.bf16.gmra.mxu3 %vm613_vm4, %v3722_v14  ;;  %v2097_v14 = vld [vmem:[#allocation4 + $0xa8] sm:$0xff] }
 0x2ce   : > { %v2886_v62 = vadd.f32 %v7330_v12, %v2664_v15  ;;  %2633 = vst.msk [vmem:[#allocation4 + $0x80] sm:$0xff] %vm613_vm4, %v2601_v51  ;;  %6062 = vmatmul.msk.bf16.gmra.mxu2 %vm613_vm4, %v7396_v55  ;;  %v2094_v12 = vld [vmem:[#allocation4 + $0x90] sm:$0xff]  ;;  %v3163_v40 = vld [vmem:[#allocation3 + $0xa8] sm:$0xff] }
 0x2cf   : > { %v2949_v3 = vld [vmem:[#allocation4 + $0x70] sm:$0xff]  ;;  %3130 = vst.msk [vmem:[#allocation3 + $0xb1] sm:$0xff] %vm613_vm4, %v3052_v13  ;;  %6097 = vmatmul.msk.bf16.gmra.mxu0 %vm613_vm4, %v7310_v18 }
 0x2d0   : > { %v2985_v9 = vmul.f32 %v7193_v53, %v2949_v3  ;;  %2918 = vst.msk [vmem:[#allocation4 + $0x78] sm:$0xff] %vm613_vm4, %v2886_v62  ;;  %v2550_v42 = vpop.f32.mrf.mxu3  ;;  %v3410_v62 = vld [vmem:[#allocation3 + $0x51] sm:$0xff] }
 0x2d1   : > { %v2264_v63 = vpop.f32.mrf.mxu2  ;;  %v3695_v3 = vld [vmem:[#allocation3 + $0x4a] sm:$0xff] }
 0x2d2   : > { %v2317_v10 = vadd.f32 %v2264_v63, %v2094_v12  ;;  %v3021_v4 = vadd.f32 %v7208_v5, %v2985_v9  ;;  %v3696_v9 = vld [vmem:[#allocation3 + $0x52] sm:$0xff] }
 0x2d3   : > { %v2380_v39 = vld [vmem:[#allocation4 + $0x88] sm:$0xff] }
 0x2d4   : > { %v2602_v44 = vadd.f32 %v2547_v38, %v2380_v39  ;;  %2349 = vst.msk [vmem:[#allocation4 + $0x90] sm:$0xff] %vm613_vm4, %v2317_v10  ;;  %v3053_v54 = vmax.f32 %v3021_v4, 0.0  ;;  %v7415_v24 = vpop.f32.mrf.mxu0  ;;  %v7455_v39 = vpack.c.bf16 %v3410_v62, %v3409_v1 }
 0x2d5   : > { %v2665_v61 = vld [vmem:[#allocation4 + $0x80] sm:$0xff] }
 0x2d6   : > { %v2887_v8 = vadd.f32 %v7343_v45, %v2665_v61  ;;  %2634 = vst.msk [vmem:[#allocation4 + $0x88] sm:$0xff] %vm613_vm4, %v2602_v44  ;;  %v3164_v17 = vld [vmem:[#allocation3 + $0xb0] sm:$0xff]  ;;  %v3724_v44 = vpack.c.bf16 %v3696_v9, %v3695_v3 }
 0x2d7   : > { %v2950_v18 = vld [vmem:[#allocation4 + $0x78] sm:$0xff]  ;;  %3131 = vst.msk [vmem:[#allocation3 + $0xc1] sm:$0xff] %vm613_vm4, %v3053_v54  ;;  %v7423_v48 = vpack.c.bf16 %v3164_v17, %v3163_v40 }
 0x2d8   : > { %v2986_v43 = vmul.f32 %v7193_v53, %v2950_v18  ;;  %2919 = vst.msk [vmem:[#allocation4 + $0x80] sm:$0xff] %vm613_vm4, %v2887_v8  ;;  %v2552_v32 = vpop.f32.mrf.mxu3 }
 0x2d9   : > { %v2266_v31 = vpop.f32.mrf.mxu2  ;;  %6051 = vmatmul.msk.bf16.gmra.mxu1 %vm613_vm4, %v7423_v48 }
 0x2da   : > { %v2318_v19 = vadd.f32 %v2266_v31, %v2095_v22  ;;  %v3022_v45 = vadd.f32 %v7208_v5, %v2986_v43 }
 0x2db   : > { %v2381_v20 = vld [vmem:[#allocation4 + $0x90] sm:$0xff] }
 0x2dc   : > { %v2603_v25 = vadd.f32 %v2550_v42, %v2381_v20  ;;  %2350 = vst.msk [vmem:[#allocation4 + $0x98] sm:$0xff] %vm613_vm4, %v2318_v19  ;;  %v3054_v21 = vmax.f32 %v3022_v45, 0.0  ;;  %v7428_v27 = vpop.f32.mrf.mxu0 }
 0x2dd   : > { %v2666_v23 = vld [vmem:[#allocation4 + $0x88] sm:$0xff]  ;;  %6080 = vmatmul.msk.bf16.gmra.mxu3 %vm613_vm4, %v3723_v29  ;;  %v2099_v29 = vld [vmem:[#allocation4 + $0xb8] sm:$0xff] }
 0x2de   : > { %v2888_v46 = vadd.f32 %v7358_v59, %v2666_v23  ;;  %2635 = vst.msk [vmem:[#allocation4 + $0x90] sm:$0xff] %vm613_vm4, %v2603_v25  ;;  %6063 = vmatmul.msk.bf16.gmra.mxu2 %vm613_vm4, %v7426_v28  ;;  %v2096_v59 = vld [vmem:[#allocation4 + $0xa0] sm:$0xff]  ;;  %v3165_v12 = vld [vmem:[#allocation3 + $0xc0] sm:$0xff] }
 0x2df   : > { %v2951_v56 = vld [vmem:[#allocation4 + $0x80] sm:$0xff]  ;;  %3132 = vst.msk [vmem:[#allocation3 + $0xc9] sm:$0xff] %vm613_vm4, %v3054_v21  ;;  %6098 = vmatmul.msk.bf16.gmra.mxu0 %vm613_vm4, %v7340_v26 }
 0x2e0   : > { %v2987_v0 = vmul.f32 %v7193_v53, %v2951_v56  ;;  %2920 = vst.msk [vmem:[#allocation4 + $0x88] sm:$0xff] %vm613_vm4, %v2888_v46  ;;  %v2555_v38 = vpop.f32.mrf.mxu3  ;;  %v3412_v46 = vld [vmem:[#allocation3 + $0x69] sm:$0xff] }
 0x2e1   : > { %v2269_v33 = vpop.f32.mrf.mxu2  ;;  %v3697_v56 = vld [vmem:[#allocation3 + $0x62] sm:$0xff] }
 0x2e2   : > { %v2319_v30 = vadd.f32 %v2269_v33, %v2096_v59  ;;  %v3023_v58 = vadd.f32 %v7208_v5, %v2987_v0  ;;  %v3698_v0 = vld [vmem:[#allocation3 + $0x6a] sm:$0xff] }
 0x2e3   : > { %v2382_v60 = vld [vmem:[#allocation4 + $0x98] sm:$0xff] }
 0x2e4   : > { %v2604_v6 = vadd.f32 %v2552_v32, %v2382_v60  ;;  %2351 = vst.msk [vmem:[#allocation4 + $0xa0] sm:$0xff] %vm613_vm4, %v2319_v30  ;;  %v3055_v52 = vmax.f32 %v3023_v58, 0.0  ;;  %v7444_v57 = vpop.f32.mrf.mxu0  ;;  %v3411_v58 = vld [vmem:[#allocation3 + $0x61] sm:$0xff] }
 0x2e5   : > { %v2667_v34 = vld [vmem:[#allocation4 + $0x90] sm:$0xff] }
 0x2e6   : > { %v2889_v35 = vadd.f32 %v7369_v41, %v2667_v34  ;;  %2636 = vst.msk [vmem:[#allocation4 + $0x98] sm:$0xff] %vm613_vm4, %v2604_v6  ;;  %v3166_v51 = vld [vmem:[#allocation3 + $0xc8] sm:$0xff]  ;;  %v3725_v34 = vpack.c.bf16 %v3698_v0, %v3697_v56 }
 0x2e7   : > { %v2952_v11 = vld [vmem:[#allocation4 + $0x88] sm:$0xff]  ;;  %3133 = vst.msk [vmem:[#allocation3 + $0xd9] sm:$0xff] %vm613_vm4, %v3055_v52  ;;  %v7452_v10 = vpack.c.bf16 %v3166_v51, %v3165_v12  ;;  %v7484_v52 = vpack.c.bf16 %v3412_v46, %v3411_v58 }
 0x2e8   : > { %v2988_v26 = vmul.f32 %v7193_v53, %v2952_v11  ;;  %2921 = vst.msk [vmem:[#allocation4 + $0x90] sm:$0xff] %vm613_vm4, %v2889_v35  ;;  %v2557_v15 = vpop.f32.mrf.mxu3 }
 0x2e9   : > { %v2271_v13 = vpop.f32.mrf.mxu2  ;;  %6052 = vmatmul.msk.bf16.gmra.mxu1 %vm613_vm4, %v7452_v10 }
 0x2ea   : > { %v2320_v63 = vadd.f32 %v2271_v13, %v2097_v14  ;;  %v3024_v41 = vadd.f32 %v7208_v5, %v2988_v26 }
 0x2eb   : > { %v2383_v42 = vld [vmem:[#allocation4 + $0xa0] sm:$0xff] }
 0x2ec   : > { %v2605_v4 = vadd.f32 %v2555_v38, %v2383_v42  ;;  %2352 = vst.msk [vmem:[#allocation4 + $0xa8] sm:$0xff] %vm613_vm4, %v2320_v63  ;;  %v3056_v54 = vmax.f32 %v3024_v41, 0.0  ;;  %v7457_v8 = vpop.f32.mrf.mxu0 }
 0x2ed   : > { %v2668_v61 = vld [vmem:[#allocation4 + $0x98] sm:$0xff]  ;;  %6081 = vmatmul.msk.bf16.gmra.mxu3 %vm613_vm4, %v3724_v44 }
 0x2ee   : > { %v2890_v18 = vadd.f32 %v7384_v2, %v2668_v61  ;;  %2637 = vst.msk [vmem:[#allocation4 + $0xa0] sm:$0xff] %vm613_vm4, %v2605_v4  ;;  %6064 = vmatmul.msk.bf16.gmra.mxu2 %vm613_vm4, %v7455_v39  ;;  %v2098_v2 = vld [vmem:[#allocation4 + $0xb0] sm:$0xff]  ;;  %v3167_v59 = vld [vmem:[#allocation3 + $0xd8] sm:$0xff] }
 0x2ef   : > { %v2953_v43 = vld [vmem:[#allocation4 + $0x90] sm:$0xff]  ;;  %3134 = vst.msk [vmem:[#allocation3 + $0xe1] sm:$0xff] %vm613_vm4, %v3056_v54  ;;  %6099 = vmatmul.msk.bf16.gmra.mxu0 %vm613_vm4, %v7366_v37  ;;  %v2101_v61 = vld [vmem:[#allocation4 + $0xc8] sm:$0xff] }
 0x2f0   : > { %v2989_v17 = vmul.f32 %v7193_v53, %v2953_v43  ;;  %2922 = vst.msk [vmem:[#allocation4 + $0x98] sm:$0xff] %vm613_vm4, %v2890_v18  ;;  %v2560_v31 = vpop.f32.mrf.mxu3 }
 0x2f1   : > { %v2274_v22 = vpop.f32.mrf.mxu2 }
 0x2f2   : > { %v2321_v32 = vadd.f32 %v2274_v22, %v2098_v2  ;;  %v3025_v7 = vadd.f32 %v7208_v5, %v2989_v17  ;;  %v3414_v17 = vld [vmem:[#allocation3 + $0x81] sm:$0xff] }
 0x2f3   : > { %v2384_v16 = vld [vmem:[#allocation4 + $0xa8] sm:$0xff]  ;;  %v3700_v2 = vld [vmem:[#allocation3 + $0x82] sm:$0xff] }
 0x2f4   : > { %v2606_v36 = vadd.f32 %v2557_v15, %v2384_v16  ;;  %2353 = vst.msk [vmem:[#allocation4 + $0xb0] sm:$0xff] %vm613_vm4, %v2321_v32  ;;  %v3057_v40 = vmax.f32 %v3025_v7, 0.0  ;;  %v7473_v45 = vpop.f32.mrf.mxu0  ;;  %v7519_v32 = vld [vmem:[%s8451_s3] ss:$0 sm:$0xff] }
 0x2f5   : > { %v2669_v19 = vld [vmem:[#allocation4 + $0xa0] sm:$0xff]  ;;  %v3264_v6 = vpop.f32.mrf.mxu1 }
 0x2f6   : > { %v2891_v20 = vadd.f32 %v7398_v47, %v2669_v19  ;;  %2638 = vst.msk [vmem:[#allocation4 + $0xa8] sm:$0xff] %vm613_vm4, %v2606_v36  ;;  %v3168_v25 = vld [vmem:[#allocation3 + $0xe0] sm:$0xff] }
 0x2f7   : > { %v2954_v50 = vld [vmem:[#allocation4 + $0x98] sm:$0xff]  ;;  %3135 = vst.msk [vmem:[#allocation3 + $0xf1] sm:$0xff] %vm613_vm4, %v3057_v40  ;;  %v7481_v30 = vpack.c.bf16 %v3168_v25, %v3167_v59  ;;  %v3413_v40 = vld [vmem:[#allocation3 + $0x79] sm:$0xff] }
 0x2f8   : > { %v2990_v37 = vmul.f32 %v7193_v53, %v2954_v50  ;;  %2923 = vst.msk [vmem:[#allocation4 + $0xa0] sm:$0xff] %vm613_vm4, %v2891_v20  ;;  %v2562_v23 = vpop.f32.mrf.mxu3  ;;  %v7525_v50 = vpack.c.bf16 %v3414_v17, %v3413_v40 }
 0x2f9   : > { %v2276_v21 = vpop.f32.mrf.mxu2  ;;  %3341 = vst.msk [vmem:[#allocation4 + $0x10] sm:$0xff] %vm613_vm4, %v3264_v6  ;;  %6053 = vmatmul.msk.bf16.gmra.mxu1 %vm613_vm4, %v7481_v30 }
 0x2fa   : > { %v2322_v33 = vadd.f32 %v2276_v21, %v2099_v29  ;;  %v3026_v47 = vadd.f32 %v7208_v5, %v2990_v37 }
 0x2fb   : > { %v2385_v38 = vld [vmem:[#allocation4 + $0xb0] sm:$0xff] }
 0x2fc   : > { %v2607_v60 = vadd.f32 %v2560_v31, %v2385_v38  ;;  %2354 = vst.msk [vmem:[#allocation4 + $0xb8] sm:$0xff] %vm613_vm4, %v2322_v33  ;;  %v3058_v35 = vmax.f32 %v3026_v47, 0.0  ;;  %v7487_v26 = vpop.f32.mrf.mxu0 }
 0x2fd   : > { %v2670_v11 = vld [vmem:[#allocation4 + $0xa8] sm:$0xff]  ;;  %6082 = vmatmul.msk.bf16.gmra.mxu3 %vm613_vm4, %v3725_v34  ;;  %v3266_v41 = vpop.f32.mrf.mxu1 }
 0x2fe   : > { %v2892_v51 = vadd.f32 %v7415_v24, %v2670_v11  ;;  %2639 = vst.msk [vmem:[#allocation4 + $0xb0] sm:$0xff] %vm613_vm4, %v2607_v60  ;;  %6065 = vmatmul.msk.bf16.gmra.mxu2 %vm613_vm4, %v7484_v52  ;;  %v2100_v24 = vld [vmem:[#allocation4 + $0xc0] sm:$0xff] }
 0x2ff   : > { %v2955_v14 = vld [vmem:[#allocation4 + $0xa0] sm:$0xff]  ;;  %3136 = vst.msk [vmem:[#allocation3 + $0xf9] sm:$0xff] %vm613_vm4, %v3058_v35  ;;  %6100 = vmatmul.msk.bf16.gmra.mxu0 %vm613_vm4, %v7392_v49 }
 0x300   : > { %v2991_v13 = vmul.f32 %v7193_v53, %v2955_v14  ;;  %2924 = vst.msk [vmem:[#allocation4 + $0xa8] sm:$0xff] %vm613_vm4, %v2892_v51  ;;  %v2565_v62 = vpop.f32.mrf.mxu3  ;;  %v3169_v22 = vld [vmem:[#allocation3 + $0xf0] sm:$0xff] }
 0x301   : > { %v2279_v15 = vpop.f32.mrf.mxu2  ;;  %3342 = vst.msk [vmem:[#allocation4 + $0x18] sm:$0xff] %vm613_vm4, %v3266_v41 }
 0x302   : > { %v2323_v3 = vadd.f32 %v2279_v15, %v2100_v24  ;;  %v3027_v9 = vadd.f32 %v7208_v5, %v2991_v13  ;;  %v7512_v5 = vld [vmem:[%s8450_s2] ss:$0 sm:$0xff]  ;;  %v2103_v13 = vld [vmem:[#allocation4 + $0xd8] sm:$0xff] }
 0x303   : > { %v2386_v12 = vld [vmem:[#allocation4 + $0xb8] sm:$0xff] }
 0x304   : > { %v2608_v63 = vadd.f32 %v2562_v23, %v2386_v12  ;;  %2355 = vst.msk [vmem:[#allocation4 + $0xc0] sm:$0xff] %vm613_vm4, %v2323_v3  ;;  %v3059_v42 = vmax.f32 %v3027_v9, 0.0  ;;  %v7504_v53 = vpop.f32.mrf.mxu0  ;;  %v3701_v3 = vld [vmem:[#allocation3 + $0x92] sm:$0xff]  ;;  %v3702_v9 = vld [vmem:[#allocation3 + $0x9a] sm:$0xff] }
 0x305   : > { %v2671_v1 = vld [vmem:[#allocation4 + $0xb0] sm:$0xff] }
 0x306   : > { %v2893_v4 = vadd.f32 %v7428_v27, %v2671_v1  ;;  %2640 = vst.msk [vmem:[#allocation4 + $0xb8] sm:$0xff] %vm613_vm4, %v2608_v63  ;;  %v3170_v54 = vld [vmem:[#allocation3 + $0xf8] sm:$0xff]  ;;  %v3269_v20 = vpop.f32.mrf.mxu1 }
 0x307   : > { %v2956_v49 = vld [vmem:[#allocation4 + $0xa8] sm:$0xff]  ;;  %3137 = vst.msk [vmem:[#allocation3 + $0x109] sm:$0xff] %vm613_vm4, %v3059_v42  ;;  %v7522_v36 = vpack.c.bf16 %v3170_v54, %v3169_v22  ;;  %v3727_v54 = vpack.c.bf16 %v3702_v9, %v3701_v3 }
 0x308   : > { %v2992_v44 = vmul.f32 %v7512_v5, %v2956_v49  ;;  %2925 = vst.msk [vmem:[#allocation4 + $0xb0] sm:$0xff] %vm613_vm4, %v2893_v4  ;;  %v2567_v43 = vpop.f32.mrf.mxu3  ;;  %v3699_v27 = vld [vmem:[#allocation3 + $0x7a] sm:$0xff]  ;;  %v3415_v1 = vld [vmem:[#allocation3 + $0x91] sm:$0xff] }
 0x309   : > { %v2281_v18 = vpop.f32.mrf.mxu2  ;;  %v3726_v37 = vpack.c.bf16 %v3700_v2, %v3699_v27  ;;  %3343 = vst.msk [vmem:[#allocation4 + $0x20] sm:$0xff] %vm613_vm4, %v3269_v20  ;;  %6054 = vmatmul.msk.bf16.gmra.mxu1 %vm613_vm4, %v7522_v36 }
 0x30a   : > { %v2324_v31 = vadd.f32 %v2281_v18, %v2101_v61  ;;  %v3028_v7 = vadd.f32 %v7519_v32, %v2992_v44 }
 0x30b   : > { %v2387_v16 = vld [vmem:[#allocation4 + $0xc0] sm:$0xff] }
 0x30c   : > { %v2609_v19 = vadd.f32 %v2565_v62, %v2387_v16  ;;  %2356 = vst.msk [vmem:[#allocation4 + $0xc8] sm:$0xff] %vm613_vm4, %v2324_v31  ;;  %v3060_v25 = vmax.f32 %v3028_v7, 0.0  ;;  %v7528_v21 = vpop.f32.mrf.mxu0  ;;  %v3416_v62 = vld [vmem:[#allocation3 + $0x99] sm:$0xff] }
 0x30d   : > { %v2672_v29 = vld [vmem:[#allocation4 + $0xb8] sm:$0xff]  ;;  %6083 = vmatmul.msk.bf16.gmra.mxu3 %vm613_vm4, %v3726_v37  ;;  %v7556_v44 = vpack.c.bf16 %v3416_v62, %v3415_v1 }
 0x30e   : > { %v2894_v23 = vadd.f32 %v7444_v57, %v2672_v29  ;;  %2641 = vst.msk [vmem:[#allocation4 + $0xc0] sm:$0xff] %vm613_vm4, %v2609_v19  ;;  %6066 = vmatmul.msk.bf16.gmra.mxu2 %vm613_vm4, %v7525_v50  ;;  %v2102_v57 = vld [vmem:[#allocation4 + $0xd0] sm:$0xff]  ;;  %v3271_v60 = vpop.f32.mrf.mxu1  ;;  %v3171_v12 = vld [vmem:[#allocation3 + $0x108] sm:$0xff] }
 0x30f   : > { %v2957_v46 = vld [vmem:[#allocation4 + $0xb0] sm:$0xff]  ;;  %3138 = vst.msk [vmem:[#allocation3 + $0x111] sm:$0xff] %vm613_vm4, %v3060_v25  ;;  %6101 = vmatmul.msk.bf16.gmra.mxu0 %vm613_vm4, %v7423_v48 }
 0x310   : > { %v2993_v56 = vmul.f32 %v7512_v5, %v2957_v46  ;;  %2926 = vst.msk [vmem:[#allocation4 + $0xb8] sm:$0xff] %vm613_vm4, %v2894_v23  ;;  %v2570_v59 = vpop.f32.mrf.mxu3 }
 0x311   : > { %v2284_v0 = vpop.f32.mrf.mxu2  ;;  %3344 = vst.msk [vmem:[#allocation4 + $0x28] sm:$0xff] %vm613_vm4, %v3271_v60 }
 0x312   : > { %v2325_v33 = vadd.f32 %v2284_v0, %v2102_v57  ;;  %v3029_v47 = vadd.f32 %v7519_v32, %v2993_v56  ;;  %v2105_v57 = vld [vmem:[#allocation4 + $0xe8] sm:$0xff] }
 0x313   : > { %v2388_v38 = vld [vmem:[#allocation4 + $0xc8] sm:$0xff] }
 0x314   : > { %v2610_v58 = vadd.f32 %v2567_v43, %v2388_v38  ;;  %2357 = vst.msk [vmem:[#allocation4 + $0xd0] sm:$0xff] %vm613_vm4, %v2325_v33  ;;  %v3061_v6 = vmax.f32 %v3029_v47, 0.0  ;;  %v7545_v35 = vpop.f32.mrf.mxu0  ;;  %v3418_v33 = vld [vmem:[#allocation3 + $0xb1] sm:$0xff] }
 0x315   : > { %v2673_v34 = vld [vmem:[#allocation4 + $0xc0] sm:$0xff] }
 0x316   : > { %v2895_v11 = vadd.f32 %v7457_v8, %v2673_v34  ;;  %2642 = vst.msk [vmem:[#allocation4 + $0xc8] sm:$0xff] %vm613_vm4, %v2610_v58  ;;  %v3172_v14 = vld [vmem:[#allocation3 + $0x110] sm:$0xff]  ;;  %v3274_v49 = vpop.f32.mrf.mxu1 }
 0x317   : > { %v2958_v48 = vld [vmem:[#allocation4 + $0xb8] sm:$0xff]  ;;  %3139 = vst.msk [vmem:[#allocation3 + $0x121] sm:$0xff] %vm613_vm4, %v3061_v6  ;;  %v7553_v42 = vpack.c.bf16 %v3172_v14, %v3171_v12  ;;  %v3704_v38 = vld [vmem:[#allocation3 + $0xb2] sm:$0xff] }
 0x318   : > { %v2994_v51 = vmul.f32 %v7512_v5, %v2958_v48  ;;  %2927 = vst.msk [vmem:[#allocation4 + $0xc0] sm:$0xff] %vm613_vm4, %v2895_v11  ;;  %v2572_v15 = vpop.f32.mrf.mxu3  ;;  %v3703_v47 = vld [vmem:[#allocation3 + $0xaa] sm:$0xff] }
 0x319   : > { %v2286_v24 = vpop.f32.mrf.mxu2  ;;  %3345 = vst.msk [vmem:[#allocation4 + $0x30] sm:$0xff] %vm613_vm4, %v3274_v49  ;;  %6055 = vmatmul.msk.bf16.gmra.mxu1 %vm613_vm4, %v7553_v42  ;;  %v3417_v11 = vld [vmem:[#allocation3 + $0xa9] sm:$0xff] }
 0x31a   : > { %v2326_v63 = vadd.f32 %v2286_v24, %v2103_v13  ;;  %v3030_v8 = vadd.f32 %v7519_v32, %v2994_v51  ;;  %v7587_v14 = vpack.c.bf16 %v3418_v33, %v3417_v11  ;;  %v3728_v13 = vpack.c.bf16 %v3704_v38, %v3703_v47 }
 0x31b   : > { %v2389_v41 = vld [vmem:[#allocation4 + $0xd0] sm:$0xff] }
 0x31c   : > { %v2611_v4 = vadd.f32 %v2570_v59, %v2389_v41  ;;  %2358 = vst.msk [vmem:[#allocation4 + $0xd8] sm:$0xff] %vm613_vm4, %v2326_v63  ;;  %v3062_v61 = vmax.f32 %v3030_v8, 0.0  ;;  %v7559_v43 = vpop.f32.mrf.mxu0 }
 0x31d   : > { %v2674_v18 = vld [vmem:[#allocation4 + $0xc8] sm:$0xff]  ;;  %6084 = vmatmul.msk.bf16.gmra.mxu3 %vm613_vm4, %v3727_v54 }
 0x31e   : > { %v2896_v17 = vadd.f32 %v7473_v45, %v2674_v18  ;;  %2643 = vst.msk [vmem:[#allocation4 + $0xd0] sm:$0xff] %vm613_vm4, %v2611_v4  ;;  %6067 = vmatmul.msk.bf16.gmra.mxu2 %vm613_vm4, %v7556_v44  ;;  %v2104_v45 = vld [vmem:[#allocation4 + $0xe0] sm:$0xff]  ;;  %v3276_v20 = vpop.f32.mrf.mxu1  ;;  %v3173_v58 = vld [vmem:[#allocation3 + $0x120] sm:$0xff] }
 0x31f   : > { %v2959_v27 = vld [vmem:[#allocation4 + $0xc0] sm:$0xff]  ;;  %3140 = vst.msk [vmem:[#allocation3 + $0x129] sm:$0xff] %vm613_vm4, %v3062_v61  ;;  %6102 = vmatmul.msk.bf16.gmra.mxu0 %vm613_vm4, %v7452_v10 }
 0x320   : > { %v2995_v2 = vmul.f32 %v7512_v5, %v2959_v27  ;;  %2928 = vst.msk [vmem:[#allocation4 + $0xc8] sm:$0xff] %vm613_vm4, %v2896_v17  ;;  %v2575_v31 = vpop.f32.mrf.mxu3 }
 0x321   : > { %v2289_v22 = vpop.f32.mrf.mxu2  ;;  %3346 = vst.msk [vmem:[#allocation4 + $0x38] sm:$0xff] %vm613_vm4, %v3276_v20  ;;  %v3706_v20 = vld [vmem:[#allocation3 + $0xca] sm:$0xff] }
 0x322   : > { %v2327_v7 = vadd.f32 %v2289_v22, %v2104_v45  ;;  %v3031_v16 = vadd.f32 %v7519_v32, %v2995_v2  ;;  %v2107_v2 = vld [vmem:[#allocation4 + $0xf8] sm:$0xff] }
 0x323   : > { %v2390_v40 = vld [vmem:[#allocation4 + $0xd8] sm:$0xff] }
 0x324   : > { %v2612_v19 = vadd.f32 %v2572_v15, %v2390_v40  ;;  %2359 = vst.msk [vmem:[#allocation4 + $0xe0] sm:$0xff] %vm613_vm4, %v2327_v7  ;;  %v3063_v37 = vmax.f32 %v3031_v16, 0.0  ;;  %v7576_v29 = vpop.f32.mrf.mxu0  ;;  %v6145_v7 = vld [vmem:[%s8452_s4 + $0x18] sm:$0xf] }
 0x325   : > { %v2675_v25 = vld [vmem:[#allocation4 + $0xd0] sm:$0xff]  ;;  %v3420_v40 = vld [vmem:[#allocation3 + $0xc9] sm:$0xff] }
 0x326   : > { %v2897_v23 = vadd.f32 %v7487_v26, %v2675_v25  ;;  %2644 = vst.msk [vmem:[#allocation4 + $0xd8] sm:$0xff] %vm613_vm4, %v2612_v19  ;;  %v3174_v56 = vld [vmem:[#allocation3 + $0x128] sm:$0xff]  ;;  %v3279_v51 = vpop.f32.mrf.mxu1  ;;  %v4933_v25 = vsel %vm3246_vm5, %v6145_v7, 0 }
 0x327   : > { %v2960_v10 = vld [vmem:[#allocation4 + $0xc8] sm:$0xff]  ;;  %3141 = vst.msk [vmem:[#allocation3 + $0x139] sm:$0xff] %vm613_vm4, %v3063_v37  ;;  %v7584_v34 = vpack.c.bf16 %v3174_v56, %v3173_v58  ;;  %v3705_v19 = vld [vmem:[#allocation3 + $0xc2] sm:$0xff]  ;;  %4942 = vmatpush.bf16.msra.mxu3 %v4933_v25 }
 0x328   : > { %v2996_v46 = vmul.f32 %v7512_v5, %v2960_v10  ;;  %2929 = vst.msk [vmem:[#allocation4 + $0xd0] sm:$0xff] %vm613_vm4, %v2897_v23  ;;  %v2577_v59 = vpop.f32.mrf.mxu3  ;;  %v3729_v38 = vpack.c.bf16 %v3706_v20, %v3705_v19 }
 0x329   : > { %v2291_v0 = vpop.f32.mrf.mxu2  ;;  %3347 = vst.msk [vmem:[#allocation4 + $0x40] sm:$0xff] %vm613_vm4, %v3279_v51  ;;  %6056 = vmatmul.msk.bf16.gmra.mxu1 %vm613_vm4, %v7584_v34 }
 0x32a   : > { %v2328_v60 = vadd.f32 %v2291_v0, %v2105_v57  ;;  %v3032_v26 = vadd.f32 %v7519_v32, %v2996_v46  ;;  %v3419_v0 = vld [vmem:[#allocation3 + $0xc1] sm:$0xff] }
 0x32b   : > { %v2391_v6 = vld [vmem:[#allocation4 + $0xe0] sm:$0xff]  ;;  %v7626_v47 = vpack.c.bf16 %v3420_v40, %v3419_v0 }
 0x32c   : > { %v2613_v48 = vadd.f32 %v2575_v31, %v2391_v6  ;;  %2360 = vst.msk [vmem:[#allocation4 + $0xe8] sm:$0xff] %vm613_vm4, %v2328_v60  ;;  %v3064_v24 = vmax.f32 %v3032_v26, 0.0  ;;  %v7590_v62 = vpop.f32.mrf.mxu0  ;;  %v6128_v31 = vld [vmem:[%s8452_s4 + $0x14] sm:$0xf]  ;;  %v6179_v0 = vld [vmem:[%s8452_s4 + $0x20] sm:$0xf] }
 0x32d   : > { %v2676_v15 = vld [vmem:[#allocation4 + $0xd8] sm:$0xff]  ;;  %6085 = vmatmul.msk.bf16.gmra.mxu3 %vm613_vm4, %v3728_v13  ;;  %v4646_v37 = vsel %vm3246_vm5, %v6128_v31, 0 }
 0x32e   : > { %v2898_v3 = vadd.f32 %v7504_v53, %v2676_v15  ;;  %2645 = vst.msk [vmem:[#allocation4 + $0xe0] sm:$0xff] %vm613_vm4, %v2613_v48  ;;  %6068 = vmatmul.msk.bf16.gmra.mxu2 %vm613_vm4, %v7587_v14  ;;  %v2106_v53 = vld [vmem:[#allocation4 + $0xf0] sm:$0xff]  ;;  %v3281_v54 = vpop.f32.mrf.mxu1  ;;  %v3175_v23 = vld [vmem:[#allocation3 + $0x138] sm:$0xff] }
 0x32f   : > { %v2961_v9 = vld [vmem:[#allocation4 + $0xd0] sm:$0xff]  ;;  %3142 = vst.msk [vmem:[#allocation3 + $0x141] sm:$0xff] %vm613_vm4, %v3064_v24  ;;  %6103 = vmatmul.msk.bf16.gmra.mxu0 %vm613_vm4, %v7481_v30  ;;  %4655 = vmatpush.bf16.msra.mxu2 %v4646_v37 }
 0x330   : > { %v2997_v12 = vmul.f32 %v7512_v5, %v2961_v9  ;;  %2930 = vst.msk [vmem:[#allocation4 + $0xd8] sm:$0xff] %vm613_vm4, %v2898_v3  ;;  %v2580_v8 = vpop.f32.mrf.mxu3 }
 0x331   : > { %v2294_v63 = vpop.f32.mrf.mxu2  ;;  %3348 = vst.msk [vmem:[#allocation4 + $0x48] sm:$0xff] %vm613_vm4, %v3281_v54 }
 0x332   : > { %v2329_v41 = vadd.f32 %v2294_v63, %v2106_v53  ;;  %v3033_v1 = vadd.f32 %v7519_v32, %v2997_v12 }
 0x333   : > { %v2392_v4 = vld [vmem:[#allocation4 + $0xe8] sm:$0xff] }
 0x334   : > { %v2614_v49 = vadd.f32 %v2577_v59, %v2392_v4  ;;  %2361 = vst.msk [vmem:[#allocation4 + $0xf0] sm:$0xff] %vm613_vm4, %v2329_v41  ;;  %v3065_v61 = vmax.f32 %v3033_v1, 0.0  ;;  %v7607_v17 = vpop.f32.mrf.mxu0 }
 0x335   : > { %v2677_v18 = vld [vmem:[#allocation4 + $0xe0] sm:$0xff] }
 0x336   : > { %v2899_v27 = vadd.f32 %v7528_v21, %v2677_v18  ;;  %2646 = vst.msk [vmem:[#allocation4 + $0xe8] sm:$0xff] %vm613_vm4, %v2614_v49  ;;  %v3176_v22 = vld [vmem:[#allocation3 + $0x140] sm:$0xff]  ;;  %v3284_v33 = vpop.f32.mrf.mxu1 }
 0x337   : > { %v2962_v30 = vld [vmem:[#allocation4 + $0xd8] sm:$0xff]  ;;  %3143 = vst.msk [vmem:[#allocation3 + $0x151] sm:$0xff] %vm613_vm4, %v3065_v61  ;;  %v7623_v57 = vpack.c.bf16 %v3176_v22, %v3175_v23  ;;  %v3372_v61 = vld [vmem:[#allocation4 + $0x8] sm:$0xff] }
 0x338   : > { %v2998_v45 = vmul.f32 %v7512_v5, %v2962_v30  ;;  %2931 = vst.msk [vmem:[#allocation4 + $0xe0] sm:$0xff] %vm613_vm4, %v2899_v27  ;;  %v2582_v16 = vpop.f32.mrf.mxu3  ;;  %v3422_v27 = vld [vmem:[#allocation3 + $0xe1] sm:$0xff] }
 0x339   : > { %v2296_v21 = vpop.f32.mrf.mxu2  ;;  %3349 = vst.msk [vmem:[#allocation4 + $0x50] sm:$0xff] %vm613_vm4, %v3284_v33  ;;  %6057 = vmatmul.msk.bf16.gmra.mxu1 %vm613_vm4, %v7623_v57  ;;  %v3707_v30 = vld [vmem:[#allocation3 + $0xda] sm:$0xff] }
 0x33a   : > { %v2330_v10 = vadd.f32 %v2296_v21, %v2107_v2  ;;  %v3034_v46 = vadd.f32 %v7519_v32, %v2998_v45  ;;  %v3708_v2 = vld [vmem:[#allocation3 + $0xe2] sm:$0xff] }
 0x33b   : > { %v2393_v56 = vld [vmem:[#allocation4 + $0xf0] sm:$0xff]  ;;  %v3730_v37 = vpack.c.bf16 %v3708_v2, %v3707_v30 }
 0x33c   : > { %v2615_v59 = vadd.f32 %v2580_v8, %v2393_v56  ;;  %2362 = vst.msk [vmem:[#allocation4 + $0xf8] sm:$0xff] %vm613_vm4, %v2330_v10  ;;  %v3066_v58 = vmax.f32 %v3034_v46, 0.0  ;;  %v7629_v26 = vpop.f32.mrf.mxu0  ;;  %v3373_v33 = vld [vmem:[#allocation4 + $0x10] sm:$0xff] }
 0x33d   : > { %v2678_v60 = vld [vmem:[#allocation4 + $0xe8] sm:$0xff]  ;;  %6086 = vmatmul.msk.bf16.gmra.mxu3 %vm613_vm4, %v3729_v38 }
 0x33e   : > { %v2900_v6 = vadd.f32 %v7545_v35, %v2678_v60  ;;  %2647 = vst.msk [vmem:[#allocation4 + $0xf0] sm:$0xff] %vm613_vm4, %v2615_v59  ;;  %6069 = vmatmul.msk.bf16.gmra.mxu2 %vm613_vm4, %v7626_v47  ;;  %v3371_v35 = vld [vmem:[#allocation4] sm:$0xff]  ;;  %v3286_v12 = vpop.f32.mrf.mxu1 }
 0x33f   : > { %v2963_v11 = vld [vmem:[#allocation4 + $0xe0] sm:$0xff]  ;;  %3144 = vst.msk [vmem:[#allocation3 + $0x159] sm:$0xff] %vm613_vm4, %v3066_v58  ;;  %6104 = vmatmul.msk.bf16.gmra.mxu0 %vm613_vm4, %v7522_v36  ;;  %v6162_v36 = vld [vmem:[%s8452_s4 + $0x1c] sm:$0xf] }
 0x340   : > { %v2999_v48 = vmul.f32 %v7512_v5, %v2963_v11  ;;  %2932 = vst.msk [vmem:[#allocation4 + $0xe8] sm:$0xff] %vm613_vm4, %v2900_v6  ;;  %v3799_v13 = vpop.f32.mrf.mxu3  ;;  %v5219_v4 = vsel %vm3246_vm5, %v6162_v36, 0  ;;  %v3177_v45 = vld [vmem:[#allocation3 + $0x150] sm:$0xff] }
 0x341   : > { %v3513_v51 = vpop.f32.mrf.mxu2  ;;  %3350 = vst.msk [vmem:[#allocation4 + $0x58] sm:$0xff] %vm613_vm4, %v3286_v12  ;;  %5228 = vmatpush.bf16.msra.mxu0 %v5219_v4  ;;  %v3424_v12 = vld [vmem:[#allocation3 + $0xf9] sm:$0xff] }
 0x342   : > { %v3593_v24 = vadd.f32 %v3513_v51, %v3371_v35  ;;  %v3035_v15 = vadd.f32 %v7519_v32, %v2999_v48  ;;  %v3709_v36 = vld [vmem:[#allocation3 + $0xf2] sm:$0xff] }
 0x343   : > { %v2394_v3 = vld [vmem:[#allocation4 + $0xf8] sm:$0xff] }
 0x344   : > { %v2616_v9 = vadd.f32 %v2582_v16, %v2394_v3  ;;  %3625 = vst.msk [vmem:[#allocation4] sm:$0xff] %vm613_vm4, %v3593_v24  ;;  %v3067_v53 = vmax.f32 %v3035_v15, 0.0  ;;  %v7646_v8 = vpop.f32.mrf.mxu0  ;;  %v3421_v16 = vld [vmem:[#allocation3 + $0xd9] sm:$0xff] }
 0x345   : > { %v2679_v63 = vld [vmem:[#allocation4 + $0xf0] sm:$0xff]  ;;  %v7661_v20 = vpack.c.bf16 %v3422_v27, %v3421_v16 }
 0x346   : > { %v2901_v41 = vadd.f32 %v7559_v43, %v2679_v63  ;;  %2648 = vst.msk [vmem:[#allocation4 + $0xf8] sm:$0xff] %vm613_vm4, %v2616_v9  ;;  %v3178_v54 = vld [vmem:[#allocation3 + $0x158] sm:$0xff]  ;;  %v3289_v19 = vpop.f32.mrf.mxu1 }
 0x347   : > { %v2964_v1 = vld [vmem:[#allocation4 + $0xe8] sm:$0xff]  ;;  %3145 = vst.msk [vmem:[#allocation3 + $0x169] sm:$0xff] %vm613_vm4, %v3067_v53  ;;  %v7658_v21 = vpack.c.bf16 %v3178_v54, %v3177_v45  ;;  %v3374_v53 = vld [vmem:[#allocation4 + $0x18] sm:$0xff] }
 0x348   : > { %v3000_v49 = vmul.f32 %v7512_v5, %v2964_v1  ;;  %2933 = vst.msk [vmem:[#allocation4 + $0xf0] sm:$0xff] %vm613_vm4, %v2901_v41  ;;  %v3801_v43 = vpop.f32.mrf.mxu3  ;;  %v3710_v1 = vld [vmem:[#allocation3 + $0xfa] sm:$0xff] }
 0x349   : > { %v3515_v18 = vpop.f32.mrf.mxu2  ;;  %3351 = vst.msk [vmem:[#allocation4 + $0x60] sm:$0xff] %vm613_vm4, %v3289_v19  ;;  %6058 = vmatmul.msk.bf16.gmra.mxu1 %vm613_vm4, %v7658_v21  ;;  %v3731_v30 = vpack.c.bf16 %v3710_v1, %v3709_v36  ;;  %v3378_v36 = vld [vmem:[#allocation4 + $0x38] sm:$0xff] }
 0x34a   : > { %v3594_v22 = vadd.f32 %v3515_v18, %v3372_v61  ;;  %v3036_v31 = vadd.f32 %v7519_v32, %v3000_v49  ;;  %v3423_v18 = vld [vmem:[#allocation3 + $0xf1] sm:$0xff] }
 0x34b   : > { %v3657_v7 = vld [vmem:[#allocation4] sm:$0xff] }
 0x34c   : > { %v3879_v40 = vadd.f32 %v3799_v13, %v3657_v7  ;;  %3626 = vst.msk [vmem:[#allocation4 + $0x8] sm:$0xff] %vm613_vm4, %v3594_v22  ;;  %v3068_v25 = vmax.f32 %v3036_v31, 0.0  ;;  %v7664_v10 = vpop.f32.mrf.mxu0  ;;  %v3375_v31 = vld [vmem:[#allocation4 + $0x20] sm:$0xff] }
 0x34d   : > { %v2680_v23 = vld [vmem:[#allocation4 + $0xf8] sm:$0xff]  ;;  %6087 = vmatmul.msk.bf16.gmra.mxu3 %vm613_vm4, %v3730_v37 }
 0x34e   : > { %v2902_v46 = vadd.f32 %v7576_v29, %v2680_v23  ;;  %3911 = vst.msk [vmem:[#allocation4] sm:$0xff] %vm613_vm4, %v3879_v40  ;;  %6070 = vmatmul.msk.bf16.gmra.mxu2 %vm613_vm4, %v7661_v20  ;;  %v5505_v29 = vsel %vm3246_vm5, %v6179_v0, 0  ;;  %v3291_v35 = vpop.f32.mrf.mxu1  ;;  %v3179_v4 = vld [vmem:[#allocation3 + $0x168] sm:$0xff] }
 0x34f   : > { %v2965_v56 = vld [vmem:[#allocation4 + $0xf0] sm:$0xff]  ;;  %3146 = vst.msk [vmem:[#allocation3 + $0x171] sm:$0xff] %vm613_vm4, %v3068_v25  ;;  %6105 = vmatmul.msk.bf16.gmra.mxu0 %vm613_vm4, %v7553_v42  ;;  %5514 = vmatpush.bf16.msra.mxu1 %v5505_v29  ;;  %v3711_v29 = vld [vmem:[#allocation3 + $0x10a] sm:$0xff] }
 0x350   : > { %v3001_v59 = vmul.f32 %v7512_v5, %v2965_v56  ;;  %2934 = vst.msk [vmem:[#allocation4 + $0xf8] sm:$0xff] %vm613_vm4, %v2902_v46  ;;  %v3804_v58 = vpop.f32.mrf.mxu3  ;;  %v3426_v46 = vld [vmem:[#allocation3 + $0x111] sm:$0xff] }
 0x351   : > { %v3518_v38 = vpop.f32.mrf.mxu2  ;;  %3352 = vst.msk [vmem:[#allocation4 + $0x68] sm:$0xff] %vm613_vm4, %v3291_v35  ;;  %v3376_v56 = vld [vmem:[#allocation4 + $0x28] sm:$0xff] }
 0x352   : > { %v3595_v60 = vadd.f32 %v3518_v38, %v3373_v33  ;;  %v3037_v6 = vadd.f32 %v7519_v32, %v3001_v59  ;;  %v3712_v33 = vld [vmem:[#allocation3 + $0x112] sm:$0xff] }
 0x353   : > { %v3658_v11 = vld [vmem:[#allocation4 + $0x8] sm:$0xff]  ;;  %v3732_v35 = vpack.c.bf16 %v3712_v33, %v3711_v29  ;;  %v3716_v29 = vld [vmem:[#allocation3 + $0x142] sm:$0xff] }
 0x354   : > { %v3880_v48 = vadd.f32 %v3801_v43, %v3658_v11  ;;  %3627 = vst.msk [vmem:[#allocation4 + $0x10] sm:$0xff] %vm613_vm4, %v3595_v60  ;;  %v3069_v51 = vmax.f32 %v3037_v6, 0.0  ;;  %v7685_v13 = vpop.f32.mrf.mxu0  ;;  %v3425_v60 = vld [vmem:[#allocation3 + $0x109] sm:$0xff] }
 0x355   : > { %v3943_v42 = vld [vmem:[#allocation4] sm:$0xff] }
 0x356   : > { %3912 = vst.msk [vmem:[#allocation4 + $0x8] sm:$0xff] %vm613_vm4, %v3880_v48  ;;  %v4165_v24 = vadd.f32 %v7590_v62, %v3943_v42  ;;  %v3180_v9 = vld [vmem:[#allocation3 + $0x170] sm:$0xff]  ;;  %v3294_v27 = vpop.f32.mrf.mxu1  ;;  %v7720_v48 = vpack.c.bf16 %v3426_v46, %v3425_v60  ;;  %v3380_v46 = vld [vmem:[#allocation4 + $0x48] sm:$0xff] }
 0x357   : > { %v2966_v15 = vld [vmem:[#allocation4 + $0xf8] sm:$0xff]  ;;  %3147 = vst.msk [vmem:[#allocation3 + $0x181] sm:$0xff] %vm613_vm4, %v3069_v51  ;;  %v7693_v62 = vpack.c.bf16 %v3180_v9, %v3179_v4 }
 0x358   : > { %v3002_v3 = vmul.f32 %v7512_v5, %v2966_v15  ;;  %4197 = vst.msk [vmem:[#allocation4] sm:$0xff] %vm613_vm4, %v4165_v24  ;;  %v3806_v41 = vpop.f32.mrf.mxu3  ;;  %v7696_v5 = vpack.c.bf16 %v3424_v12, %v3423_v18  ;;  %v3377_v24 = vld [vmem:[#allocation4 + $0x30] sm:$0xff] }
 0x359   : > { %v3520_v63 = vpop.f32.mrf.mxu2  ;;  %3353 = vst.msk [vmem:[#allocation4 + $0x70] sm:$0xff] %vm613_vm4, %v3294_v27  ;;  %6059 = vmatmul.msk.bf16.gmra.mxu1 %vm613_vm4, %v7693_v62 }
 0x35a   : > { %v3596_v49 = vadd.f32 %v3520_v63, %v3374_v53  ;;  %v3038_v54 = vadd.f32 %v7519_v32, %v3002_v3 }
 0x35b   : > { %v3659_v61 = vld [vmem:[#allocation4 + $0x10] sm:$0xff] }
 0x35c   : > { %v3881_v43 = vadd.f32 %v3804_v58, %v3659_v61  ;;  %3628 = vst.msk [vmem:[#allocation4 + $0x18] sm:$0xff] %vm613_vm4, %v3596_v49  ;;  %v3070_v2 = vmax.f32 %v3038_v54, 0.0  ;;  %v7699_v45 = vpop.f32.mrf.mxu0  ;;  %v3713_v49 = vld [vmem:[#allocation3 + $0x122] sm:$0xff]  ;;  %v3714_v54 = vld [vmem:[#allocation3 + $0x12a] sm:$0xff] }
 0x35d   : > { %v3944_v22 = vld [vmem:[#allocation4 + $0x8] sm:$0xff]  ;;  %6088 = vmatmul.msk.bf16.gmra.mxu3 %vm613_vm4, %v3731_v30 }
 0x35e   : > { %3913 = vst.msk [vmem:[#allocation4 + $0x10] sm:$0xff] %vm613_vm4, %v3881_v43  ;;  %6071 = vmatmul.msk.bf16.gmra.mxu2 %vm613_vm4, %v7696_v5  ;;  %v4166_v32 = vadd.f32 %v7607_v17, %v3944_v22  ;;  %v3296_v25 = vpop.f32.mrf.mxu1  ;;  %v3427_v43 = vld [vmem:[#allocation3 + $0x121] sm:$0xff]  ;;  %v3733_v22 = vpack.c.bf16 %v3714_v54, %v3713_v49 }
 0x35f   : > { %3148 = vst.msk [vmem:[#allocation3 + $0x189] sm:$0xff] %vm613_vm4, %v3070_v2  ;;  %6106 = vmatmul.msk.bf16.gmra.mxu0 %vm613_vm4, %v7584_v34 }
 0x360   : > { %4198 = vst.msk [vmem:[#allocation4 + $0x8] sm:$0xff] %vm613_vm4, %v4166_v32  ;;  %v3809_v16 = vpop.f32.mrf.mxu3 }
 0x361   : > { %v3523_v7 = vpop.f32.mrf.mxu2  ;;  %3354 = vst.msk [vmem:[#allocation4 + $0x78] sm:$0xff] %vm613_vm4, %v3296_v25 }
 0x362   : > { %v3597_v40 = vadd.f32 %v3523_v7, %v3375_v31  ;;  %v3379_v7 = vld [vmem:[#allocation4 + $0x40] sm:$0xff] }
 0x363   : > { %v3660_v19 = vld [vmem:[#allocation4 + $0x18] sm:$0xff] }
 0x364   : > { %v3882_v37 = vadd.f32 %v3806_v41, %v3660_v19  ;;  %3629 = vst.msk [vmem:[#allocation4 + $0x20] sm:$0xff] %vm613_vm4, %v3597_v40  ;;  %v7714_v17 = vpop.f32.mrf.mxu0 }
 0x365   : > { %v3945_v23 = vld [vmem:[#allocation4 + $0x10] sm:$0xff] }
 0x366   : > { %3914 = vst.msk [vmem:[#allocation4 + $0x18] sm:$0xff] %vm613_vm4, %v3882_v37  ;;  %v4167_v34 = vadd.f32 %v7629_v26, %v3945_v23  ;;  %v3299_v11 = vpop.f32.mrf.mxu1 }
 0x367   : > { %3355 = vst.msk [vmem:[#allocation4 + $0x80] sm:$0xff] %vm613_vm4, %v3299_v11 }
 0x368   : > { %4199 = vst.msk [vmem:[#allocation4 + $0x10] sm:$0xff] %vm613_vm4, %v4167_v34  ;;  %v3811_v59 = vpop.f32.mrf.mxu3 }
 0x369   : > { %v3525_v0 = vpop.f32.mrf.mxu2  ;;  %6112 = vmatmul.msk.bf16.vlgmr.msrb.gmra.mxu1 %vm613_vm4, %v7396_v55 }
 0x36a   : > { %v3598_v38 = vadd.f32 %v3525_v0, %v3376_v56 }
 0x36b   : > { %v3661_v58 = vld [vmem:[#allocation4 + $0x20] sm:$0xff] }
 0x36c   : > { %v3883_v6 = vadd.f32 %v3809_v16, %v3661_v58  ;;  %3630 = vst.msk [vmem:[#allocation4 + $0x28] sm:$0xff] %vm613_vm4, %v3598_v38  ;;  %v7723_v26 = vpop.f32.mrf.mxu0  ;;  %v3429_v58 = vld [vmem:[#allocation3 + $0x139] sm:$0xff] }
 0x36d   : > { %v3946_v51 = vld [vmem:[#allocation4 + $0x18] sm:$0xff]  ;;  %6089 = vmatmul.msk.bf16.gmra.mxu3 %vm613_vm4, %v3732_v35 }
 0x36e   : > { %3915 = vst.msk [vmem:[#allocation4 + $0x20] sm:$0xff] %vm613_vm4, %v3883_v6  ;;  %6072 = vmatmul.msk.bf16.gmra.mxu2 %vm613_vm4, %v7720_v48  ;;  %v4168_v42 = vadd.f32 %v7646_v8, %v3946_v51  ;;  %v3301_v63 = vpop.f32.mrf.mxu1 }
 0x36f   : > { %6107 = vmatmul.msk.bf16.gmra.mxu0 %vm613_vm4, %v7623_v57  ;;  %3356 = vst.msk [vmem:[#allocation4 + $0x88] sm:$0xff] %vm613_vm4, %v3301_v63  ;;  %v3428_v57 = vld [vmem:[#allocation3 + $0x129] sm:$0xff] }
 0x370   : > { %4200 = vst.msk [vmem:[#allocation4 + $0x18] sm:$0xff] %vm613_vm4, %v4168_v42  ;;  %v3814_v3 = vpop.f32.mrf.mxu3  ;;  %v7743_v2 = vpack.c.bf16 %v3428_v57, %v3427_v43 }
 0x371   : > { %v3528_v15 = vpop.f32.mrf.mxu2 }
 0x372   : > { %v3599_v9 = vadd.f32 %v3528_v15, %v3377_v24  ;;  %v3381_v24 = vld [vmem:[#allocation4 + $0x50] sm:$0xff] }
 0x373   : > { %v3662_v12 = vld [vmem:[#allocation4 + $0x28] sm:$0xff] }
 0x374   : > { %v3884_v53 = vadd.f32 %v3811_v59, %v3662_v12  ;;  %3631 = vst.msk [vmem:[#allocation4 + $0x30] sm:$0xff] %vm613_vm4, %v3599_v9  ;;  %v7737_v8 = vpop.f32.mrf.mxu0  ;;  %v3715_v59 = vld [vmem:[#allocation3 + $0x13a] sm:$0xff] }
 0x375   : > { %v3947_v41 = vld [vmem:[#allocation4 + $0x20] sm:$0xff]  ;;  %v3734_v35 = vpack.c.bf16 %v3716_v29, %v3715_v59 }
 0x376   : > { %3916 = vst.msk [vmem:[#allocation4 + $0x28] sm:$0xff] %vm613_vm4, %v3884_v53  ;;  %v4169_v55 = vadd.f32 %v7664_v10, %v3947_v41  ;;  %v3304_v30 = vpop.f32.mrf.mxu1  ;;  %v3719_v29 = vld [vmem:[#allocation3 + $0x16a] sm:$0xff] }
 0x377   : > { %3357 = vst.msk [vmem:[#allocation4 + $0x90] sm:$0xff] %vm613_vm4, %v3304_v30 }
 0x378   : > { %4201 = vst.msk [vmem:[#allocation4 + $0x20] sm:$0xff] %vm613_vm4, %v4169_v55  ;;  %v3816_v4 = vpop.f32.mrf.mxu3  ;;  %v3382_v55 = vld [vmem:[#allocation4 + $0x58] sm:$0xff] }
 0x379   : > { %v3530_v1 = vpop.f32.mrf.mxu2  ;;  %6113 = vmatmul.msk.bf16.gmra.mxu1 %vm613_vm4, %v7426_v28 }
 0x37a   : > { %v3600_v61 = vadd.f32 %v3530_v1, %v3378_v36  ;;  %v3717_v1 = vld [vmem:[#allocation3 + $0x152] sm:$0xff] }
 0x37b   : > { %v3663_v18 = vld [vmem:[#allocation4 + $0x30] sm:$0xff] }
 0x37c   : > { %v3885_v27 = vadd.f32 %v3814_v3, %v3663_v18  ;;  %3632 = vst.msk [vmem:[#allocation4 + $0x38] sm:$0xff] %vm613_vm4, %v3600_v61  ;;  %v7746_v10 = vpop.f32.mrf.mxu0  ;;  %v3431_v61 = vld [vmem:[#allocation3 + $0x151] sm:$0xff]  ;;  %v4006_v18 = vld [vmem:[#allocation3 + $0x188] sm:$0xff] }
 0x37d   : > { %v3948_v32 = vld [vmem:[#allocation4 + $0x28] sm:$0xff]  ;;  %6090 = vmatmul.msk.bf16.gmra.mxu3 %vm613_vm4, %v3733_v22 }
 0x37e   : > { %3917 = vst.msk [vmem:[#allocation4 + $0x30] sm:$0xff] %vm613_vm4, %v3885_v27  ;;  %6073 = vmatmul.msk.bf16.gmra.mxu2 %vm613_vm4, %v7743_v2  ;;  %v4170_v31 = vadd.f32 %v7685_v13, %v3948_v32  ;;  %v3306_v23 = vpop.f32.mrf.mxu1  ;;  %v4005_v32 = vld [vmem:[#allocation3 + $0x180] sm:$0xff] }
 0x37f   : > { %6108 = vmatmul.msk.bf16.gmra.mxu0 %vm613_vm4, %v7658_v21  ;;  %3358 = vst.msk [vmem:[#allocation4 + $0x98] sm:$0xff] %vm613_vm4, %v3306_v23  ;;  %v3430_v21 = vld [vmem:[#allocation3 + $0x141] sm:$0xff] }
 0x380   : > { %4202 = vst.msk [vmem:[#allocation4 + $0x28] sm:$0xff] %vm613_vm4, %v4170_v31  ;;  %v3819_v40 = vpop.f32.mrf.mxu3  ;;  %v7766_v11 = vpack.c.bf16 %v3430_v21, %v3429_v58 }
 0x381   : > { %v3533_v16 = vpop.f32.mrf.mxu2 }
 0x382   : > { %v3601_v19 = vadd.f32 %v3533_v16, %v3379_v7  ;;  %v4022_v7 = vpack.c.bf16 %v4006_v18, %v4005_v32  ;;  %v4835_v18 = vld [vmem:[#allocation3 + $0x38] sm:$0xff] }
 0x383   : > { %v3664_v37 = vld [vmem:[#allocation4 + $0x38] sm:$0xff]  ;;  %v5123_v32 = vld [vmem:[#allocation3 + $0x51] sm:$0xff] }
 0x384   : > { %v3886_v25 = vadd.f32 %v3816_v4, %v3664_v37  ;;  %3633 = vst.msk [vmem:[#allocation4 + $0x40] sm:$0xff] %vm613_vm4, %v3601_v19  ;;  %v7760_v13 = vpop.f32.mrf.mxu0  ;;  %v3718_v4 = vld [vmem:[#allocation3 + $0x15a] sm:$0xff] }
 0x385   : > { %v3949_v34 = vld [vmem:[#allocation4 + $0x30] sm:$0xff]  ;;  %v3735_v22 = vpack.c.bf16 %v3718_v4, %v3717_v1  ;;  %v3386_v4 = vld [vmem:[#allocation4 + $0x78] sm:$0xff] }
 0x386   : > { %3918 = vst.msk [vmem:[#allocation4 + $0x38] sm:$0xff] %vm613_vm4, %v3886_v25  ;;  %v4171_v28 = vadd.f32 %v7699_v45, %v3949_v34  ;;  %v3309_v6 = vpop.f32.mrf.mxu1  ;;  %v4547_v1 = vld [vmem:[#allocation3 + $0x1a] sm:$0xff] }
 0x387   : > { %3359 = vst.msk [vmem:[#allocation4 + $0xa0] sm:$0xff] %vm613_vm4, %v3309_v6  ;;  %v5121_v6 = vld [vmem:[#allocation3 + $0x39] sm:$0xff] }
 0x388   : > { %4203 = vst.msk [vmem:[#allocation4 + $0x30] sm:$0xff] %vm613_vm4, %v4171_v28  ;;  %v3821_v0 = vpop.f32.mrf.mxu3 }
 0x389   : > { %v3535_v56 = vpop.f32.mrf.mxu2  ;;  %6114 = vmatmul.msk.bf16.gmra.mxu1 %vm613_vm4, %v7455_v39 }
 0x38a   : > { %v3602_v33 = vadd.f32 %v3535_v56, %v3380_v46  ;;  %v3434_v46 = vld [vmem:[#allocation3 + $0x171] sm:$0xff] }
 0x38b   : > { %v3665_v38 = vld [vmem:[#allocation4 + $0x40] sm:$0xff]  ;;  %v3384_v56 = vld [vmem:[#allocation4 + $0x68] sm:$0xff] }
 0x38c   : > { %v3887_v60 = vadd.f32 %v3819_v40, %v3665_v38  ;;  %3634 = vst.msk [vmem:[#allocation4 + $0x48] sm:$0xff] %vm613_vm4, %v3602_v33  ;;  %v7769_v45 = vpop.f32.mrf.mxu0  ;;  %v3383_v40 = vld [vmem:[#allocation4 + $0x60] sm:$0xff] }
 0x38d   : > { %v3950_v51 = vld [vmem:[#allocation4 + $0x38] sm:$0xff]  ;;  %6091 = vmatmul.msk.bf16.gmra.mxu3 %vm613_vm4, %v3734_v35  ;;  %v3720_v33 = vld [vmem:[#allocation3 + $0x172] sm:$0xff] }
 0x38e   : > { %3919 = vst.msk [vmem:[#allocation4 + $0x40] sm:$0xff] %vm613_vm4, %v3887_v60  ;;  %6074 = vmatmul.msk.bf16.gmra.mxu2 %vm613_vm4, %v7766_v11  ;;  %v4172_v42 = vadd.f32 %v7714_v17, %v3950_v51  ;;  %v3311_v63 = vpop.f32.mrf.mxu1  ;;  %v3433_v60 = vld [vmem:[#allocation3 + $0x169] sm:$0xff] }
 0x38f   : > { %6109 = vmatmul.msk.bf16.gmra.mxu0 %vm613_vm4, %v7693_v62  ;;  %3360 = vst.msk [vmem:[#allocation4 + $0xa8] sm:$0xff] %vm613_vm4, %v3311_v63  ;;  %v3432_v62 = vld [vmem:[#allocation3 + $0x159] sm:$0xff] }
 0x390   : > { %4204 = vst.msk [vmem:[#allocation4 + $0x38] sm:$0xff] %vm613_vm4, %v4172_v42  ;;  %v3824_v3 = vpop.f32.mrf.mxu3  ;;  %v7789_v30 = vpack.c.bf16 %v3432_v62, %v3431_v61  ;;  %v7811_v42 = vpack.c.bf16 %v3434_v46, %v3433_v60  ;;  %v4548_v61 = vld [vmem:[#allocation3 + $0x22] sm:$0xff]  ;;  %v4550_v60 = vld [vmem:[#allocation3 + $0x3a] sm:$0xff] }
 0x391   : > { %v3538_v15 = vpop.f32.mrf.mxu2 }
 0x392   : > { %v3603_v9 = vadd.f32 %v3538_v15, %v3381_v24  ;;  %v3736_v24 = vpack.c.bf16 %v3720_v33, %v3719_v29  ;;  %v5120_v15 = vld [vmem:[#allocation3 + $0x31] sm:$0xff] }
 0x393   : > { %v3666_v12 = vld [vmem:[#allocation4 + $0x48] sm:$0xff] }
 0x394   : > { %v3888_v53 = vadd.f32 %v3821_v0, %v3666_v12  ;;  %3635 = vst.msk [vmem:[#allocation4 + $0x50] sm:$0xff] %vm613_vm4, %v3603_v9  ;;  %v7783_v17 = vpop.f32.mrf.mxu0  ;;  %v5152_v9 = vpack.c.bf16 %v5121_v6, %v5120_v15  ;;  %v4549_v29 = vld [vmem:[#allocation3 + $0x32] sm:$0xff]  ;;  %v5125_v15 = vld [vmem:[#allocation3 + $0x69] sm:$0xff] }
 0x395   : > { %v3951_v41 = vld [vmem:[#allocation4 + $0x40] sm:$0xff]  ;;  %v3388_v33 = vld [vmem:[#allocation4 + $0x88] sm:$0xff] }
 0x396   : > { %3920 = vst.msk [vmem:[#allocation4 + $0x48] sm:$0xff] %vm613_vm4, %v3888_v53  ;;  %v4173_v39 = vadd.f32 %v7723_v26, %v3951_v41  ;;  %v3314_v27 = vpop.f32.mrf.mxu1  ;;  %v3385_v53 = vld [vmem:[#allocation4 + $0x70] sm:$0xff]  ;;  %v4837_v6 = vld [vmem:[#allocation3 + $0x50] sm:$0xff] }
 0x397   : > { %3361 = vst.msk [vmem:[#allocation4 + $0xb0] sm:$0xff] %vm613_vm4, %v3314_v27 }
 0x398   : > { %4205 = vst.msk [vmem:[#allocation4 + $0x40] sm:$0xff] %vm613_vm4, %v4173_v39  ;;  %v3826_v36 = vpop.f32.mrf.mxu3 }
 0x399   : > { %v3540_v57 = vpop.f32.mrf.mxu2  ;;  %6115 = vmatmul.msk.bf16.gmra.mxu1 %vm613_vm4, %v7484_v52 }
 0x39a   : > { %v3604_v49 = vadd.f32 %v3540_v57, %v3382_v55 }
 0x39b   : > { %v3667_v54 = vld [vmem:[#allocation4 + $0x50] sm:$0xff] }
 0x39c   : > { %v3889_v43 = vadd.f32 %v3824_v3, %v3667_v54  ;;  %3636 = vst.msk [vmem:[#allocation4 + $0x58] sm:$0xff] %vm613_vm4, %v3604_v49  ;;  %v7792_v26 = vpop.f32.mrf.mxu0 }
 0x39d   : > { %v3952_v31 = vld [vmem:[#allocation4 + $0x48] sm:$0xff]  ;;  %6092 = vmatmul.msk.bf16.gmra.mxu3 %vm613_vm4, %v3735_v22  ;;  %v4834_v22 = vld [vmem:[#allocation3 + $0x30] sm:$0xff] }
 0x39e   : > { %3921 = vst.msk [vmem:[#allocation4 + $0x50] sm:$0xff] %vm613_vm4, %v3889_v43  ;;  %6075 = vmatmul.msk.bf16.gmra.mxu2 %vm613_vm4, %v7789_v30  ;;  %v4174_v16 = vadd.f32 %v7737_v8, %v3952_v31  ;;  %v3316_v28 = vpop.f32.mrf.mxu1 }
 0x39f   : > { %6110 = vmatmul.msk.bf16.gmra.mxu0 %vm613_vm4, %v4022_v7  ;;  %3362 = vst.msk [vmem:[#allocation4 + $0xb8] sm:$0xff] %vm613_vm4, %v3316_v28 }
 0x3a0   : > { %4206 = vst.msk [vmem:[#allocation4 + $0x48] sm:$0xff] %vm613_vm4, %v4174_v16  ;;  %v3829_v37 = vpop.f32.mrf.mxu3  ;;  %v4579_v16 = vpack.c.bf16 %v4548_v61, %v4547_v1  ;;  %v4551_v61 = vld [vmem:[#allocation3 + $0x4a] sm:$0xff] }
 0x3a1   : > { %v3543_v19 = vpop.f32.mrf.mxu2 }
 0x3a2   : > { %v3605_v25 = vadd.f32 %v3543_v19, %v3383_v40  ;;  %v4866_v40 = vpack.c.bf16 %v4835_v18, %v4834_v22  ;;  %v5122_v19 = vld [vmem:[#allocation3 + $0x49] sm:$0xff]  ;;  %v4552_v22 = vld [vmem:[#allocation3 + $0x52] sm:$0xff] }
 0x3a3   : > { %v3668_v23 = vld [vmem:[#allocation4 + $0x58] sm:$0xff] }
 0x3a4   : > { %v3890_v34 = vadd.f32 %v3826_v36, %v3668_v23  ;;  %3637 = vst.msk [vmem:[#allocation4 + $0x60] sm:$0xff] %vm613_vm4, %v3605_v25  ;;  %v7805_v21 = vpop.f32.mrf.mxu0  ;;  %v5153_v25 = vpack.c.bf16 %v5123_v32, %v5122_v19  ;;  %v3390_v18 = vld [vmem:[#allocation4 + $0x98] sm:$0xff] }
 0x3a5   : > { %v3953_v8 = vld [vmem:[#allocation4 + $0x50] sm:$0xff]  ;;  %v4839_v32 = vld [vmem:[#allocation3 + $0x68] sm:$0xff] }
 0x3a6   : > { %3922 = vst.msk [vmem:[#allocation4 + $0x58] sm:$0xff] %vm613_vm4, %v3890_v34  ;;  %v4175_v52 = vadd.f32 %v7746_v10, %v3953_v8  ;;  %v3319_v51 = vpop.f32.mrf.mxu1  ;;  %v3387_v34 = vld [vmem:[#allocation4 + $0x80] sm:$0xff] }
 0x3a7   : > { %3363 = vst.msk [vmem:[#allocation4 + $0xc0] sm:$0xff] %vm613_vm4, %v3319_v51 }
 0x3a8   : > { %4207 = vst.msk [vmem:[#allocation4 + $0x50] sm:$0xff] %vm613_vm4, %v4175_v52  ;;  %v3831_v59 = vpop.f32.mrf.mxu3 }
 0x3a9   : > { %v3545_v0 = vpop.f32.mrf.mxu2  ;;  %6116 = vmatmul.msk.bf16.gmra.mxu1 %vm613_vm4, %v7525_v50 }
 0x3aa   : > { %v3606_v38 = vadd.f32 %v3545_v0, %v3384_v56 }
 0x3ab   : > { %v3669_v58 = vld [vmem:[#allocation4 + $0x60] sm:$0xff] }
 0x3ac   : > { %v3891_v35 = vadd.f32 %v3829_v37, %v3669_v58  ;;  %3638 = vst.msk [vmem:[#allocation4 + $0x68] sm:$0xff] %vm613_vm4, %v3606_v38  ;;  %v7814_v10 = vpop.f32.mrf.mxu0 }
 0x3ad   : > { %v3954_v3 = vld [vmem:[#allocation4 + $0x58] sm:$0xff]  ;;  %6093 = vmatmul.msk.bf16.gmra.mxu3 %vm613_vm4, %v3736_v24 }
 0x3ae   : > { %3923 = vst.msk [vmem:[#allocation4 + $0x60] sm:$0xff] %vm613_vm4, %v3891_v35  ;;  %6076 = vmatmul.msk.bf16.gmra.mxu2 %vm613_vm4, %v7811_v42  ;;  %v4176_v12 = vadd.f32 %v7760_v13, %v3954_v3  ;;  %v3321_v57 = vpop.f32.mrf.mxu1  ;;  %v4836_v24 = vld [vmem:[#allocation3 + $0x48] sm:$0xff] }
 0x3af   : > { %6163 = vmatmul.msk.bf16.vlgmr.msra.gmra.mxu0 %vm613_vm4, %v5152_v9  ;;  %3364 = vst.msk [vmem:[#allocation4 + $0xc8] sm:$0xff] %vm613_vm4, %v3321_v57 }
 0x3b0   : > { %4208 = vst.msk [vmem:[#allocation4 + $0x58] sm:$0xff] %vm613_vm4, %v4176_v12  ;;  %v3834_v41 = vpop.f32.mrf.mxu3  ;;  %v7852_v12 = vpack.c.bf16 %v4550_v60, %v4549_v29  ;;  %v3392_v60 = vld [vmem:[#allocation4 + $0xa8] sm:$0xff] }
 0x3b1   : > { %v3548_v63 = vpop.f32.mrf.mxu2 }
 0x3b2   : > { %v3607_v39 = vadd.f32 %v3548_v63, %v3385_v53  ;;  %v4867_v53 = vpack.c.bf16 %v4837_v6, %v4836_v24  ;;  %v5124_v63 = vld [vmem:[#allocation3 + $0x61] sm:$0xff] }
 0x3b3   : > { %v3670_v62 = vld [vmem:[#allocation4 + $0x68] sm:$0xff]  ;;  %v4841_v24 = vld [vmem:[#allocation3 + $0x80] sm:$0xff] }
 0x3b4   : > { %v3892_v55 = vadd.f32 %v3831_v59, %v3670_v62  ;;  %3639 = vst.msk [vmem:[#allocation4 + $0x70] sm:$0xff] %vm613_vm4, %v3607_v39  ;;  %v7827_v36 = vpop.f32.mrf.mxu0  ;;  %v5154_v39 = vpack.c.bf16 %v5125_v15, %v5124_v63 }
 0x3b5   : > { %v3955_v13 = vld [vmem:[#allocation4 + $0x60] sm:$0xff] }
 0x3b6   : > { %3924 = vst.msk [vmem:[#allocation4 + $0x68] sm:$0xff] %vm613_vm4, %v3892_v55  ;;  %v4177_v50 = vadd.f32 %v7769_v45, %v3955_v13  ;;  %v3324_v7 = vpop.f32.mrf.mxu1  ;;  %v3389_v55 = vld [vmem:[#allocation4 + $0x90] sm:$0xff] }
 0x3b7   : > { %3365 = vst.msk [vmem:[#allocation4 + $0xd0] sm:$0xff] %vm613_vm4, %v3324_v7 }
 0x3b8   : > { %4209 = vst.msk [vmem:[#allocation4 + $0x60] sm:$0xff] %vm613_vm4, %v4177_v50  ;;  %v3836_v54 = vpop.f32.mrf.mxu3 }
 0x3b9   : > { %v3550_v49 = vpop.f32.mrf.mxu2  ;;  %6117 = vmatmul.msk.bf16.gmra.mxu1 %vm613_vm4, %v7556_v44 }
 0x3ba   : > { %v3608_v43 = vadd.f32 %v3550_v49, %v3386_v4 }
 0x3bb   : > { %v3671_v27 = vld [vmem:[#allocation4 + $0x70] sm:$0xff] }
 0x3bc   : > { %v3893_v31 = vadd.f32 %v3834_v41, %v3671_v27  ;;  %3640 = vst.msk [vmem:[#allocation4 + $0x78] sm:$0xff] %vm613_vm4, %v3608_v43  ;;  %v7834_v45 = vpop.f32.mrf.mxu0 }
 0x3bd   : > { %v3956_v37 = vld [vmem:[#allocation4 + $0x68] sm:$0xff]  ;;  %6146 = vmatmul.msk.bf16.vlgmr.msra.gmra.mxu3 %vm613_vm4, %v4866_v40  ;;  %v5127_v40 = vld [vmem:[#allocation3 + $0x81] sm:$0xff] }
 0x3be   : > { %3925 = vst.msk [vmem:[#allocation4 + $0x70] sm:$0xff] %vm613_vm4, %v3893_v31  ;;  %6129 = vmatmul.msk.bf16.vlgmr.msra.gmra.mxu2 %vm613_vm4, %v4579_v16  ;;  %v4178_v23 = vadd.f32 %v7783_v17, %v3956_v37  ;;  %v3326_v0 = vpop.f32.mrf.mxu1  ;;  %v4838_v16 = vld [vmem:[#allocation3 + $0x60] sm:$0xff] }
 0x3bf   : > { %6164 = vmatmul.msk.bf16.gmra.mxu0 %vm613_vm4, %v5153_v25  ;;  %3366 = vst.msk [vmem:[#allocation4 + $0xd8] sm:$0xff] %vm613_vm4, %v3326_v0  ;;  %v7874_v25 = vpack.c.bf16 %v4552_v22, %v4551_v61 }
 0x3c0   : > { %4210 = vst.msk [vmem:[#allocation4 + $0x68] sm:$0xff] %vm613_vm4, %v4178_v23  ;;  %v3839_v8 = vpop.f32.mrf.mxu3  ;;  %v4868_v23 = vpack.c.bf16 %v4839_v32, %v4838_v16  ;;  %v3394_v16 = vld [vmem:[#allocation4 + $0xb8] sm:$0xff] }
 0x3c1   : > { %v3553_v28 = vpop.f32.mrf.mxu2 }
 0x3c2   : > { %v3609_v52 = vadd.f32 %v3553_v28, %v3387_v34  ;;  %v5126_v34 = vld [vmem:[#allocation3 + $0x79] sm:$0xff] }
 0x3c3   : > { %v3672_v46 = vld [vmem:[#allocation4 + $0x78] sm:$0xff] }
 0x3c4   : > { %v3894_v56 = vadd.f32 %v3836_v54, %v3672_v46  ;;  %3641 = vst.msk [vmem:[#allocation4 + $0x80] sm:$0xff] %vm613_vm4, %v3609_v52  ;;  %v7846_v59 = vpop.f32.mrf.mxu0  ;;  %v3391_v46 = vld [vmem:[#allocation4 + $0xa0] sm:$0xff] }
 0x3c5   : > { %v3957_v17 = vld [vmem:[#allocation4 + $0x70] sm:$0xff] }
 0x3c6   : > { %3926 = vst.msk [vmem:[#allocation4 + $0x78] sm:$0xff] %vm613_vm4, %v3894_v56  ;;  %v4179_v44 = vadd.f32 %v7792_v26, %v3957_v17  ;;  %v3329_v9 = vpop.f32.mrf.mxu1 }
 0x3c7   : > { %3367 = vst.msk [vmem:[#allocation4 + $0xe0] sm:$0xff] %vm613_vm4, %v3329_v9  ;;  %v4840_v9 = vld [vmem:[#allocation3 + $0x78] sm:$0xff] }
 0x3c8   : > { %4211 = vst.msk [vmem:[#allocation4 + $0x70] sm:$0xff] %vm613_vm4, %v4179_v44  ;;  %v3841_v58 = vpop.f32.mrf.mxu3 }
 0x3c9   : > { %v3555_v38 = vpop.f32.mrf.mxu2  ;;  %6118 = vmatmul.msk.bf16.gmra.mxu1 %vm613_vm4, %v7587_v14 }
 0x3ca   : > { %v3610_v35 = vadd.f32 %v3555_v38, %v3388_v33 }
 0x3cb   : > { %v3673_v51 = vld [vmem:[#allocation4 + $0x80] sm:$0xff] }
 0x3cc   : > { %v3895_v3 = vadd.f32 %v3839_v8, %v3673_v51  ;;  %3642 = vst.msk [vmem:[#allocation4 + $0x88] sm:$0xff] %vm613_vm4, %v3610_v35  ;;  %v7855_v26 = vpop.f32.mrf.mxu0  ;;  %v5155_v8 = vpack.c.bf16 %v5127_v40, %v5126_v34  ;;  %v4554_v51 = vld [vmem:[#allocation3 + $0x6a] sm:$0xff] }
 0x3cd   : > { %v3958_v41 = vld [vmem:[#allocation4 + $0x78] sm:$0xff]  ;;  %6147 = vmatmul.msk.bf16.gmra.mxu3 %vm613_vm4, %v4867_v53  ;;  %v5129_v53 = vld [vmem:[#allocation3 + $0x99] sm:$0xff] }
 0x3ce   : > { %3927 = vst.msk [vmem:[#allocation4 + $0x80] sm:$0xff] %vm613_vm4, %v3895_v3  ;;  %6130 = vmatmul.msk.bf16.gmra.mxu2 %vm613_vm4, %v7852_v12  ;;  %v4180_v62 = vadd.f32 %v7805_v21, %v3958_v41  ;;  %v3331_v49 = vpop.f32.mrf.mxu1  ;;  %v4229_v41 = vld [vmem:[#allocation4] sm:$0xff] }
 0x3cf   : > { %6165 = vmatmul.msk.bf16.gmra.mxu0 %vm613_vm4, %v5154_v39  ;;  %3368 = vst.msk [vmem:[#allocation4 + $0xe8] sm:$0xff] %vm613_vm4, %v3331_v49  ;;  %v3393_v49 = vld [vmem:[#allocation4 + $0xb0] sm:$0xff] }
 0x3d0   : > { %4212 = vst.msk [vmem:[#allocation4 + $0x78] sm:$0xff] %vm613_vm4, %v4180_v62  ;;  %v3844_v13 = vpop.f32.mrf.mxu3 }
 0x3d1   : > { %v3558_v57 = vpop.f32.mrf.mxu2 }
 0x3d2   : > { %v3611_v50 = vadd.f32 %v3558_v57, %v3389_v55 }
 0x3d3   : > { %v3674_v1 = vld [vmem:[#allocation4 + $0x88] sm:$0xff] }
 0x3d4   : > { %v3896_v4 = vadd.f32 %v3841_v58, %v3674_v1  ;;  %3643 = vst.msk [vmem:[#allocation4 + $0x90] sm:$0xff] %vm613_vm4, %v3611_v50  ;;  %v7868_v54 = vpop.f32.mrf.mxu0  ;;  %v4553_v58 = vld [vmem:[#allocation3 + $0x62] sm:$0xff] }
 0x3d5   : > { %v3959_v21 = vld [vmem:[#allocation4 + $0x80] sm:$0xff]  ;;  %v7896_v62 = vpack.c.bf16 %v4554_v51, %v4553_v58 }
 0x3d6   : > { %3928 = vst.msk [vmem:[#allocation4 + $0x88] sm:$0xff] %vm613_vm4, %v3896_v4  ;;  %v4181_v14 = vadd.f32 %v7814_v10, %v3959_v21  ;;  %v3334_v37 = vpop.f32.mrf.mxu1 }
 0x3d7   : > { %3369 = vst.msk [vmem:[#allocation4 + $0xf0] sm:$0xff] %vm613_vm4, %v3334_v37  ;;  %v4556_v37 = vld [vmem:[#allocation3 + $0x82] sm:$0xff] }
 0x3d8   : > { %4213 = vst.msk [vmem:[#allocation4 + $0x80] sm:$0xff] %vm613_vm4, %v4181_v14  ;;  %v3846_v27 = vpop.f32.mrf.mxu3 }
 0x3d9   : > { %v3560_v43 = vpop.f32.mrf.mxu2  ;;  %6119 = vmatmul.msk.bf16.gmra.mxu1 %vm613_vm4, %v7626_v47 }
 0x3da   : > { %v3612_v31 = vadd.f32 %v3560_v43, %v3390_v18 }
 0x3db   : > { %v3675_v7 = vld [vmem:[#allocation4 + $0x90] sm:$0xff] }
 0x3dc   : > { %v3897_v19 = vadd.f32 %v3844_v13, %v3675_v7  ;;  %3644 = vst.msk [vmem:[#allocation4 + $0x98] sm:$0xff] %vm613_vm4, %v3612_v31  ;;  %v7877_v10 = vpop.f32.mrf.mxu0  ;;  %v5128_v13 = vld [vmem:[#allocation3 + $0x91] sm:$0xff]  ;;  %v4555_v7 = vld [vmem:[#allocation3 + $0x7a] sm:$0xff] }
 0x3dd   : > { %v3960_v28 = vld [vmem:[#allocation4 + $0x88] sm:$0xff]  ;;  %6148 = vmatmul.msk.bf16.gmra.mxu3 %vm613_vm4, %v4868_v23  ;;  %v5156_v1 = vpack.c.bf16 %v5129_v53, %v5128_v13 }
 0x3de   : > { %3929 = vst.msk [vmem:[#allocation4 + $0x90] sm:$0xff] %vm613_vm4, %v3897_v19  ;;  %6131 = vmatmul.msk.bf16.gmra.mxu2 %vm613_vm4, %v7874_v25  ;;  %v4182_v52 = vadd.f32 %v7827_v36, %v3960_v28  ;;  %v3336_v33 = vpop.f32.mrf.mxu1  ;;  %v4843_v23 = vld [vmem:[#allocation3 + $0x98] sm:$0xff] }
 0x3df   : > { %6166 = vmatmul.msk.bf16.gmra.mxu0 %vm613_vm4, %v5155_v8  ;;  %3370 = vst.msk [vmem:[#allocation4 + $0xf8] sm:$0xff] %vm613_vm4, %v3336_v33  ;;  %v4842_v8 = vld [vmem:[#allocation3 + $0x90] sm:$0xff]  ;;  %v4558_v13 = vld [vmem:[#allocation3 + $0x9a] sm:$0xff] }
 0x3e0   : > { %4214 = vst.msk [vmem:[#allocation4 + $0x88] sm:$0xff] %vm613_vm4, %v4182_v52  ;;  %v3849_v0 = vpop.f32.mrf.mxu3  ;;  %v5131_v52 = vld [vmem:[#allocation3 + $0xb1] sm:$0xff]  ;;  %v5130_v33 = vld [vmem:[#allocation3 + $0xa9] sm:$0xff] }
 0x3e1   : > { %v3563_v56 = vpop.f32.mrf.mxu2 }
 0x3e2   : > { %v3613_v17 = vadd.f32 %v3563_v56, %v3391_v46  ;;  %v4231_v56 = vld [vmem:[#allocation4 + $0x10] sm:$0xff] }
 0x3e3   : > { %v3676_v44 = vld [vmem:[#allocation4 + $0x98] sm:$0xff] }
 0x3e4   : > { %v3898_v29 = vadd.f32 %v3846_v27, %v3676_v44  ;;  %3645 = vst.msk [vmem:[#allocation4 + $0xa0] sm:$0xff] %vm613_vm4, %v3613_v17  ;;  %v7890_v38 = vpop.f32.mrf.mxu0  ;;  %v4230_v27 = vld [vmem:[#allocation4 + $0x8] sm:$0xff]  ;;  %v4870_v17 = vpack.c.bf16 %v4843_v23, %v4842_v8 }
 0x3e5   : > { %v3961_v36 = vld [vmem:[#allocation4 + $0x90] sm:$0xff] }
 0x3e6   : > { %3930 = vst.msk [vmem:[#allocation4 + $0x98] sm:$0xff] %vm613_vm4, %v3898_v29  ;;  %v4183_v47 = vadd.f32 %v7834_v45, %v3961_v36  ;;  %v4371_v39 = vpop.f32.mrf.mxu1  ;;  %v4869_v45 = vpack.c.bf16 %v4841_v24, %v4840_v9 }
 0x3e7   : > { %v4451_v55 = vadd.f32 %v4371_v39, %v4229_v41  ;;  %v4557_v41 = vld [vmem:[#allocation3 + $0x92] sm:$0xff] }
 0x3e8   : > { %4215 = vst.msk [vmem:[#allocation4 + $0x90] sm:$0xff] %vm613_vm4, %v4183_v47  ;;  %v3851_v35 = vpop.f32.mrf.mxu3  ;;  %v5157_v47 = vpack.c.bf16 %v5131_v52, %v5130_v33  ;;  %v3396_v39 = vld [vmem:[#allocation4 + $0xc8] sm:$0xff] }
 0x3e9   : > { %v3565_v6 = vpop.f32.mrf.mxu2  ;;  %4483 = vst.msk [vmem:[#allocation4] sm:$0xff] %vm613_vm4, %v4451_v55  ;;  %6120 = vmatmul.msk.bf16.gmra.mxu1 %vm613_vm4, %v7661_v20  ;;  %v4560_v33 = vld [vmem:[#allocation3 + $0xb2] sm:$0xff] }
 0x3ea   : > { %v3614_v15 = vadd.f32 %v3565_v6, %v3392_v60  ;;  %v3395_v60 = vld [vmem:[#allocation4 + $0xc0] sm:$0xff] }
 0x3eb   : > { %v3677_v3 = vld [vmem:[#allocation4 + $0xa0] sm:$0xff] }
 0x3ec   : > { %v3899_v63 = vadd.f32 %v3849_v0, %v3677_v3  ;;  %3646 = vst.msk [vmem:[#allocation4 + $0xa8] sm:$0xff] %vm613_vm4, %v3614_v15  ;;  %v7898_v57 = vpop.f32.mrf.mxu0  ;;  %v4232_v3 = vld [vmem:[#allocation4 + $0x18] sm:$0xff] }
 0x3ed   : > { %v3962_v50 = vld [vmem:[#allocation4 + $0x98] sm:$0xff]  ;;  %6149 = vmatmul.msk.bf16.gmra.mxu3 %vm613_vm4, %v4869_v45 }
 0x3ee   : > { %3931 = vst.msk [vmem:[#allocation4 + $0xa0] sm:$0xff] %vm613_vm4, %v3899_v63  ;;  %6132 = vmatmul.msk.bf16.gmra.mxu2 %vm613_vm4, %v7896_v62  ;;  %v4184_v4 = vadd.f32 %v7846_v59, %v3962_v50  ;;  %v4373_v22 = vpop.f32.mrf.mxu1  ;;  %v4845_v50 = vld [vmem:[#allocation3 + $0xb0] sm:$0xff] }
 0x3ef   : > { %6167 = vmatmul.msk.bf16.gmra.mxu0 %vm613_vm4, %v5156_v1  ;;  %v4452_v59 = vadd.f32 %v4373_v22, %v4230_v27 }
 0x3f0   : > { %4216 = vst.msk [vmem:[#allocation4 + $0x98] sm:$0xff] %vm613_vm4, %v4184_v4  ;;  %v3854_v14 = vpop.f32.mrf.mxu3 }
 0x3f1   : > { %v3568_v21 = vpop.f32.mrf.mxu2  ;;  %4484 = vst.msk [vmem:[#allocation4 + $0x8] sm:$0xff] %vm613_vm4, %v4452_v59  ;;  %v5132_v59 = vld [vmem:[#allocation3 + $0xc1] sm:$0xff] }
 0x3f2   : > { %v3615_v61 = vadd.f32 %v3568_v21, %v3393_v49  ;;  %v4844_v49 = vld [vmem:[#allocation3 + $0xa8] sm:$0xff] }
 0x3f3   : > { %v3678_v18 = vld [vmem:[#allocation4 + $0xa8] sm:$0xff]  ;;  %v5133_v21 = vld [vmem:[#allocation3 + $0xc9] sm:$0xff] }
 0x3f4   : > { %v3900_v43 = vadd.f32 %v3851_v35, %v3678_v18  ;;  %3647 = vst.msk [vmem:[#allocation4 + $0xb0] sm:$0xff] %vm613_vm4, %v3615_v61  ;;  %v7911_v32 = vpop.f32.mrf.mxu0  ;;  %v4233_v61 = vld [vmem:[#allocation4 + $0x20] sm:$0xff] }
 0x3f5   : > { %v3963_v31 = vld [vmem:[#allocation4 + $0xa0] sm:$0xff] }
 0x3f6   : > { %3932 = vst.msk [vmem:[#allocation4 + $0xa8] sm:$0xff] %vm613_vm4, %v3900_v43  ;;  %v4185_v20 = vadd.f32 %v7855_v26, %v3963_v31  ;;  %v4376_v0 = vpop.f32.mrf.mxu1  ;;  %v7918_v26 = vpack.c.bf16 %v4556_v37, %v4555_v7  ;;  %v4871_v43 = vpack.c.bf16 %v4845_v50, %v4844_v49 }
 0x3f7   : > { %v4453_v44 = vadd.f32 %v4376_v0, %v4231_v56  ;;  %v4559_v56 = vld [vmem:[#allocation3 + $0xaa] sm:$0xff] }
 0x3f8   : > { %4217 = vst.msk [vmem:[#allocation4 + $0xa0] sm:$0xff] %vm613_vm4, %v4185_v20  ;;  %v3856_v19 = vpop.f32.mrf.mxu3  ;;  %v5158_v20 = vpack.c.bf16 %v5133_v21, %v5132_v59  ;;  %v3398_v0 = vld [vmem:[#allocation4 + $0xd8] sm:$0xff] }
 0x3f9   : > { %v3570_v40 = vpop.f32.mrf.mxu2  ;;  %4485 = vst.msk [vmem:[#allocation4 + $0x10] sm:$0xff] %vm613_vm4, %v4453_v44  ;;  %6121 = vmatmul.msk.bf16.gmra.mxu1 %vm613_vm4, %v7696_v5  ;;  %v4562_v59 = vld [vmem:[#allocation3 + $0xca] sm:$0xff] }
 0x3fa   : > { %v3616_v34 = vadd.f32 %v3570_v40, %v3394_v16  ;;  %v3397_v16 = vld [vmem:[#allocation4 + $0xd0] sm:$0xff] }
 0x3fb   : > { %v3679_v28 = vld [vmem:[#allocation4 + $0xb0] sm:$0xff] }
 0x3fc   : > { %v3901_v46 = vadd.f32 %v3854_v14, %v3679_v28  ;;  %3648 = vst.msk [vmem:[#allocation4 + $0xb8] sm:$0xff] %vm613_vm4, %v3616_v34  ;;  %v7920_v29 = vpop.f32.mrf.mxu0  ;;  %v4234_v28 = vld [vmem:[#allocation4 + $0x28] sm:$0xff] }
 0x3fd   : > { %v3964_v36 = vld [vmem:[#allocation4 + $0xa8] sm:$0xff]  ;;  %6150 = vmatmul.msk.bf16.gmra.mxu3 %vm613_vm4, %v4870_v17 }
 0x3fe   : > { %3933 = vst.msk [vmem:[#allocation4 + $0xb0] sm:$0xff] %vm613_vm4, %v3901_v46  ;;  %6133 = vmatmul.msk.bf16.gmra.mxu2 %vm613_vm4, %v7918_v26  ;;  %v4186_v58 = vadd.f32 %v7868_v54, %v3964_v36  ;;  %v4378_v9 = vpop.f32.mrf.mxu1  ;;  %v4847_v36 = vld [vmem:[#allocation3 + $0xc8] sm:$0xff] }
 0x3ff   : > { %6168 = vmatmul.msk.bf16.gmra.mxu0 %vm613_vm4, %v5157_v47  ;;  %v4454_v54 = vadd.f32 %v4378_v9, %v4232_v3 }
 0x400   : > { %4218 = vst.msk [vmem:[#allocation4 + $0xa8] sm:$0xff] %vm613_vm4, %v4186_v58  ;;  %v3859_v35 = vpop.f32.mrf.mxu3 }
 0x401   : > { %v3573_v6 = vpop.f32.mrf.mxu2  ;;  %4486 = vst.msk [vmem:[#allocation4 + $0x18] sm:$0xff] %vm613_vm4, %v4454_v54  ;;  %v5134_v54 = vld [vmem:[#allocation3 + $0xd9] sm:$0xff] }
 0x402   : > { %v3617_v51 = vadd.f32 %v3573_v6, %v3395_v60  ;;  %v4846_v60 = vld [vmem:[#allocation3 + $0xc0] sm:$0xff] }
 0x403   : > { %v3680_v24 = vld [vmem:[#allocation4 + $0xb8] sm:$0xff] }
 0x404   : > { %v3902_v15 = vadd.f32 %v3856_v19, %v3680_v24  ;;  %3649 = vst.msk [vmem:[#allocation4 + $0xc0] sm:$0xff] %vm613_vm4, %v3617_v51  ;;  %v7933_v53 = vpop.f32.mrf.mxu0  ;;  %v5135_v6 = vld [vmem:[#allocation3 + $0xe1] sm:$0xff] }
 0x405   : > { %v3965_v63 = vld [vmem:[#allocation4 + $0xb0] sm:$0xff] }
 0x406   : > { %3934 = vst.msk [vmem:[#allocation4 + $0xb8] sm:$0xff] %vm613_vm4, %v3902_v15  ;;  %v4187_v5 = vadd.f32 %v7877_v10, %v3965_v63  ;;  %v4381_v18 = vpop.f32.mrf.mxu1  ;;  %v7940_v10 = vpack.c.bf16 %v4558_v13, %v4557_v41  ;;  %v4235_v51 = vld [vmem:[#allocation4 + $0x30] sm:$0xff]  ;;  %v4872_v15 = vpack.c.bf16 %v4847_v36, %v4846_v60 }
 0x407   : > { %v4455_v27 = vadd.f32 %v4381_v18, %v4233_v61  ;;  %v4561_v61 = vld [vmem:[#allocation3 + $0xc2] sm:$0xff]  ;;  %v3400_v18 = vld [vmem:[#allocation4 + $0xe8] sm:$0xff] }
 0x408   : > { %4219 = vst.msk [vmem:[#allocation4 + $0xb0] sm:$0xff] %vm613_vm4, %v4187_v5  ;;  %v3861_v55 = vpop.f32.mrf.mxu3  ;;  %v5159_v5 = vpack.c.bf16 %v5135_v6, %v5134_v54  ;;  %v4564_v54 = vld [vmem:[#allocation3 + $0xe2] sm:$0xff] }
 0x409   : > { %v3575_v45 = vpop.f32.mrf.mxu2  ;;  %4487 = vst.msk [vmem:[#allocation4 + $0x20] sm:$0xff] %vm613_vm4, %v4455_v27  ;;  %6122 = vmatmul.msk.bf16.gmra.mxu1 %vm613_vm4, %v7720_v48 }
 0x40a   : > { %v3618_v1 = vadd.f32 %v3575_v45, %v3396_v39  ;;  %v3399_v39 = vld [vmem:[#allocation4 + $0xe0] sm:$0xff] }
 0x40b   : > { %v3681_v4 = vld [vmem:[#allocation4 + $0xc0] sm:$0xff] }
 0x40c   : > { %v3903_v14 = vadd.f32 %v3859_v35, %v3681_v4  ;;  %3650 = vst.msk [vmem:[#allocation4 + $0xc8] sm:$0xff] %vm613_vm4, %v3618_v1  ;;  %v7942_v22 = vpop.f32.mrf.mxu0  ;;  %v4236_v4 = vld [vmem:[#allocation4 + $0x38] sm:$0xff] }
 0x40d   : > { %v3966_v31 = vld [vmem:[#allocation4 + $0xb8] sm:$0xff]  ;;  %6151 = vmatmul.msk.bf16.gmra.mxu3 %vm613_vm4, %v4871_v43 }
 0x40e   : > { %3935 = vst.msk [vmem:[#allocation4 + $0xc0] sm:$0xff] %vm613_vm4, %v3903_v14  ;;  %6134 = vmatmul.msk.bf16.gmra.mxu2 %vm613_vm4, %v7940_v10  ;;  %v4188_v7 = vadd.f32 %v7890_v38, %v3966_v31  ;;  %v4383_v8 = vpop.f32.mrf.mxu1  ;;  %v4849_v31 = vld [vmem:[#allocation3 + $0xe0] sm:$0xff] }
 0x40f   : > { %6169 = vmatmul.msk.bf16.gmra.mxu0 %vm613_vm4, %v5158_v20  ;;  %v4456_v38 = vadd.f32 %v4383_v8, %v4234_v28 }
 0x410   : > { %4220 = vst.msk [vmem:[#allocation4 + $0xb8] sm:$0xff] %vm613_vm4, %v4188_v7  ;;  %v3864_v19 = vpop.f32.mrf.mxu3 }
 0x411   : > { %v3578_v40 = vpop.f32.mrf.mxu2  ;;  %4488 = vst.msk [vmem:[#allocation4 + $0x28] sm:$0xff] %vm613_vm4, %v4456_v38  ;;  %v5136_v38 = vld [vmem:[#allocation3 + $0xf1] sm:$0xff] }
 0x412   : > { %v3619_v37 = vadd.f32 %v3578_v40, %v3397_v16  ;;  %v4848_v16 = vld [vmem:[#allocation3 + $0xd8] sm:$0xff] }
 0x413   : > { %v3682_v23 = vld [vmem:[#allocation4 + $0xc8] sm:$0xff] }
 0x414   : > { %v3904_v34 = vadd.f32 %v3861_v55, %v3682_v23  ;;  %3651 = vst.msk [vmem:[#allocation4 + $0xd0] sm:$0xff] %vm613_vm4, %v3619_v37  ;;  %v7955_v52 = vpop.f32.mrf.mxu0  ;;  %v5137_v40 = vld [vmem:[#allocation3 + $0xf9] sm:$0xff]  ;;  %v4237_v37 = vld [vmem:[#allocation4 + $0x40] sm:$0xff] }
 0x415   : > { %v3967_v46 = vld [vmem:[#allocation4 + $0xc0] sm:$0xff] }
 0x416   : > { %3936 = vst.msk [vmem:[#allocation4 + $0xc8] sm:$0xff] %vm613_vm4, %v3904_v34  ;;  %v4189_v48 = vadd.f32 %v7898_v57, %v3967_v46  ;;  %v4386_v24 = vpop.f32.mrf.mxu1  ;;  %v7962_v57 = vpack.c.bf16 %v4560_v33, %v4559_v56  ;;  %v4873_v34 = vpack.c.bf16 %v4849_v31, %v4848_v16 }
 0x417   : > { %v4457_v3 = vadd.f32 %v4386_v24, %v4235_v51  ;;  %v4563_v51 = vld [vmem:[#allocation3 + $0xda] sm:$0xff]  ;;  %v3402_v24 = vld [vmem:[#allocation4 + $0xf8] sm:$0xff] }
 0x418   : > { %4221 = vst.msk [vmem:[#allocation4 + $0xc0] sm:$0xff] %vm613_vm4, %v4189_v48  ;;  %v3866_v44 = vpop.f32.mrf.mxu3  ;;  %v5160_v48 = vpack.c.bf16 %v5137_v40, %v5136_v38  ;;  %v4566_v38 = vld [vmem:[#allocation3 + $0xfa] sm:$0xff] }
 0x419   : > { %v3580_v17 = vpop.f32.mrf.mxu2  ;;  %4489 = vst.msk [vmem:[#allocation4 + $0x30] sm:$0xff] %vm613_vm4, %v4457_v3  ;;  %6123 = vmatmul.msk.bf16.gmra.mxu1 %vm613_vm4, %v7743_v2 }
 0x41a   : > { %v3620_v47 = vadd.f32 %v3580_v17, %v3398_v0  ;;  %v3401_v0 = vld [vmem:[#allocation4 + $0xf0] sm:$0xff] }
 0x41b   : > { %v3683_v58 = vld [vmem:[#allocation4 + $0xd0] sm:$0xff] }
 0x41c   : > { %v3905_v35 = vadd.f32 %v3864_v19, %v3683_v58  ;;  %3652 = vst.msk [vmem:[#allocation4 + $0xd8] sm:$0xff] %vm613_vm4, %v3620_v47  ;;  %v7964_v9 = vpop.f32.mrf.mxu0  ;;  %v4238_v58 = vld [vmem:[#allocation4 + $0x48] sm:$0xff] }
 0x41d   : > { %v3968_v63 = vld [vmem:[#allocation4 + $0xc8] sm:$0xff]  ;;  %6152 = vmatmul.msk.bf16.gmra.mxu3 %vm613_vm4, %v4872_v15 }
 0x41e   : > { %3937 = vst.msk [vmem:[#allocation4 + $0xd0] sm:$0xff] %vm613_vm4, %v3905_v35  ;;  %6135 = vmatmul.msk.bf16.gmra.mxu2 %vm613_vm4, %v7962_v57  ;;  %v4190_v41 = vadd.f32 %v7911_v32, %v3968_v63  ;;  %v4388_v49 = vpop.f32.mrf.mxu1  ;;  %v4851_v63 = vld [vmem:[#allocation3 + $0xf8] sm:$0xff] }
 0x41f   : > { %6170 = vmatmul.msk.bf16.gmra.mxu0 %vm613_vm4, %v5159_v5  ;;  %v4458_v32 = vadd.f32 %v4388_v49, %v4236_v4 }
 0x420   : > { %4222 = vst.msk [vmem:[#allocation4 + $0xc8] sm:$0xff] %vm613_vm4, %v4190_v41  ;;  %v3869_v55 = vpop.f32.mrf.mxu3 }
 0x421   : > { %v3583_v45 = vpop.f32.mrf.mxu2  ;;  %4490 = vst.msk [vmem:[#allocation4 + $0x38] sm:$0xff] %vm613_vm4, %v4458_v32  ;;  %v5138_v32 = vld [vmem:[#allocation3 + $0x109] sm:$0xff] }
 0x422   : > { %v3621_v13 = vadd.f32 %v3583_v45, %v3399_v39  ;;  %v4850_v39 = vld [vmem:[#allocation3 + $0xf0] sm:$0xff] }
 0x423   : > { %v3684_v50 = vld [vmem:[#allocation4 + $0xd8] sm:$0xff]  ;;  %v5139_v45 = vld [vmem:[#allocation3 + $0x111] sm:$0xff] }
 0x424   : > { %v3906_v1 = vadd.f32 %v3866_v44, %v3684_v50  ;;  %3653 = vst.msk [vmem:[#allocation4 + $0xe0] sm:$0xff] %vm613_vm4, %v3621_v13  ;;  %v7977_v21 = vpop.f32.mrf.mxu0  ;;  %v4239_v13 = vld [vmem:[#allocation4 + $0x50] sm:$0xff] }
 0x425   : > { %v3969_v14 = vld [vmem:[#allocation4 + $0xd0] sm:$0xff] }
 0x426   : > { %3938 = vst.msk [vmem:[#allocation4 + $0xd8] sm:$0xff] %vm613_vm4, %v3906_v1  ;;  %v4191_v2 = vadd.f32 %v7920_v29, %v3969_v14  ;;  %v4391_v23 = vpop.f32.mrf.mxu1  ;;  %v7984_v29 = vpack.c.bf16 %v4562_v59, %v4561_v61  ;;  %v4874_v1 = vpack.c.bf16 %v4851_v63, %v4850_v39 }
 0x427   : > { %v4459_v28 = vadd.f32 %v4391_v23, %v4237_v37  ;;  %v4565_v37 = vld [vmem:[#allocation3 + $0xf2] sm:$0xff] }
 0x428   : > { %4223 = vst.msk [vmem:[#allocation4 + $0xd0] sm:$0xff] %vm613_vm4, %v4191_v2  ;;  %v3871_v27 = vpop.f32.mrf.mxu3  ;;  %v5161_v2 = vpack.c.bf16 %v5139_v45, %v5138_v32  ;;  %v4516_v23 = vld [vmem:[#allocation4 + $0x8] sm:$0xff] }
 0x429   : > { %v3585_v43 = vpop.f32.mrf.mxu2  ;;  %4491 = vst.msk [vmem:[#allocation4 + $0x40] sm:$0xff] %vm613_vm4, %v4459_v28  ;;  %6124 = vmatmul.msk.bf16.gmra.mxu1 %vm613_vm4, %v7766_v11  ;;  %v4568_v32 = vld [vmem:[#allocation3 + $0x112] sm:$0xff] }
 0x42a   : > { %v3622_v20 = vadd.f32 %v3585_v43, %v3400_v18  ;;  %v4515_v18 = vld [vmem:[#allocation4] sm:$0xff] }
 0x42b   : > { %v3685_v7 = vld [vmem:[#allocation4 + $0xe0] sm:$0xff] }
 0x42c   : > { %v3907_v19 = vadd.f32 %v3869_v55, %v3685_v7  ;;  %3654 = vst.msk [vmem:[#allocation4 + $0xe8] sm:$0xff] %vm613_vm4, %v3622_v20  ;;  %v7986_v8 = vpop.f32.mrf.mxu0  ;;  %v4240_v7 = vld [vmem:[#allocation4 + $0x58] sm:$0xff] }
 0x42d   : > { %v3970_v46 = vld [vmem:[#allocation4 + $0xd8] sm:$0xff]  ;;  %6153 = vmatmul.msk.bf16.gmra.mxu3 %vm613_vm4, %v4873_v34 }
 0x42e   : > { %3939 = vst.msk [vmem:[#allocation4 + $0xe0] sm:$0xff] %vm613_vm4, %v3907_v19  ;;  %6136 = vmatmul.msk.bf16.gmra.mxu2 %vm613_vm4, %v7984_v29  ;;  %v4192_v56 = vadd.f32 %v7933_v53, %v3970_v46  ;;  %v4393_v60 = vpop.f32.mrf.mxu1  ;;  %v4853_v46 = vld [vmem:[#allocation3 + $0x110] sm:$0xff] }
 0x42f   : > { %6171 = vmatmul.msk.bf16.gmra.mxu0 %vm613_vm4, %v5160_v48  ;;  %v4460_v53 = vadd.f32 %v4393_v60, %v4238_v58 }
 0x430   : > { %4224 = vst.msk [vmem:[#allocation4 + $0xd8] sm:$0xff] %vm613_vm4, %v4192_v56  ;;  %v3874_v44 = vpop.f32.mrf.mxu3 }
 0x431   : > { %v3588_v17 = vpop.f32.mrf.mxu2  ;;  %4492 = vst.msk [vmem:[#allocation4 + $0x48] sm:$0xff] %vm613_vm4, %v4460_v53  ;;  %v5140_v53 = vld [vmem:[#allocation3 + $0x121] sm:$0xff] }
 0x432   : > { %v3623_v33 = vadd.f32 %v3588_v17, %v3401_v0  ;;  %v4852_v0 = vld [vmem:[#allocation3 + $0x108] sm:$0xff] }
 0x433   : > { %v3686_v36 = vld [vmem:[#allocation4 + $0xe8] sm:$0xff]  ;;  %v5141_v17 = vld [vmem:[#allocation3 + $0x129] sm:$0xff] }
 0x434   : > { %v3908_v47 = vadd.f32 %v3871_v27, %v3686_v36  ;;  %3655 = vst.msk [vmem:[#allocation4 + $0xf0] sm:$0xff] %vm613_vm4, %v3623_v33  ;;  %v7999_v6 = vpop.f32.mrf.mxu0  ;;  %v4241_v33 = vld [vmem:[#allocation4 + $0x60] sm:$0xff] }
 0x435   : > { %v3971_v35 = vld [vmem:[#allocation4 + $0xe0] sm:$0xff] }
 0x436   : > { %3940 = vst.msk [vmem:[#allocation4 + $0xe8] sm:$0xff] %vm613_vm4, %v3908_v47  ;;  %v4193_v11 = vadd.f32 %v7942_v22, %v3971_v35  ;;  %v4396_v50 = vpop.f32.mrf.mxu1  ;;  %v8006_v22 = vpack.c.bf16 %v4564_v54, %v4563_v51  ;;  %v4875_v47 = vpack.c.bf16 %v4853_v46, %v4852_v0 }
 0x437   : > { %v4461_v4 = vadd.f32 %v4396_v50, %v4239_v13  ;;  %v4567_v13 = vld [vmem:[#allocation3 + $0x10a] sm:$0xff] }
 0x438   : > { %4225 = vst.msk [vmem:[#allocation4 + $0xe0] sm:$0xff] %vm613_vm4, %v4193_v11  ;;  %v3876_v3 = vpop.f32.mrf.mxu3  ;;  %v5162_v11 = vpack.c.bf16 %v5141_v17, %v5140_v53  ;;  %v4518_v50 = vld [vmem:[#allocation4 + $0x18] sm:$0xff] }
 0x439   : > { %v3590_v15 = vpop.f32.mrf.mxu2  ;;  %4493 = vst.msk [vmem:[#allocation4 + $0x50] sm:$0xff] %vm613_vm4, %v4461_v4  ;;  %6125 = vmatmul.msk.bf16.gmra.mxu1 %vm613_vm4, %v7789_v30  ;;  %v4569_v53 = vld [vmem:[#allocation3 + $0x122] sm:$0xff] }
 0x43a   : > { %v3624_v5 = vadd.f32 %v3590_v15, %v3402_v24  ;;  %v4517_v24 = vld [vmem:[#allocation4 + $0x10] sm:$0xff] }
 0x43b   : > { %v3687_v41 = vld [vmem:[#allocation4 + $0xf0] sm:$0xff] }
 0x43c   : > { %v3909_v55 = vadd.f32 %v3874_v44, %v3687_v41  ;;  %3656 = vst.msk [vmem:[#allocation4 + $0xf8] sm:$0xff] %vm613_vm4, %v3624_v5  ;;  %v8008_v49 = vpop.f32.mrf.mxu0  ;;  %v4242_v41 = vld [vmem:[#allocation4 + $0x68] sm:$0xff] }
 0x43d   : > { %v3972_v14 = vld [vmem:[#allocation4 + $0xe8] sm:$0xff]  ;;  %6154 = vmatmul.msk.bf16.gmra.mxu3 %vm613_vm4, %v4874_v1 }
 0x43e   : > { %3941 = vst.msk [vmem:[#allocation4 + $0xf0] sm:$0xff] %vm613_vm4, %v3909_v55  ;;  %6137 = vmatmul.msk.bf16.gmra.mxu2 %vm613_vm4, %v8006_v22  ;;  %v4194_v61 = vadd.f32 %v7955_v52, %v3972_v14  ;;  %v4398_v16 = vpop.f32.mrf.mxu1  ;;  %v4855_v14 = vld [vmem:[#allocation3 + $0x128] sm:$0xff] }
 0x43f   : > { %6172 = vmatmul.msk.bf16.gmra.mxu0 %vm613_vm4, %v5161_v2  ;;  %v4462_v52 = vadd.f32 %v4398_v16, %v4240_v7  ;;  %v4292_v2 = vld [vmem:[#allocation3 + $0x189] sm:$0xff]  ;;  %v4291_v7 = vld [vmem:[#allocation3 + $0x181] sm:$0xff] }
 0x440   : > { %4226 = vst.msk [vmem:[#allocation4 + $0xe8] sm:$0xff] %vm613_vm4, %v4194_v61  ;;  %v4944_v27 = vpop.f32.mrf.mxu3 }
 0x441   : > { %v4657_v43 = vpop.f32.mrf.mxu2  ;;  %4494 = vst.msk [vmem:[#allocation4 + $0x58] sm:$0xff] %vm613_vm4, %v4462_v52 }
 0x442   : > { %v4737_v59 = vadd.f32 %v4657_v43, %v4515_v18  ;;  %v4854_v43 = vld [vmem:[#allocation3 + $0x120] sm:$0xff] }
 0x443   : > { %v3688_v31 = vld [vmem:[#allocation4 + $0xf8] sm:$0xff]  ;;  %v4876_v16 = vpack.c.bf16 %v4855_v14, %v4854_v43  ;;  %v4521_v14 = vld [vmem:[#allocation4 + $0x30] sm:$0xff] }
 0x444   : > { %v3910_v20 = vadd.f32 %v3876_v3, %v3688_v31  ;;  %4769 = vst.msk [vmem:[#allocation4] sm:$0xff] %vm613_vm4, %v4737_v59  ;;  %v8021_v40 = vpop.f32.mrf.mxu0  ;;  %v4243_v31 = vld [vmem:[#allocation4 + $0x70] sm:$0xff] }
 0x445   : > { %v3973_v19 = vld [vmem:[#allocation4 + $0xf0] sm:$0xff] }
 0x446   : > { %3942 = vst.msk [vmem:[#allocation4 + $0xf8] sm:$0xff] %vm613_vm4, %v3910_v20  ;;  %v4195_v30 = vadd.f32 %v7964_v9, %v3973_v19  ;;  %v4401_v36 = vpop.f32.mrf.mxu1  ;;  %v8028_v9 = vpack.c.bf16 %v4566_v38, %v4565_v37  ;;  %v8052_v19 = vpack.c.bf16 %v4292_v2, %v4291_v7  ;;  %v5142_v37 = vld [vmem:[#allocation3 + $0x139] sm:$0xff]  ;;  %v4519_v38 = vld [vmem:[#allocation4 + $0x20] sm:$0xff] }
 0x447   : > { %v4463_v58 = vadd.f32 %v4401_v36, %v4241_v33 }
 0x448   : > { %4227 = vst.msk [vmem:[#allocation4 + $0xf0] sm:$0xff] %vm613_vm4, %v4195_v30  ;;  %v4946_v28 = vpop.f32.mrf.mxu3 }
 0x449   : > { %v4659_v34 = vpop.f32.mrf.mxu2  ;;  %4495 = vst.msk [vmem:[#allocation4 + $0x60] sm:$0xff] %vm613_vm4, %v4463_v58  ;;  %6126 = vmatmul.msk.bf16.gmra.mxu1 %vm613_vm4, %v7811_v42 }
 0x44a   : > { %v4738_v48 = vadd.f32 %v4659_v34, %v4516_v23 }
 0x44b   : > { %v4801_v56 = vld [vmem:[#allocation4] sm:$0xff] }
 0x44c   : > { %v5024_v44 = vadd.f32 %v4944_v27, %v4801_v56  ;;  %4770 = vst.msk [vmem:[#allocation4 + $0x8] sm:$0xff] %vm613_vm4, %v4738_v48  ;;  %v8030_v60 = vpop.f32.mrf.mxu0  ;;  %v5143_v27 = vld [vmem:[#allocation3 + $0x141] sm:$0xff] }
 0x44d   : > { %v3974_v35 = vld [vmem:[#allocation4 + $0xf8] sm:$0xff]  ;;  %6155 = vmatmul.msk.bf16.gmra.mxu3 %vm613_vm4, %v4875_v47  ;;  %v5163_v34 = vpack.c.bf16 %v5143_v27, %v5142_v37 }
 0x44e   : > { %5056 = vst.msk [vmem:[#allocation4] sm:$0xff] %vm613_vm4, %v5024_v44  ;;  %6138 = vmatmul.msk.bf16.gmra.mxu2 %vm613_vm4, %v8028_v9  ;;  %v4196_v51 = vadd.f32 %v7977_v21, %v3974_v35  ;;  %v4403_v39 = vpop.f32.mrf.mxu1  ;;  %v4244_v44 = vld [vmem:[#allocation4 + $0x78] sm:$0xff]  ;;  %v4520_v35 = vld [vmem:[#allocation4 + $0x28] sm:$0xff] }
 0x44f   : > { %6173 = vmatmul.msk.bf16.gmra.mxu0 %vm613_vm4, %v5162_v11  ;;  %v4464_v21 = vadd.f32 %v4403_v39, %v4242_v41  ;;  %v4245_v39 = vld [vmem:[#allocation4 + $0x80] sm:$0xff] }
 0x450   : > { %4228 = vst.msk [vmem:[#allocation4 + $0xf8] sm:$0xff] %vm613_vm4, %v4196_v51  ;;  %v4949_v3 = vpop.f32.mrf.mxu3 }
 0x451   : > { %v4662_v15 = vpop.f32.mrf.mxu2  ;;  %4496 = vst.msk [vmem:[#allocation4 + $0x68] sm:$0xff] %vm613_vm4, %v4464_v21 }
 0x452   : > { %v4739_v54 = vadd.f32 %v4662_v15, %v4517_v24  ;;  %v4570_v24 = vld [vmem:[#allocation3 + $0x12a] sm:$0xff]  ;;  %v4857_v15 = vld [vmem:[#allocation3 + $0x140] sm:$0xff] }
 0x453   : > { %v4802_v63 = vld [vmem:[#allocation4 + $0x8] sm:$0xff] }
 0x454   : > { %v5025_v5 = vadd.f32 %v4946_v28, %v4802_v63  ;;  %4771 = vst.msk [vmem:[#allocation4 + $0x10] sm:$0xff] %vm613_vm4, %v4739_v54  ;;  %v8043_v45 = vpop.f32.mrf.mxu0  ;;  %v4856_v63 = vld [vmem:[#allocation3 + $0x138] sm:$0xff] }
 0x455   : > { %v5088_v55 = vld [vmem:[#allocation4] sm:$0xff] }
 0x456   : > { %5057 = vst.msk [vmem:[#allocation4 + $0x8] sm:$0xff] %vm613_vm4, %v5025_v5  ;;  %v5310_v42 = vadd.f32 %v7986_v8, %v5088_v55  ;;  %v4406_v20 = vpop.f32.mrf.mxu1  ;;  %v8050_v8 = vpack.c.bf16 %v4568_v32, %v4567_v13  ;;  %v5145_v5 = vld [vmem:[#allocation3 + $0x159] sm:$0xff]  ;;  %v4877_v55 = vpack.c.bf16 %v4857_v15, %v4856_v63 }
 0x457   : > { %v4465_v52 = vadd.f32 %v4406_v20, %v4243_v31 }
 0x458   : > { %5342 = vst.msk [vmem:[#allocation4] sm:$0xff] %vm613_vm4, %v5310_v42  ;;  %v4951_v4 = vpop.f32.mrf.mxu3 }
 0x459   : > { %v4664_v1 = vpop.f32.mrf.mxu2  ;;  %4497 = vst.msk [vmem:[#allocation4 + $0x70] sm:$0xff] %vm613_vm4, %v4465_v52  ;;  %6127 = vmatmul.msk.bf16.gmra.mxu1 %vm613_vm4, %v8052_v19  ;;  %v4522_v52 = vld [vmem:[#allocation4 + $0x38] sm:$0xff] }
 0x45a   : > { %v4740_v61 = vadd.f32 %v4664_v1, %v4518_v50  ;;  %v5144_v50 = vld [vmem:[#allocation3 + $0x151] sm:$0xff] }
 0x45b   : > { %v4803_v18 = vld [vmem:[#allocation4 + $0x10] sm:$0xff] }
 0x45c   : > { %v5026_v59 = vadd.f32 %v4949_v3, %v4803_v18  ;;  %4772 = vst.msk [vmem:[#allocation4 + $0x18] sm:$0xff] %vm613_vm4, %v4740_v61  ;;  %v8054_v30 = vpop.f32.mrf.mxu0 }
 0x45d   : > { %v5089_v23 = vld [vmem:[#allocation4 + $0x8] sm:$0xff]  ;;  %6156 = vmatmul.msk.bf16.gmra.mxu3 %vm613_vm4, %v4876_v16 }
 0x45e   : > { %5058 = vst.msk [vmem:[#allocation4 + $0x10] sm:$0xff] %vm613_vm4, %v5026_v59  ;;  %6139 = vmatmul.msk.bf16.gmra.mxu2 %vm613_vm4, %v8050_v8  ;;  %v5311_v28 = vadd.f32 %v7999_v6, %v5089_v23  ;;  %v4408_v33 = vpop.f32.mrf.mxu1  ;;  %v4246_v59 = vld [vmem:[#allocation4 + $0x88] sm:$0xff] }
 0x45f   : > { %6174 = vmatmul.msk.bf16.gmra.mxu0 %vm613_vm4, %v5163_v34  ;;  %v4466_v6 = vadd.f32 %v4408_v33, %v4244_v44  ;;  %v4571_v16 = vld [vmem:[#allocation3 + $0x13a] sm:$0xff]  ;;  %v4572_v34 = vld [vmem:[#allocation3 + $0x142] sm:$0xff] }
 0x460   : > { %5343 = vst.msk [vmem:[#allocation4 + $0x8] sm:$0xff] %vm613_vm4, %v5311_v28  ;;  %v4954_v48 = vpop.f32.mrf.mxu3  ;;  %v4859_v28 = vld [vmem:[#allocation3 + $0x158] sm:$0xff] }
 0x461   : > { %v4667_v46 = vpop.f32.mrf.mxu2  ;;  %4498 = vst.msk [vmem:[#allocation4 + $0x78] sm:$0xff] %vm613_vm4, %v4466_v6 }
 0x462   : > { %v4741_v56 = vadd.f32 %v4667_v46, %v4519_v38 }
 0x463   : > { %v4804_v0 = vld [vmem:[#allocation4 + $0x18] sm:$0xff] }
 0x464   : > { %v5027_v17 = vadd.f32 %v4951_v4, %v4804_v0  ;;  %4773 = vst.msk [vmem:[#allocation4 + $0x20] sm:$0xff] %vm613_vm4, %v4741_v56  ;;  %v8067_v36 = vpop.f32.mrf.mxu0  ;;  %v5164_v4 = vpack.c.bf16 %v5145_v5, %v5144_v50  ;;  %v5147_v56 = vld [vmem:[#allocation3 + $0x171] sm:$0xff]  ;;  %v4248_v5 = vld [vmem:[#allocation4 + $0x98] sm:$0xff] }
 0x465   : > { %v5090_v47 = vld [vmem:[#allocation4 + $0x10] sm:$0xff] }
 0x466   : > { %5059 = vst.msk [vmem:[#allocation4 + $0x18] sm:$0xff] %vm613_vm4, %v5027_v17  ;;  %v5312_v58 = vadd.f32 %v8008_v49, %v5090_v47  ;;  %v4411_v21 = vpop.f32.mrf.mxu1  ;;  %v8074_v49 = vpack.c.bf16 %v4570_v24, %v4569_v53  ;;  %v4247_v17 = vld [vmem:[#allocation4 + $0x90] sm:$0xff] }
 0x467   : > { %v4467_v42 = vadd.f32 %v4411_v21, %v4245_v39 }
 0x468   : > { %5344 = vst.msk [vmem:[#allocation4 + $0x10] sm:$0xff] %vm613_vm4, %v5312_v58  ;;  %v4956_v51 = vpop.f32.mrf.mxu3  ;;  %v5146_v58 = vld [vmem:[#allocation3 + $0x169] sm:$0xff] }
 0x469   : > { %v4669_v11 = vpop.f32.mrf.mxu2  ;;  %4499 = vst.msk [vmem:[#allocation4 + $0x80] sm:$0xff] %vm613_vm4, %v4467_v42  ;;  %6180 = vmatmul.msk.bf16.vlgmr.msra.gmra.mxu1 %vm613_vm4, %v7852_v12  ;;  %v4524_v42 = vld [vmem:[#allocation4 + $0x48] sm:$0xff] }
 0x46a   : > { %v4742_v3 = vadd.f32 %v4669_v11, %v4520_v35  ;;  %v5165_v35 = vpack.c.bf16 %v5147_v56, %v5146_v58  ;;  %v4575_v56 = vld [vmem:[#allocation3 + $0x16a] sm:$0xff] }
 0x46b   : > { %v4805_v54 = vld [vmem:[#allocation4 + $0x20] sm:$0xff] }
 0x46c   : > { %v5028_v41 = vadd.f32 %v4954_v48, %v4805_v54  ;;  %4774 = vst.msk [vmem:[#allocation4 + $0x28] sm:$0xff] %vm613_vm4, %v4742_v3  ;;  %v8076_v13 = vpop.f32.mrf.mxu0  ;;  %v4858_v48 = vld [vmem:[#allocation3 + $0x150] sm:$0xff] }
 0x46d   : > { %v5091_v1 = vld [vmem:[#allocation4 + $0x18] sm:$0xff]  ;;  %6157 = vmatmul.msk.bf16.gmra.mxu3 %vm613_vm4, %v4877_v55  ;;  %v4878_v33 = vpack.c.bf16 %v4859_v28, %v4858_v48  ;;  %v4573_v55 = vld [vmem:[#allocation3 + $0x152] sm:$0xff] }
 0x46e   : > { %5060 = vst.msk [vmem:[#allocation4 + $0x20] sm:$0xff] %vm613_vm4, %v5028_v41  ;;  %6140 = vmatmul.msk.bf16.gmra.mxu2 %vm613_vm4, %v8074_v49  ;;  %v5313_v32 = vadd.f32 %v8021_v40, %v5091_v1  ;;  %v4413_v31 = vpop.f32.mrf.mxu1 }
 0x46f   : > { %6175 = vmatmul.msk.bf16.gmra.mxu0 %vm613_vm4, %v5164_v4  ;;  %v4468_v40 = vadd.f32 %v4413_v31, %v4246_v59  ;;  %v4574_v4 = vld [vmem:[#allocation3 + $0x15a] sm:$0xff] }
 0x470   : > { %5345 = vst.msk [vmem:[#allocation4 + $0x18] sm:$0xff] %vm613_vm4, %v5313_v32  ;;  %v4959_v61 = vpop.f32.mrf.mxu3  ;;  %v4861_v32 = vld [vmem:[#allocation3 + $0x170] sm:$0xff]  ;;  %v8118_v59 = vpack.c.bf16 %v4574_v4, %v4573_v55 }
 0x471   : > { %v4672_v2 = vpop.f32.mrf.mxu2  ;;  %4500 = vst.msk [vmem:[#allocation4 + $0x88] sm:$0xff] %vm613_vm4, %v4468_v40 }
 0x472   : > { %v4743_v18 = vadd.f32 %v4672_v2, %v4521_v14 }
 0x473   : > { %v4806_v43 = vld [vmem:[#allocation4 + $0x28] sm:$0xff] }
 0x474   : > { %v5029_v27 = vadd.f32 %v4956_v51, %v4806_v43  ;;  %4775 = vst.msk [vmem:[#allocation4 + $0x30] sm:$0xff] %vm613_vm4, %v4743_v18  ;;  %v8089_v20 = vpop.f32.mrf.mxu0  ;;  %v4523_v51 = vld [vmem:[#allocation4 + $0x40] sm:$0xff] }
 0x475   : > { %v5092_v7 = vld [vmem:[#allocation4 + $0x20] sm:$0xff] }
 0x476   : > { %5061 = vst.msk [vmem:[#allocation4 + $0x28] sm:$0xff] %vm613_vm4, %v5029_v27  ;;  %v5314_v12 = vadd.f32 %v8030_v60, %v5092_v7  ;;  %v4416_v44 = vpop.f32.mrf.mxu1  ;;  %v8096_v60 = vpack.c.bf16 %v4572_v34, %v4571_v16  ;;  %v4249_v43 = vld [vmem:[#allocation4 + $0xa0] sm:$0xff]  ;;  %v4525_v16 = vld [vmem:[#allocation4 + $0x50] sm:$0xff] }
 0x477   : > { %v4469_v6 = vadd.f32 %v4416_v44, %v4247_v17 }
 0x478   : > { %5346 = vst.msk [vmem:[#allocation4 + $0x20] sm:$0xff] %vm613_vm4, %v5314_v12  ;;  %v4961_v23 = vpop.f32.mrf.mxu3 }
 0x479   : > { %v4674_v37 = vpop.f32.mrf.mxu2  ;;  %4501 = vst.msk [vmem:[#allocation4 + $0x90] sm:$0xff] %vm613_vm4, %v4469_v6  ;;  %6181 = vmatmul.msk.bf16.gmra.mxu1 %vm613_vm4, %v7874_v25  ;;  %v4863_v6 = vld [vmem:[#allocation3 + $0x188] sm:$0xff] }
 0x47a   : > { %v4744_v38 = vadd.f32 %v4674_v37, %v4522_v52 }
 0x47b   : > { %v4807_v46 = vld [vmem:[#allocation4 + $0x30] sm:$0xff] }
 0x47c   : > { %v5030_v0 = vadd.f32 %v4959_v61, %v4807_v46  ;;  %4776 = vst.msk [vmem:[#allocation4 + $0x38] sm:$0xff] %vm613_vm4, %v4744_v38  ;;  %v8098_v47 = vpop.f32.mrf.mxu0  ;;  %v4860_v61 = vld [vmem:[#allocation3 + $0x168] sm:$0xff]  ;;  %v4250_v38 = vld [vmem:[#allocation4 + $0xa8] sm:$0xff] }
 0x47d   : > { %v5093_v53 = vld [vmem:[#allocation4 + $0x28] sm:$0xff]  ;;  %6158 = vmatmul.msk.bf16.gmra.mxu3 %vm613_vm4, %v4878_v33 }
 0x47e   : > { %5062 = vst.msk [vmem:[#allocation4 + $0x30] sm:$0xff] %vm613_vm4, %v5030_v0  ;;  %6141 = vmatmul.msk.bf16.gmra.mxu2 %vm613_vm4, %v8096_v60  ;;  %v5315_v11 = vadd.f32 %v8043_v45, %v5093_v53  ;;  %v4418_v41 = vpop.f32.mrf.mxu1  ;;  %v4526_v0 = vld [vmem:[#allocation4 + $0x58] sm:$0xff]  ;;  %v4576_v33 = vld [vmem:[#allocation3 + $0x172] sm:$0xff] }
 0x47f   : > { %6176 = vmatmul.msk.bf16.gmra.mxu0 %vm613_vm4, %v5165_v35  ;;  %v4470_v45 = vadd.f32 %v4418_v41, %v4248_v5  ;;  %v4862_v35 = vld [vmem:[#allocation3 + $0x180] sm:$0xff]  ;;  %v4527_v5 = vld [vmem:[#allocation4 + $0x60] sm:$0xff] }
 0x480   : > { %5347 = vst.msk [vmem:[#allocation4 + $0x28] sm:$0xff] %vm613_vm4, %v5315_v11  ;;  %v4964_v15 = vpop.f32.mrf.mxu3 }
 0x481   : > { %v4677_v24 = vpop.f32.mrf.mxu2  ;;  %4502 = vst.msk [vmem:[#allocation4 + $0x98] sm:$0xff] %vm613_vm4, %v4470_v45 }
 0x482   : > { %v4745_v3 = vadd.f32 %v4677_v24, %v4523_v51  ;;  %v4251_v51 = vld [vmem:[#allocation4 + $0xb0] sm:$0xff] }
 0x483   : > { %v4808_v54 = vld [vmem:[#allocation4 + $0x38] sm:$0xff] }
 0x484   : > { %v5031_v63 = vadd.f32 %v4961_v23, %v4808_v54  ;;  %4777 = vst.msk [vmem:[#allocation4 + $0x40] sm:$0xff] %vm613_vm4, %v4745_v3  ;;  %v8111_v39 = vpop.f32.mrf.mxu0 }
 0x485   : > { %v5094_v21 = vld [vmem:[#allocation4 + $0x30] sm:$0xff] }
 0x486   : > { %5063 = vst.msk [vmem:[#allocation4 + $0x38] sm:$0xff] %vm613_vm4, %v5031_v63  ;;  %v5316_v25 = vadd.f32 %v8054_v30, %v5094_v21  ;;  %v4421_v27 = vpop.f32.mrf.mxu1  ;;  %v4879_v30 = vpack.c.bf16 %v4861_v32, %v4860_v61  ;;  %v4864_v32 = vld [vmem:[#allocation3 + $0x198] sm:$0xff] }
 0x487   : > { %v4471_v31 = vadd.f32 %v4421_v27, %v4249_v43  ;;  %v4577_v43 = vld [vmem:[#allocation3 + $0x182] sm:$0xff]  ;;  %v4578_v27 = vld [vmem:[#allocation3 + $0x18a] sm:$0xff] }
 0x488   : > { %5348 = vst.msk [vmem:[#allocation4 + $0x30] sm:$0xff] %vm613_vm4, %v5316_v25  ;;  %v4966_v1 = vpop.f32.mrf.mxu3 }
 0x489   : > { %v4679_v50 = vpop.f32.mrf.mxu2  ;;  %4503 = vst.msk [vmem:[#allocation4 + $0xa0] sm:$0xff] %vm613_vm4, %v4471_v31  ;;  %6182 = vmatmul.msk.bf16.gmra.mxu1 %vm613_vm4, %v7896_v62 }
 0x48a   : > { %v4746_v14 = vadd.f32 %v4679_v50, %v4524_v42  ;;  %v4252_v50 = vld [vmem:[#allocation4 + $0xb8] sm:$0xff] }
 0x48b   : > { %v4809_v2 = vld [vmem:[#allocation4 + $0x40] sm:$0xff] }
 0x48c   : > { %v5032_v18 = vadd.f32 %v4964_v15, %v4809_v2  ;;  %4778 = vst.msk [vmem:[#allocation4 + $0x48] sm:$0xff] %vm613_vm4, %v4746_v14  ;;  %v8124_v7 = vpop.f32.mrf.mxu0  ;;  %v4880_v15 = vpack.c.bf16 %v4863_v6, %v4862_v35  ;;  %v4865_v14 = vld [vmem:[#allocation3 + $0x1a0] sm:$0xff]  ;;  %v4528_v2 = vld [vmem:[#allocation4 + $0x68] sm:$0xff]  ;;  %v4530_v35 = vld [vmem:[#allocation4 + $0x78] sm:$0xff] }
 0x48d   : > { %v5095_v40 = vld [vmem:[#allocation4 + $0x38] sm:$0xff]  ;;  %6159 = vmatmul.msk.bf16.gmra.mxu3 %vm613_vm4, %v4879_v30  ;;  %v4881_v31 = vpack.c.bf16 %v4865_v14, %v4864_v32  ;;  %v4532_v14 = vld [vmem:[#allocation4 + $0x88] sm:$0xff] }
 0x48e   : > { %5064 = vst.msk [vmem:[#allocation4 + $0x40] sm:$0xff] %vm613_vm4, %v5032_v18  ;;  %6142 = vmatmul.msk.bf16.gmra.mxu2 %vm613_vm4, %v8118_v59  ;;  %v5317_v12 = vadd.f32 %v8067_v36, %v5095_v40  ;;  %v4423_v46 = vpop.f32.mrf.mxu1 }
 0x48f   : > { %6177 = vmatmul.msk.bf16.gmra.mxu0 %vm613_vm4, %v8052_v19  ;;  %v4472_v36 = vadd.f32 %v4423_v46, %v4250_v38  ;;  %v5150_v38 = vld [vmem:[#allocation3 + $0x199] sm:$0xff]  ;;  %v5151_v46 = vld [vmem:[#allocation3 + $0x1a1] sm:$0xff] }
 0x490   : > { %5349 = vst.msk [vmem:[#allocation4 + $0x38] sm:$0xff] %vm613_vm4, %v5317_v12  ;;  %v4969_v37 = vpop.f32.mrf.mxu3 }
 0x491   : > { %v4682_v52 = vpop.f32.mrf.mxu2  ;;  %4504 = vst.msk [vmem:[#allocation4 + $0xa8] sm:$0xff] %vm613_vm4, %v4472_v36  ;;  %v5167_v36 = vpack.c.bf16 %v5151_v46, %v5150_v38 }
 0x492   : > { %v4747_v23 = vadd.f32 %v4682_v52, %v4525_v16  ;;  %v4253_v16 = vld [vmem:[#allocation4 + $0xc0] sm:$0xff] }
 0x493   : > { %v4810_v34 = vld [vmem:[#allocation4 + $0x48] sm:$0xff] }
 0x494   : > { %v5033_v28 = vadd.f32 %v4966_v1, %v4810_v34  ;;  %4779 = vst.msk [vmem:[#allocation4 + $0x50] sm:$0xff] %vm613_vm4, %v4747_v23  ;;  %v8137_v19 = vpop.f32.mrf.mxu0 }
 0x495   : > { %v5096_v48 = vld [vmem:[#allocation4 + $0x40] sm:$0xff] }
 0x496   : > { %5065 = vst.msk [vmem:[#allocation4 + $0x48] sm:$0xff] %vm613_vm4, %v5033_v28  ;;  %v5318_v62 = vadd.f32 %v8076_v13, %v5096_v48  ;;  %v4426_v24 = vpop.f32.mrf.mxu1  ;;  %v8141_v13 = vpack.c.bf16 %v4576_v33, %v4575_v56  ;;  %v4529_v48 = vld [vmem:[#allocation4 + $0x70] sm:$0xff]  ;;  %v4254_v33 = vld [vmem:[#allocation4 + $0xc8] sm:$0xff] }
 0x497   : > { %v4473_v3 = vadd.f32 %v4426_v24, %v4251_v51 }
 0x498   : > { %5350 = vst.msk [vmem:[#allocation4 + $0x40] sm:$0xff] %vm613_vm4, %v5318_v62  ;;  %v4971_v44 = vpop.f32.mrf.mxu3 }
 0x499   : > { %v4684_v17 = vpop.f32.mrf.mxu2  ;;  %4505 = vst.msk [vmem:[#allocation4 + $0xb0] sm:$0xff] %vm613_vm4, %v4473_v3  ;;  %6183 = vmatmul.msk.bf16.gmra.mxu1 %vm613_vm4, %v7918_v26 }
 0x49a   : > { %v4748_v58 = vadd.f32 %v4684_v17, %v4526_v0 }
 0x49b   : > { %v4811_v53 = vld [vmem:[#allocation4 + $0x50] sm:$0xff] }
 0x49c   : > { %v5034_v11 = vadd.f32 %v4969_v37, %v4811_v53  ;;  %4780 = vst.msk [vmem:[#allocation4 + $0x58] sm:$0xff] %vm613_vm4, %v4748_v58  ;;  %v8152_v25 = vpop.f32.mrf.mxu0  ;;  %v8162_v37 = vpack.c.bf16 %v4578_v27, %v4577_v43 }
 0x49d   : > { %v5097_v54 = vld [vmem:[#allocation4 + $0x48] sm:$0xff]  ;;  %6160 = vmatmul.msk.bf16.gmra.mxu3 %vm613_vm4, %v4880_v15 }
 0x49e   : > { %5066 = vst.msk [vmem:[#allocation4 + $0x50] sm:$0xff] %vm613_vm4, %v5034_v11  ;;  %6143 = vmatmul.msk.bf16.gmra.mxu2 %vm613_vm4, %v8141_v13  ;;  %v5319_v63 = vadd.f32 %v8089_v20, %v5097_v54  ;;  %v4428_v1 = vpop.f32.mrf.mxu1  ;;  %v4255_v54 = vld [vmem:[#allocation4 + $0xd0] sm:$0xff] }
 0x49f   : > { %v4474_v20 = vadd.f32 %v4428_v1, %v4252_v50  ;;  %6178 = vmatmul.msk.bf16.gmra.mxu0 %vm613_vm4, %v5167_v36 }
 0x4a0   : > { %5351 = vst.msk [vmem:[#allocation4 + $0x48] sm:$0xff] %vm613_vm4, %v5319_v63  ;;  %v4974_v45 = vpop.f32.mrf.mxu3 }
 0x4a1   : > { %v4687_v41 = vpop.f32.mrf.mxu2  ;;  %4506 = vst.msk [vmem:[#allocation4 + $0xb8] sm:$0xff] %vm613_vm4, %v4474_v20 }
 0x4a2   : > { %v4749_v21 = vadd.f32 %v4687_v41, %v4527_v5 }
 0x4a3   : > { %v4812_v55 = vld [vmem:[#allocation4 + $0x58] sm:$0xff] }
 0x4a4   : > { %v5035_v42 = vadd.f32 %v4971_v44, %v4812_v55  ;;  %4781 = vst.msk [vmem:[#allocation4 + $0x60] sm:$0xff] %vm613_vm4, %v4749_v21  ;;  %v4531_v21 = vld [vmem:[#allocation4 + $0x80] sm:$0xff] }
 0x4a5   : > { %v5098_v4 = vld [vmem:[#allocation4 + $0x50] sm:$0xff] }
 0x4a6   : > { %5067 = vst.msk [vmem:[#allocation4 + $0x58] sm:$0xff] %vm613_vm4, %v5035_v42  ;;  %v5320_v26 = vadd.f32 %v8098_v47, %v5098_v4  ;;  %v4431_v52 = vpop.f32.mrf.mxu1  ;;  %v8160_v47 = vpop.f32.mrf.mxu0  ;;  %v4256_v4 = vld [vmem:[#allocation4 + $0xd8] sm:$0xff] }
 0x4a7   : > { %v4475_v23 = vadd.f32 %v4431_v52, %v4253_v16  ;;  %v4533_v52 = vld [vmem:[#allocation4 + $0x90] sm:$0xff] }
 0x4a8   : > { %5352 = vst.msk [vmem:[#allocation4 + $0x50] sm:$0xff] %vm613_vm4, %v5320_v26  ;;  %v4976_v18 = vpop.f32.mrf.mxu3 }
 0x4a9   : > { %v4689_v61 = vpop.f32.mrf.mxu2  ;;  %4507 = vst.msk [vmem:[#allocation4 + $0xc0] sm:$0xff] %vm613_vm4, %v4475_v23  ;;  %6184 = vmatmul.msk.bf16.gmra.mxu1 %vm613_vm4, %v7940_v10 }
 0x4aa   : > { %v4750_v30 = vadd.f32 %v4689_v61, %v4528_v2 }
 0x4ab   : > { %v4813_v40 = vld [vmem:[#allocation4 + $0x60] sm:$0xff] }
 0x4ac   : > { %v5036_v12 = vadd.f32 %v4974_v45, %v4813_v40  ;;  %4782 = vst.msk [vmem:[#allocation4 + $0x68] sm:$0xff] %vm613_vm4, %v4750_v30 }
 0x4ad   : > { %v5099_v34 = vld [vmem:[#allocation4 + $0x58] sm:$0xff]  ;;  %6161 = vmatmul.msk.bf16.gmra.mxu3 %vm613_vm4, %v4881_v31  ;;  %v4257_v31 = vld [vmem:[#allocation4 + $0xe0] sm:$0xff] }
 0x4ae   : > { %5068 = vst.msk [vmem:[#allocation4 + $0x60] sm:$0xff] %vm613_vm4, %v5036_v12  ;;  %6144 = vmatmul.msk.bf16.gmra.mxu2 %vm613_vm4, %v8162_v37  ;;  %v5321_v28 = vadd.f32 %v8111_v39, %v5099_v34  ;;  %v4433_v39 = vpop.f32.mrf.mxu1  ;;  %v8176_v10 = vpop.f32.mrf.mxu0 }
 0x4af   : > { %v4476_v6 = vadd.f32 %v4433_v39, %v4254_v33 }
 0x4b0   : > { %5353 = vst.msk [vmem:[#allocation4 + $0x58] sm:$0xff] %vm613_vm4, %v5321_v28  ;;  %v4979_v56 = vpop.f32.mrf.mxu3 }
 0x4b1   : > { %v4692_v62 = vpop.f32.mrf.mxu2  ;;  %4508 = vst.msk [vmem:[#allocation4 + $0xc8] sm:$0xff] %vm613_vm4, %v4476_v6 }
 0x4b2   : > { %v4751_v0 = vadd.f32 %v4692_v62, %v4529_v48  ;;  %v4258_v48 = vld [vmem:[#allocation4 + $0xe8] sm:$0xff] }
 0x4b3   : > { %v4814_v17 = vld [vmem:[#allocation4 + $0x68] sm:$0xff] }
 0x4b4   : > { %v5037_v44 = vadd.f32 %v4976_v18, %v4814_v17  ;;  %4783 = vst.msk [vmem:[#allocation4 + $0x70] sm:$0xff] %vm613_vm4, %v4751_v0 }
 0x4b5   : > { %v5100_v58 = vld [vmem:[#allocation4 + $0x60] sm:$0xff] }
 0x4b6   : > { %5069 = vst.msk [vmem:[#allocation4 + $0x68] sm:$0xff] %vm613_vm4, %v5037_v44  ;;  %v5322_v53 = vadd.f32 %v8124_v7, %v5100_v58  ;;  %v4436_v63 = vpop.f32.mrf.mxu1  ;;  %v8187_v45 = vpop.f32.mrf.mxu0  ;;  %v4259_v58 = vld [vmem:[#allocation4 + $0xf0] sm:$0xff] }
 0x4b7   : > { %v4477_v5 = vadd.f32 %v4436_v63, %v4255_v54 }
 0x4b8   : > { %5354 = vst.msk [vmem:[#allocation4 + $0x60] sm:$0xff] %vm613_vm4, %v5322_v53  ;;  %v4981_v51 = vpop.f32.mrf.mxu3 }
 0x4b9   : > { %v4694_v11 = vpop.f32.mrf.mxu2  ;;  %4509 = vst.msk [vmem:[#allocation4 + $0xd0] sm:$0xff] %vm613_vm4, %v4477_v5  ;;  %6185 = vmatmul.msk.bf16.gmra.mxu1 %vm613_vm4, %v7962_v57 }
 0x4ba   : > { %v4752_v24 = vadd.f32 %v4694_v11, %v4530_v35 }
 0x4bb   : > { %v4815_v15 = vld [vmem:[#allocation4 + $0x70] sm:$0xff] }
 0x4bc   : > { %v5038_v3 = vadd.f32 %v4979_v56, %v4815_v15  ;;  %4784 = vst.msk [vmem:[#allocation4 + $0x78] sm:$0xff] %vm613_vm4, %v4752_v24  ;;  %v4535_v24 = vld [vmem:[#allocation4 + $0xa0] sm:$0xff] }
 0x4bd   : > { %v5101_v41 = vld [vmem:[#allocation4 + $0x68] sm:$0xff] }
 0x4be   : > { %5070 = vst.msk [vmem:[#allocation4 + $0x70] sm:$0xff] %vm613_vm4, %v5038_v3  ;;  %v5323_v7 = vadd.f32 %v8137_v19, %v5101_v41  ;;  %v4438_v26 = vpop.f32.mrf.mxu1  ;;  %v5275_v18 = vpop.f32.mrf.mxu0  ;;  %v4260_v41 = vld [vmem:[#allocation4 + $0xf8] sm:$0xff] }
 0x4bf   : > { %v4478_v19 = vadd.f32 %v4438_v26, %v4256_v4 }
 0x4c0   : > { %5355 = vst.msk [vmem:[#allocation4 + $0x68] sm:$0xff] %vm613_vm4, %v5323_v7  ;;  %v4984_v42 = vpop.f32.mrf.mxu3 }
 0x4c1   : > { %v4697_v55 = vpop.f32.mrf.mxu2  ;;  %4510 = vst.msk [vmem:[#allocation4 + $0xd8] sm:$0xff] %vm613_vm4, %v4478_v19  ;;  %v5374_v19 = vld [vmem:[#allocation4] sm:$0xff] }
 0x4c2   : > { %v4753_v50 = vadd.f32 %v4697_v55, %v4531_v21 }
 0x4c3   : > { %v4816_v1 = vld [vmem:[#allocation4 + $0x78] sm:$0xff] }
 0x4c4   : > { %v5039_v20 = vadd.f32 %v4981_v51, %v4816_v1  ;;  %4785 = vst.msk [vmem:[#allocation4 + $0x80] sm:$0xff] %vm613_vm4, %v4753_v50 }
 0x4c5   : > { %v5102_v32 = vld [vmem:[#allocation4 + $0x70] sm:$0xff] }
 0x4c6   : > { %5071 = vst.msk [vmem:[#allocation4 + $0x78] sm:$0xff] %vm613_vm4, %v5039_v20  ;;  %v5324_v57 = vadd.f32 %v8152_v25, %v5102_v32  ;;  %v4441_v40 = vpop.f32.mrf.mxu1  ;;  %v5277_v36 = vpop.f32.mrf.mxu0 }
 0x4c7   : > { %v4479_v12 = vadd.f32 %v4441_v40, %v4257_v31  ;;  %v8227_v31 = vld [vmem:[%s8453_s5] ss:$0 sm:$0xff] }
 0x4c8   : > { %5356 = vst.msk [vmem:[#allocation4 + $0x70] sm:$0xff] %vm613_vm4, %v5324_v57  ;;  %v4986_v61 = vpop.f32.mrf.mxu3 }
 0x4c9   : > { %v4699_v2 = vpop.f32.mrf.mxu2  ;;  %4511 = vst.msk [vmem:[#allocation4 + $0xe0] sm:$0xff] %vm613_vm4, %v4479_v12  ;;  %6186 = vmatmul.msk.bf16.gmra.mxu1 %vm613_vm4, %v7984_v29  ;;  %v4534_v29 = vld [vmem:[#allocation4 + $0x98] sm:$0xff] }
 0x4ca   : > { %v4754_v43 = vadd.f32 %v4699_v2, %v4532_v14 }
 0x4cb   : > { %v4817_v27 = vld [vmem:[#allocation4 + $0x80] sm:$0xff] }
 0x4cc   : > { %v5040_v30 = vadd.f32 %v4984_v42, %v4817_v27  ;;  %4786 = vst.msk [vmem:[#allocation4 + $0x88] sm:$0xff] %vm613_vm4, %v4754_v43  ;;  %v4536_v42 = vld [vmem:[#allocation4 + $0xa8] sm:$0xff] }
 0x4cd   : > { %v5103_v16 = vld [vmem:[#allocation4 + $0x78] sm:$0xff] }
 0x4ce   : > { %5072 = vst.msk [vmem:[#allocation4 + $0x80] sm:$0xff] %vm613_vm4, %v5040_v30  ;;  %v5325_v25 = vadd.f32 %v8160_v47, %v5103_v16  ;;  %v4443_v62 = vpop.f32.mrf.mxu1  ;;  %v5280_v51 = vpop.f32.mrf.mxu0  ;;  %v5375_v16 = vld [vmem:[#allocation4 + $0x8] sm:$0xff] }
 0x4cf   : > { %v4480_v56 = vadd.f32 %v4443_v62, %v4258_v48 }
 0x4d0   : > { %5357 = vst.msk [vmem:[#allocation4 + $0x78] sm:$0xff] %vm613_vm4, %v5325_v25  ;;  %v4989_v34 = vpop.f32.mrf.mxu3 }
 0x4d1   : > { %v4702_v23 = vpop.f32.mrf.mxu2  ;;  %4512 = vst.msk [vmem:[#allocation4 + $0xe8] sm:$0xff] %vm613_vm4, %v4480_v56 }
 0x4d2   : > { %v4755_v28 = vadd.f32 %v4702_v23, %v4533_v52 }
 0x4d3   : > { %v4818_v38 = vld [vmem:[#allocation4 + $0x88] sm:$0xff] }
 0x4d4   : > { %v5041_v46 = vadd.f32 %v4986_v61, %v4818_v38  ;;  %4787 = vst.msk [vmem:[#allocation4 + $0x90] sm:$0xff] %vm613_vm4, %v4755_v28  ;;  %v4537_v61 = vld [vmem:[#allocation4 + $0xb0] sm:$0xff] }
 0x4d5   : > { %v5104_v47 = vld [vmem:[#allocation4 + $0x80] sm:$0xff] }
 0x4d6   : > { %5073 = vst.msk [vmem:[#allocation4 + $0x88] sm:$0xff] %vm613_vm4, %v5041_v46  ;;  %v5326_v0 = vadd.f32 %v8176_v10, %v5104_v47  ;;  %v4446_v53 = vpop.f32.mrf.mxu1 }
 0x4d7   : > { %v4481_v35 = vadd.f32 %v4446_v53, %v4259_v58 }
 0x4d8   : > { %5358 = vst.msk [vmem:[#allocation4 + $0x80] sm:$0xff] %vm613_vm4, %v5326_v0  ;;  %v4991_v44 = vpop.f32.mrf.mxu3 }
 0x4d9   : > { %v4704_v17 = vpop.f32.mrf.mxu2  ;;  %4513 = vst.msk [vmem:[#allocation4 + $0xf0] sm:$0xff] %vm613_vm4, %v4481_v35  ;;  %6187 = vmatmul.msk.bf16.gmra.mxu1 %vm613_vm4, %v8006_v22  ;;  %v5282_v22 = vpop.f32.mrf.mxu0 }
 0x4da   : > { %v4756_v33 = vadd.f32 %v4704_v17, %v4534_v29 }
 0x4db   : > { %v4819_v39 = vld [vmem:[#allocation4 + $0x90] sm:$0xff] }
 0x4dc   : > { %v5042_v6 = vadd.f32 %v4989_v34, %v4819_v39  ;;  %4788 = vst.msk [vmem:[#allocation4 + $0x98] sm:$0xff] %vm613_vm4, %v4756_v33 }
 0x4dd   : > { %v5105_v11 = vld [vmem:[#allocation4 + $0x88] sm:$0xff] }
 0x4de   : > { %5074 = vst.msk [vmem:[#allocation4 + $0x90] sm:$0xff] %vm613_vm4, %v5042_v6  ;;  %v5327_v10 = vadd.f32 %v8187_v45, %v5105_v11  ;;  %v4448_v7 = vpop.f32.mrf.mxu1 }
 0x4df   : > { %v4482_v21 = vadd.f32 %v4448_v7, %v4260_v41 }
 0x4e0   : > { %5359 = vst.msk [vmem:[#allocation4 + $0x88] sm:$0xff] %vm613_vm4, %v5327_v10  ;;  %v4994_v3 = vpop.f32.mrf.mxu3 }
 0x4e1   : > { %v4707_v15 = vpop.f32.mrf.mxu2  ;;  %4514 = vst.msk [vmem:[#allocation4 + $0xf8] sm:$0xff] %vm613_vm4, %v4482_v21  ;;  %v5285_v27 = vpop.f32.mrf.mxu0 }
 0x4e2   : > { %v4757_v54 = vadd.f32 %v4707_v15, %v4535_v24 }
 0x4e3   : > { %v4820_v63 = vld [vmem:[#allocation4 + $0x98] sm:$0xff] }
 0x4e4   : > { %v5043_v5 = vadd.f32 %v4991_v44, %v4820_v63  ;;  %4789 = vst.msk [vmem:[#allocation4 + $0xa0] sm:$0xff] %vm613_vm4, %v4757_v54  ;;  %v5376_v44 = vld [vmem:[#allocation4 + $0x10] sm:$0xff] }
 0x4e5   : > { %v5106_v55 = vld [vmem:[#allocation4 + $0x90] sm:$0xff] }
 0x4e6   : > { %5075 = vst.msk [vmem:[#allocation4 + $0x98] sm:$0xff] %vm613_vm4, %v5043_v5  ;;  %v5328_v45 = vadd.f32 %v5275_v18, %v5106_v55  ;;  %v5516_v32 = vpop.f32.mrf.mxu1  ;;  %v5377_v5 = vld [vmem:[#allocation4 + $0x18] sm:$0xff] }
 0x4e7   : > { %v5596_v57 = vadd.f32 %v5516_v32, %v5374_v19 }
 0x4e8   : > { %5360 = vst.msk [vmem:[#allocation4 + $0x90] sm:$0xff] %vm613_vm4, %v5328_v45  ;;  %v4996_v1 = vpop.f32.mrf.mxu3 }
 0x4e9   : > { %v4709_v50 = vpop.f32.mrf.mxu2  ;;  %5628 = vst.msk [vmem:[#allocation4] sm:$0xff] %vm613_vm4, %v5596_v57  ;;  %6188 = vmatmul.msk.bf16.gmra.mxu1 %vm613_vm4, %v8028_v9  ;;  %v8233_v9 = vld [vmem:[%s8454_s6] ss:$0 sm:$0xff]  ;;  %v5287_v29 = vpop.f32.mrf.mxu0 }
 0x4ea   : > { %v4758_v20 = vadd.f32 %v4709_v50, %v4536_v42  ;;  %v4540_v50 = vld [vmem:[#allocation4 + $0xc8] sm:$0xff]  ;;  %v5378_v57 = vld [vmem:[#allocation4 + $0x20] sm:$0xff] }
 0x4eb   : > { %v4821_v4 = vld [vmem:[#allocation4 + $0xa0] sm:$0xff] }
 0x4ec   : > { %v5044_v26 = vadd.f32 %v4994_v3, %v4821_v4  ;;  %4790 = vst.msk [vmem:[#allocation4 + $0xa8] sm:$0xff] %vm613_vm4, %v4758_v20 }
 0x4ed   : > { %v5107_v14 = vld [vmem:[#allocation4 + $0x98] sm:$0xff] }
 0x4ee   : > { %5076 = vst.msk [vmem:[#allocation4 + $0xa0] sm:$0xff] %vm613_vm4, %v5044_v26  ;;  %v5329_v2 = vadd.f32 %v5277_v36, %v5107_v14  ;;  %v5518_v25 = vpop.f32.mrf.mxu1  ;;  %v4538_v36 = vld [vmem:[#allocation4 + $0xb8] sm:$0xff] }
 0x4ef   : > { %v5597_v52 = vadd.f32 %v5518_v25, %v5375_v16 }
 0x4f0   : > { %5361 = vst.msk [vmem:[#allocation4 + $0x98] sm:$0xff] %vm613_vm4, %v5329_v2  ;;  %v4999_v43 = vpop.f32.mrf.mxu3  ;;  %v5660_v34 = vld [vmem:[#allocation4] sm:$0xff] }
 0x4f1   : > { %v4712_v18 = vpop.f32.mrf.mxu2  ;;  %v5696_v38 = vmul.f32 %v8227_v31, %v5660_v34  ;;  %5629 = vst.msk [vmem:[#allocation4 + $0x8] sm:$0xff] %vm613_vm4, %v5597_v52 }
 0x4f2   : > { %v4759_v30 = vadd.f32 %v4712_v18, %v4537_v61 }
 0x4f3   : > { %v4822_v40 = vld [vmem:[#allocation4 + $0xa8] sm:$0xff]  ;;  %v5732_v46 = vadd.f32 %v8233_v9, %v5696_v38 }
 0x4f4   : > { %v5045_v12 = vadd.f32 %v4996_v1, %v4822_v40  ;;  %4791 = vst.msk [vmem:[#allocation4 + $0xb0] sm:$0xff] %vm613_vm4, %v4759_v30  ;;  %v5379_v38 = vld [vmem:[#allocation4 + $0x28] sm:$0xff] }
 0x4f5   : > { %v5108_v23 = vld [vmem:[#allocation4 + $0xa0] sm:$0xff]  ;;  %v5764_v47 = vmax.f32 %v5732_v46, 0.0 }
 0x4f6   : > { %5077 = vst.msk [vmem:[#allocation4 + $0xa8] sm:$0xff] %vm613_vm4, %v5045_v12  ;;  %v5330_v28 = vadd.f32 %v5280_v51, %v5108_v23  ;;  %v5521_v33 = vpop.f32.mrf.mxu1  ;;  %v4539_v51 = vld [vmem:[#allocation4 + $0xc0] sm:$0xff]  ;;  %v4541_v12 = vld [vmem:[#allocation4 + $0xd0] sm:$0xff] }
 0x4f7   : > { %5796 = vst.msk [vmem:[%s8244_s16] sm:$0xff] %vm613_vm4, %v5764_v47  ;;  %v5598_v39 = vadd.f32 %v5521_v33, %v5376_v44 }
 0x4f8   : > { %5362 = vst.msk [vmem:[#allocation4 + $0xa0] sm:$0xff] %vm613_vm4, %v5330_v28  ;;  %v5001_v62 = vpop.f32.mrf.mxu3  ;;  %v5661_v58 = vld [vmem:[#allocation4 + $0x8] sm:$0xff] }
 0x4f9   : > { %v4714_v48 = vpop.f32.mrf.mxu2  ;;  %v5697_v35 = vmul.f32 %v8227_v31, %v5661_v58  ;;  %5630 = vst.msk [vmem:[#allocation4 + $0x10] sm:$0xff] %vm613_vm4, %v5598_v39  ;;  %6189 = vmatmul.msk.bf16.gmra.mxu1 %vm613_vm4, %v8050_v8  ;;  %v5290_v8 = vpop.f32.mrf.mxu0 }
 0x4fa   : > { %v4760_v56 = vadd.f32 %v4714_v48, %v4538_v36 }
 0x4fb   : > { %v4823_v0 = vld [vmem:[#allocation4 + $0xb0] sm:$0xff]  ;;  %v5733_v11 = vadd.f32 %v8233_v9, %v5697_v35 }
 0x4fc   : > { %v5046_v17 = vadd.f32 %v4999_v43, %v4823_v0  ;;  %4792 = vst.msk [vmem:[#allocation4 + $0xb8] sm:$0xff] %vm613_vm4, %v4760_v56  ;;  %v4542_v0 = vld [vmem:[#allocation4 + $0xd8] sm:$0xff] }
 0x4fd   : > { %v5109_v6 = vld [vmem:[#allocation4 + $0xa8] sm:$0xff]  ;;  %v5765_v3 = vmax.f32 %v5733_v11, 0.0 }
 0x4fe   : > { %5078 = vst.msk [vmem:[#allocation4 + $0xb0] sm:$0xff] %vm613_vm4, %v5046_v17  ;;  %v5331_v53 = vadd.f32 %v5282_v22, %v5109_v6  ;;  %v5523_v41 = vpop.f32.mrf.mxu1 }
 0x4ff   : > { %5797 = vst.msk [vmem:[%s8244_s16 + $0x8] sm:$0xff] %vm613_vm4, %v5765_v3  ;;  %v5599_v7 = vadd.f32 %v5523_v41, %v5377_v5 }
 0x500   : > { %5363 = vst.msk [vmem:[#allocation4 + $0xa8] sm:$0xff] %vm613_vm4, %v5331_v53  ;;  %v5004_v24 = vpop.f32.mrf.mxu3  ;;  %v5662_v55 = vld [vmem:[#allocation4 + $0x10] sm:$0xff] }
 0x501   : > { %v4717_v10 = vpop.f32.mrf.mxu2  ;;  %v5698_v22 = vmul.f32 %v8227_v31, %v5662_v55  ;;  %5631 = vst.msk [vmem:[#allocation4 + $0x18] sm:$0xff] %vm613_vm4, %v5599_v7  ;;  %v5292_v30 = vpop.f32.mrf.mxu0  ;;  %v5380_v53 = vld [vmem:[#allocation4 + $0x30] sm:$0xff] }
 0x502   : > { %v4761_v15 = vadd.f32 %v4717_v10, %v4539_v51 }
 0x503   : > { %v4824_v54 = vld [vmem:[#allocation4 + $0xb8] sm:$0xff]  ;;  %v5734_v42 = vadd.f32 %v8233_v9, %v5698_v22 }
 0x504   : > { %v5047_v63 = vadd.f32 %v5001_v62, %v4824_v54  ;;  %4793 = vst.msk [vmem:[#allocation4 + $0xc0] sm:$0xff] %vm613_vm4, %v4761_v15  ;;  %v4543_v54 = vld [vmem:[#allocation4 + $0xe0] sm:$0xff] }
 0x505   : > { %v5110_v21 = vld [vmem:[#allocation4 + $0xb0] sm:$0xff]  ;;  %v5766_v26 = vmax.f32 %v5734_v42, 0.0 }
 0x506   : > { %5079 = vst.msk [vmem:[#allocation4 + $0xb8] sm:$0xff] %vm613_vm4, %v5047_v63  ;;  %v5332_v45 = vadd.f32 %v5285_v27, %v5110_v21  ;;  %v5526_v14 = vpop.f32.mrf.mxu1 }
 0x507   : > { %5798 = vst.msk [vmem:[%s8244_s16 + $0x10] sm:$0xff] %vm613_vm4, %v5766_v26  ;;  %v5600_v2 = vadd.f32 %v5526_v14, %v5378_v57  ;;  %v4544_v26 = vld [vmem:[#allocation4 + $0xe8] sm:$0xff] }
 0x508   : > { %5364 = vst.msk [vmem:[#allocation4 + $0xb0] sm:$0xff] %vm613_vm4, %v5332_v45  ;;  %v5006_v20 = vpop.f32.mrf.mxu3  ;;  %v5663_v18 = vld [vmem:[#allocation4 + $0x18] sm:$0xff] }
 0x509   : > { %v4719_v1 = vpop.f32.mrf.mxu2  ;;  %v5699_v27 = vmul.f32 %v8227_v31, %v5663_v18  ;;  %5632 = vst.msk [vmem:[#allocation4 + $0x20] sm:$0xff] %vm613_vm4, %v5600_v2  ;;  %6190 = vmatmul.msk.bf16.gmra.mxu1 %vm613_vm4, %v8074_v49  ;;  %v5295_v44 = vpop.f32.mrf.mxu0 }
 0x50a   : > { %v4762_v4 = vadd.f32 %v4719_v1, %v4540_v50 }
 0x50b   : > { %v4825_v19 = vld [vmem:[#allocation4 + $0xc0] sm:$0xff]  ;;  %v5735_v40 = vadd.f32 %v8233_v9, %v5699_v27 }
 0x50c   : > { %v5048_v32 = vadd.f32 %v5004_v24, %v4825_v19  ;;  %4794 = vst.msk [vmem:[#allocation4 + $0xc8] sm:$0xff] %vm613_vm4, %v4762_v4 }
 0x50d   : > { %v5111_v61 = vld [vmem:[#allocation4 + $0xb8] sm:$0xff]  ;;  %v5767_v23 = vmax.f32 %v5735_v40, 0.0 }
 0x50e   : > { %5080 = vst.msk [vmem:[#allocation4 + $0xc0] sm:$0xff] %vm613_vm4, %v5048_v32  ;;  %v5333_v43 = vadd.f32 %v5287_v29, %v5111_v61  ;;  %v5528_v46 = vpop.f32.mrf.mxu1  ;;  %v5382_v61 = vld [vmem:[#allocation4 + $0x40] sm:$0xff] }
 0x50f   : > { %5799 = vst.msk [vmem:[%s8244_s16 + $0x18] sm:$0xff] %vm613_vm4, %v5767_v23  ;;  %v5601_v36 = vadd.f32 %v5528_v46, %v5379_v38  ;;  %v4545_v23 = vld [vmem:[#allocation4 + $0xf0] sm:$0xff] }
 0x510   : > { %5365 = vst.msk [vmem:[#allocation4 + $0xb8] sm:$0xff] %vm613_vm4, %v5333_v43  ;;  %v5009_v25 = vpop.f32.mrf.mxu3  ;;  %v5664_v48 = vld [vmem:[#allocation4 + $0x20] sm:$0xff] }
 0x511   : > { %v4722_v16 = vpop.f32.mrf.mxu2  ;;  %v5700_v56 = vmul.f32 %v8227_v31, %v5664_v48  ;;  %5633 = vst.msk [vmem:[#allocation4 + $0x28] sm:$0xff] %vm613_vm4, %v5601_v36  ;;  %v5297_v45 = vpop.f32.mrf.mxu0 }
 0x512   : > { %v4763_v52 = vadd.f32 %v4722_v16, %v4541_v12 }
 0x513   : > { %v4826_v34 = vld [vmem:[#allocation4 + $0xc8] sm:$0xff]  ;;  %v5736_v47 = vadd.f32 %v8233_v9, %v5700_v56 }
 0x514   : > { %v5049_v28 = vadd.f32 %v5006_v20, %v4826_v34  ;;  %4795 = vst.msk [vmem:[#allocation4 + $0xd0] sm:$0xff] %vm613_vm4, %v4763_v52 }
 0x515   : > { %v5112_v49 = vld [vmem:[#allocation4 + $0xc0] sm:$0xff]  ;;  %v5768_v33 = vmax.f32 %v5736_v47, 0.0 }
 0x516   : > { %5081 = vst.msk [vmem:[#allocation4 + $0xc8] sm:$0xff] %vm613_vm4, %v5049_v28  ;;  %v5334_v62 = vadd.f32 %v5290_v8, %v5112_v49  ;;  %v5531_v35 = vpop.f32.mrf.mxu1  ;;  %v5381_v8 = vld [vmem:[#allocation4 + $0x38] sm:$0xff]  ;;  %v5383_v49 = vld [vmem:[#allocation4 + $0x48] sm:$0xff] }
 0x517   : > { %5800 = vst.msk [vmem:[%s8244_s16 + $0x20] sm:$0xff] %vm613_vm4, %v5768_v33  ;;  %v5602_v11 = vadd.f32 %v5531_v35, %v5380_v53  ;;  %v4546_v33 = vld [vmem:[#allocation4 + $0xf8] sm:$0xff]  ;;  %v5384_v35 = vld [vmem:[#allocation4 + $0x50] sm:$0xff] }
 0x518   : > { %5366 = vst.msk [vmem:[#allocation4 + $0xc0] sm:$0xff] %vm613_vm4, %v5334_v62  ;;  %v5011_v6 = vpop.f32.mrf.mxu3  ;;  %v5665_v10 = vld [vmem:[#allocation4 + $0x28] sm:$0xff] }
 0x519   : > { %v4724_v29 = vpop.f32.mrf.mxu2  ;;  %v5701_v15 = vmul.f32 %v8227_v31, %v5665_v10  ;;  %5634 = vst.msk [vmem:[#allocation4 + $0x30] sm:$0xff] %vm613_vm4, %v5602_v11  ;;  %6191 = vmatmul.msk.bf16.gmra.mxu1 %vm613_vm4, %v8096_v60  ;;  %v5300_v12 = vpop.f32.mrf.mxu0 }
 0x51a   : > { %v4764_v17 = vadd.f32 %v4724_v29, %v4542_v0 }
 0x51b   : > { %v4827_v39 = vld [vmem:[#allocation4 + $0xd0] sm:$0xff]  ;;  %v5737_v3 = vadd.f32 %v8233_v9, %v5701_v15 }
 0x51c   : > { %v5050_v58 = vadd.f32 %v5009_v25, %v4827_v39  ;;  %4796 = vst.msk [vmem:[#allocation4 + $0xd8] sm:$0xff] %vm613_vm4, %v4764_v17 }
 0x51d   : > { %v5113_v51 = vld [vmem:[#allocation4 + $0xc8] sm:$0xff]  ;;  %v5769_v41 = vmax.f32 %v5737_v3, 0.0 }
 0x51e   : > { %5082 = vst.msk [vmem:[#allocation4 + $0xd0] sm:$0xff] %vm613_vm4, %v5050_v58  ;;  %v5335_v24 = vadd.f32 %v5292_v30, %v5113_v51  ;;  %v5533_v55 = vpop.f32.mrf.mxu1 }
 0x51f   : > { %5801 = vst.msk [vmem:[%s8244_s16 + $0x28] sm:$0xff] %vm613_vm4, %v5769_v41  ;;  %v5603_v22 = vadd.f32 %v5533_v55, %v5381_v8  ;;  %v5385_v8 = vld [vmem:[#allocation4 + $0x58] sm:$0xff] }
 0x520   : > { %5367 = vst.msk [vmem:[#allocation4 + $0xc8] sm:$0xff] %vm613_vm4, %v5335_v24  ;;  %v5014_v42 = vpop.f32.mrf.mxu3  ;;  %v5666_v50 = vld [vmem:[#allocation4 + $0x30] sm:$0xff] }
 0x521   : > { %v4727_v63 = vpop.f32.mrf.mxu2  ;;  %v5702_v20 = vmul.f32 %v8227_v31, %v5666_v50  ;;  %5635 = vst.msk [vmem:[#allocation4 + $0x38] sm:$0xff] %vm613_vm4, %v5603_v22  ;;  %v5302_v17 = vpop.f32.mrf.mxu0 }
 0x522   : > { %v4765_v5 = vadd.f32 %v4727_v63, %v4543_v54 }
 0x523   : > { %v4828_v7 = vld [vmem:[#allocation4 + $0xd8] sm:$0xff]  ;;  %v5738_v4 = vadd.f32 %v8233_v9, %v5702_v20 }
 0x524   : > { %v5051_v21 = vadd.f32 %v5011_v6, %v4828_v7  ;;  %4797 = vst.msk [vmem:[#allocation4 + $0xe0] sm:$0xff] %vm613_vm4, %v4765_v5 }
 0x525   : > { %v5114_v60 = vld [vmem:[#allocation4 + $0xd0] sm:$0xff]  ;;  %v5770_v57 = vmax.f32 %v5738_v4, 0.0 }
 0x526   : > { %5083 = vst.msk [vmem:[#allocation4 + $0xd8] sm:$0xff] %vm613_vm4, %v5051_v21  ;;  %v5336_v1 = vadd.f32 %v5295_v44, %v5114_v60  ;;  %v5536_v18 = vpop.f32.mrf.mxu1 }
 0x527   : > { %5802 = vst.msk [vmem:[%s8244_s16 + $0x30] sm:$0xff] %vm613_vm4, %v5770_v57  ;;  %v5604_v43 = vadd.f32 %v5536_v18, %v5382_v61 }
 0x528   : > { %5368 = vst.msk [vmem:[#allocation4 + $0xd0] sm:$0xff] %vm613_vm4, %v5336_v1  ;;  %v5667_v30 = vld [vmem:[#allocation4 + $0x38] sm:$0xff]  ;;  %v5016_v25 = vpop.f32.mrf.mxu3 }
 0x529   : > { %v4729_v19 = vpop.f32.mrf.mxu2  ;;  %v5703_v16 = vmul.f32 %v8227_v31, %v5667_v30  ;;  %5636 = vst.msk [vmem:[#allocation4 + $0x40] sm:$0xff] %vm613_vm4, %v5604_v43  ;;  %6192 = vmatmul.msk.bf16.gmra.mxu1 %vm613_vm4, %v8118_v59  ;;  %v5305_v41 = vpop.f32.mrf.mxu0 }
 0x52a   : > { %v4766_v32 = vadd.f32 %v4729_v19, %v4544_v26  ;;  %v5386_v26 = vld [vmem:[#allocation4 + $0x60] sm:$0xff] }
 0x52b   : > { %v4829_v14 = vld [vmem:[#allocation4 + $0xe0] sm:$0xff]  ;;  %v5739_v52 = vadd.f32 %v8233_v9, %v5703_v16 }
 0x52c   : > { %v5052_v2 = vadd.f32 %v5014_v42, %v4829_v14  ;;  %4798 = vst.msk [vmem:[#allocation4 + $0xe8] sm:$0xff] %vm613_vm4, %v4766_v32 }
 0x52d   : > { %v5115_v27 = vld [vmem:[#allocation4 + $0xd8] sm:$0xff]  ;;  %v5771_v38 = vmax.f32 %v5739_v52, 0.0 }
 0x52e   : > { %5084 = vst.msk [vmem:[#allocation4 + $0xe0] sm:$0xff] %vm613_vm4, %v5052_v2  ;;  %v5337_v40 = vadd.f32 %v5297_v45, %v5115_v27  ;;  %v5538_v48 = vpop.f32.mrf.mxu1  ;;  %v5387_v27 = vld [vmem:[#allocation4 + $0x68] sm:$0xff]  ;;  %v5437_v52 = vld [vmem:[#allocation3 + $0x1a2] sm:$0xff] }
 0x52f   : > { %5803 = vst.msk [vmem:[%s8244_s16 + $0x38] sm:$0xff] %vm613_vm4, %v5771_v38  ;;  %v5605_v62 = vadd.f32 %v5538_v48, %v5383_v49 }
 0x530   : > { %5369 = vst.msk [vmem:[#allocation4 + $0xd8] sm:$0xff] %vm613_vm4, %v5337_v40  ;;  %v5668_v59 = vld [vmem:[#allocation4 + $0x40] sm:$0xff]  ;;  %v5019_v29 = vpop.f32.mrf.mxu3 }
 0x531   : > { %v4732_v34 = vpop.f32.mrf.mxu2  ;;  %v5704_v0 = vmul.f32 %v8227_v31, %v5668_v59  ;;  %5637 = vst.msk [vmem:[#allocation4 + $0x48] sm:$0xff] %vm613_vm4, %v5605_v62  ;;  %v5307_v4 = vpop.f32.mrf.mxu0 }
 0x532   : > { %v4767_v28 = vadd.f32 %v4732_v34, %v4545_v23 }
 0x533   : > { %v4830_v46 = vld [vmem:[#allocation4 + $0xe8] sm:$0xff]  ;;  %v5740_v44 = vadd.f32 %v8233_v9, %v5704_v0 }
 0x534   : > { %v5053_v36 = vadd.f32 %v5016_v25, %v4830_v46  ;;  %4799 = vst.msk [vmem:[#allocation4 + $0xf0] sm:$0xff] %vm613_vm4, %v4767_v28  ;;  %v5436_v25 = vld [vmem:[#allocation3 + $0x19a] sm:$0xff] }
 0x535   : > { %v5116_v56 = vld [vmem:[#allocation4 + $0xe0] sm:$0xff]  ;;  %v5772_v58 = vmax.f32 %v5740_v44, 0.0  ;;  %v5453_v34 = vpack.c.bf16 %v5437_v52, %v5436_v25  ;;  %v5388_v28 = vld [vmem:[#allocation4 + $0x70] sm:$0xff] }
 0x536   : > { %5085 = vst.msk [vmem:[#allocation4 + $0xe8] sm:$0xff] %vm613_vm4, %v5053_v36  ;;  %v5338_v47 = vadd.f32 %v5300_v12, %v5116_v56  ;;  %v5541_v11 = vpop.f32.mrf.mxu1  ;;  %v5389_v56 = vld [vmem:[#allocation4 + $0x78] sm:$0xff] }
 0x537   : > { %5804 = vst.msk [vmem:[%s8244_s16 + $0x40] sm:$0xff] %vm613_vm4, %v5772_v58  ;;  %v5606_v10 = vadd.f32 %v5541_v11, %v5384_v35 }
 0x538   : > { %5370 = vst.msk [vmem:[#allocation4 + $0xe0] sm:$0xff] %vm613_vm4, %v5338_v47  ;;  %v5669_v15 = vld [vmem:[#allocation4 + $0x48] sm:$0xff]  ;;  %v5021_v5 = vpop.f32.mrf.mxu3 }
 0x539   : > { %v4734_v39 = vpop.f32.mrf.mxu2  ;;  %v5705_v54 = vmul.f32 %v8227_v31, %v5669_v15  ;;  %5638 = vst.msk [vmem:[#allocation4 + $0x50] sm:$0xff] %vm613_vm4, %v5606_v10  ;;  %6193 = vmatmul.msk.bf16.gmra.mxu1 %vm613_vm4, %v8141_v13 }
 0x53a   : > { %v4768_v6 = vadd.f32 %v4734_v39, %v4546_v33  ;;  %v5390_v33 = vld [vmem:[#allocation4 + $0x80] sm:$0xff] }
 0x53b   : > { %v4831_v53 = vld [vmem:[#allocation4 + $0xf0] sm:$0xff]  ;;  %v5741_v63 = vadd.f32 %v8233_v9, %v5705_v54 }
 0x53c   : > { %4800 = vst.msk [vmem:[#allocation4 + $0xf8] sm:$0xff] %vm613_vm4, %v4768_v6  ;;  %v5054_v51 = vadd.f32 %v5019_v29, %v4831_v53 }
 0x53d   : > { %v5117_v24 = vld [vmem:[#allocation4 + $0xe8] sm:$0xff]  ;;  %v5773_v7 = vmax.f32 %v5741_v63, 0.0 }
 0x53e   : > { %5086 = vst.msk [vmem:[#allocation4 + $0xf0] sm:$0xff] %vm613_vm4, %v5054_v51  ;;  %v5339_v3 = vadd.f32 %v5302_v17, %v5117_v24  ;;  %v5543_v55 = vpop.f32.mrf.mxu1  ;;  %v5391_v51 = vld [vmem:[#allocation4 + $0x88] sm:$0xff] }
 0x53f   : > { %5805 = vst.msk [vmem:[%s8244_s16 + $0x48] sm:$0xff] %vm613_vm4, %v5773_v7  ;;  %v5607_v22 = vadd.f32 %v5543_v55, %v5385_v8 }
 0x540   : > { %5371 = vst.msk [vmem:[#allocation4 + $0xe8] sm:$0xff] %vm613_vm4, %v5339_v3  ;;  %v5670_v60 = vld [vmem:[#allocation4 + $0x50] sm:$0xff] }
 0x541   : > { %v5706_v50 = vmul.f32 %v8227_v31, %v5670_v60  ;;  %5639 = vst.msk [vmem:[#allocation4 + $0x58] sm:$0xff] %vm613_vm4, %v5607_v22  ;;  %v5393_v22 = vld [vmem:[#allocation4 + $0x98] sm:$0xff] }
 0x543   : > { %v4832_v21 = vld [vmem:[#allocation4 + $0xf8] sm:$0xff]  ;;  %v5742_v1 = vadd.f32 %v8233_v9, %v5706_v50 }
 0x544   : > { %v5055_v45 = vadd.f32 %v5021_v5, %v4832_v21  ;;  %v5392_v5 = vld [vmem:[#allocation4 + $0x90] sm:$0xff] }
 0x545   : > { %v5118_v42 = vld [vmem:[#allocation4 + $0xf0] sm:$0xff]  ;;  %v5774_v20 = vmax.f32 %v5742_v1, 0.0 }
 0x546   : > { %5087 = vst.msk [vmem:[#allocation4 + $0xf8] sm:$0xff] %vm613_vm4, %v5055_v45  ;;  %v5340_v13 = vadd.f32 %v5305_v41, %v5118_v42  ;;  %v5546_v19 = vpop.f32.mrf.mxu1 }
 0x547   : > { %5806 = vst.msk [vmem:[%s8244_s16 + $0x50] sm:$0xff] %vm613_vm4, %v5774_v20  ;;  %v5608_v32 = vadd.f32 %v5546_v19, %v5386_v26 }
 0x548   : > { %5372 = vst.msk [vmem:[#allocation4 + $0xf0] sm:$0xff] %vm613_vm4, %v5340_v13  ;;  %v5671_v14 = vld [vmem:[#allocation4 + $0x58] sm:$0xff] }
 0x549   : > { %v5707_v61 = vmul.f32 %v8227_v31, %v5671_v14  ;;  %5640 = vst.msk [vmem:[#allocation4 + $0x60] sm:$0xff] %vm613_vm4, %v5608_v32  ;;  %6194 = vmatmul.msk.bf16.gmra.mxu1 %vm613_vm4, %v8162_v37 }
 0x54b   : > { %v5743_v18 = vadd.f32 %v8233_v9, %v5707_v61  ;;  %v5395_v61 = vld [vmem:[#allocation4 + $0xa8] sm:$0xff] }
 0x54d   : > { %v5119_v57 = vld [vmem:[#allocation4 + $0xf8] sm:$0xff]  ;;  %v5775_v43 = vmax.f32 %v5743_v18, 0.0 }
 0x54e   : > { %v5341_v2 = vadd.f32 %v5307_v4, %v5119_v57  ;;  %v5548_v30 = vpop.f32.mrf.mxu1  ;;  %v5394_v4 = vld [vmem:[#allocation4 + $0xa0] sm:$0xff] }
 0x54f   : > { %5807 = vst.msk [vmem:[%s8244_s16 + $0x58] sm:$0xff] %vm613_vm4, %v5775_v43  ;;  %v5609_v40 = vadd.f32 %v5548_v30, %v5387_v27 }
 0x550   : > { %5373 = vst.msk [vmem:[#allocation4 + $0xf8] sm:$0xff] %vm613_vm4, %v5341_v2  ;;  %v5672_v12 = vld [vmem:[#allocation4 + $0x60] sm:$0xff] }
 0x551   : > { %v5708_v16 = vmul.f32 %v8227_v31, %v5672_v12  ;;  %5641 = vst.msk [vmem:[#allocation4 + $0x68] sm:$0xff] %vm613_vm4, %v5609_v40 }
 0x553   : > { %v5744_v37 = vadd.f32 %v8233_v9, %v5708_v16  ;;  %v5396_v16 = vld [vmem:[#allocation4 + $0xb0] sm:$0xff] }
 0x555   : > { %v5776_v23 = vmax.f32 %v5744_v37, 0.0 }
 0x556   : > { %v5551_v38 = vpop.f32.mrf.mxu1 }
 0x557   : > { %5808 = vst.msk [vmem:[%s8244_s16 + $0x60] sm:$0xff] %vm613_vm4, %v5776_v23  ;;  %v5610_v46 = vadd.f32 %v5551_v38, %v5388_v28  ;;  %v5397_v38 = vld [vmem:[#allocation4 + $0xb8] sm:$0xff] }
 0x558   : > { %v5673_v36 = vld [vmem:[#allocation4 + $0x68] sm:$0xff] }
 0x559   : > { %v5709_v49 = vmul.f32 %v8227_v31, %v5673_v36  ;;  %5642 = vst.msk [vmem:[#allocation4 + $0x70] sm:$0xff] %vm613_vm4, %v5610_v46  ;;  %6195 = vmatmul.msk.bf16.gmra.mxu1 %vm613_vm4, %v5453_v34 }
 0x55b   : > { %v5745_v48 = vadd.f32 %v8233_v9, %v5709_v49 }
 0x55d   : > { %v5777_v62 = vmax.f32 %v5745_v48, 0.0 }
 0x55e   : > { %v5553_v59 = vpop.f32.mrf.mxu1 }
 0x55f   : > { %5809 = vst.msk [vmem:[%s8244_s16 + $0x68] sm:$0xff] %vm613_vm4, %v5777_v62  ;;  %v5611_v47 = vadd.f32 %v5553_v59, %v5389_v56  ;;  %v5398_v59 = vld [vmem:[#allocation4 + $0xc0] sm:$0xff] }
 0x560   : > { %v5674_v0 = vld [vmem:[#allocation4 + $0x70] sm:$0xff] }
 0x561   : > { %v5710_v29 = vmul.f32 %v8227_v31, %v5674_v0  ;;  %5643 = vst.msk [vmem:[#allocation4 + $0x78] sm:$0xff] %vm613_vm4, %v5611_v47 }
 0x563   : > { %v5746_v17 = vadd.f32 %v8233_v9, %v5710_v29 }
 0x565   : > { %v5778_v44 = vmax.f32 %v5746_v17, 0.0 }
 0x566   : > { %v5556_v39 = vpop.f32.mrf.mxu1 }
 0x567   : > { %5810 = vst.msk [vmem:[%s8244_s16 + $0x70] sm:$0xff] %vm613_vm4, %v5778_v44  ;;  %v5612_v6 = vadd.f32 %v5556_v39, %v5390_v33  ;;  %v5399_v39 = vld [vmem:[#allocation4 + $0xc8] sm:$0xff] }
 0x568   : > { %v5675_v58 = vld [vmem:[#allocation4 + $0x78] sm:$0xff] }
 0x569   : > { %v5711_v53 = vmul.f32 %v8227_v31, %v5675_v58  ;;  %5644 = vst.msk [vmem:[#allocation4 + $0x80] sm:$0xff] %vm613_vm4, %v5612_v6 }
 0x56b   : > { %v5747_v35 = vadd.f32 %v8233_v9, %v5711_v53 }
 0x56d   : > { %v5779_v11 = vmax.f32 %v5747_v35, 0.0 }
 0x56e   : > { %v5558_v10 = vpop.f32.mrf.mxu1 }
 0x56f   : > { %5811 = vst.msk [vmem:[%s8244_s16 + $0x78] sm:$0xff] %vm613_vm4, %v5779_v11  ;;  %v5613_v24 = vadd.f32 %v5558_v10, %v5391_v51  ;;  %v5400_v10 = vld [vmem:[#allocation4 + $0xd0] sm:$0xff] }
 0x570   : > { %v5676_v15 = vld [vmem:[#allocation4 + $0x80] sm:$0xff] }
 0x571   : > { %v5712_v3 = vmul.f32 %v8227_v31, %v5676_v15  ;;  %5645 = vst.msk [vmem:[#allocation4 + $0x88] sm:$0xff] %vm613_vm4, %v5613_v24 }
 0x573   : > { %v5748_v54 = vadd.f32 %v8233_v9, %v5712_v3 }
 0x575   : > { %v5780_v63 = vmax.f32 %v5748_v54, 0.0 }
 0x576   : > { %v5561_v41 = vpop.f32.mrf.mxu1 }
 0x577   : > { %5812 = vst.msk [vmem:[%s8244_s16 + $0x80] sm:$0xff] %vm613_vm4, %v5780_v63  ;;  %v5614_v7 = vadd.f32 %v5561_v41, %v5392_v5  ;;  %v5401_v41 = vld [vmem:[#allocation4 + $0xd8] sm:$0xff] }
 0x578   : > { %v5677_v21 = vld [vmem:[#allocation4 + $0x88] sm:$0xff] }
 0x579   : > { %v5713_v8 = vmul.f32 %v8227_v31, %v5677_v21  ;;  %5646 = vst.msk [vmem:[#allocation4 + $0x90] sm:$0xff] %vm613_vm4, %v5614_v7 }
 0x57b   : > { %v5749_v55 = vadd.f32 %v8233_v9, %v5713_v8 }
 0x57d   : > { %v5781_v45 = vmax.f32 %v5749_v55, 0.0 }
 0x57e   : > { %v5563_v42 = vpop.f32.mrf.mxu1 }
 0x57f   : > { %5813 = vst.msk [vmem:[%s8244_s16 + $0x88] sm:$0xff] %vm613_vm4, %v5781_v45  ;;  %v5615_v60 = vadd.f32 %v5563_v42, %v5393_v22  ;;  %v5402_v42 = vld [vmem:[#allocation4 + $0xe0] sm:$0xff] }
 0x580   : > { %v5678_v13 = vld [vmem:[#allocation4 + $0x90] sm:$0xff] }
 0x581   : > { %v5714_v50 = vmul.f32 %v8227_v31, %v5678_v13  ;;  %5647 = vst.msk [vmem:[#allocation4 + $0x98] sm:$0xff] %vm613_vm4, %v5615_v60 }
 0x583   : > { %v5750_v1 = vadd.f32 %v8233_v9, %v5714_v50 }
 0x585   : > { %v5782_v20 = vmax.f32 %v5750_v1, 0.0 }
 0x586   : > { %v5566_v26 = vpop.f32.mrf.mxu1 }
 0x587   : > { %5814 = vst.msk [vmem:[%s8244_s16 + $0x90] sm:$0xff] %vm613_vm4, %v5782_v20  ;;  %v5616_v19 = vadd.f32 %v5566_v26, %v5394_v4  ;;  %v5403_v26 = vld [vmem:[#allocation4 + $0xe8] sm:$0xff] }
 0x588   : > { %v5679_v32 = vld [vmem:[#allocation4 + $0x98] sm:$0xff] }
 0x589   : > { %v5715_v57 = vmul.f32 %v8227_v31, %v5679_v32  ;;  %5648 = vst.msk [vmem:[#allocation4 + $0xa0] sm:$0xff] %vm613_vm4, %v5616_v19 }
 0x58b   : > { %v5751_v14 = vadd.f32 %v8233_v9, %v5715_v57 }
 0x58d   : > { %v5783_v2 = vmax.f32 %v5751_v14, 0.0 }
 0x58e   : > { %v5568_v18 = vpop.f32.mrf.mxu1 }
 0x58f   : > { %5815 = vst.msk [vmem:[%s8244_s16 + $0x98] sm:$0xff] %vm613_vm4, %v5783_v2  ;;  %v5617_v43 = vadd.f32 %v5568_v18, %v5395_v61  ;;  %v5404_v18 = vld [vmem:[#allocation4 + $0xf0] sm:$0xff] }
 0x590   : > { %v5680_v27 = vld [vmem:[#allocation4 + $0xa0] sm:$0xff] }
 0x591   : > { %v5716_v30 = vmul.f32 %v8227_v31, %v5680_v27  ;;  %5649 = vst.msk [vmem:[#allocation4 + $0xa8] sm:$0xff] %vm613_vm4, %v5617_v43 }
 0x593   : > { %v5752_v40 = vadd.f32 %v8233_v9, %v5716_v30 }
 0x595   : > { %v5784_v12 = vmax.f32 %v5752_v40, 0.0 }
 0x596   : > { %v5571_v25 = vpop.f32.mrf.mxu1 }
 0x597   : > { %5816 = vst.msk [vmem:[%s8244_s16 + $0xa0] sm:$0xff] %vm613_vm4, %v5784_v12  ;;  %v5618_v52 = vadd.f32 %v5571_v25, %v5396_v16  ;;  %v5405_v25 = vld [vmem:[#allocation4 + $0xf8] sm:$0xff] }
 0x598   : > { %v5681_v37 = vld [vmem:[#allocation4 + $0xa8] sm:$0xff] }
 0x599   : > { %v5717_v23 = vmul.f32 %v8227_v31, %v5681_v37  ;;  %5650 = vst.msk [vmem:[#allocation4 + $0xb0] sm:$0xff] %vm613_vm4, %v5618_v52 }
 0x59b   : > { %v5753_v34 = vadd.f32 %v8233_v9, %v5717_v23 }
 0x59d   : > { %v5785_v28 = vmax.f32 %v5753_v34, 0.0 }
 0x59e   : > { %v5573_v46 = vpop.f32.mrf.mxu1 }
 0x59f   : > { %5817 = vst.msk [vmem:[%s8244_s16 + $0xa8] sm:$0xff] %vm613_vm4, %v5785_v28  ;;  %v5619_v36 = vadd.f32 %v5573_v46, %v5397_v38 }
 0x5a0   : > { %v5682_v49 = vld [vmem:[#allocation4 + $0xb0] sm:$0xff] }
 0x5a1   : > { %v5718_v48 = vmul.f32 %v8227_v31, %v5682_v49  ;;  %5651 = vst.msk [vmem:[#allocation4 + $0xb8] sm:$0xff] %vm613_vm4, %v5619_v36 }
 0x5a3   : > { %v5754_v62 = vadd.f32 %v8233_v9, %v5718_v48 }
 0x5a5   : > { %v5786_v56 = vmax.f32 %v5754_v62, 0.0 }
 0x5a6   : > { %v5576_v47 = vpop.f32.mrf.mxu1 }
 0x5a7   : > { %5818 = vst.msk [vmem:[%s8244_s16 + $0xb0] sm:$0xff] %vm613_vm4, %v5786_v56  ;;  %v5620_v0 = vadd.f32 %v5576_v47, %v5398_v59 }
 0x5a8   : > { %v5683_v29 = vld [vmem:[#allocation4 + $0xb8] sm:$0xff] }
 0x5a9   : > { %v5719_v17 = vmul.f32 %v8227_v31, %v5683_v29  ;;  %5652 = vst.msk [vmem:[#allocation4 + $0xc0] sm:$0xff] %vm613_vm4, %v5620_v0 }
 0x5ab   : > { %v5755_v44 = vadd.f32 %v8233_v9, %v5719_v17 }
 0x5ad   : > { %v5787_v33 = vmax.f32 %v5755_v44, 0.0 }
 0x5ae   : > { %v5578_v6 = vpop.f32.mrf.mxu1 }
 0x5af   : > { %5819 = vst.msk [vmem:[%s8244_s16 + $0xb8] sm:$0xff] %vm613_vm4, %v5787_v33  ;;  %v5621_v58 = vadd.f32 %v5578_v6, %v5399_v39 }
 0x5b0   : > { %v5684_v53 = vld [vmem:[#allocation4 + $0xc0] sm:$0xff] }
 0x5b1   : > { %v5720_v35 = vmul.f32 %v8227_v31, %v5684_v53  ;;  %5653 = vst.msk [vmem:[#allocation4 + $0xc8] sm:$0xff] %vm613_vm4, %v5621_v58 }
 0x5b3   : > { %v5756_v11 = vadd.f32 %v8233_v9, %v5720_v35 }
 0x5b5   : > { %v5788_v51 = vmax.f32 %v5756_v11, 0.0 }
 0x5b6   : > { %v5581_v24 = vpop.f32.mrf.mxu1 }
 0x5b7   : > { %5820 = vst.msk [vmem:[%s8244_s16 + $0xc0] sm:$0xff] %vm613_vm4, %v5788_v51  ;;  %v5622_v15 = vadd.f32 %v5581_v24, %v5400_v10 }
 0x5b8   : > { %v5685_v3 = vld [vmem:[#allocation4 + $0xc8] sm:$0xff] }
 0x5b9   : > { %v5721_v54 = vmul.f32 %v8227_v31, %v5685_v3  ;;  %5654 = vst.msk [vmem:[#allocation4 + $0xd0] sm:$0xff] %vm613_vm4, %v5622_v15 }
 0x5bb   : > { %v5757_v63 = vadd.f32 %v8233_v9, %v5721_v54 }
 0x5bd   : > { %v5789_v5 = vmax.f32 %v5757_v63, 0.0 }
 0x5be   : > { %v5583_v7 = vpop.f32.mrf.mxu1 }
 0x5bf   : > { %5821 = vst.msk [vmem:[%s8244_s16 + $0xc8] sm:$0xff] %vm613_vm4, %v5789_v5  ;;  %v5623_v21 = vadd.f32 %v5583_v7, %v5401_v41 }
 0x5c0   : > { %v5686_v8 = vld [vmem:[#allocation4 + $0xd0] sm:$0xff] }
 0x5c1   : > { %v5722_v55 = vmul.f32 %v8227_v31, %v5686_v8  ;;  %5655 = vst.msk [vmem:[#allocation4 + $0xd8] sm:$0xff] %vm613_vm4, %v5623_v21 }
 0x5c3   : > { %v5758_v45 = vadd.f32 %v8233_v9, %v5722_v55 }
 0x5c5   : > { %v5790_v22 = vmax.f32 %v5758_v45, 0.0 }
 0x5c6   : > { %v5586_v60 = vpop.f32.mrf.mxu1 }
 0x5c7   : > { %5822 = vst.msk [vmem:[%s8244_s16 + $0xd0] sm:$0xff] %vm613_vm4, %v5790_v22  ;;  %v5624_v13 = vadd.f32 %v5586_v60, %v5402_v42 }
 0x5c8   : > { %v5687_v50 = vld [vmem:[#allocation4 + $0xd8] sm:$0xff] }
 0x5c9   : > { %v5723_v1 = vmul.f32 %v8227_v31, %v5687_v50  ;;  %5656 = vst.msk [vmem:[#allocation4 + $0xe0] sm:$0xff] %vm613_vm4, %v5624_v13 }
 0x5cb   : > { %v5759_v20 = vadd.f32 %v8233_v9, %v5723_v1 }
 0x5cd   : > { %v5791_v4 = vmax.f32 %v5759_v20, 0.0 }
 0x5ce   : > { %v5588_v19 = vpop.f32.mrf.mxu1 }
 0x5cf   : > { %5823 = vst.msk [vmem:[%s8244_s16 + $0xd8] sm:$0xff] %vm613_vm4, %v5791_v4  ;;  %v5625_v32 = vadd.f32 %v5588_v19, %v5403_v26 }
 0x5d0   : > { %v5688_v57 = vld [vmem:[#allocation4 + $0xe0] sm:$0xff] }
 0x5d1   : > { %v5724_v14 = vmul.f32 %v8227_v31, %v5688_v57  ;;  %5657 = vst.msk [vmem:[#allocation4 + $0xe8] sm:$0xff] %vm613_vm4, %v5625_v32 }
 0x5d3   : > { %v5760_v2 = vadd.f32 %v8233_v9, %v5724_v14 }
 0x5d5   : > { %v5792_v61 = vmax.f32 %v5760_v2, 0.0 }
 0x5d6   : > { %v5591_v43 = vpop.f32.mrf.mxu1 }
 0x5d7   : > { %5824 = vst.msk [vmem:[%s8244_s16 + $0xe0] sm:$0xff] %vm613_vm4, %v5792_v61  ;;  %v5626_v27 = vadd.f32 %v5591_v43, %v5404_v18 }
 0x5d8   : > { %v5689_v30 = vld [vmem:[#allocation4 + $0xe8] sm:$0xff] }
 0x5d9   : > { %v5725_v40 = vmul.f32 %v8227_v31, %v5689_v30  ;;  %5658 = vst.msk [vmem:[#allocation4 + $0xf0] sm:$0xff] %vm613_vm4, %v5626_v27 }
 0x5db   : > { %v5761_v12 = vadd.f32 %v8233_v9, %v5725_v40 }
 0x5dd   : > { %v5793_v16 = vmax.f32 %v5761_v12, 0.0 }
 0x5de   : > { %v5593_v52 = vpop.f32.mrf.mxu1 }
 0x5df   : > { %5825 = vst.msk [vmem:[%s8244_s16 + $0xe8] sm:$0xff] %vm613_vm4, %v5793_v16  ;;  %v5627_v37 = vadd.f32 %v5593_v52, %v5405_v25 }
 0x5e0   : > { %v5690_v23 = vld [vmem:[#allocation4 + $0xf0] sm:$0xff] }
 0x5e1   : > { %v5726_v34 = vmul.f32 %v8227_v31, %v5690_v23  ;;  %5659 = vst.msk [vmem:[#allocation4 + $0xf8] sm:$0xff] %vm613_vm4, %v5627_v37 }
 0x5e3   : > { %v5762_v28 = vadd.f32 %v8233_v9, %v5726_v34 }
 0x5e5   : > { %v5794_v38 = vmax.f32 %v5762_v28, 0.0 }
 0x5e7   : > { %5826 = vst.msk [vmem:[%s8244_s16 + $0xf0] sm:$0xff] %vm613_vm4, %v5794_v38 }
 0x5e8   : > { %v5691_v46 = vld [vmem:[#allocation4 + $0xf8] sm:$0xff] }
 0x5e9   : > { %v5727_v36 = vmul.f32 %v8227_v31, %v5691_v46 }
 0x5eb   : > { %v5763_v49 = vadd.f32 %v8233_v9, %v5727_v36 }
 0x5ed   : > { %v5795_v48 = vmax.f32 %v5763_v49, 0.0 }
 0x5ef   : > { %5827 = vst.msk [vmem:[%s8244_s16 + $0xf8] sm:$0xff] %vm613_vm4, %v5795_v48 }
 0x5f0 PF: > { %s17_s24 = sadd.s32 1, %s6302_s24  }
 0x5f1   : > { %p14_p4 = scmp.ge.s32.totalorder %s17_s24, 4  }
 0x5f3   :  { %16 = sbr.rel (!%p14_p4) target bundleno = 1 (0x1), region = 100 }

</bundles_post_ra>
